<compile_context>
chip_gen: v7x
topology: tpu7x:2x2x1
jax: 0.10.0
libtpu: 0.0.40
codegen_flags: <defaults>
</compile_context>

<pallas_src>
import functools

import jax
import jax.numpy as jnp
from jax.experimental import pallas as pl
from jax.experimental.pallas import tpu as pltpu

_LANE = 128


def _round_up(v, m):
    return (v + m - 1) // m * m


def _sigmoid(x):
    # Exact sigmoid via EUP tanh (no VPU divide, no logistic-lowering risk).
    return 0.5 * (jnp.tanh(0.5 * x) + 1.0)


# ---------------------------------------------------------------------------
# Fused layer kernel: Conv3x3(+bias)+ReLU  [+ ChannelGate + SpatialGate]
# One grid step == one image (grid over batch, "parallel").
# ---------------------------------------------------------------------------
def _fused_layer_kernel(*refs, pre_packed, apply_cbam, c_real):
    if apply_cbam:
        (x_ref, w_ref, b_ref, w1_ref, b1_ref, w2_ref, b2_ref,
         band_ref, shift_ref, o_ref) = refs
    else:
        x_ref, w_ref, b_ref, o_ref = refs

    _, h, wd, cout = o_ref.shape
    f32 = jnp.float32

    # ---- Conv 3x3 (stride 1, pad 1) as implicit GEMM, register accumulation.
    x = x_ref[0]                                        # (H, W, Kin) bf16
    if pre_packed:
        # Layer-1 path: wrapper pre-packed the 3x3xCin neighborhood into K.
        acc = jnp.dot(x.reshape(h * wd, x.shape[-1]), w_ref[0],
                      preferred_element_type=f32)
    else:
        cin = x.shape[-1]
        k3 = 3 * cin
        # Pack the three kx taps into the lane/K axis -> K = 3*Cin_p.
        zc = jnp.zeros((h, 1, cin), x.dtype)
        xw = jnp.concatenate([zc, x, zc], axis=1)       # (H, W+2, Cin)
        xk = jnp.concatenate(
            [xw[:, 0:wd, :], xw[:, 1:wd + 1, :], xw[:, 2:wd + 2, :]],
            axis=-1)                                    # (H, W, 3*Cin)
        zr = jnp.zeros((wd, k3), x.dtype)
        xk = jnp.concatenate([zr, xk.reshape(h * wd, k3), zr], axis=0)
        # Three ky taps = three aligned row-offset dots.
        acc = jnp.dot(xk[0:h * wd], w_ref[0], preferred_element_type=f32)
        acc = acc + jnp.dot(xk[wd:wd + h * wd], w_ref[1],
                            preferred_element_type=f32)
        acc = acc + jnp.dot(xk[2 * wd:2 * wd + h * wd], w_ref[2],
                            preferred_element_type=f32)

    y = jnp.maximum(acc + b_ref[...], 0.0)              # (H*W, Cout_p) f32

    if not apply_cbam:
        o_ref[...] = y.reshape(1, h, wd, cout).astype(o_ref.dtype)
        return

    # ---- ChannelGate: sigmoid(mlp(avg_pool) + mlp(max_pool)), applied to y.
    pavg = jnp.sum(y, axis=0, keepdims=True) * (1.0 / (h * wd))   # (1, Cout_p)
    pmax = jnp.max(y, axis=0, keepdims=True)                      # (1, Cout_p)
    p = jnp.concatenate([pavg, pmax], axis=0)                     # (2, Cout_p)
    hid = jnp.maximum(
        jnp.dot(p, w1_ref[...], preferred_element_type=f32) + b1_ref[...], 0.0)
    att = jnp.dot(hid, w2_ref[...], preferred_element_type=f32) + b2_ref[...]
    gate = _sigmoid(att[0:1, :] + att[1:2, :])                    # (1, Cout_p)
    yg = y * gate                                                 # (H*W, Cout_p)

    # ---- SpatialGate: ChannelPool -> (3,13) conv (BN folded) -> sigmoid.
    # Padded output channels are exactly 0 (zero-padded weights/bias) and
    # yg >= 0, so max/sum over all lanes equal the real-channel max/mean.
    yg3 = yg.reshape(h, wd, cout)
    cmax = jnp.max(yg3, axis=-1)                        # (H, W)
    cmean = jnp.sum(yg3, axis=-1) * (1.0 / c_real)      # (H, W)
    zrow = jnp.zeros((1, wd), f32)
    planes = (jnp.concatenate([zrow, cmax, zrow], axis=0),    # channel 0: max
              jnp.concatenate([zrow, cmean, zrow], axis=0))   # channel 1: mean
    s = jnp.zeros((h, wd), f32)
    for ci in range(2):                                 # kx taps as MXU band-mats
        for ky in range(3):
            s = s + jnp.dot(planes[ci][ky:ky + h, :], band_ref[3 * ci + ky],
                            preferred_element_type=f32)
    sig = _sigmoid(s + shift_ref[0])                    # (H, W)
    out = yg3 * sig[:, :, None]
    o_ref[...] = out.reshape(1, h, wd, cout).astype(o_ref.dtype)


def _fused_layer(x, wk, bias, cbam_in, *, pre_packed, c_real, out_dtype):
    """x: (N, H, W, Kin) bf16 (lane-dense). Returns (N, H, W, Cout_p)."""
    n, h, wd, kin = x.shape
    t, k, cout_p = wk.shape
    apply_cbam = cbam_in is not None

    kernel = functools.partial(_fused_layer_kernel, pre_packed=pre_packed,
                               apply_cbam=apply_cbam, c_real=c_real)

    in_specs = [
        pl.BlockSpec((1, h, wd, kin), lambda i: (i, 0, 0, 0)),
        pl.BlockSpec((t, k, cout_p), lambda i: (0, 0, 0)),
        pl.BlockSpec((1, cout_p), lambda i: (0, 0)),
    ]
    inputs = [x, wk, bias]
    if apply_cbam:
        w1, b1, w2, b2, band, shift = cbam_in
        hid_p = w1.shape[1]
        in_specs += [
            pl.BlockSpec((cout_p, hid_p), lambda i: (0, 0)),
            pl.BlockSpec((1, hid_p), lambda i: (0, 0)),
            pl.BlockSpec((hid_p, cout_p), lambda i: (0, 0)),
            pl.BlockSpec((1, cout_p), lambda i: (0, 0)),
            pl.BlockSpec((6, wd, wd), lambda i: (0, 0, 0)),
            pl.BlockSpec(memory_space=pltpu.MemorySpace.SMEM),
        ]
        inputs += [w1, b1, w2, b2, band, shift]

    flops = 2 * n * h * wd * t * k * cout_p
    if apply_cbam:
        flops += 2 * n * h * wd * 6 * wd + 6 * n * h * wd * cout_p
    bytes_acc = sum(int(a.size) * a.dtype.itemsize for a in inputs)
    bytes_acc += n * h * wd * cout_p * jnp.dtype(out_dtype).itemsize
    cost = pl.CostEstimate(
        flops=int(flops),
        transcendentals=int(n * (h * wd + cout_p)) if apply_cbam else 0,
        bytes_accessed=int(bytes_acc))

    return pl.pallas_call(
        kernel,
        out_shape=jax.ShapeDtypeStruct((n, h, wd, cout_p), out_dtype),
        grid_spec=pltpu.PrefetchScalarGridSpec(
            num_scalar_prefetch=0,
            grid=(n,),
            in_specs=in_specs,
            out_specs=pl.BlockSpec((1, h, wd, cout_p), lambda i: (i, 0, 0, 0)),
        ),
        compiler_params=pltpu.CompilerParams(
            dimension_semantics=("parallel",),
            vmem_limit_bytes=32 * 1024 * 1024),
        cost_estimate=cost,
    )(*inputs)


# ---------------------------------------------------------------------------
# Parameter packing (XLA, runs once per call on tiny tensors).
# ---------------------------------------------------------------------------
def _prep_conv(w_oihw, bias, *, pre_packed, cin_p, cout_p, kpad=None,
               dtype=jnp.bfloat16):
    c_out, c_in, kh, kw = w_oihw.shape
    wt = jnp.transpose(w_oihw, (2, 3, 1, 0))                  # (ky, kx, ci, co)
    if pre_packed:
        wk = wt.reshape(kh * kw * c_in, c_out)
        wk = jnp.pad(wk, ((0, kpad - kh * kw * c_in), (0, cout_p - c_out)))
        wk = wk.reshape(1, kpad, cout_p)
    else:
        wk = jnp.pad(wt, ((0, 0), (0, 0), (0, cin_p - c_in),
                          (0, cout_p - c_out)))
        wk = wk.reshape(kh, kw * cin_p, cout_p)               # K order: (kx, ci)
    b = jnp.pad(bias, (0, cout_p - c_out)).reshape(1, cout_p).astype(jnp.float32)
    return wk.astype(dtype), b


def _prep_cbam(prm, c_real, c_pad, wd):
    ch = prm["mlp_w1"].shape[0]
    hid_p = _round_up(ch, _LANE)
    w1 = jnp.zeros((c_pad, hid_p), jnp.float32).at[:c_real, :ch].set(
        prm["mlp_w1"].T)
    b1 = jnp.zeros((1, hid_p), jnp.float32).at[0, :ch].set(prm["mlp_b1"])
    w2 = jnp.zeros((hid_p, c_pad), jnp.float32).at[:ch, :c_real].set(
        prm["mlp_w2"].T)
    b2 = jnp.zeros((1, c_pad), jnp.float32).at[0, :c_real].set(prm["mlp_b2"])

    # Fold inference-mode BN scale into the (3,13) spatial conv weights.
    bn_scale = prm["bn_gamma"] / jnp.sqrt(prm["bn_var"] + 1e-5)     # (1,)
    w_sp = (prm["spatial_w"][0] * bn_scale).astype(jnp.float32)     # (2, 3, 13)
    shift = (prm["bn_beta"] - prm["bn_mean"] * bn_scale).astype(
        jnp.float32).reshape(1)
    # Band matrices B[c, ky][x_src, x_dst] = w_sp[c, ky, x_src - x_dst + 6].
    xs = jnp.arange(wd)
    dd = xs[:, None] - xs[None, :] + 6
    valid = (dd >= 0) & (dd <= 12)
    band = jnp.where(valid[None, None], w_sp[:, :, jnp.clip(dd, 0, 12)], 0.0)
    band = band.reshape(6, wd, wd).astype(jnp.float32)
    return w1, b1, w2, b2, band, shift


# ---------------------------------------------------------------------------
# Full forward pass.
# ---------------------------------------------------------------------------
@jax.jit
def attentive_cnn_forward(x, params):
    """x: (N, C_in, H, W) f32 NCHW -> (N, C_out, H, W) f32 NCHW."""
    n, c_in, h, wd = x.shape

    # NCHW -> NHWC once; layer-1 im2col (K = 9*Cin, padded to a lane multiple).
    xh = jnp.transpose(x, (0, 2, 3, 1))
    xp = jnp.pad(xh, ((0, 0), (1, 1), (1, 1), (0, 0)))
    pats = jnp.concatenate(
        [xp[:, ky:ky + h, kx:kx + wd, :] for ky in range(3) for kx in range(3)],
        axis=-1)
    k1 = 9 * c_in
    k1p = _round_up(k1, _LANE)
    pats = jnp.pad(pats, ((0, 0), (0, 0), (0, 0),
                          (0, k1p - k1))).astype(jnp.bfloat16)

    # Layer 1: conv1 + ReLU + CBAM(64), fused.
    c1 = params["conv1_w"].shape[0]
    c1p = _round_up(c1, _LANE)
    w1k, b1k = _prep_conv(params["conv1_w"], params["conv1_b"],
                          pre_packed=True, cin_p=None, cout_p=c1p, kpad=k1p)
    cb1 = _prep_cbam(params["cbam1"], c1, c1p, wd)
    y1 = _fused_layer(pats, w1k, b1k, cb1, pre_packed=True, c_real=c1,
                      out_dtype=jnp.bfloat16)

    # Layer 2: conv2 + ReLU + CBAM(128), fused.
    c2 = params["conv2_w"].shape[0]
    c2p = _round_up(c2, _LANE)
    w2k, b2k = _prep_conv(params["conv2_w"], params["conv2_b"],
                          pre_packed=False, cin_p=c1p, cout_p=c2p)
    cb2 = _prep_cbam(params["cbam2"], c2, c2p, wd)
    y2 = _fused_layer(y1, w2k, b2k, cb2, pre_packed=False, c_real=c2,
                      out_dtype=jnp.bfloat16)

    # Layer 3: conv3 + ReLU (no CBAM, no pool outputs).
    c3 = params["conv3_w"].shape[0]
    c3p = _round_up(c3, _LANE)
    w3k, b3k = _prep_conv(params["conv3_w"], params["conv3_b"],
                          pre_packed=False, cin_p=c2p, cout_p=c3p)
    y3 = _fused_layer(y2, w3k, b3k, None, pre_packed=False, c_real=c3,
                      out_dtype=jnp.float32)

    out = y3[..., :c3]                                  # strip channel pad
    return jnp.transpose(out, (0, 3, 1, 2))             # NHWC -> NCHW (once)


if __name__ == "__main__":
    N, C_IN, H, W = 2, 4, 16, 16
    C_OUT = 8

    keys = jax.random.split(jax.random.PRNGKey(0), 17)

    def _cbam_params(ks, c):
        ch = max(c // 16, 1)
        return {
            "mlp_w1": 0.2 * jax.random.normal(ks[0], (ch, c), jnp.float32),
            "mlp_b1": 0.1 * jax.random.normal(ks[1], (ch,), jnp.float32),
            "mlp_w2": 0.2 * jax.random.normal(ks[2], (c, ch), jnp.float32),
            "mlp_b2": 0.1 * jax.random.normal(ks[3], (c,), jnp.float32),
            "spatial_w": 0.1 * jax.random.normal(ks[4], (1, 2, 3, 13), jnp.float32),
            "bn_gamma": jnp.ones((1,), jnp.float32),
            "bn_beta": jnp.zeros((1,), jnp.float32),
            "bn_mean": jnp.zeros((1,), jnp.float32),
            "bn_var": jnp.ones((1,), jnp.float32),
        }

    params = {
        "conv1_w": 0.2 * jax.random.normal(keys[0], (64, C_IN, 3, 3), jnp.float32),
        "conv1_b": 0.1 * jax.random.normal(keys[1], (64,), jnp.float32),
        "cbam1": _cbam_params(keys[2:7], 64),
        "conv2_w": 0.05 * jax.random.normal(keys[7], (128, 64, 3, 3), jnp.float32),
        "conv2_b": 0.1 * jax.random.normal(keys[8], (128,), jnp.float32),
        "cbam2": _cbam_params(keys[9:14], 128),
        "conv3_w": 0.05 * jax.random.normal(keys[14], (C_OUT, 128, 3, 3), jnp.float32),
        "conv3_b": 0.1 * jax.random.normal(keys[15], (C_OUT,), jnp.float32),
    }
    x = jax.random.normal(keys[16], (N, C_IN, H, W), jnp.float32)

    out = attentive_cnn_forward(x, params)
    jax.block_until_ready(out)
    assert out.shape == (N, C_OUT, H, W), out.shape
    assert bool(jnp.all(jnp.isfinite(out)))
    print("KERNEL_OK")
</pallas_src>

<mosaic_0001>
module attributes {stable_mosaic.version = 11 : i64} {
  func.func @_fused_layer_kernel(%arg0: i32, %arg1: memref<1x16x16x128xbf16, #tpu.memory_space<vmem>>, %arg2: memref<1x128x128xbf16, #tpu.memory_space<vmem>>, %arg3: memref<1x128xf32, #tpu.memory_space<vmem>>, %arg4: memref<128x128xf32, #tpu.memory_space<vmem>>, %arg5: memref<1x128xf32, #tpu.memory_space<vmem>>, %arg6: memref<128x128xf32, #tpu.memory_space<vmem>>, %arg7: memref<1x128xf32, #tpu.memory_space<vmem>>, %arg8: memref<6x16x16xf32, #tpu.memory_space<vmem>>, %arg9: memref<1xf32, #tpu.memory_space<smem>>, %arg10: memref<1x16x16x128xbf16, #tpu.memory_space<vmem>>) attributes {dimension_semantics = [#tpu.dimension_semantics<parallel>], iteration_bounds = array<i64: 2>, scalar_prefetch = 0 : i64, scratch_operands = 0 : i64, tpu.core_type = #tpu.core_type<tc>, window_params = [{transform_indices = @transform_0, window_bounds = array<i64: 1, 16, 16, 128>}, {pipeline_mode = #tpu.pipeline_mode<synchronous>, transform_indices = @transform_1, window_bounds = array<i64: 1, 128, 128>}, {pipeline_mode = #tpu.pipeline_mode<synchronous>, transform_indices = @transform_2, window_bounds = array<i64: 1, 128>}, {pipeline_mode = #tpu.pipeline_mode<synchronous>, transform_indices = @transform_3, window_bounds = array<i64: 128, 128>}, {pipeline_mode = #tpu.pipeline_mode<synchronous>, transform_indices = @transform_4, window_bounds = array<i64: 1, 128>}, {pipeline_mode = #tpu.pipeline_mode<synchronous>, transform_indices = @transform_5, window_bounds = array<i64: 128, 128>}, {pipeline_mode = #tpu.pipeline_mode<synchronous>, transform_indices = @transform_6, window_bounds = array<i64: 1, 128>}, {pipeline_mode = #tpu.pipeline_mode<synchronous>, transform_indices = @transform_7, window_bounds = array<i64: 6, 16, 16>}, {transform_indices = @transform_8, window_bounds = array<i64: 1>}, {transform_indices = @transform_9, window_bounds = array<i64: 1, 16, 16, 128>}]} {
    %c0 = arith.constant 0 : index
    %c0_0 = arith.constant 0 : index
    %c0_1 = arith.constant 0 : index
    %c0_2 = arith.constant 0 : index
    %0 = vector.load %arg1[%c0, %c0_0, %c0_1, %c0_2] : memref<1x16x16x128xbf16, #tpu.memory_space<vmem>>, vector<1x16x16x128xbf16>
    %1 = vector.shape_cast %0 : vector<1x16x16x128xbf16> to vector<16x16x128xbf16>
    %2 = vector.shape_cast %1 : vector<16x16x128xbf16> to vector<256x128xbf16>
    %c0_3 = arith.constant 0 : index
    %c0_4 = arith.constant 0 : index
    %c0_5 = arith.constant 0 : index
    %3 = vector.load %arg2[%c0_3, %c0_4, %c0_5] : memref<1x128x128xbf16, #tpu.memory_space<vmem>>, vector<1x128x128xbf16>
    %4 = vector.shape_cast %3 : vector<1x128x128xbf16> to vector<128x128xbf16>
    %cst = arith.constant dense<0.000000e+00> : vector<256x128xf32>
    %5 = tpu.matmul %2, %4, %cst {dimension_numbers = #tpu.dot_dimension_numbers<[1], [0], [0], [1], [0, 0, 1, 1], [], []>} : vector<256x128xbf16>, vector<128x128xbf16>, vector<256x128xf32> -> vector<256x128xf32>
    %c0_6 = arith.constant 0 : index
    %c0_7 = arith.constant 0 : index
    %6 = vector.load %arg3[%c0_6, %c0_7] : memref<1x128xf32, #tpu.memory_space<vmem>>, vector<1x128xf32>
    %7 = vector.broadcast %6 : vector<1x128xf32> to vector<256x128xf32>
    %8 = arith.addf %5, %7 : vector<256x128xf32>
    %cst_8 = arith.constant 0.000000e+00 : f32
    %9 = vector.broadcast %cst_8 : f32 to vector<256x128xf32>
    %10 = arith.maximumf %8, %9 : vector<256x128xf32>
    %cst_9 = arith.constant dense<0.000000e+00> : vector<128xf32>
    %11 = vector.multi_reduction <add>, %10, %cst_9 [0] : vector<256x128xf32> to vector<128xf32>
    %12 = vector.shape_cast %11 : vector<128xf32> to vector<1x128xf32>
    %cst_10 = arith.constant 3.906250e-03 : f32
    %13 = vector.broadcast %cst_10 : f32 to vector<1x128xf32>
    %14 = arith.mulf %12, %13 : vector<1x128xf32>
    %cst_11 = arith.constant dense<0xFF800000> : vector<128xf32>
    %15 = vector.multi_reduction <maximumf>, %10, %cst_11 [0] : vector<256x128xf32> to vector<128xf32>
    %16 = vector.shape_cast %15 : vector<128xf32> to vector<1x128xf32>
    %17 = tpu.concatenate %14, %16 in 0 : vector<1x128xf32>, vector<1x128xf32> -> vector<2x128xf32>
    %c0_12 = arith.constant 0 : index
    %c0_13 = arith.constant 0 : index
    %18 = vector.load %arg4[%c0_12, %c0_13] : memref<128x128xf32, #tpu.memory_space<vmem>>, vector<128x128xf32>
    %cst_14 = arith.constant dense<0.000000e+00> : vector<2x128xf32>
    %19 = tpu.matmul %17, %18, %cst_14 {dimension_numbers = #tpu.dot_dimension_numbers<[1], [0], [0], [1], [0, 0, 1, 1], [], []>} : vector<2x128xf32>, vector<128x128xf32>, vector<2x128xf32> -> vector<2x128xf32>
    %c0_15 = arith.constant 0 : index
    %c0_16 = arith.constant 0 : index
    %20 = vector.load %arg5[%c0_15, %c0_16] : memref<1x128xf32, #tpu.memory_space<vmem>>, vector<1x128xf32>
    %21 = vector.broadcast %20 : vector<1x128xf32> to vector<2x128xf32>
    %22 = arith.addf %19, %21 : vector<2x128xf32>
    %cst_17 = arith.constant 0.000000e+00 : f32
    %23 = vector.broadcast %cst_17 : f32 to vector<2x128xf32>
    %24 = arith.maximumf %22, %23 : vector<2x128xf32>
    %c0_18 = arith.constant 0 : index
    %c0_19 = arith.constant 0 : index
    %25 = vector.load %arg6[%c0_18, %c0_19] : memref<128x128xf32, #tpu.memory_space<vmem>>, vector<128x128xf32>
    %cst_20 = arith.constant dense<0.000000e+00> : vector<2x128xf32>
    %26 = tpu.matmul %24, %25, %cst_20 {dimension_numbers = #tpu.dot_dimension_numbers<[1], [0], [0], [1], [0, 0, 1, 1], [], []>} : vector<2x128xf32>, vector<128x128xf32>, vector<2x128xf32> -> vector<2x128xf32>
    %c0_21 = arith.constant 0 : index
    %c0_22 = arith.constant 0 : index
    %27 = vector.load %arg7[%c0_21, %c0_22] : memref<1x128xf32, #tpu.memory_space<vmem>>, vector<1x128xf32>
    %28 = vector.broadcast %27 : vector<1x128xf32> to vector<2x128xf32>
    %29 = arith.addf %26, %28 : vector<2x128xf32>
    %30 = vector.extract_strided_slice %29 {offsets = [0, 0], sizes = [1, 128], strides = [1, 1]} : vector<2x128xf32> to vector<1x128xf32>
    %31 = vector.extract_strided_slice %29 {offsets = [1, 0], sizes = [1, 128], strides = [1, 1]} : vector<2x128xf32> to vector<1x128xf32>
    %32 = arith.addf %30, %31 : vector<1x128xf32>
    %cst_23 = arith.constant 5.000000e-01 : f32
    %33 = vector.broadcast %cst_23 : f32 to vector<1x128xf32>
    %34 = arith.mulf %33, %32 : vector<1x128xf32>
    %35 = math.tanh %34 : vector<1x128xf32>
    %cst_24 = arith.constant 1.000000e+00 : f32
    %36 = vector.broadcast %cst_24 : f32 to vector<1x128xf32>
    %37 = arith.addf %35, %36 : vector<1x128xf32>
    %cst_25 = arith.constant 5.000000e-01 : f32
    %38 = vector.broadcast %cst_25 : f32 to vector<1x128xf32>
    %39 = arith.mulf %38, %37 : vector<1x128xf32>
    %40 = vector.broadcast %39 : vector<1x128xf32> to vector<256x128xf32>
    %41 = arith.mulf %10, %40 : vector<256x128xf32>
    %42 = vector.shape_cast %41 : vector<256x128xf32> to vector<16x16x128xf32>
    %cst_26 = arith.constant dense<0xFF800000> : vector<16x16xf32>
    %43 = vector.multi_reduction <maximumf>, %42, %cst_26 [2] : vector<16x16x128xf32> to vector<16x16xf32>
    %cst_27 = arith.constant dense<0.000000e+00> : vector<16x16xf32>
    %44 = vector.multi_reduction <add>, %42, %cst_27 [2] : vector<16x16x128xf32> to vector<16x16xf32>
    %cst_28 = arith.constant 1.562500e-02 : f32
    %45 = vector.broadcast %cst_28 : f32 to vector<16x16xf32>
    %46 = arith.mulf %44, %45 : vector<16x16xf32>
    %cst_29 = arith.constant 0.000000e+00 : f32
    %47 = vector.broadcast %cst_29 : f32 to vector<1x16xf32>
    %48 = tpu.concatenate %47, %43, %47 in 0 : vector<1x16xf32>, vector<16x16xf32>, vector<1x16xf32> -> vector<18x16xf32>
    %49 = tpu.concatenate %47, %46, %47 in 0 : vector<1x16xf32>, vector<16x16xf32>, vector<1x16xf32> -> vector<18x16xf32>
    %cst_30 = arith.constant 0.000000e+00 : f32
    %50 = vector.broadcast %cst_30 : f32 to vector<16x16xf32>
    %51 = vector.extract_strided_slice %48 {offsets = [0, 0], sizes = [16, 16], strides = [1, 1]} : vector<18x16xf32> to vector<16x16xf32>
    %c0_31 = arith.constant 0 : index
    %c0_32 = arith.constant 0 : index
    %c0_33 = arith.constant 0 : index
    %52 = vector.load %arg8[%c0_31, %c0_32, %c0_33] : memref<6x16x16xf32, #tpu.memory_space<vmem>>, vector<1x16x16xf32>
    %53 = vector.shape_cast %52 : vector<1x16x16xf32> to vector<16x16xf32>
    %cst_34 = arith.constant dense<0.000000e+00> : vector<16x16xf32>
    %54 = tpu.matmul %51, %53, %cst_34 {dimension_numbers = #tpu.dot_dimension_numbers<[1], [0], [0], [1], [0, 0, 1, 1], [], []>} : vector<16x16xf32>, vector<16x16xf32>, vector<16x16xf32> -> vector<16x16xf32>
    %55 = arith.addf %50, %54 : vector<16x16xf32>
    %56 = vector.extract_strided_slice %48 {offsets = [1, 0], sizes = [16, 16], strides = [1, 1]} : vector<18x16xf32> to vector<16x16xf32>
    %c1 = arith.constant 1 : index
    %c0_35 = arith.constant 0 : index
    %c0_36 = arith.constant 0 : index
    %57 = vector.load %arg8[%c1, %c0_35, %c0_36] : memref<6x16x16xf32, #tpu.memory_space<vmem>>, vector<1x16x16xf32>
    %58 = vector.shape_cast %57 : vector<1x16x16xf32> to vector<16x16xf32>
    %cst_37 = arith.constant dense<0.000000e+00> : vector<16x16xf32>
    %59 = tpu.matmul %56, %58, %cst_37 {dimension_numbers = #tpu.dot_dimension_numbers<[1], [0], [0], [1], [0, 0, 1, 1], [], []>} : vector<16x16xf32>, vector<16x16xf32>, vector<16x16xf32> -> vector<16x16xf32>
    %60 = arith.addf %55, %59 : vector<16x16xf32>
    %61 = vector.extract_strided_slice %48 {offsets = [2, 0], sizes = [16, 16], strides = [1, 1]} : vector<18x16xf32> to vector<16x16xf32>
    %c2 = arith.constant 2 : index
    %c0_38 = arith.constant 0 : index
    %c0_39 = arith.constant 0 : index
    %62 = vector.load %arg8[%c2, %c0_38, %c0_39] : memref<6x16x16xf32, #tpu.memory_space<vmem>>, vector<1x16x16xf32>
    %63 = vector.shape_cast %62 : vector<1x16x16xf32> to vector<16x16xf32>
    %cst_40 = arith.constant dense<0.000000e+00> : vector<16x16xf32>
    %64 = tpu.matmul %61, %63, %cst_40 {dimension_numbers = #tpu.dot_dimension_numbers<[1], [0], [0], [1], [0, 0, 1, 1], [], []>} : vector<16x16xf32>, vector<16x16xf32>, vector<16x16xf32> -> vector<16x16xf32>
    %65 = arith.addf %60, %64 : vector<16x16xf32>
    %66 = vector.extract_strided_slice %49 {offsets = [0, 0], sizes = [16, 16], strides = [1, 1]} : vector<18x16xf32> to vector<16x16xf32>
    %c3 = arith.constant 3 : index
    %c0_41 = arith.constant 0 : index
    %c0_42 = arith.constant 0 : index
    %67 = vector.load %arg8[%c3, %c0_41, %c0_42] : memref<6x16x16xf32, #tpu.memory_space<vmem>>, vector<1x16x16xf32>
    %68 = vector.shape_cast %67 : vector<1x16x16xf32> to vector<16x16xf32>
    %cst_43 = arith.constant dense<0.000000e+00> : vector<16x16xf32>
    %69 = tpu.matmul %66, %68, %cst_43 {dimension_numbers = #tpu.dot_dimension_numbers<[1], [0], [0], [1], [0, 0, 1, 1], [], []>} : vector<16x16xf32>, vector<16x16xf32>, vector<16x16xf32> -> vector<16x16xf32>
    %70 = arith.addf %65, %69 : vector<16x16xf32>
    %71 = vector.extract_strided_slice %49 {offsets = [1, 0], sizes = [16, 16], strides = [1, 1]} : vector<18x16xf32> to vector<16x16xf32>
    %c4 = arith.constant 4 : index
    %c0_44 = arith.constant 0 : index
    %c0_45 = arith.constant 0 : index
    %72 = vector.load %arg8[%c4, %c0_44, %c0_45] : memref<6x16x16xf32, #tpu.memory_space<vmem>>, vector<1x16x16xf32>
    %73 = vector.shape_cast %72 : vector<1x16x16xf32> to vector<16x16xf32>
    %cst_46 = arith.constant dense<0.000000e+00> : vector<16x16xf32>
    %74 = tpu.matmul %71, %73, %cst_46 {dimension_numbers = #tpu.dot_dimension_numbers<[1], [0], [0], [1], [0, 0, 1, 1], [], []>} : vector<16x16xf32>, vector<16x16xf32>, vector<16x16xf32> -> vector<16x16xf32>
    %75 = arith.addf %70, %74 : vector<16x16xf32>
    %76 = vector.extract_strided_slice %49 {offsets = [2, 0], sizes = [16, 16], strides = [1, 1]} : vector<18x16xf32> to vector<16x16xf32>
    %c5 = arith.constant 5 : index
    %c0_47 = arith.constant 0 : index
    %c0_48 = arith.constant 0 : index
    %77 = vector.load %arg8[%c5, %c0_47, %c0_48] : memref<6x16x16xf32, #tpu.memory_space<vmem>>, vector<1x16x16xf32>
    %78 = vector.shape_cast %77 : vector<1x16x16xf32> to vector<16x16xf32>
    %cst_49 = arith.constant dense<0.000000e+00> : vector<16x16xf32>
    %79 = tpu.matmul %76, %78, %cst_49 {dimension_numbers = #tpu.dot_dimension_numbers<[1], [0], [0], [1], [0, 0, 1, 1], [], []>} : vector<16x16xf32>, vector<16x16xf32>, vector<16x16xf32> -> vector<16x16xf32>
    %80 = arith.addf %75, %79 : vector<16x16xf32>
    %c0_50 = arith.constant 0 : index
    %81 = memref.load %arg9[%c0_50] : memref<1xf32, #tpu.memory_space<smem>>
    %82 = vector.broadcast %81 : f32 to vector<16x16xf32>
    %83 = arith.addf %80, %82 : vector<16x16xf32>
    %cst_51 = arith.constant 5.000000e-01 : f32
    %84 = vector.broadcast %cst_51 : f32 to vector<16x16xf32>
    %85 = arith.mulf %84, %83 : vector<16x16xf32>
    %86 = math.tanh %85 : vector<16x16xf32>
    %cst_52 = arith.constant 1.000000e+00 : f32
    %87 = vector.broadcast %cst_52 : f32 to vector<16x16xf32>
    %88 = arith.addf %86, %87 : vector<16x16xf32>
    %cst_53 = arith.constant 5.000000e-01 : f32
    %89 = vector.broadcast %cst_53 : f32 to vector<16x16xf32>
    %90 = arith.mulf %89, %88 : vector<16x16xf32>
    %91 = vector.shape_cast %90 : vector<16x16xf32> to vector<16x16x1xf32>
    %92 = vector.broadcast %91 : vector<16x16x1xf32> to vector<16x16x128xf32>
    %93 = arith.mulf %42, %92 : vector<16x16x128xf32>
    %94 = vector.shape_cast %93 : vector<16x16x128xf32> to vector<1x16x16x128xf32>
    %95 = arith.truncf %94 : vector<1x16x16x128xf32> to vector<1x16x16x128xbf16>
    %c0_54 = arith.constant 0 : index
    %c0_55 = arith.constant 0 : index
    %c0_56 = arith.constant 0 : index
    %c0_57 = arith.constant 0 : index
    %96 = vector.load %arg10[%c0_54, %c0_55, %c0_56, %c0_57] : memref<1x16x16x128xbf16, #tpu.memory_space<vmem>>, vector<1x16x16x128xbf16>
    tpu.vector_store %arg10[%c0_54, %c0_55, %c0_56, %c0_57], %95 {strides = array<i32>} : memref<1x16x16x128xbf16, #tpu.memory_space<vmem>>, vector<1x16x16x128xbf16>,
    return
  }
  func.func @transform_0(%arg0: i32) -> (i32, i32, i32, i32) {
    %c0_i32 = arith.constant 0 : i32
    %c0_i32_0 = arith.constant 0 : i32
    %c0_i32_1 = arith.constant 0 : i32
    %c0_i32_2 = arith.constant 0 : i32
    return %arg0, %c0_i32, %c0_i32_0, %c0_i32_1 : i32, i32, i32, i32
  }
  func.func @transform_1(%arg0: i32) -> (i32, i32, i32) {
    %c0_i32 = arith.constant 0 : i32
    %c0_i32_0 = arith.constant 0 : i32
    %c0_i32_1 = arith.constant 0 : i32
    %c0_i32_2 = arith.constant 0 : i32
    return %c0_i32, %c0_i32_0, %c0_i32_1 : i32, i32, i32
  }
  func.func @transform_2(%arg0: i32) -> (i32, i32) {
    %c0_i32 = arith.constant 0 : i32
    %c0_i32_0 = arith.constant 0 : i32
    %c0_i32_1 = arith.constant 0 : i32
    return %c0_i32, %c0_i32_0 : i32, i32
  }
  func.func @transform_3(%arg0: i32) -> (i32, i32) {
    %c0_i32 = arith.constant 0 : i32
    %c0_i32_0 = arith.constant 0 : i32
    %c0_i32_1 = arith.constant 0 : i32
    return %c0_i32, %c0_i32_0 : i32, i32
  }
  func.func @transform_4(%arg0: i32) -> (i32, i32) {
    %c0_i32 = arith.constant 0 : i32
    %c0_i32_0 = arith.constant 0 : i32
    %c0_i32_1 = arith.constant 0 : i32
    return %c0_i32, %c0_i32_0 : i32, i32
  }
  func.func @transform_5(%arg0: i32) -> (i32, i32) {
    %c0_i32 = arith.constant 0 : i32
    %c0_i32_0 = arith.constant 0 : i32
    %c0_i32_1 = arith.constant 0 : i32
    return %c0_i32, %c0_i32_0 : i32, i32
  }
  func.func @transform_6(%arg0: i32) -> (i32, i32) {
    %c0_i32 = arith.constant 0 : i32
    %c0_i32_0 = arith.constant 0 : i32
    %c0_i32_1 = arith.constant 0 : i32
    return %c0_i32, %c0_i32_0 : i32, i32
  }
  func.func @transform_7(%arg0: i32) -> (i32, i32, i32) {
    %c0_i32 = arith.constant 0 : i32
    %c0_i32_0 = arith.constant 0 : i32
    %c0_i32_1 = arith.constant 0 : i32
    %c0_i32_2 = arith.constant 0 : i32
    return %c0_i32, %c0_i32_0, %c0_i32_1 : i32, i32, i32
  }
  func.func @transform_8(%arg0: i32) -> i32 {
    %c0_i32 = arith.constant 0 : i32
    %c0_i32_0 = arith.constant 0 : i32
    return %c0_i32 : i32
  }
  func.func @transform_9(%arg0: i32) -> (i32, i32, i32, i32) {
    %c0_i32 = arith.constant 0 : i32
    %c0_i32_0 = arith.constant 0 : i32
    %c0_i32_1 = arith.constant 0 : i32
    %c0_i32_2 = arith.constant 0 : i32
    return %arg0, %c0_i32, %c0_i32_0, %c0_i32_1 : i32, i32, i32, i32
  }
}

module attributes {stable_mosaic.version = 11 : i64} {
  func.func @_fused_layer_kernel(%arg0: i32, %arg1: memref<1x16x16x128xbf16, #tpu.memory_space<vmem>>, %arg2: memref<3x384x128xbf16, #tpu.memory_space<vmem>>, %arg3: memref<1x128xf32, #tpu.memory_space<vmem>>, %arg4: memref<128x128xf32, #tpu.memory_space<vmem>>, %arg5: memref<1x128xf32, #tpu.memory_space<vmem>>, %arg6: memref<128x128xf32, #tpu.memory_space<vmem>>, %arg7: memref<1x128xf32, #tpu.memory_space<vmem>>, %arg8: memref<6x16x16xf32, #tpu.memory_space<vmem>>, %arg9: memref<1xf32, #tpu.memory_space<smem>>, %arg10: memref<1x16x16x128xbf16, #tpu.memory_space<vmem>>) attributes {dimension_semantics = [#tpu.dimension_semantics<parallel>], iteration_bounds = array<i64: 2>, scalar_prefetch = 0 : i64, scratch_operands = 0 : i64, tpu.core_type = #tpu.core_type<tc>, window_params = [{transform_indices = @transform_0, window_bounds = array<i64: 1, 16, 16, 128>}, {pipeline_mode = #tpu.pipeline_mode<synchronous>, transform_indices = @transform_1, window_bounds = array<i64: 3, 384, 128>}, {pipeline_mode = #tpu.pipeline_mode<synchronous>, transform_indices = @transform_2, window_bounds = array<i64: 1, 128>}, {pipeline_mode = #tpu.pipeline_mode<synchronous>, transform_indices = @transform_3, window_bounds = array<i64: 128, 128>}, {pipeline_mode = #tpu.pipeline_mode<synchronous>, transform_indices = @transform_4, window_bounds = array<i64: 1, 128>}, {pipeline_mode = #tpu.pipeline_mode<synchronous>, transform_indices = @transform_5, window_bounds = array<i64: 128, 128>}, {pipeline_mode = #tpu.pipeline_mode<synchronous>, transform_indices = @transform_6, window_bounds = array<i64: 1, 128>}, {pipeline_mode = #tpu.pipeline_mode<synchronous>, transform_indices = @transform_7, window_bounds = array<i64: 6, 16, 16>}, {transform_indices = @transform_8, window_bounds = array<i64: 1>}, {transform_indices = @transform_9, window_bounds = array<i64: 1, 16, 16, 128>}]} {
    %c0 = arith.constant 0 : index
    %c0_0 = arith.constant 0 : index
    %c0_1 = arith.constant 0 : index
    %c0_2 = arith.constant 0 : index
    %0 = vector.load %arg1[%c0, %c0_0, %c0_1, %c0_2] : memref<1x16x16x128xbf16, #tpu.memory_space<vmem>>, vector<1x16x16x128xbf16>
    %1 = vector.shape_cast %0 : vector<1x16x16x128xbf16> to vector<16x16x128xbf16>
    %cst = arith.constant 0.000000e+00 : bf16
    %2 = vector.broadcast %cst : bf16 to vector<16x1x128xbf16>
    %3 = tpu.concatenate %2, %1, %2 in 1 : vector<16x1x128xbf16>, vector<16x16x128xbf16>, vector<16x1x128xbf16> -> vector<16x18x128xbf16>
    %4 = vector.extract_strided_slice %3 {offsets = [0, 0, 0], sizes = [16, 16, 128], strides = [1, 1, 1]} : vector<16x18x128xbf16> to vector<16x16x128xbf16>
    %5 = vector.extract_strided_slice %3 {offsets = [0, 1, 0], sizes = [16, 16, 128], strides = [1, 1, 1]} : vector<16x18x128xbf16> to vector<16x16x128xbf16>
    %6 = vector.extract_strided_slice %3 {offsets = [0, 2, 0], sizes = [16, 16, 128], strides = [1, 1, 1]} : vector<16x18x128xbf16> to vector<16x16x128xbf16>
    %7 = tpu.concatenate %4, %5, %6 in 2 : vector<16x16x128xbf16>, vector<16x16x128xbf16>, vector<16x16x128xbf16> -> vector<16x16x384xbf16>
    %cst_3 = arith.constant 0.000000e+00 : bf16
    %8 = vector.broadcast %cst_3 : bf16 to vector<16x384xbf16>
    %9 = vector.shape_cast %7 : vector<16x16x384xbf16> to vector<256x384xbf16>
    %10 = tpu.concatenate %8, %9, %8 in 0 : vector<16x384xbf16>, vector<256x384xbf16>, vector<16x384xbf16> -> vector<288x384xbf16>
    %11 = vector.extract_strided_slice %10 {offsets = [0, 0], sizes = [256, 384], strides = [1, 1]} : vector<288x384xbf16> to vector<256x384xbf16>
    %c0_4 = arith.constant 0 : index
    %c0_5 = arith.constant 0 : index
    %c0_6 = arith.constant 0 : index
    %12 = vector.load %arg2[%c0_4, %c0_5, %c0_6] : memref<3x384x128xbf16, #tpu.memory_space<vmem>>, vector<1x384x128xbf16>
    %13 = vector.shape_cast %12 : vector<1x384x128xbf16> to vector<384x128xbf16>
    %cst_7 = arith.constant dense<0.000000e+00> : vector<256x128xf32>
    %14 = tpu.matmul %11, %13, %cst_7 {dimension_numbers = #tpu.dot_dimension_numbers<[1], [0], [0], [1], [0, 0, 1, 1], [], []>} : vector<256x384xbf16>, vector<384x128xbf16>, vector<256x128xf32> -> vector<256x128xf32>
    %15 = vector.extract_strided_slice %10 {offsets = [16, 0], sizes = [256, 384], strides = [1, 1]} : vector<288x384xbf16> to vector<256x384xbf16>
    %c1 = arith.constant 1 : index
    %c0_8 = arith.constant 0 : index
    %c0_9 = arith.constant 0 : index
    %16 = vector.load %arg2[%c1, %c0_8, %c0_9] : memref<3x384x128xbf16, #tpu.memory_space<vmem>>, vector<1x384x128xbf16>
    %17 = vector.shape_cast %16 : vector<1x384x128xbf16> to vector<384x128xbf16>
    %cst_10 = arith.constant dense<0.000000e+00> : vector<256x128xf32>
    %18 = tpu.matmul %15, %17, %cst_10 {dimension_numbers = #tpu.dot_dimension_numbers<[1], [0], [0], [1], [0, 0, 1, 1], [], []>} : vector<256x384xbf16>, vector<384x128xbf16>, vector<256x128xf32> -> vector<256x128xf32>
    %19 = arith.addf %14, %18 : vector<256x128xf32>
    %20 = vector.extract_strided_slice %10 {offsets = [32, 0], sizes = [256, 384], strides = [1, 1]} : vector<288x384xbf16> to vector<256x384xbf16>
    %c2 = arith.constant 2 : index
    %c0_11 = arith.constant 0 : index
    %c0_12 = arith.constant 0 : index
    %21 = vector.load %arg2[%c2, %c0_11, %c0_12] : memref<3x384x128xbf16, #tpu.memory_space<vmem>>, vector<1x384x128xbf16>
    %22 = vector.shape_cast %21 : vector<1x384x128xbf16> to vector<384x128xbf16>
    %cst_13 = arith.constant dense<0.000000e+00> : vector<256x128xf32>
    %23 = tpu.matmul %20, %22, %cst_13 {dimension_numbers = #tpu.dot_dimension_numbers<[1], [0], [0], [1], [0, 0, 1, 1], [], []>} : vector<256x384xbf16>, vector<384x128xbf16>, vector<256x128xf32> -> vector<256x128xf32>
    %24 = arith.addf %19, %23 : vector<256x128xf32>
    %c0_14 = arith.constant 0 : index
    %c0_15 = arith.constant 0 : index
    %25 = vector.load %arg3[%c0_14, %c0_15] : memref<1x128xf32, #tpu.memory_space<vmem>>, vector<1x128xf32>
    %26 = vector.broadcast %25 : vector<1x128xf32> to vector<256x128xf32>
    %27 = arith.addf %24, %26 : vector<256x128xf32>
    %cst_16 = arith.constant 0.000000e+00 : f32
    %28 = vector.broadcast %cst_16 : f32 to vector<256x128xf32>
    %29 = arith.maximumf %27, %28 : vector<256x128xf32>
    %cst_17 = arith.constant dense<0.000000e+00> : vector<128xf32>
    %30 = vector.multi_reduction <add>, %29, %cst_17 [0] : vector<256x128xf32> to vector<128xf32>
    %31 = vector.shape_cast %30 : vector<128xf32> to vector<1x128xf32>
    %cst_18 = arith.constant 3.906250e-03 : f32
    %32 = vector.broadcast %cst_18 : f32 to vector<1x128xf32>
    %33 = arith.mulf %31, %32 : vector<1x128xf32>
    %cst_19 = arith.constant dense<0xFF800000> : vector<128xf32>
    %34 = vector.multi_reduction <maximumf>, %29, %cst_19 [0] : vector<256x128xf32> to vector<128xf32>
    %35 = vector.shape_cast %34 : vector<128xf32> to vector<1x128xf32>
    %36 = tpu.concatenate %33, %35 in 0 : vector<1x128xf32>, vector<1x128xf32> -> vector<2x128xf32>
    %c0_20 = arith.constant 0 : index
    %c0_21 = arith.constant 0 : index
    %37 = vector.load %arg4[%c0_20, %c0_21] : memref<128x128xf32, #tpu.memory_space<vmem>>, vector<128x128xf32>
    %cst_22 = arith.constant dense<0.000000e+00> : vector<2x128xf32>
    %38 = tpu.matmul %36, %37, %cst_22 {dimension_numbers = #tpu.dot_dimension_numbers<[1], [0], [0], [1], [0, 0, 1, 1], [], []>} : vector<2x128xf32>, vector<128x128xf32>, vector<2x128xf32> -> vector<2x128xf32>
    %c0_23 = arith.constant 0 : index
    %c0_24 = arith.constant 0 : index
    %39 = vector.load %arg5[%c0_23, %c0_24] : memref<1x128xf32, #tpu.memory_space<vmem>>, vector<1x128xf32>
    %40 = vector.broadcast %39 : vector<1x128xf32> to vector<2x128xf32>
    %41 = arith.addf %38, %40 : vector<2x128xf32>
    %cst_25 = arith.constant 0.000000e+00 : f32
    %42 = vector.broadcast %cst_25 : f32 to vector<2x128xf32>
    %43 = arith.maximumf %41, %42 : vector<2x128xf32>
    %c0_26 = arith.constant 0 : index
    %c0_27 = arith.constant 0 : index
    %44 = vector.load %arg6[%c0_26, %c0_27] : memref<128x128xf32, #tpu.memory_space<vmem>>, vector<128x128xf32>
    %cst_28 = arith.constant dense<0.000000e+00> : vector<2x128xf32>
    %45 = tpu.matmul %43, %44, %cst_28 {dimension_numbers = #tpu.dot_dimension_numbers<[1], [0], [0], [1], [0, 0, 1, 1], [], []>} : vector<2x128xf32>, vector<128x128xf32>, vector<2x128xf32> -> vector<2x128xf32>
    %c0_29 = arith.constant 0 : index
    %c0_30 = arith.constant 0 : index
    %46 = vector.load %arg7[%c0_29, %c0_30] : memref<1x128xf32, #tpu.memory_space<vmem>>, vector<1x128xf32>
    %47 = vector.broadcast %46 : vector<1x128xf32> to vector<2x128xf32>
    %48 = arith.addf %45, %47 : vector<2x128xf32>
    %49 = vector.extract_strided_slice %48 {offsets = [0, 0], sizes = [1, 128], strides = [1, 1]} : vector<2x128xf32> to vector<1x128xf32>
    %50 = vector.extract_strided_slice %48 {offsets = [1, 0], sizes = [1, 128], strides = [1, 1]} : vector<2x128xf32> to vector<1x128xf32>
    %51 = arith.addf %49, %50 : vector<1x128xf32>
    %cst_31 = arith.constant 5.000000e-01 : f32
    %52 = vector.broadcast %cst_31 : f32 to vector<1x128xf32>
    %53 = arith.mulf %52, %51 : vector<1x128xf32>
    %54 = math.tanh %53 : vector<1x128xf32>
    %cst_32 = arith.constant 1.000000e+00 : f32
    %55 = vector.broadcast %cst_32 : f32 to vector<1x128xf32>
    %56 = arith.addf %54, %55 : vector<1x128xf32>
    %cst_33 = arith.constant 5.000000e-01 : f32
    %57 = vector.broadcast %cst_33 : f32 to vector<1x128xf32>
    %58 = arith.mulf %57, %56 : vector<1x128xf32>
    %59 = vector.broadcast %58 : vector<1x128xf32> to vector<256x128xf32>
    %60 = arith.mulf %29, %59 : vector<256x128xf32>
    %61 = vector.shape_cast %60 : vector<256x128xf32> to vector<16x16x128xf32>
    %cst_34 = arith.constant dense<0xFF800000> : vector<16x16xf32>
    %62 = vector.multi_reduction <maximumf>, %61, %cst_34 [2] : vector<16x16x128xf32> to vector<16x16xf32>
    %cst_35 = arith.constant dense<0.000000e+00> : vector<16x16xf32>
    %63 = vector.multi_reduction <add>, %61, %cst_35 [2] : vector<16x16x128xf32> to vector<16x16xf32>
    %cst_36 = arith.constant 7.812500e-03 : f32
    %64 = vector.broadcast %cst_36 : f32 to vector<16x16xf32>
    %65 = arith.mulf %63, %64 : vector<16x16xf32>
    %cst_37 = arith.constant 0.000000e+00 : f32
    %66 = vector.broadcast %cst_37 : f32 to vector<1x16xf32>
    %67 = tpu.concatenate %66, %62, %66 in 0 : vector<1x16xf32>, vector<16x16xf32>, vector<1x16xf32> -> vector<18x16xf32>
    %68 = tpu.concatenate %66, %65, %66 in 0 : vector<1x16xf32>, vector<16x16xf32>, vector<1x16xf32> -> vector<18x16xf32>
    %cst_38 = arith.constant 0.000000e+00 : f32
    %69 = vector.broadcast %cst_38 : f32 to vector<16x16xf32>
    %70 = vector.extract_strided_slice %67 {offsets = [0, 0], sizes = [16, 16], strides = [1, 1]} : vector<18x16xf32> to vector<16x16xf32>
    %c0_39 = arith.constant 0 : index
    %c0_40 = arith.constant 0 : index
    %c0_41 = arith.constant 0 : index
    %71 = vector.load %arg8[%c0_39, %c0_40, %c0_41] : memref<6x16x16xf32, #tpu.memory_space<vmem>>, vector<1x16x16xf32>
    %72 = vector.shape_cast %71 : vector<1x16x16xf32> to vector<16x16xf32>
    %cst_42 = arith.constant dense<0.000000e+00> : vector<16x16xf32>
    %73 = tpu.matmul %70, %72, %cst_42 {dimension_numbers = #tpu.dot_dimension_numbers<[1], [0], [0], [1], [0, 0, 1, 1], [], []>} : vector<16x16xf32>, vector<16x16xf32>, vector<16x16xf32> -> vector<16x16xf32>
    %74 = arith.addf %69, %73 : vector<16x16xf32>
    %75 = vector.extract_strided_slice %67 {offsets = [1, 0], sizes = [16, 16], strides = [1, 1]} : vector<18x16xf32> to vector<16x16xf32>
    %c1_43 = arith.constant 1 : index
    %c0_44 = arith.constant 0 : index
    %c0_45 = arith.constant 0 : index
    %76 = vector.load %arg8[%c1_43, %c0_44, %c0_45] : memref<6x16x16xf32, #tpu.memory_space<vmem>>, vector<1x16x16xf32>
    %77 = vector.shape_cast %76 : vector<1x16x16xf32> to vector<16x16xf32>
    %cst_46 = arith.constant dense<0.000000e+00> : vector<16x16xf32>
    %78 = tpu.matmul %75, %77, %cst_46 {dimension_numbers = #tpu.dot_dimension_numbers<[1], [0], [0], [1], [0, 0, 1, 1], [], []>} : vector<16x16xf32>, vector<16x16xf32>, vector<16x16xf32> -> vector<16x16xf32>
    %79 = arith.addf %74, %78 : vector<16x16xf32>
    %80 = vector.extract_strided_slice %67 {offsets = [2, 0], sizes = [16, 16], strides = [1, 1]} : vector<18x16xf32> to vector<16x16xf32>
    %c2_47 = arith.constant 2 : index
    %c0_48 = arith.constant 0 : index
    %c0_49 = arith.constant 0 : index
    %81 = vector.load %arg8[%c2_47, %c0_48, %c0_49] : memref<6x16x16xf32, #tpu.memory_space<vmem>>, vector<1x16x16xf32>
    %82 = vector.shape_cast %81 : vector<1x16x16xf32> to vector<16x16xf32>
    %cst_50 = arith.constant dense<0.000000e+00> : vector<16x16xf32>
    %83 = tpu.matmul %80, %82, %cst_50 {dimension_numbers = #tpu.dot_dimension_numbers<[1], [0], [0], [1], [0, 0, 1, 1], [], []>} : vector<16x16xf32>, vector<16x16xf32>, vector<16x16xf32> -> vector<16x16xf32>
    %84 = arith.addf %79, %83 : vector<16x16xf32>
    %85 = vector.extract_strided_slice %68 {offsets = [0, 0], sizes = [16, 16], strides = [1, 1]} : vector<18x16xf32> to vector<16x16xf32>
    %c3 = arith.constant 3 : index
    %c0_51 = arith.constant 0 : index
    %c0_52 = arith.constant 0 : index
    %86 = vector.load %arg8[%c3, %c0_51, %c0_52] : memref<6x16x16xf32, #tpu.memory_space<vmem>>, vector<1x16x16xf32>
    %87 = vector.shape_cast %86 : vector<1x16x16xf32> to vector<16x16xf32>
    %cst_53 = arith.constant dense<0.000000e+00> : vector<16x16xf32>
    %88 = tpu.matmul %85, %87, %cst_53 {dimension_numbers = #tpu.dot_dimension_numbers<[1], [0], [0], [1], [0, 0, 1, 1], [], []>} : vector<16x16xf32>, vector<16x16xf32>, vector<16x16xf32> -> vector<16x16xf32>
    %89 = arith.addf %84, %88 : vector<16x16xf32>
    %90 = vector.extract_strided_slice %68 {offsets = [1, 0], sizes = [16, 16], strides = [1, 1]} : vector<18x16xf32> to vector<16x16xf32>
    %c4 = arith.constant 4 : index
    %c0_54 = arith.constant 0 : index
    %c0_55 = arith.constant 0 : index
    %91 = vector.load %arg8[%c4, %c0_54, %c0_55] : memref<6x16x16xf32, #tpu.memory_space<vmem>>, vector<1x16x16xf32>
    %92 = vector.shape_cast %91 : vector<1x16x16xf32> to vector<16x16xf32>
    %cst_56 = arith.constant dense<0.000000e+00> : vector<16x16xf32>
    %93 = tpu.matmul %90, %92, %cst_56 {dimension_numbers = #tpu.dot_dimension_numbers<[1], [0], [0], [1], [0, 0, 1, 1], [], []>} : vector<16x16xf32>, vector<16x16xf32>, vector<16x16xf32> -> vector<16x16xf32>
    %94 = arith.addf %89, %93 : vector<16x16xf32>
    %95 = vector.extract_strided_slice %68 {offsets = [2, 0], sizes = [16, 16], strides = [1, 1]} : vector<18x16xf32> to vector<16x16xf32>
    %c5 = arith.constant 5 : index
    %c0_57 = arith.constant 0 : index
    %c0_58 = arith.constant 0 : index
    %96 = vector.load %arg8[%c5, %c0_57, %c0_58] : memref<6x16x16xf32, #tpu.memory_space<vmem>>, vector<1x16x16xf32>
    %97 = vector.shape_cast %96 : vector<1x16x16xf32> to vector<16x16xf32>
    %cst_59 = arith.constant dense<0.000000e+00> : vector<16x16xf32>
    %98 = tpu.matmul %95, %97, %cst_59 {dimension_numbers = #tpu.dot_dimension_numbers<[1], [0], [0], [1], [0, 0, 1, 1], [], []>} : vector<16x16xf32>, vector<16x16xf32>, vector<16x16xf32> -> vector<16x16xf32>
    %99 = arith.addf %94, %98 : vector<16x16xf32>
    %c0_60 = arith.constant 0 : index
    %100 = memref.load %arg9[%c0_60] : memref<1xf32, #tpu.memory_space<smem>>
    %101 = vector.broadcast %100 : f32 to vector<16x16xf32>
    %102 = arith.addf %99, %101 : vector<16x16xf32>
    %cst_61 = arith.constant 5.000000e-01 : f32
    %103 = vector.broadcast %cst_61 : f32 to vector<16x16xf32>
    %104 = arith.mulf %103, %102 : vector<16x16xf32>
    %105 = math.tanh %104 : vector<16x16xf32>
    %cst_62 = arith.constant 1.000000e+00 : f32
    %106 = vector.broadcast %cst_62 : f32 to vector<16x16xf32>
    %107 = arith.addf %105, %106 : vector<16x16xf32>
    %cst_63 = arith.constant 5.000000e-01 : f32
    %108 = vector.broadcast %cst_63 : f32 to vector<16x16xf32>
    %109 = arith.mulf %108, %107 : vector<16x16xf32>
    %110 = vector.shape_cast %109 : vector<16x16xf32> to vector<16x16x1xf32>
    %111 = vector.broadcast %110 : vector<16x16x1xf32> to vector<16x16x128xf32>
    %112 = arith.mulf %61, %111 : vector<16x16x128xf32>
    %113 = vector.shape_cast %112 : vector<16x16x128xf32> to vector<1x16x16x128xf32>
    %114 = arith.truncf %113 : vector<1x16x16x128xf32> to vector<1x16x16x128xbf16>
    %c0_64 = arith.constant 0 : index
    %c0_65 = arith.constant 0 : index
    %c0_66 = arith.constant 0 : index
    %c0_67 = arith.constant 0 : index
    %115 = vector.load %arg10[%c0_64, %c0_65, %c0_66, %c0_67] : memref<1x16x16x128xbf16, #tpu.memory_space<vmem>>, vector<1x16x16x128xbf16>
    tpu.vector_store %arg10[%c0_64, %c0_65, %c0_66, %c0_67], %114 {strides = array<i32>} : memref<1x16x16x128xbf16, #tpu.memory_space<vmem>>, vector<1x16x16x128xbf16>,
    return
  }
  func.func @transform_0(%arg0: i32) -> (i32, i32, i32, i32) {
    %c0_i32 = arith.constant 0 : i32
    %c0_i32_0 = arith.constant 0 : i32
    %c0_i32_1 = arith.constant 0 : i32
    %c0_i32_2 = arith.constant 0 : i32
    return %arg0, %c0_i32, %c0_i32_0, %c0_i32_1 : i32, i32, i32, i32
  }
  func.func @transform_1(%arg0: i32) -> (i32, i32, i32) {
    %c0_i32 = arith.constant 0 : i32
    %c0_i32_0 = arith.constant 0 : i32
    %c0_i32_1 = arith.constant 0 : i32
    %c0_i32_2 = arith.constant 0 : i32
    return %c0_i32, %c0_i32_0, %c0_i32_1 : i32, i32, i32
  }
  func.func @transform_2(%arg0: i32) -> (i32, i32) {
    %c0_i32 = arith.constant 0 : i32
    %c0_i32_0 = arith.constant 0 : i32
    %c0_i32_1 = arith.constant 0 : i32
    return %c0_i32, %c0_i32_0 : i32, i32
  }
  func.func @transform_3(%arg0: i32) -> (i32, i32) {
    %c0_i32 = arith.constant 0 : i32
    %c0_i32_0 = arith.constant 0 : i32
    %c0_i32_1 = arith.constant 0 : i32
    return %c0_i32, %c0_i32_0 : i32, i32
  }
  func.func @transform_4(%arg0: i32) -> (i32, i32) {
    %c0_i32 = arith.constant 0 : i32
    %c0_i32_0 = arith.constant 0 : i32
    %c0_i32_1 = arith.constant 0 : i32
    return %c0_i32, %c0_i32_0 : i32, i32
  }
  func.func @transform_5(%arg0: i32) -> (i32, i32) {
    %c0_i32 = arith.constant 0 : i32
    %c0_i32_0 = arith.constant 0 : i32
    %c0_i32_1 = arith.constant 0 : i32
    return %c0_i32, %c0_i32_0 : i32, i32
  }
  func.func @transform_6(%arg0: i32) -> (i32, i32) {
    %c0_i32 = arith.constant 0 : i32
    %c0_i32_0 = arith.constant 0 : i32
    %c0_i32_1 = arith.constant 0 : i32
    return %c0_i32, %c0_i32_0 : i32, i32
  }
  func.func @transform_7(%arg0: i32) -> (i32, i32, i32) {
    %c0_i32 = arith.constant 0 : i32
    %c0_i32_0 = arith.constant 0 : i32
    %c0_i32_1 = arith.constant 0 : i32
    %c0_i32_2 = arith.constant 0 : i32
    return %c0_i32, %c0_i32_0, %c0_i32_1 : i32, i32, i32
  }
  func.func @transform_8(%arg0: i32) -> i32 {
    %c0_i32 = arith.constant 0 : i32
    %c0_i32_0 = arith.constant 0 : i32
    return %c0_i32 : i32
  }
  func.func @transform_9(%arg0: i32) -> (i32, i32, i32, i32) {
    %c0_i32 = arith.constant 0 : i32
    %c0_i32_0 = arith.constant 0 : i32
    %c0_i32_1 = arith.constant 0 : i32
    %c0_i32_2 = arith.constant 0 : i32
    return %arg0, %c0_i32, %c0_i32_0, %c0_i32_1 : i32, i32, i32, i32
  }
}

module attributes {stable_mosaic.version = 11 : i64} {
  func.func @_fused_layer_kernel(%arg0: i32, %arg1: memref<1x16x16x128xbf16, #tpu.memory_space<vmem>>, %arg2: memref<3x384x128xbf16, #tpu.memory_space<vmem>>, %arg3: memref<1x128xf32, #tpu.memory_space<vmem>>, %arg4: memref<1x16x16x128xf32, #tpu.memory_space<vmem>>) attributes {dimension_semantics = [#tpu.dimension_semantics<parallel>], iteration_bounds = array<i64: 2>, scalar_prefetch = 0 : i64, scratch_operands = 0 : i64, tpu.core_type = #tpu.core_type<tc>, window_params = [{transform_indices = @transform_0, window_bounds = array<i64: 1, 16, 16, 128>}, {pipeline_mode = #tpu.pipeline_mode<synchronous>, transform_indices = @transform_1, window_bounds = array<i64: 3, 384, 128>}, {pipeline_mode = #tpu.pipeline_mode<synchronous>, transform_indices = @transform_2, window_bounds = array<i64: 1, 128>}, {transform_indices = @transform_3, window_bounds = array<i64: 1, 16, 16, 128>}]} {
    %c0 = arith.constant 0 : index
    %c0_0 = arith.constant 0 : index
    %c0_1 = arith.constant 0 : index
    %c0_2 = arith.constant 0 : index
    %0 = vector.load %arg1[%c0, %c0_0, %c0_1, %c0_2] : memref<1x16x16x128xbf16, #tpu.memory_space<vmem>>, vector<1x16x16x128xbf16>
    %1 = vector.shape_cast %0 : vector<1x16x16x128xbf16> to vector<16x16x128xbf16>
    %cst = arith.constant 0.000000e+00 : bf16
    %2 = vector.broadcast %cst : bf16 to vector<16x1x128xbf16>
    %3 = tpu.concatenate %2, %1, %2 in 1 : vector<16x1x128xbf16>, vector<16x16x128xbf16>, vector<16x1x128xbf16> -> vector<16x18x128xbf16>
    %4 = vector.extract_strided_slice %3 {offsets = [0, 0, 0], sizes = [16, 16, 128], strides = [1, 1, 1]} : vector<16x18x128xbf16> to vector<16x16x128xbf16>
    %5 = vector.extract_strided_slice %3 {offsets = [0, 1, 0], sizes = [16, 16, 128], strides = [1, 1, 1]} : vector<16x18x128xbf16> to vector<16x16x128xbf16>
    %6 = vector.extract_strided_slice %3 {offsets = [0, 2, 0], sizes = [16, 16, 128], strides = [1, 1, 1]} : vector<16x18x128xbf16> to vector<16x16x128xbf16>
    %7 = tpu.concatenate %4, %5, %6 in 2 : vector<16x16x128xbf16>, vector<16x16x128xbf16>, vector<16x16x128xbf16> -> vector<16x16x384xbf16>
    %cst_3 = arith.constant 0.000000e+00 : bf16
    %8 = vector.broadcast %cst_3 : bf16 to vector<16x384xbf16>
    %9 = vector.shape_cast %7 : vector<16x16x384xbf16> to vector<256x384xbf16>
    %10 = tpu.concatenate %8, %9, %8 in 0 : vector<16x384xbf16>, vector<256x384xbf16>, vector<16x384xbf16> -> vector<288x384xbf16>
    %11 = vector.extract_strided_slice %10 {offsets = [0, 0], sizes = [256, 384], strides = [1, 1]} : vector<288x384xbf16> to vector<256x384xbf16>
    %c0_4 = arith.constant 0 : index
    %c0_5 = arith.constant 0 : index
    %c0_6 = arith.constant 0 : index
    %12 = vector.load %arg2[%c0_4, %c0_5, %c0_6] : memref<3x384x128xbf16, #tpu.memory_space<vmem>>, vector<1x384x128xbf16>
    %13 = vector.shape_cast %12 : vector<1x384x128xbf16> to vector<384x128xbf16>
    %cst_7 = arith.constant dense<0.000000e+00> : vector<256x128xf32>
    %14 = tpu.matmul %11, %13, %cst_7 {dimension_numbers = #tpu.dot_dimension_numbers<[1], [0], [0], [1], [0, 0, 1, 1], [], []>} : vector<256x384xbf16>, vector<384x128xbf16>, vector<256x128xf32> -> vector<256x128xf32>
    %15 = vector.extract_strided_slice %10 {offsets = [16, 0], sizes = [256, 384], strides = [1, 1]} : vector<288x384xbf16> to vector<256x384xbf16>
    %c1 = arith.constant 1 : index
    %c0_8 = arith.constant 0 : index
    %c0_9 = arith.constant 0 : index
    %16 = vector.load %arg2[%c1, %c0_8, %c0_9] : memref<3x384x128xbf16, #tpu.memory_space<vmem>>, vector<1x384x128xbf16>
    %17 = vector.shape_cast %16 : vector<1x384x128xbf16> to vector<384x128xbf16>
    %cst_10 = arith.constant dense<0.000000e+00> : vector<256x128xf32>
    %18 = tpu.matmul %15, %17, %cst_10 {dimension_numbers = #tpu.dot_dimension_numbers<[1], [0], [0], [1], [0, 0, 1, 1], [], []>} : vector<256x384xbf16>, vector<384x128xbf16>, vector<256x128xf32> -> vector<256x128xf32>
    %19 = arith.addf %14, %18 : vector<256x128xf32>
    %20 = vector.extract_strided_slice %10 {offsets = [32, 0], sizes = [256, 384], strides = [1, 1]} : vector<288x384xbf16> to vector<256x384xbf16>
    %c2 = arith.constant 2 : index
    %c0_11 = arith.constant 0 : index
    %c0_12 = arith.constant 0 : index
    %21 = vector.load %arg2[%c2, %c0_11, %c0_12] : memref<3x384x128xbf16, #tpu.memory_space<vmem>>, vector<1x384x128xbf16>
    %22 = vector.shape_cast %21 : vector<1x384x128xbf16> to vector<384x128xbf16>
    %cst_13 = arith.constant dense<0.000000e+00> : vector<256x128xf32>
    %23 = tpu.matmul %20, %22, %cst_13 {dimension_numbers = #tpu.dot_dimension_numbers<[1], [0], [0], [1], [0, 0, 1, 1], [], []>} : vector<256x384xbf16>, vector<384x128xbf16>, vector<256x128xf32> -> vector<256x128xf32>
    %24 = arith.addf %19, %23 : vector<256x128xf32>
    %c0_14 = arith.constant 0 : index
    %c0_15 = arith.constant 0 : index
    %25 = vector.load %arg3[%c0_14, %c0_15] : memref<1x128xf32, #tpu.memory_space<vmem>>, vector<1x128xf32>
    %26 = vector.broadcast %25 : vector<1x128xf32> to vector<256x128xf32>
    %27 = arith.addf %24, %26 : vector<256x128xf32>
    %cst_16 = arith.constant 0.000000e+00 : f32
    %28 = vector.broadcast %cst_16 : f32 to vector<256x128xf32>
    %29 = arith.maximumf %27, %28 : vector<256x128xf32>
    %30 = vector.shape_cast %29 : vector<256x128xf32> to vector<1x16x16x128xf32>
    %c0_17 = arith.constant 0 : index
    %c0_18 = arith.constant 0 : index
    %c0_19 = arith.constant 0 : index
    %c0_20 = arith.constant 0 : index
    %31 = vector.load %arg4[%c0_17, %c0_18, %c0_19, %c0_20] : memref<1x16x16x128xf32, #tpu.memory_space<vmem>>, vector<1x16x16x128xf32>
    tpu.vector_store %arg4[%c0_17, %c0_18, %c0_19, %c0_20], %30 {strides = array<i32>} : memref<1x16x16x128xf32, #tpu.memory_space<vmem>>, vector<1x16x16x128xf32>,
    return
  }
  func.func @transform_0(%arg0: i32) -> (i32, i32, i32, i32) {
    %c0_i32 = arith.constant 0 : i32
    %c0_i32_0 = arith.constant 0 : i32
    %c0_i32_1 = arith.constant 0 : i32
    %c0_i32_2 = arith.constant 0 : i32
    return %arg0, %c0_i32, %c0_i32_0, %c0_i32_1 : i32, i32, i32, i32
  }
  func.func @transform_1(%arg0: i32) -> (i32, i32, i32) {
    %c0_i32 = arith.constant 0 : i32
    %c0_i32_0 = arith.constant 0 : i32
    %c0_i32_1 = arith.constant 0 : i32
    %c0_i32_2 = arith.constant 0 : i32
    return %c0_i32, %c0_i32_0, %c0_i32_1 : i32, i32, i32
  }
  func.func @transform_2(%arg0: i32) -> (i32, i32) {
    %c0_i32 = arith.constant 0 : i32
    %c0_i32_0 = arith.constant 0 : i32
    %c0_i32_1 = arith.constant 0 : i32
    return %c0_i32, %c0_i32_0 : i32, i32
  }
  func.func @transform_3(%arg0: i32) -> (i32, i32, i32, i32) {
    %c0_i32 = arith.constant 0 : i32
    %c0_i32_0 = arith.constant 0 : i32
    %c0_i32_1 = arith.constant 0 : i32
    %c0_i32_2 = arith.constant 0 : i32
    return %arg0, %c0_i32, %c0_i32_0, %c0_i32_1 : i32, i32, i32, i32
  }
}

</mosaic_0001>

<bundles_post_ra>
// kernel: attentive_cnn_forward.3
= control target key start
LH: loop header
LB: loop body
LE: loop exit
PB: predicated region body
PF: predicated region fallthrough
CT: control target
= control target key end

     0   :  { %s3203_s11 = smov 0   ;;  %s4004_s0 = inlined_call_operand.vmem [shape: bf16[2,16,16,128], index: 0, kind: input, shape index: {}]   ;;  %s4005_s1 = inlined_call_operand.vmem [shape: bf16[1,128,128], index: 1, kind: input, shape index: {}]   ;;  %s4006_s2 = inlined_call_operand.vmem [shape: f32[1,128], index: 2, kind: input, shape index: {}]   ;;  %s4007_s3 = inlined_call_operand.vmem [shape: f32[128,128], index: 3, kind: input, shape index: {}]   ;;  %s4008_s4 = inlined_call_operand.vmem [shape: f32[1,128], index: 4, kind: input, shape index: {}]   ;;  %s4009_s5 = inlined_call_operand.vmem [shape: f32[128,128], index: 5, kind: input, shape index: {}]   ;;  %s4010_s6 = inlined_call_operand.vmem [shape: f32[1,128], index: 6, kind: input, shape index: {}]   ;;  %s4011_s7 = inlined_call_operand.vmem [shape: f32[6,16,16], index: 7, kind: input, shape index: {}]   ;;  %s4012_s8 = inlined_call_operand.<no memory space> [shape: f32[1], index: 8, kind: input, shape index: {}]   ;;  %s4013_s9 = inlined_call_operand.vmem [shape: bf16[2,16,16,128], index: 9, kind: output, shape index: {}]  }
   0x1   :  { %14 = sst [smem:[#allocation2]] %s4012_s8 }
   0x2 LB: > { %s2553_s12 = sadd.s32 4294967295, %s3145_s11   ;;  %p2557_p0 = scmp.ge.s32.totalorder %s3145_s11, 1  ;;  %s3145_s11 = sphi %s3203_s11, %s20_s11  }
   0x3   : > { %p288_p1 = scmp.lt.s32.totalorder %s3145_s11, 3 }
   0x5   : > { %p289_p2 = pnand %p2557_p0, %p288_p1 }
   0x7   : > { %292 = sbr.rel (%p289_p2) target bundleno = 1499 (0x5db), region = 56 }
   0xe   : > { %v3109_v0 = vld [vmem:[%s4005_s1] sm:$0xff]   ;;  %p324_p3 = scmp.lt.s32.totalorder %s2553_s12, 1  ;;  %v3110_v1 = vld [vmem:[%s4005_s1 + $0x8] sm:$0xff]   ;;  %v3111_v2 = vld [vmem:[%s4005_s1 + $0x10] sm:$0xff]   ;;  %v3147_v27 = vmov 0.0|0.0   ;;  %vm3148_vm0 = vmmov 0  }
   0xf   : > { %2856 = vmatprep.subr.bf16.mxu0 %v3109_v0  ;;  %v3112_v3 = vld [vmem:[%s4005_s1 + $0x18] sm:$0xff]   ;;  %v3113_v5 = vld [vmem:[%s4005_s1 + $0x20] sm:$0xff]   ;;  %v3114_v6 = vld [vmem:[%s4005_s1 + $0x28] sm:$0xff]   ;;  %3016 = vmatprep.subr.bf16.mxu1 %v3147_v27  ;;  %v3149_v45 = vmov 0.0   ;;  %vm802_vm1 = vcmask 1040384   ;;  %vm1238_vm2 = vcmask 130112  }
  0x10   : > { %s4036_s12 = smov (!%p324_p3, %s2553_s12), 1  ;;  %2857 = vmatpush3.bf16.msra.mxu0 %v3109_v0  ;;  %v3115_v7 = vld [vmem:[%s4005_s1 + $0x30] sm:$0xff]   ;;  %v3116_v8 = vld [vmem:[%s4005_s1 + $0x38] sm:$0xff]   ;;  %v804_v24 = vld [vmem:[%s4007_s3] sm:$0xff]  ;;  %2936 = vmatprep.mubr.msk.f32.mxu1 %vm3148_vm0, %v3149_v45  ;;  %vm1375_vm3 = vcmask 1042434   ;;  %vm1387_vm4 = vcmask 1041409  }
  0x11   : > { %2858 = vmatprep.subr.bf16.mxu0 %v3110_v1  ;;  %s2645_s18 = sshll.u32 %s4036_s12, 7  ;;  %v805_v25 = vld [vmem:[%s4007_s3 + $0x8] sm:$0xff]  ;;  %v806_v28 = vld [vmem:[%s4007_s3 + $0x10] sm:$0xff]  ;;  %v807_v29 = vld [vmem:[%s4007_s3 + $0x18] sm:$0xff]  ;;  %vm1377_vm5 = vcmask 1043459   ;;  %vm1379_vm6 = vcmask 1044484  }
  0x12   : > { %s3228_s21 = scalar_lea.vmem %s4004_s0, %s2645_s18  ;;  %v3017_v26 = vpack.c.bf16 %v805_v25, %v804_v24  ;;  %v3020_v30 = vpack.c.bf16 %v807_v29, %v806_v28  ;;  %v808_v31 = vld [vmem:[%s4007_s3 + $0x20] sm:$0xff]  ;;  %v809_v32 = vld [vmem:[%s4007_s3 + $0x28] sm:$0xff]  ;;  %v810_v34 = vld [vmem:[%s4007_s3 + $0x30] sm:$0xff]  ;;  %vm1381_vm7 = vcmask 1045509   ;;  %vm1383_vm8 = vcmask 1046534   ;;  %s2118_s10 = sld [smem:[#allocation2]] }
  0x13   : > { %v3117_v4 = vld [vmem:[%s3228_s21] sm:$0xff]   ;;  %v3118_v9 = vld [vmem:[%s3228_s21 + $0x8] sm:$0xff]   ;;  %v3119_v10 = vld [vmem:[%s3228_s21 + $0x10] sm:$0xff]   ;;  %v3023_v33 = vpack.c.bf16 %v809_v32, %v808_v31  ;;  %vm1385_vm9 = vcmask 1047559   ;;  %vm1599_vm10 = vcmask 1046528   ;;  %vm1605_vm11 = vcmask 130048   ;;  %s3953_s8 = scalar_lea.vmem %s4013_s9, %s2645_s18 }
  0x14   : > { %2859 = vmatpush3.bf16.msra.mxu0 %v3110_v1  ;;  %2872 = vmatprep.mubr.bf16.mxu0 %v3117_v4  ;;  %v3120_v11 = vld [vmem:[%s3228_s21 + $0x18] sm:$0xff]   ;;  %v3121_v12 = vld [vmem:[%s3228_s21 + $0x20] sm:$0xff]   ;;  %v3122_v13 = vld [vmem:[%s3228_s21 + $0x28] sm:$0xff]   ;;  %vm1767_vm12 = vcmask 1045504  }
  0x15   : > { %2860 = vmatprep.subr.bf16.mxu0 %v3111_v2  ;;  %v3123_v14 = vld [vmem:[%s3228_s21 + $0x30] sm:$0xff]   ;;  %v3124_v15 = vld [vmem:[%s3228_s21 + $0x38] sm:$0xff]   ;;  %v3125_v16 = vld [vmem:[%s3228_s21 + $0x40] sm:$0xff]   ;;  %3018 = vmatpush3.bf16.msra.mxu1 %v3017_v26 }
  0x16   : > { %v3126_v17 = vld [vmem:[%s3228_s21 + $0x48] sm:$0xff]   ;;  %v3127_v18 = vld [vmem:[%s3228_s21 + $0x50] sm:$0xff]   ;;  %v3128_v19 = vld [vmem:[%s3228_s21 + $0x58] sm:$0xff]   ;;  %3019 = vmatprep.subr.bf16.mxu1 %v3147_v27 }
  0x17   : > { %v3129_v20 = vld [vmem:[%s3228_s21 + $0x60] sm:$0xff]   ;;  %v3130_v21 = vld [vmem:[%s3228_s21 + $0x68] sm:$0xff]   ;;  %v3131_v22 = vld [vmem:[%s3228_s21 + $0x70] sm:$0xff]  }
  0x18   : > { %2861 = vmatpush3.bf16.msra.mxu0 %v3111_v2  ;;  %v3132_v23 = vld [vmem:[%s3228_s21 + $0x78] sm:$0xff]   ;;  %v812_v37 = vld [vmem:[%s4007_s3 + $0x40] sm:$0xff]  ;;  %v813_v38 = vld [vmem:[%s4007_s3 + $0x48] sm:$0xff] }
  0x19   : > { %2862 = vmatprep.subr.bf16.mxu0 %v3112_v3  ;;  %3021 = vmatpush3.bf16.msra.mxu1 %v3020_v30  ;;  %v811_v35 = vld [vmem:[%s4007_s3 + $0x38] sm:$0xff]  ;;  %v3029_v39 = vpack.c.bf16 %v813_v38, %v812_v37  ;;  %v814_v40 = vld [vmem:[%s4007_s3 + $0x50] sm:$0xff]  ;;  %v816_v43 = vld [vmem:[%s4007_s3 + $0x60] sm:$0xff] }
  0x1a   : > { %3022 = vmatprep.subr.bf16.mxu1 %v3147_v27  ;;  %v3026_v36 = vpack.c.bf16 %v811_v35, %v810_v34  ;;  %v815_v41 = vld [vmem:[%s4007_s3 + $0x58] sm:$0xff]  ;;  %v817_v44 = vld [vmem:[%s4007_s3 + $0x68] sm:$0xff]  ;;  %v818_v47 = vld [vmem:[%s4007_s3 + $0x70] sm:$0xff] }
  0x1b   : > { %v3032_v42 = vpack.c.bf16 %v815_v41, %v814_v40  ;;  %v3035_v46 = vpack.c.bf16 %v817_v44, %v816_v43  ;;  %v819_v48 = vld [vmem:[%s4007_s3 + $0x78] sm:$0xff]  ;;  %v3323_v50 = vld [vmem:[%s4006_s2] ss:$0 sm:$0xff] }
  0x1c   : > { %2863 = vmatpush3.bf16.msra.mxu0 %v3112_v3  ;;  %v3038_v49 = vpack.c.bf16 %v819_v48, %v818_v47 }
  0x1d   : > { %2864 = vmatprep.subr.bf16.mxu0 %v3113_v5  ;;  %3024 = vmatpush3.bf16.msra.mxu1 %v3023_v33 }
  0x1e   : > { %3025 = vmatprep.subr.bf16.mxu1 %v3147_v27 }
  0x20   : > { %2865 = vmatpush3.bf16.msra.mxu0 %v3113_v5 }
  0x21   : > { %2866 = vmatprep.subr.bf16.mxu0 %v3114_v6  ;;  %3027 = vmatpush3.bf16.msra.mxu1 %v3026_v36 }
  0x22   : > { %3028 = vmatprep.subr.bf16.mxu1 %v3147_v27 }
  0x24   : > { %2867 = vmatpush3.bf16.msra.mxu0 %v3114_v6 }
  0x25   : > { %2868 = vmatprep.subr.bf16.mxu0 %v3115_v7  ;;  %3030 = vmatpush3.bf16.msra.mxu1 %v3029_v39 }
  0x26   : > { %3031 = vmatprep.subr.bf16.mxu1 %v3147_v27 }
  0x28   : > { %2869 = vmatpush3.bf16.msra.mxu0 %v3115_v7 }
  0x29   : > { %2870 = vmatprep.subr.bf16.mxu0 %v3116_v8  ;;  %3033 = vmatpush3.bf16.msra.mxu1 %v3032_v42 }
  0x2a   : > { %3034 = vmatprep.subr.bf16.mxu1 %v3147_v27 }
  0x2c   : > { %2871 = vmatpush3.bf16.msra.mxu0 %v3116_v8 }
  0x2d   : > { %3036 = vmatpush3.bf16.msra.mxu1 %v3035_v46 }
  0x2e   : > { %3037 = vmatprep.subr.bf16.mxu1 %v3147_v27 }
  0x2f   : > { %2873 = vmatmul.mubr.bf16.vlgmr.msra.gmra.mrb[0].mxu0 %v3118_v9 }
  0x30   : > { %2876 = vmatprep.mubr.bf16.mxu0 %v3119_v10 }
  0x31   : > { %3039 = vmatpush3.bf16.msra.mxu1 %v3038_v49 }
  0x32   : > { %3040 = vmatprep.subr.bf16.mxu1 %v3147_v27 }
  0x37   : > { %2877 = vmatmul.mubr.bf16.gmra.mrb[4].mxu0 %v3120_v11 }
  0x38   : > { %2880 = vmatprep.mubr.bf16.mxu0 %v3121_v12 }
  0x3f   : > { %2881 = vmatmul.mubr.bf16.gmra.mrb[8].mxu0 %v3122_v13 }
  0x40   : > { %2884 = vmatprep.mubr.bf16.mxu0 %v3123_v14 }
  0x47   : > { %2885 = vmatmul.mubr.bf16.gmra.mrb[12].mxu0 %v3124_v15 }
  0x48   : > { %2888 = vmatprep.mubr.bf16.mxu0 %v3125_v16 }
  0x4f   : > { %2889 = vmatmul.mubr.bf16.gmra.mrb[16].mxu0 %v3126_v17 }
  0x50   : > { %2892 = vmatprep.mubr.bf16.mxu0 %v3127_v18 }
  0x57   : > { %2893 = vmatmul.mubr.bf16.gmra.mrb[20].mxu0 %v3128_v19 }
  0x58   : > { %2896 = vmatprep.mubr.bf16.mxu0 %v3129_v20 }
  0x5f   : > { %2897 = vmatmul.mubr.bf16.gmra.mrb[24].mxu0 %v3130_v21 }
  0x60   : > { %2900 = vmatprep.mubr.bf16.mxu0 %v3131_v22 }
  0x67   : > { %2901 = vmatmul.mubr.bf16.gmra.mrb[28].mxu0 %v3132_v23 }
 0x102   : > { %v2874_v51 = vpop.f32.mrb[0].mxu0 }
 0x103   : > { %v568_v52 = vpop.f32.mrb[1].mxu0  ;;  %v577_v56 = vadd.f32 %v2874_v51, %v3323_v50 }
 0x104   : > { %v569_v53 = vadd.f32 %v3323_v50, %v568_v52  ;;  %v2875_v54 = vpop.f32.mrb[2].mxu0 }
 0x105   : > { %v571_v55 = vpop.f32.mrb[3].mxu0  ;;  %v580_v59 = vadd.f32 %v2875_v54, %v3323_v50  ;;  %v3333_v61 = vmax.f32 %v577_v56, 0.0 }
 0x106   : > { %v572_v57 = vadd.f32 %v3323_v50, %v571_v55  ;;  %v3328_v58 = vmax.f32 %v569_v53, 0.0 }
 0x107   : > { %v3337_v1 = vmax.f32 %v580_v59, 0.0 }
 0x108   : > { %v3331_v60 = vmax.f32 %v572_v57, 0.0 }
 0x10a   : > { %v727_v62 = vadd.f32 %v3331_v60, %v3328_v58  ;;  %v2878_v63 = vpop.f32.mrb[4].mxu0 }
 0x10b   : > { %v584_v0 = vpop.f32.mrb[5].mxu0  ;;  %v593_v6 = vadd.f32 %v2878_v63, %v3323_v50 }
 0x10c   : > { %v728_v2 = vadd.f32 %v727_v62, %v3333_v61  ;;  %v585_v3 = vadd.f32 %v3323_v50, %v584_v0  ;;  %v2879_v4 = vpop.f32.mrb[6].mxu0 }
 0x10d   : > { %v587_v5 = vpop.f32.mrb[7].mxu0  ;;  %v596_v11 = vadd.f32 %v2879_v4, %v3323_v50  ;;  %v3350_v13 = vmax.f32 %v593_v6, 0.0 }
 0x10e   : > { %v3342_v7 = vmax.f32 %v585_v3, 0.0  ;;  %v729_v8 = vadd.f32 %v728_v2, %v3337_v1  ;;  %v588_v9 = vadd.f32 %v3323_v50, %v587_v5 }
 0x10f   : > { %v3353_v17 = vmax.f32 %v596_v11, 0.0 }
 0x110   : > { %v730_v10 = vadd.f32 %v729_v8, %v3342_v7  ;;  %v3348_v12 = vmax.f32 %v588_v9, 0.0 }
 0x112   : > { %v731_v14 = vadd.f32 %v730_v10, %v3348_v12  ;;  %v2882_v15 = vpop.f32.mrb[8].mxu0 }
 0x113   : > { %v600_v16 = vpop.f32.mrb[9].mxu0  ;;  %v609_v22 = vadd.f32 %v2882_v15, %v3323_v50 }
 0x114   : > { %v732_v18 = vadd.f32 %v731_v14, %v3350_v13  ;;  %v601_v19 = vadd.f32 %v3323_v50, %v600_v16  ;;  %v2883_v20 = vpop.f32.mrb[10].mxu0 }
 0x115   : > { %v603_v21 = vpop.f32.mrb[11].mxu0  ;;  %v612_v28 = vadd.f32 %v2883_v20, %v3323_v50  ;;  %v3366_v30 = vmax.f32 %v609_v22, 0.0 }
 0x116   : > { %v3358_v23 = vmax.f32 %v601_v19, 0.0  ;;  %v733_v24 = vadd.f32 %v732_v18, %v3353_v17  ;;  %v604_v25 = vadd.f32 %v3323_v50, %v603_v21 }
 0x117   : > { %v3369_v34 = vmax.f32 %v612_v28, 0.0 }
 0x118   : > { %v734_v26 = vadd.f32 %v733_v24, %v3358_v23  ;;  %v3364_v29 = vmax.f32 %v604_v25, 0.0 }
 0x11a   : > { %v735_v31 = vadd.f32 %v734_v26, %v3364_v29  ;;  %v2886_v32 = vpop.f32.mrb[12].mxu0 }
 0x11b   : > { %v616_v33 = vpop.f32.mrb[13].mxu0  ;;  %v625_v39 = vadd.f32 %v2886_v32, %v3323_v50 }
 0x11c   : > { %v736_v35 = vadd.f32 %v735_v31, %v3366_v30  ;;  %v617_v36 = vadd.f32 %v3323_v50, %v616_v33  ;;  %v2887_v37 = vpop.f32.mrb[14].mxu0  ;;  %v767_v31 = vmax.f32 %v3333_v61, %v3350_v13 }
 0x11d   : > { %v619_v38 = vpop.f32.mrb[15].mxu0  ;;  %v628_v44 = vadd.f32 %v2887_v37, %v3323_v50  ;;  %v3382_v47 = vmax.f32 %v625_v39, 0.0  ;;  %v768_v39 = vmax.f32 %v3337_v1, %v3353_v17 }
 0x11e   : > { %v3374_v40 = vmax.f32 %v617_v36, 0.0  ;;  %v737_v41 = vadd.f32 %v736_v35, %v3369_v34  ;;  %v620_v42 = vadd.f32 %v3323_v50, %v619_v38  ;;  %v765_v38 = vmax.f32 %v3328_v58, %v3342_v7 }
 0x11f   : > { %v3385_v52 = vmax.f32 %v628_v44, 0.0 }
 0x120   : > { %v738_v43 = vadd.f32 %v737_v41, %v3374_v40  ;;  %v3380_v46 = vmax.f32 %v620_v42, 0.0  ;;  %v766_v41 = vmax.f32 %v3331_v60, %v3348_v12  ;;  %v771_v42 = vmax.f32 %v767_v31, %v3366_v30 }
 0x122   : > { %v739_v48 = vadd.f32 %v738_v43, %v3380_v46  ;;  %v2890_v49 = vpop.f32.mrb[16].mxu0 }
 0x123   : > { %v632_v51 = vpop.f32.mrb[17].mxu0  ;;  %v641_v57 = vadd.f32 %v2890_v49, %v3323_v50 }
 0x124   : > { %v740_v53 = vadd.f32 %v739_v48, %v3382_v47  ;;  %v633_v54 = vadd.f32 %v3323_v50, %v632_v51  ;;  %v2891_v55 = vpop.f32.mrb[18].mxu0 }
 0x125   : > { %v635_v56 = vpop.f32.mrb[19].mxu0  ;;  %v644_v2 = vadd.f32 %v2891_v55, %v3323_v50  ;;  %v3398_v4 = vmax.f32 %v641_v57, 0.0  ;;  %v775_v57 = vmax.f32 %v771_v42, %v3382_v47 }
 0x126   : > { %v3390_v59 = vmax.f32 %v633_v54, 0.0  ;;  %v741_v62 = vadd.f32 %v740_v53, %v3385_v52  ;;  %v636_v63 = vadd.f32 %v3323_v50, %v635_v56  ;;  %v769_v53 = vmax.f32 %v765_v38, %v3358_v23 }
 0x127   : > { %v3401_v9 = vmax.f32 %v644_v2, 0.0  ;;  %v772_v54 = vmax.f32 %v768_v39, %v3369_v34  ;;  %v770_v56 = vmax.f32 %v766_v41, %v3364_v29 }
 0x128   : > { %v742_v0 = vadd.f32 %v741_v62, %v3390_v59  ;;  %v3396_v3 = vmax.f32 %v636_v63, 0.0 }
 0x129   : > { %v776_v2 = vmax.f32 %v772_v54, %v3385_v52 }
 0x12a   : > { %v743_v5 = vadd.f32 %v742_v0, %v3396_v3  ;;  %v2894_v6 = vpop.f32.mrb[20].mxu0  ;;  %v773_v0 = vmax.f32 %v769_v53, %v3374_v40 }
 0x12b   : > { %v648_v8 = vpop.f32.mrb[21].mxu0  ;;  %v657_v16 = vadd.f32 %v2894_v6, %v3323_v50  ;;  %v779_v6 = vmax.f32 %v775_v57, %v3398_v4 }
 0x12c   : > { %v744_v10 = vadd.f32 %v743_v5, %v3398_v4  ;;  %v649_v11 = vadd.f32 %v3323_v50, %v648_v8  ;;  %v2895_v14 = vpop.f32.mrb[22].mxu0  ;;  %v774_v5 = vmax.f32 %v770_v56, %v3380_v46 }
 0x12d   : > { %v651_v15 = vpop.f32.mrb[23].mxu0  ;;  %v660_v22 = vadd.f32 %v2895_v14, %v3323_v50  ;;  %v3414_v25 = vmax.f32 %v657_v16, 0.0  ;;  %v777_v14 = vmax.f32 %v773_v0, %v3390_v59 }
 0x12e   : > { %v3406_v18 = vmax.f32 %v649_v11, 0.0  ;;  %v745_v19 = vadd.f32 %v744_v10, %v3401_v9  ;;  %v652_v20 = vadd.f32 %v3323_v50, %v651_v15  ;;  %v780_v15 = vmax.f32 %v776_v2, %v3401_v9 }
 0x12f   : > { %v3419_v33 = vmax.f32 %v660_v22, 0.0  ;;  %v783_v22 = vmax.f32 %v779_v6, %v3414_v25 }
 0x130   : > { %v746_v21 = vadd.f32 %v745_v19, %v3406_v18  ;;  %v3412_v24 = vmax.f32 %v652_v20, 0.0 }
 0x132   : > { %v747_v26 = vadd.f32 %v746_v21, %v3412_v24  ;;  %v2898_v28 = vpop.f32.mrb[24].mxu0  ;;  %v778_v21 = vmax.f32 %v774_v5, %v3396_v3 }
 0x133   : > { %v664_v32 = vpop.f32.mrb[25].mxu0  ;;  %v673_v44 = vadd.f32 %v2898_v28, %v3323_v50 }
 0x134   : > { %v748_v35 = vadd.f32 %v747_v26, %v3414_v25  ;;  %v665_v36 = vadd.f32 %v3323_v50, %v664_v32  ;;  %v2899_v37 = vpop.f32.mrb[26].mxu0  ;;  %v781_v32 = vmax.f32 %v777_v14, %v3406_v18  ;;  %v782_v39 = vmax.f32 %v778_v21, %v3412_v24 }
 0x135   : > { %v667_v43 = vpop.f32.mrb[27].mxu0  ;;  %v676_v55 = vadd.f32 %v2899_v37, %v3323_v50  ;;  %v3447_v8 = vmax.f32 %v673_v44, 0.0 }
 0x136   : > { %v3431_v48 = vmax.f32 %v665_v36, 0.0  ;;  %v749_v49 = vadd.f32 %v748_v35, %v3419_v33  ;;  %v668_v51 = vadd.f32 %v3323_v50, %v667_v43  ;;  %v784_v35 = vmax.f32 %v780_v15, %v3419_v33 }
 0x137   : > { %v3452_v16 = vmax.f32 %v676_v55, 0.0  ;;  %v787_v44 = vmax.f32 %v783_v22, %v3447_v8 }
 0x138   : > { %v750_v62 = vadd.f32 %v749_v49, %v3431_v48  ;;  %v3441_v63 = vmax.f32 %v668_v51, 0.0  ;;  %v785_v53 = vmax.f32 %v781_v32, %v3431_v48 }
 0x139   : > { %v788_v49 = vmax.f32 %v784_v35, %v3452_v16 }
 0x13a   : > { %v751_v10 = vadd.f32 %v750_v62, %v3441_v63  ;;  %v2902_v11 = vpop.f32.mrb[28].mxu0  ;;  %v786_v54 = vmax.f32 %v782_v39, %v3441_v63 }
 0x13b   : > { %v689_v19 = vadd.f32 %v2902_v11, %v3323_v50  ;;  %v680_v20 = vpop.f32.mrb[29].mxu0 }
 0x13c   : > { %v752_v26 = vadd.f32 %v751_v10, %v3447_v8  ;;  %v681_v28 = vadd.f32 %v3323_v50, %v680_v20  ;;  %v2903_v31 = vpop.f32.mrb[30].mxu0 }
 0x13d   : > { %v3461_v36 = vmax.f32 %v689_v19, 0.0  ;;  %v692_v37 = vadd.f32 %v2903_v31, %v3323_v50  ;;  %v683_v38 = vpop.f32.mrb[31].mxu0 }
 0x13e   : > { %v3465_v41 = vmax.f32 %v681_v28, 0.0  ;;  %v753_v42 = vadd.f32 %v752_v26, %v3452_v16  ;;  %v684_v43 = vadd.f32 %v3323_v50, %v683_v38  ;;  %v899_v38 = vld [vmem:[%s4009_s5 + $0x8] sm:$0xff] }
 0x13f   : > { %v3471_v51 = vmax.f32 %v692_v37, 0.0  ;;  %v791_v57 = vmax.f32 %v787_v44, %v3461_v36  ;;  %v898_v37 = vld [vmem:[%s4009_s5] sm:$0xff] }
 0x140   : > { %v754_v55 = vadd.f32 %v753_v42, %v3465_v41  ;;  %v3476_v56 = vmax.f32 %v684_v43, 0.0  ;;  %v789_v50 = vmax.f32 %v785_v53, %v3465_v41  ;;  %v3041_v44 = vpack.c.bf16 %v899_v38, %v898_v37  ;;  %v901_v53 = vld [vmem:[%s4009_s5 + $0x18] sm:$0xff] }
 0x141   : > { %v792_v62 = vmax.f32 %v788_v49, %v3471_v51  ;;  %v900_v49 = vld [vmem:[%s4009_s5 + $0x10] sm:$0xff] }
 0x142   : > { %v755_v0 = vadd.f32 %v754_v55, %v3476_v56  ;;  %v790_v2 = vmax.f32 %v786_v54, %v3476_v56  ;;  %v3044_v55 = vpack.c.bf16 %v901_v53, %v900_v49 }
 0x143   : > { %v794_v5 = vmax.f32 %v791_v57, %v792_v62  ;;  %v902_v57 = vld [vmem:[%s4009_s5 + $0x20] sm:$0xff]  ;;  %v903_v62 = vld [vmem:[%s4009_s5 + $0x28] sm:$0xff] }
 0x144   : > { %v756_v6 = vadd.f32 %v755_v0, %v3461_v36  ;;  %v793_v10 = vmax.f32 %v789_v50, %v790_v2  ;;  %v3047_v50 = vpack.c.bf16 %v903_v62, %v902_v57  ;;  %v904_v0 = vld [vmem:[%s4009_s5 + $0x30] sm:$0xff] }
 0x146   : > { %v757_v11 = vadd.f32 %v756_v6, %v3471_v51  ;;  %v795_v14 = vmax.f32 %v793_v10, %v794_v5  ;;  %v906_v5 = vld [vmem:[%s4009_s5 + $0x40] sm:$0xff]  ;;  %v907_v6 = vld [vmem:[%s4009_s5 + $0x48] sm:$0xff] }
 0x147   : > { %v3053_v10 = vpack.c.bf16 %v907_v6, %v906_v5 }
 0x148   : > { %v758_v15 = vrot.slane %v757_v11, 4  ;;  %v796_v19 = vrot.slane %v795_v14, 4 }
 0x14a   : > { %v759_v20 = vadd.f32 %v758_v15, %v757_v11  ;;  %v797_v21 = vmax.f32 %v795_v14, %v796_v19  ;;  %v908_v11 = vld [vmem:[%s4009_s5 + $0x50] sm:$0xff]  ;;  %v909_v14 = vld [vmem:[%s4009_s5 + $0x58] sm:$0xff]  ;;  %v910_v19 = vld [vmem:[%s4009_s5 + $0x60] sm:$0xff] }
 0x14b   : > { %v3056_v15 = vpack.c.bf16 %v909_v14, %v908_v11  ;;  %v1593_v11 = vld [vmem:[%s4011_s7 + $0x8] sm:$0xff] }
 0x14c   : > { %v760_v22 = vrot.slane %v759_v20, 2  ;;  %v798_v26 = vrot.slane %v797_v21, 2 }
 0x14e   : > { %v761_v28 = vadd.f32 %v760_v22, %v759_v20  ;;  %v799_v31 = vmax.f32 %v797_v21, %v798_v26  ;;  %v911_v20 = vld [vmem:[%s4009_s5 + $0x68] sm:$0xff]  ;;  %v912_v22 = vld [vmem:[%s4009_s5 + $0x70] sm:$0xff]  ;;  %v913_v26 = vld [vmem:[%s4009_s5 + $0x78] sm:$0xff] }
 0x14f   : > { %v3059_v21 = vpack.c.bf16 %v911_v20, %v910_v19 }
 0x150   : > { %v762_v32 = vrot.slane %v761_v28, 1  ;;  %v800_v35 = vrot.slane %v799_v31, 1 }
 0x152   : > { %v763_v39 = vadd.f32 %v762_v32, %v761_v28  ;;  %v801_v43 = vmax.f32 %v799_v31, %v800_v35  ;;  %v3062_v28 = vpack.c.bf16 %v913_v26, %v912_v22  ;;  %v2587_v31 = vld [vmem:[%s4008_s4] ss:$0 sm:$0xff] }
 0x154   : > { %v764_v42 = vmul.f32 0.00390625, %v763_v39 }
 0x156   : > { %v803_v54 = vsel %vm802_vm1, %v764_v42, %v801_v43 }
 0x157   : > { %2937 = vmatmul.mubr.f32.vlgmr.msra.gmra.mrb[0].mxu1 %v803_v54  ;;  %v999_v54 = vlaneseq }
 0x158   : > { %3042 = vmatpush3.bf16.msra.mxu1 %v3041_v44  ;;  %2971 = vmatprep.mubr.msk.f32.mxu1 %vm3148_vm0, %v3149_v45  ;;  %v905_v45 = vld [vmem:[%s4009_s5 + $0x38] sm:$0xff] }
 0x159   : > { %3043 = vmatprep.subr.bf16.mxu1 %v3147_v27  ;;  %v3050_v2 = vpack.c.bf16 %v905_v45, %v904_v0 }
 0x15c   : > { %3045 = vmatpush3.bf16.msra.mxu1 %v3044_v55  ;;  %v3550_v55 = vshrl.u32 %v999_v54, 7 }
 0x15d   : > { %3046 = vmatprep.subr.bf16.mxu1 %v3147_v27 }
 0x160   : > { %3048 = vmatpush3.bf16.msra.mxu1 %v3047_v50  ;;  %v3553_v50 = vsub.s32 0, %v3550_v55 }
 0x161   : > { %3049 = vmatprep.subr.bf16.mxu1 %v3147_v27 }
 0x164   : > { %3051 = vmatpush3.bf16.msra.mxu1 %v3050_v2 }
 0x165   : > { %3052 = vmatprep.subr.bf16.mxu1 %v3147_v27 }
 0x168   : > { %3054 = vmatpush3.bf16.msra.mxu1 %v3053_v10 }
 0x169   : > { %3055 = vmatprep.subr.bf16.mxu1 %v3147_v27 }
 0x16c   : > { %3057 = vmatpush3.bf16.msra.mxu1 %v3056_v15 }
 0x16d   : > { %3058 = vmatprep.subr.bf16.mxu1 %v3147_v27 }
 0x170   : > { %3060 = vmatpush3.bf16.msra.mxu1 %v3059_v21 }
 0x171   : > { %3061 = vmatprep.subr.bf16.mxu1 %v3147_v27  ;;  %v2588_v27 = vld [vmem:[%s4010_s6] ss:$0 sm:$0xff] }
 0x174   : > { %3063 = vmatpush3.bf16.msra.mxu1 %v3062_v28 }
 0x22a   : > { %v893_v32 = vpop.f32.mrb[0].mxu1 }
 0x22b   : > { %v894_v35 = vadd.f32 %v2587_v31, %v893_v32  ;;  %v2938_v37 = vpop.f32.mrb[1].mxu1 }
 0x22d   : > { %v897_v38 = vmax.f32 %v894_v35, 0.0 }
 0x22f   : > { %2972 = vmatmul.mubr.f32.vlgmr.msra.gmra.mrb[2].mxu1 %v897_v38 }
 0x302   : > { %v987_v39 = vpop.f32.mrb[2].mxu1 }
 0x303   : > { %v988_v42 = vadd.f32 %v2588_v27, %v987_v39  ;;  %v2973_v43 = vpop.f32.mrb[3].mxu1 }
 0x305   : > { %v992_v44 = vrot.slane %v988_v42, 1 }
 0x307   : > { %v994_v49 = vadd.f32 %v992_v44, %v988_v42  ;;  %v1228_v42 = vand.u32 127, %v999_v54 }
 0x309   : > { %v995_v53 = vmul.f32 0.5, %v994_v49  ;;  %v1233_v49 = vadd.s32 4294967288, %v1228_v42 }
 0x30b   : > { %3133 = vtanh.f32 %v995_v53 }
 0x315   : > { %v3134_v57 = vpop.eup %3133 }
 0x316   : > { %v997_v62 = vadd.f32 1.0, %v3134_v57 }
 0x318   : > { %v998_v0 = vmul.f32 0.5, %v997_v62  ;;  %v3745_v62 = vsub.s32 %v1233_v49, %v3550_v55 }
 0x31a   : > { %v1002_v45 = vrot.slane %v998_v0, %v3553_v50  ;;  %v3748_v0 = vsub.s32 %v1228_v42, %v3550_v55 }
 0x31c   : > { %v3557_v2 = vmul.f32 %v1002_v45, %v3333_v61  ;;  %v3560_v5 = vmul.f32 %v1002_v45, %v3328_v58  ;;  %v3565_v6 = vmul.f32 %v1002_v45, %v3337_v1  ;;  %v3568_v10 = vmul.f32 %v1002_v45, %v3331_v60 }
 0x31d   : > { %v3573_v61 = vmul.f32 %v1002_v45, %v3385_v52  ;;  %v3576_v58 = vmul.f32 %v1002_v45, %v3382_v47  ;;  %v3581_v1 = vmul.f32 %v1002_v45, %v3396_v3  ;;  %v3584_v60 = vmul.f32 %v1002_v45, %v3390_v59 }
 0x31e   : > { %1039 = vmax.xlane.f32.xlu1 %v3557_v2  ;;  %1035 = vmax.xlane.f32.xlu0 %v3560_v5  ;;  %v3589_v52 = vmul.f32 %v1002_v45, %v3348_v12  ;;  %v3592_v47 = vmul.f32 %v1002_v45, %v3342_v7  ;;  %v3597_v3 = vmul.f32 %v1002_v45, %v3401_v9 }
 0x31f   : > { %4021 = vst [vmem:[#allocation3_spill] sm:$0xff] %v3573_v61  ;;  %4022 = vst [vmem:[#allocation4_spill] sm:$0xff] %v3576_v58  ;;  %v3600_v59 = vmul.f32 %v1002_v45, %v3398_v4  ;;  %v3605_v12 = vmul.f32 %v1002_v45, %v3353_v17  ;;  %v3608_v7 = vmul.f32 %v1002_v45, %v3350_v13 }
 0x320   : > { %v3613_v9 = vmul.f32 %v1002_v45, %v3412_v24  ;;  %v3616_v4 = vmul.f32 %v1002_v45, %v3406_v18  ;;  %v3621_v17 = vmul.f32 %v1002_v45, %v3364_v29  ;;  %v3624_v13 = vmul.f32 %v1002_v45, %v3358_v23 }
 0x321   : > { %v3629_v24 = vmul.f32 %v1002_v45, %v3419_v33  ;;  %v3632_v18 = vmul.f32 %v1002_v45, %v3414_v25  ;;  %v3637_v29 = vmul.f32 %v1002_v45, %v3369_v34  ;;  %v3640_v23 = vmul.f32 %v1002_v45, %v3366_v30 }
 0x322   : > { %1041 = vmax.xlane.f32.xlu1 %v3565_v6  ;;  %1037 = vmax.xlane.f32.xlu0 %v3568_v10  ;;  %v3645_v33 = vmul.f32 %v1002_v45, %v3441_v63  ;;  %v3648_v25 = vmul.f32 %v1002_v45, %v3431_v48  ;;  %v3653_v34 = vmul.f32 %v1002_v45, %v3380_v46 }
 0x323   : > { %4023 = vst [vmem:[#allocation5_spill] sm:$0xff] %v3637_v29  ;;  %v3656_v30 = vmul.f32 %v1002_v45, %v3374_v40  ;;  %v3661_v63 = vmul.f32 %v1002_v45, %v3452_v16  ;;  %v3664_v48 = vmul.f32 %v1002_v45, %v3447_v8  ;;  %v3669_v46 = vmul.f32 %v1002_v45, %v3476_v56  ;;  %v1592_v56 = vld [vmem:[%s4011_s7] sm:$0xff] }
 0x324   : > { %4024 = vst [vmem:[#allocation6_spill] sm:$0xff] %v3653_v34  ;;  %v3672_v40 = vmul.f32 %v1002_v45, %v3465_v41  ;;  %v3677_v16 = vmul.f32 %v1002_v45, %v3471_v51  ;;  %v3680_v8 = vmul.f32 %v1002_v45, %v3461_v36  ;;  %v2589_v36 = vld [vmem:[%s4011_s7 + $0x10] sm:$0xff]  ;;  %v2590_v41 = vld [vmem:[%s4011_s7 + $0x18] sm:$0xff]  ;;  %v3710_v14 = vpack.c.bf16 %v1593_v11, %v1592_v56 }
 0x325   : > { %4025 = vst [vmem:[#allocation7_spill] sm:$0xff] %v3656_v30  ;;  %v3064_v51 = vpack.c.bf16 %v2590_v41, %v2589_v36 }
 0x326   : > { %1065 = vmax.xlane.f32.xlu1 %v3573_v61  ;;  %1063 = vmax.xlane.f32.xlu0 %v3576_v58  ;;  %4026 = vst [vmem:[#allocation8_spill] sm:$0xff] %v3677_v16  ;;  %4027 = vst [vmem:[#allocation9_spill] sm:$0xff] %v3680_v8 }
 0x327   : > { %3065 = vmatprep.subr.bf16.mxu1 %v3064_v51 }
 0x328   : > { %3067 = vmatpush3.bf16.msra.mxu1 %v3064_v51 }
 0x329   : > { %3069 = vmatprep.subr.bf16.mxu1 %v3710_v14 }
 0x32a   : > { %1069 = vmax.xlane.f32.xlu1 %v3581_v1  ;;  %1067 = vmax.xlane.f32.xlu0 %v3584_v60 }
 0x32e   : > { %1045 = vmax.xlane.f32.xlu1 %v3589_v52  ;;  %1043 = vmax.xlane.f32.xlu0 %v3592_v47 }
 0x332   : > { %1073 = vmax.xlane.f32.xlu1 %v3597_v3  ;;  %1071 = vmax.xlane.f32.xlu0 %v3600_v59 }
 0x336   : > { %1049 = vmax.xlane.f32.xlu1 %v3605_v12  ;;  %1047 = vmax.xlane.f32.xlu0 %v3608_v7 }
 0x33a   : > { %1077 = vmax.xlane.f32.xlu1 %v3613_v9  ;;  %1075 = vmax.xlane.f32.xlu0 %v3616_v4 }
 0x33e   : > { %1053 = vmax.xlane.f32.xlu1 %v3621_v17  ;;  %1051 = vmax.xlane.f32.xlu0 %v3624_v13 }
 0x342   : > { %1081 = vmax.xlane.f32.xlu1 %v3629_v24  ;;  %1079 = vmax.xlane.f32.xlu0 %v3632_v18 }
 0x346   : > { %1057 = vmax.xlane.f32.xlu1 %v3637_v29  ;;  %1055 = vmax.xlane.f32.xlu0 %v3640_v23 }
 0x34a   : > { %1085 = vmax.xlane.f32.xlu1 %v3645_v33  ;;  %1083 = vmax.xlane.f32.xlu0 %v3648_v25 }
 0x34e   : > { %1061 = vmax.xlane.f32.xlu1 %v3653_v34  ;;  %1059 = vmax.xlane.f32.xlu0 %v3656_v30 }
 0x352   : > { %1089 = vmax.xlane.f32.xlu1 %v3661_v63  ;;  %1087 = vmax.xlane.f32.xlu0 %v3664_v48 }
 0x356   : > { %1093 = vmax.xlane.f32.xlu1 %v3669_v46  ;;  %1091 = vmax.xlane.f32.xlu0 %v3672_v40 }
 0x35a   : > { %1097 = vmax.xlane.f32.xlu1 %v3677_v16  ;;  %1095 = vmax.xlane.f32.xlu0 %v3680_v8 }
 0x35e   : > { %1101 = vadd.xlane.f32.xlu1 %v3568_v10  ;;  %1099 = vadd.xlane.f32.xlu0 %v3560_v5 }
 0x362   : > { %1105 = vadd.xlane.f32.xlu1 %v3565_v6  ;;  %1103 = vadd.xlane.f32.xlu0 %v3557_v2 }
 0x366   : > { %1109 = vadd.xlane.f32.xlu1 %v3589_v52  ;;  %1107 = vadd.xlane.f32.xlu0 %v3592_v47 }
 0x36a   : > { %1129 = vadd.xlane.f32.xlu1 %v3573_v61  ;;  %1127 = vadd.xlane.f32.xlu0 %v3576_v58 }
 0x36e   : > { %1133 = vadd.xlane.f32.xlu1 %v3581_v1  ;;  %1131 = vadd.xlane.f32.xlu0 %v3584_v60 }
 0x372   : > { %1113 = vadd.xlane.f32.xlu1 %v3605_v12  ;;  %1111 = vadd.xlane.f32.xlu0 %v3608_v7 }
 0x376   : > { %1137 = vadd.xlane.f32.xlu1 %v3597_v3  ;;  %1135 = vadd.xlane.f32.xlu0 %v3600_v59 }
 0x37a   : > { %1117 = vadd.xlane.f32.xlu1 %v3621_v17  ;;  %1115 = vadd.xlane.f32.xlu0 %v3624_v13 }
 0x37e   : > { %1141 = vadd.xlane.f32.xlu1 %v3613_v9  ;;  %1139 = vadd.xlane.f32.xlu0 %v3616_v4 }
 0x382   : > { %1121 = vadd.xlane.f32.xlu1 %v3637_v29  ;;  %1119 = vadd.xlane.f32.xlu0 %v3640_v23 }
 0x386   : > { %1145 = vadd.xlane.f32.xlu1 %v3629_v24  ;;  %1143 = vadd.xlane.f32.xlu0 %v3632_v18 }
 0x38a   : > { %1125 = vadd.xlane.f32.xlu1 %v3653_v34  ;;  %1123 = vadd.xlane.f32.xlu0 %v3656_v30 }
 0x38e   : > { %1149 = vadd.xlane.f32.xlu1 %v3645_v33  ;;  %1147 = vadd.xlane.f32.xlu0 %v3648_v25 }
 0x392   : > { %1153 = vadd.xlane.f32.xlu1 %v3661_v63  ;;  %1151 = vadd.xlane.f32.xlu0 %v3664_v48 }
 0x396   : > { %1157 = vadd.xlane.f32.xlu1 %v3669_v46  ;;  %1155 = vadd.xlane.f32.xlu0 %v3672_v40 }
 0x39a   : > { %1161 = vadd.xlane.f32.xlu1 %v3677_v16  ;;  %1159 = vadd.xlane.f32.xlu0 %v3680_v8 }
 0x3ab   : > { %v1040_v15 = vpop.xlane.xlu1 %1039  ;;  %v1036_v19 = vpop.xlane.xlu0 %1035 }
 0x3ac   : > { %v1243_v51 = vrot.slane %v1040_v15, %v3748_v0  ;;  %v1232_v56 = vrot.slane %v1036_v19, %v3748_v0 }
 0x3af   : > { %v1042_v20 = vpop.xlane.xlu1 %1041  ;;  %v1038_v21 = vpop.xlane.xlu0 %1037 }
 0x3b0   : > { %v1247_v41 = vrot.slane %v1042_v20, %v3745_v62  ;;  %v1237_v54 = vrot.slane %v1038_v21, %v3745_v62 }
 0x3b2   : > { %v1248_v49 = vsel %vm1238_vm2, %v1247_v41, %v1243_v51  ;;  %v1239_v42 = vsel %vm1238_vm2, %v1237_v54, %v1232_v56 }
 0x3b3   : > { %v3731_v22 = vpop.xlane.xlu1 %1065  ;;  %v3733_v26 = vpop.xlane.xlu0 %1063  ;;  %v1376_v58 = vsel %vm1375_vm3, %v1248_v49, %v1239_v42 }
 0x3b7   : > { %v1070_v28 = vpop.xlane.xlu1 %1069  ;;  %v1068_v31 = vpop.xlane.xlu0 %1067 }
 0x3b8   : > { %v1310_v41 = vrot.slane %v1070_v28, %v3745_v62  ;;  %v1306_v54 = vrot.slane %v1068_v31, %v3748_v0 }
 0x3bb   : > { %v1046_v32 = vpop.xlane.xlu1 %1045  ;;  %v1044_v35 = vpop.xlane.xlu0 %1043 }
 0x3bc   : > { %v1256_v8 = vrot.slane %v1046_v32, %v3745_v62  ;;  %v1252_v20 = vrot.slane %v1044_v35, %v3748_v0  ;;  %v1301_v35 = vrot.slane %v3731_v22, %v3745_v62 }
 0x3be   : > { %v1257_v49 = vsel %vm1238_vm2, %v1256_v8, %v1252_v20 }
 0x3bf   : > { %v3735_v37 = vpop.xlane.xlu1 %1073  ;;  %v3737_v38 = vpop.xlane.xlu0 %1071 }
 0x3c0   : > { %v1319_v28 = vrot.slane %v3735_v37, %v3745_v62  ;;  %v1315_v31 = vrot.slane %v3737_v38, %v3748_v0 }
 0x3c3   : > { %v1050_v27 = vpop.xlane.xlu1 %1049  ;;  %v1048_v39 = vpop.xlane.xlu0 %1047 }
 0x3c4   : > { %v1265_v21 = vrot.slane %v1050_v27, %v3745_v62  ;;  %v1261_v15 = vrot.slane %v1048_v39, %v3748_v0  ;;  %v1297_v27 = vrot.slane %v3733_v26, %v3748_v0 }
 0x3c7   : > { %v3740_v43 = vpop.xlane.xlu1 %1077  ;;  %v3742_v44 = vpop.xlane.xlu0 %1075 }
 0x3c8   : > { %v1328_v22 = vrot.slane %v3740_v43, %v3745_v62  ;;  %v1324_v26 = vrot.slane %v3742_v44, %v3748_v0 }
 0x3cb   : > { %v1054_v53 = vpop.xlane.xlu1 %1053  ;;  %v1052_v57 = vpop.xlane.xlu0 %1051 }
 0x3cc   : > { %v1274_v51 = vrot.slane %v1054_v53, %v3745_v62  ;;  %v1270_v32 = vrot.slane %v1052_v57, %v3748_v0  ;;  %v1266_v53 = vsel %vm1238_vm2, %v1265_v21, %v1261_v15  ;;  %v1378_v21 = vsel %vm1377_vm5, %v1257_v49, %v1376_v58 }
 0x3ce   : > { %v1275_v37 = vsel %vm1238_vm2, %v1274_v51, %v1270_v32 }
 0x3cf   : > { %v3750_v45 = vpop.xlane.xlu1 %1081  ;;  %v3752_v36 = vpop.xlane.xlu0 %1079 }
 0x3d0   : > { %v1337_v38 = vrot.slane %v3750_v45, %v3745_v62  ;;  %v1333_v20 = vrot.slane %v3752_v36, %v3748_v0  ;;  %v1329_v36 = vsel %vm1238_vm2, %v1328_v22, %v1324_v26 }
 0x3d3   : > { %v1058_v11 = vpop.xlane.xlu1 %1057  ;;  %v1056_v16 = vpop.xlane.xlu0 %1055 }
 0x3d4   : > { %v1283_v39 = vrot.slane %v1058_v11, %v3745_v62  ;;  %v1279_v56 = vrot.slane %v1056_v16, %v3748_v0  ;;  %v1311_v11 = vsel %vm1238_vm2, %v1310_v41, %v1306_v54  ;;  %v1320_v41 = vsel %vm1238_vm2, %v1319_v28, %v1315_v31 }
 0x3d5   : > { %v1380_v54 = vsel %vm1379_vm6, %v1266_v53, %v1378_v21 }
 0x3d6   : > { %v1284_v43 = vsel %vm1238_vm2, %v1283_v39, %v1279_v56  ;;  %v1382_v58 = vsel %vm1381_vm7, %v1275_v37, %v1380_v54 }
 0x3d7   : > { %v1086_v61 = vpop.xlane.xlu1 %1085  ;;  %v1084_v19 = vpop.xlane.xlu0 %1083 }
 0x3d8   : > { %v1346_v44 = vrot.slane %v1086_v61, %v3745_v62  ;;  %v1342_v15 = vrot.slane %v1084_v19, %v3748_v0 }
 0x3da   : > { %v1347_v49 = vsel %vm1238_vm2, %v1346_v44, %v1342_v15 }
 0x3db   : > { %v1062_v57 = vpop.xlane.xlu1 %1061  ;;  %v1060_v42 = vpop.xlane.xlu0 %1059 }
 0x3dc   : > { %v1292_v16 = vrot.slane %v1062_v57, %v3745_v62  ;;  %v1288_v8 = vrot.slane %v1060_v42, %v3748_v0  ;;  %v1302_v57 = vsel %vm1238_vm2, %v1301_v35, %v1297_v27  ;;  %v1338_v35 = vsel %vm1238_vm2, %v1337_v38, %v1333_v20 }
 0x3dd   : > { %v1388_v19 = vsel %vm1387_vm4, %v1311_v11, %v1302_v57  ;;  %v1384_v27 = vsel %vm1383_vm8, %v1284_v43, %v1382_v58 }
 0x3de   : > { %v1293_v51 = vsel %vm1238_vm2, %v1292_v16, %v1288_v8  ;;  %v1389_v56 = vsel %vm1375_vm3, %v1320_v41, %v1388_v19 }
 0x3df   : > { %v1090_v45 = vpop.xlane.xlu1 %1089  ;;  %v1088_v32 = vpop.xlane.xlu0 %1087  ;;  %v1386_v28 = vsel %vm1385_vm9, %v1293_v51, %v1384_v27  ;;  %v1390_v31 = vsel %vm1377_vm5, %v1329_v36, %v1389_v56  ;;  %v2596_v36 = vld [vmem:[%s4011_s7 + $0x28] sm:$0xff] }
 0x3e0   : > { %v1355_v39 = vrot.slane %v1090_v45, %v3745_v62  ;;  %v1351_v61 = vrot.slane %v1088_v32, %v3748_v0  ;;  %v1391_v26 = vsel %vm1379_vm6, %v1338_v35, %v1390_v31  ;;  %v1397_v37 = vsel %vm802_vm1, 0.0, %v1386_v28  ;;  %v2595_v32 = vld [vmem:[%s4011_s7 + $0x20] sm:$0xff]  ;;  %v2599_v28 = vld [vmem:[%s4011_s7 + $0x30] sm:$0xff]  ;;  %v2600_v31 = vld [vmem:[%s4011_s7 + $0x38] sm:$0xff] }
 0x3e1   : > { %v1392_v11 = vsel %vm1381_vm7, %v1347_v49, %v1391_v26  ;;  %v1600_v41 = vrot.slane %v1397_v37, 1  ;;  %v3072_v35 = vpack.c.bf16 %v2596_v36, %v2595_v32  ;;  %v1768_v26 = vrot.slane %v1397_v37, 2 }
 0x3e2   : > { %v1356_v53 = vsel %vm1238_vm2, %v1355_v39, %v1351_v61 }
 0x3e3   : > { %v1094_v42 = vpop.xlane.xlu1 %1093  ;;  %v1092_v22 = vpop.xlane.xlu0 %1091  ;;  %v1393_v38 = vsel %vm1383_vm8, %v1356_v53, %v1392_v11 }
 0x3e4   : > { %v1364_v16 = vrot.slane %v1094_v42, %v3745_v62  ;;  %v1360_v8 = vrot.slane %v1092_v22, %v3748_v0 }
 0x3e6   : > { %v1365_v20 = vsel %vm1238_vm2, %v1364_v16, %v1360_v8  ;;  %v3076_v16 = vpack.c.bf16 %v2600_v31, %v2599_v28 }
 0x3e7   : > { %v1394_v21 = vsel %vm1385_vm9, %v1365_v20, %v1393_v38  ;;  %v1098_v43 = vpop.xlane.xlu1 %1097  ;;  %v1096_v44 = vpop.xlane.xlu0 %1095  ;;  %v2603_v20 = vld [vmem:[%s4011_s7 + $0x40] sm:$0xff] }
 0x3e8   : > { %v1373_v15 = vrot.slane %v1098_v43, %v3745_v62  ;;  %v1369_v57 = vrot.slane %v1096_v44, %v3748_v0  ;;  %v1601_v54 = vrot.slane %v1394_v21, 1  ;;  %v1769_v22 = vrot.slane %v1394_v21, 2 }
 0x3ea   : > { %v1374_v51 = vsel %vm1238_vm2, %v1373_v15, %v1369_v57  ;;  %v1602_v45 = vsel %vm1599_vm10, %v1600_v41, %v1601_v54 }
 0x3eb   : > { %v1398_v58 = vsel %vm802_vm1, %v1374_v51, 0.0  ;;  %v1102_v39 = vpop.xlane.xlu1 %1101  ;;  %2978 = vmatprep.mubr.msk.f32.mxu1 %vm1605_vm11, %v1602_v45  ;;  %v1100_v61 = vpop.xlane.xlu0 %1099 }
 0x3ec   : > { %v1603_v19 = vrot.slane %v1398_v58, 1  ;;  %v1771_v38 = vrot.slane %v1398_v58, 2  ;;  %v1164_v31 = vmul.f32 0.015625, %v1102_v39 }
 0x3ee   : > { %v1604_v27 = vsel %vm1599_vm10, %v1601_v54, %v1603_v19  ;;  %v1438_v30 = vrot.slane %v1164_v31, %v3745_v62 }
 0x3ef   : > { %v1106_v56 = vpop.xlane.xlu1 %1105  ;;  %2979 = vmatmul.mubr.msk.f32.vlgmr.msra.gmra.mrb[4].mxu1 %vm1605_vm11, %v1604_v27  ;;  %v1104_v49 = vpop.xlane.xlu0 %1103 }
 0x3f0   : > { %2985 = vmatprep.mubr.msk.f32.mxu1 %vm1605_vm11, %v1397_v37  ;;  %3071 = vmatpush3.bf16.msra.mxu1 %v3710_v14  ;;  %v1770_v14 = vsel %vm1767_vm12, %v1768_v26, %v1769_v22  ;;  %v2604_v37 = vld [vmem:[%s4011_s7 + $0x48] sm:$0xff]  ;;  %v1166_v36 = vmul.f32 0.015625, %v1106_v56  ;;  %v1165_v58 = vmul.f32 0.015625, %v1104_v49  ;;  %v1163_v26 = vmul.f32 0.015625, %v1100_v61 }
 0x3f1   : > { %3073 = vmatprep.subr.bf16.mxu1 %v3072_v35  ;;  %v3852_v15 = vpack.c.bf16 %v2604_v37, %v2603_v20 }
 0x3f3   : > { %v1110_v53 = vpop.xlane.xlu1 %1109  ;;  %v1108_v42 = vpop.xlane.xlu0 %1107 }
 0x3f4   : > { %v1168_v27 = vmul.f32 0.015625, %v1110_v53  ;;  %v1167_v28 = vmul.f32 0.015625, %v1108_v42  ;;  %v1434_v53 = vrot.slane %v1163_v26, %v3748_v0 }
 0x3f6   : > { %v1452_v34 = vrot.slane %v1167_v28, %v3748_v0  ;;  %v1439_v28 = vsel %vm1238_vm2, %v1438_v30, %v1434_v53 }
 0x3f7   : > { %v1130_v8 = vpop.xlane.xlu1 %1129  ;;  %2986 = vmatmul.mubr.msk.f32.vlgmr.msra.gmra.mrb[4].mxu1 %vm1605_vm11, %v1394_v21  ;;  %v1128_v11 = vpop.xlane.xlu0 %1127  ;;  %v1772_v21 = vsel %vm1767_vm12, %v1769_v22, %v1771_v38  ;;  %v1447_v38 = vrot.slane %v1166_v36, %v3745_v62 }
 0x3f8   : > { %2992 = vmatprep.mubr.msk.f32.mxu1 %vm1605_vm11, %v1770_v14  ;;  %3075 = vmatpush3.bf16.msra.mxu1 %v3072_v35 }
 0x3f9   : > { %3077 = vmatprep.subr.bf16.mxu1 %v3076_v16 }
 0x3fb   : > { %v1134_v43 = vpop.xlane.xlu1 %1133  ;;  %v1132_v44 = vpop.xlane.xlu0 %1131 }
 0x3fc   : > { %v1180_v29 = vmul.f32 0.015625, %v1134_v43 }
 0x3ff   : > { %v1114_v57 = vpop.xlane.xlu1 %1113  ;;  %2993 = vmatmul.mubr.msk.f32.vlgmr.msra.gmra.mrb[4].mxu1 %vm1605_vm11, %v1772_v21  ;;  %v1112_v41 = vpop.xlane.xlu0 %1111  ;;  %v1456_v21 = vrot.slane %v1168_v27, %v3745_v62 }
 0x400   : > { %3079 = vmatpush3.bf16.msra.mxu1 %v3076_v16  ;;  %v1170_v22 = vmul.f32 0.015625, %v1114_v57  ;;  %v1169_v14 = vmul.f32 0.015625, %v1112_v41  ;;  %v1443_v16 = vrot.slane %v1165_v58, %v3748_v0 }
 0x401   : > { %3081 = vmatprep.subr.bf16.mxu1 %v3852_v15  ;;  %v1457_v27 = vsel %vm1238_vm2, %v1456_v21, %v1452_v34  ;;  %v1179_v34 = vmul.f32 0.015625, %v1132_v44  ;;  %v1510_v21 = vrot.slane %v1180_v29, %v3745_v62 }
 0x402   : > { %v1465_v42 = vrot.slane %v1170_v22, %v3745_v62  ;;  %v1461_v57 = vrot.slane %v1169_v14, %v3748_v0  ;;  %v1448_v41 = vsel %vm1238_vm2, %v1447_v38, %v1443_v16  ;;  %v1178_v16 = vmul.f32 0.015625, %v1130_v8 }
 0x403   : > { %v1138_v54 = vpop.xlane.xlu1 %1137  ;;  %v1136_v51 = vpop.xlane.xlu0 %1135  ;;  %v1575_v22 = vsel %vm1375_vm3, %v1448_v41, %v1439_v28  ;;  %v1506_v44 = vrot.slane %v1179_v34, %v3748_v0 }
 0x404   : > { %v1466_v14 = vsel %vm1238_vm2, %v1465_v42, %v1461_v57  ;;  %v1576_v38 = vsel %vm1377_vm5, %v1457_v27, %v1575_v22 }
 0x405   : > { %v1577_v53 = vsel %vm1379_vm6, %v1466_v14, %v1576_v38 }
 0x407   : > { %v1118_v45 = vpop.xlane.xlu1 %1117  ;;  %v1116_v32 = vpop.xlane.xlu0 %1115 }
 0x408   : > { %v1172_v56 = vmul.f32 0.015625, %v1118_v45  ;;  %v1171_v49 = vmul.f32 0.015625, %v1116_v32 }
 0x40a   : > { %v1474_v45 = vrot.slane %v1172_v56, %v3745_v62  ;;  %v1470_v32 = vrot.slane %v1171_v49, %v3748_v0 }
 0x40b   : > { %v1142_v19 = vpop.xlane.xlu1 %1141  ;;  %v1140_v35 = vpop.xlane.xlu0 %1139 }
 0x40c   : > { %v1475_v56 = vsel %vm1238_vm2, %v1474_v45, %v1470_v32  ;;  %v1184_v42 = vmul.f32 0.015625, %v1142_v19  ;;  %v1183_v57 = vmul.f32 0.015625, %v1140_v35  ;;  %v1501_v19 = vrot.slane %v1178_v16, %v3745_v62 }
 0x40d   : > { %v1578_v32 = vsel %vm1381_vm7, %v1475_v56, %v1577_v53 }
 0x40e   : > { %v1524_v38 = vrot.slane %v1183_v57, %v3748_v0 }
 0x40f   : > { %v1122_v20 = vpop.xlane.xlu1 %1121  ;;  %v1120_v37 = vpop.xlane.xlu0 %1119 }
 0x410   : > { %v1174_v39 = vmul.f32 0.015625, %v1122_v20  ;;  %v1173_v61 = vmul.f32 0.015625, %v1120_v37  ;;  %v1177_v20 = vmul.f32 0.015625, %v1128_v11 }
 0x412   : > { %v1483_v31 = vrot.slane %v1174_v39, %v3745_v62  ;;  %v1479_v26 = vrot.slane %v1173_v61, %v3748_v0  ;;  %v1182_v39 = vmul.f32 0.015625, %v1138_v54  ;;  %v1181_v61 = vmul.f32 0.015625, %v1136_v51 }
 0x413   : > { %v1146_v36 = vpop.xlane.xlu1 %1145  ;;  %v1144_v58 = vpop.xlane.xlu0 %1143 }
 0x414   : > { %v1484_v41 = vsel %vm1238_vm2, %v1483_v31, %v1479_v26  ;;  %v1186_v27 = vmul.f32 0.015625, %v1146_v36  ;;  %v1185_v29 = vmul.f32 0.015625, %v1144_v58  ;;  %v1519_v35 = vrot.slane %v1182_v39, %v3745_v62 }
 0x415   : > { %v1579_v51 = vsel %vm1383_vm8, %v1484_v41, %v1578_v32  ;;  %v1515_v31 = vrot.slane %v1181_v61, %v3748_v0  ;;  %v1497_v36 = vrot.slane %v1177_v20, %v3748_v0  ;;  %v1528_v58 = vrot.slane %v1184_v42, %v3745_v62 }
 0x416   : > { %v1533_v16 = vrot.slane %v1185_v29, %v3748_v0 }
 0x417   : > { %v1126_v43 = vpop.xlane.xlu1 %1125  ;;  %v1124_v37 = vpop.xlane.xlu0 %1123  ;;  %v1520_v61 = vsel %vm1238_vm2, %v1519_v35, %v1515_v31  ;;  %v1502_v41 = vsel %vm1238_vm2, %v1501_v19, %v1497_v36 }
 0x418   : > { %v1176_v30 = vmul.f32 0.015625, %v1126_v43  ;;  %v1175_v49 = vmul.f32 0.015625, %v1124_v37  ;;  %v1511_v43 = vsel %vm1238_vm2, %v1510_v21, %v1506_v44  ;;  %v1537_v37 = vrot.slane %v1186_v27, %v3745_v62 }
 0x419   : > { %v1529_v21 = vsel %vm1238_vm2, %v1528_v58, %v1524_v38 }
 0x41a   : > { %v1492_v8 = vrot.slane %v1176_v30, %v3745_v62  ;;  %v1488_v11 = vrot.slane %v1175_v49, %v3748_v0 }
 0x41b   : > { %v1150_v28 = vpop.xlane.xlu1 %1149  ;;  %v1148_v45 = vpop.xlane.xlu0 %1147 }
 0x41c   : > { %v1188_v22 = vmul.f32 0.015625, %v1150_v28  ;;  %v1187_v14 = vmul.f32 0.015625, %v1148_v45  ;;  %v1493_v54 = vsel %vm1238_vm2, %v1492_v8, %v1488_v11  ;;  %v1581_v8 = vsel %vm1387_vm4, %v1511_v43, %v1502_v41 }
 0x41d   : > { %v1580_v26 = vsel %vm1385_vm9, %v1493_v54, %v1579_v51  ;;  %v1538_v11 = vsel %vm1238_vm2, %v1537_v37, %v1533_v16  ;;  %v1582_v29 = vsel %vm1375_vm3, %v1520_v61, %v1581_v8 }
 0x41e   : > { %v1590_v34 = vsel %vm802_vm1, 0.0, %v1580_v26  ;;  %v1546_v49 = vrot.slane %v1188_v22, %v3745_v62  ;;  %v1542_v20 = vrot.slane %v1187_v14, %v3748_v0  ;;  %v2607_v22 = vld [vmem:[%s4011_s7 + $0x50] sm:$0xff]  ;;  %v2608_v14 = vld [vmem:[%s4011_s7 + $0x58] sm:$0xff]  ;;  %v1583_v54 = vsel %vm1377_vm5, %v1529_v21, %v1582_v29 }
 0x41f   : > { %v1154_v56 = vpop.xlane.xlu1 %1153  ;;  %2999 = vmatprep.mubr.msk.f32.mxu1 %vm1605_vm11, %v1590_v34  ;;  %v1152_v30 = vpop.xlane.xlu0 %1151  ;;  %v1584_v19 = vsel %vm1379_vm6, %v1538_v11, %v1583_v54  ;;  %v3084_v38 = vpack.c.bf16 %v2608_v14, %v2607_v22  ;;  %v2032_v8 = vrot.slane %v1590_v34, 2 }
 0x420   : > { %v1190_v53 = vmul.f32 0.015625, %v1154_v56  ;;  %v1189_v39 = vmul.f32 0.015625, %v1152_v30  ;;  %v1547_v28 = vsel %vm1238_vm2, %v1546_v49, %v1542_v20  ;;  %v1943_v49 = vrot.slane %v1590_v34, 1 }
 0x421   : > { %v1585_v26 = vsel %vm1381_vm7, %v1547_v28, %v1584_v19 }
 0x422   : > { %v1555_v42 = vrot.slane %v1190_v53, %v3745_v62  ;;  %v1551_v57 = vrot.slane %v1189_v39, %v3748_v0 }
 0x423   : > { %v1158_v44 = vpop.xlane.xlu1 %1157  ;;  %v1156_v27 = vpop.xlane.xlu0 %1155 }
 0x424   : > { %v1192_v45 = vmul.f32 0.015625, %v1158_v44  ;;  %v1191_v32 = vmul.f32 0.015625, %v1156_v27  ;;  %v1556_v51 = vsel %vm1238_vm2, %v1555_v42, %v1551_v57  ;;  %v2119_v44 = vstv %s2118_s10 }
 0x425   : > { %v1586_v56 = vsel %vm1383_vm8, %v1556_v51, %v1585_v26  ;;  %v2143_v51 = vsub.s32 1, %v3550_v55 }
 0x426   : > { %v1564_v35 = vrot.slane %v1192_v45, %v3745_v62  ;;  %v1560_v31 = vrot.slane %v1191_v32, %v3748_v0 }
 0x427   : > { %v1162_v36 = vpop.xlane.xlu1 %1161  ;;  %v1160_v58 = vpop.xlane.xlu0 %1159 }
 0x428   : > { %v1565_v43 = vsel %vm1238_vm2, %v1564_v35, %v1560_v31  ;;  %v1194_v37 = vmul.f32 0.015625, %v1162_v36  ;;  %v1193_v16 = vmul.f32 0.015625, %v1160_v58  ;;  %v2154_v31 = vsub.s32 2, %v3550_v55 }
 0x429   : > { %v1587_v30 = vsel %vm1385_vm9, %v1565_v43, %v1586_v56  ;;  %v2165_v36 = vsub.s32 3, %v3550_v55 }
 0x42a   : > { %v1573_v20 = vrot.slane %v1194_v37, %v3745_v62  ;;  %v1569_v53 = vrot.slane %v1193_v16, %v3748_v0  ;;  %3000 = vmatmul.mubr.msk.f32.vlgmr.msra.gmra.mrb[4].mxu1 %vm1605_vm11, %v1587_v30  ;;  %v1944_v39 = vrot.slane %v1587_v30, 1  ;;  %v2033_v57 = vrot.slane %v1587_v30, 2 }
 0x42b   : > { %3083 = vmatpush3.bf16.msra.mxu1 %v3852_v15  ;;  %v2187_v37 = vsub.s32 5, %v3550_v55 }
 0x42c   : > { %v1574_v61 = vsel %vm1238_vm2, %v1573_v20, %v1569_v53  ;;  %v1945_v41 = vsel %vm1599_vm10, %v1943_v49, %v1944_v39  ;;  %3085 = vmatprep.subr.bf16.mxu1 %v3084_v38  ;;  %v2034_v0 = vsel %vm1767_vm12, %v2032_v8, %v2033_v57  ;;  %v2198_v49 = vsub.s32 6, %v3550_v55 }
 0x42d   : > { %v1591_v21 = vsel %vm802_vm1, %v1574_v61, 0.0  ;;  %3006 = vmatprep.mubr.msk.f32.mxu1 %vm1605_vm11, %v1945_v41 }
 0x42e   : > { %v1946_v42 = vrot.slane %v1591_v21, 1  ;;  %v2035_v15 = vrot.slane %v1591_v21, 2 }
 0x430   : > { %v1947_v62 = vsel %vm1599_vm10, %v1944_v39, %v1946_v42  ;;  %v2036_v11 = vsel %vm1767_vm12, %v2033_v57, %v2035_v15 }
 0x432   : > { %3007 = vmatmul.mubr.msk.f32.vlgmr.msra.gmra.mrb[4].mxu1 %vm1605_vm11, %v1947_v62  ;;  %v2209_v62 = vsub.s32 7, %v3550_v55 }
 0x433   : > { %3087 = vmatpush3.bf16.msra.mxu1 %v3084_v38  ;;  %3013 = vmatprep.mubr.msk.f32.mxu1 %vm1605_vm11, %v2034_v0  ;;  %v2176_v38 = vsub.s32 4, %v3550_v55 }
 0x43a   : > { %3014 = vmatmul.mubr.msk.f32.vlgmr.msra.gmra.mrb[4].mxu1 %vm1605_vm11, %v2036_v11 }
 0x50d   : > { %v3015_v27 = vpop.f32.mrb[4].mxu1 }
 0x50e   : > { %v2121_v29 = vadd.f32 %v3015_v27, %v2119_v44  ;;  %v2107_v28 = vpop.f32.mrb[5].mxu1 }
 0x50f   : > { %v2120_v14 = vadd.f32 %v2119_v44, %v2107_v28 }
 0x510   : > { %v2123_v34 = vmul.f32 0.5, %v2121_v29 }
 0x511   : > { %v2122_v19 = vmul.f32 0.5, %v2120_v14 }
 0x512   : > { %3135 = vtanh.f32 %v2123_v34 }
 0x513   : > { %3137 = vtanh.f32 %v2122_v19 }
 0x51c   : > { %v3136_v45 = vpop.eup %3135 }
 0x51d   : > { %v2127_v32 = vadd.f32 1.0, %v3136_v45  ;;  %v3138_v16 = vpop.eup %3137 }
 0x51e   : > { %v2126_v56 = vadd.f32 1.0, %v3138_v16 }
 0x51f   : > { %v2129_v22 = vmul.f32 0.5, %v2127_v32 }
 0x520   : > { %v2128_v20 = vmul.f32 0.5, %v2126_v56 }
 0x521   : > { %v2221_v54 = vrot.slane %v2129_v22, %v3553_v50  ;;  %v2232_v35 = vrot.slane %v2129_v22, %v2143_v51  ;;  %v2243_v26 = vrot.slane %v2129_v22, %v2154_v31  ;;  %v2254_v58 = vrot.slane %v2129_v22, %v2165_v36 }
 0x522   : > { %v2265_v43 = vrot.slane %v2129_v22, %v2176_v38  ;;  %v2276_v30 = vrot.slane %v2129_v22, %v2187_v37  ;;  %v2287_v53 = vrot.slane %v2129_v22, %v2198_v49  ;;  %v2133_v39 = vrot.slane %v2128_v20, %v3553_v50 }
 0x523   : > { %2227 = vbcast.lane.b32.xlu1 %v2221_v54, 264  ;;  %2223 = vbcast.lane.b32.xlu0 %v2221_v54, 256  ;;  %v2144_v61 = vrot.slane %v2128_v20, %v2143_v51  ;;  %v2155_v41 = vrot.slane %v2128_v20, %v2154_v31  ;;  %v2166_v21 = vrot.slane %v2128_v20, %v2165_v36 }
 0x524   : > { %v2177_v42 = vrot.slane %v2128_v20, %v2176_v38  ;;  %v2188_v57 = vrot.slane %v2128_v20, %v2187_v37  ;;  %v2199_v8 = vrot.slane %v2128_v20, %v2198_v49  ;;  %v2210_v50 = vrot.slane %v2128_v20, %v2209_v62 }
 0x525   : > { %v2298_v0 = vrot.slane %v2129_v22, %v2209_v62 }
 0x527   : > { %2238 = vbcast.lane.b32.xlu1 %v2232_v35, 264  ;;  %2234 = vbcast.lane.b32.xlu0 %v2232_v35, 256 }
 0x52b   : > { %2249 = vbcast.lane.b32.xlu1 %v2243_v26, 264  ;;  %2245 = vbcast.lane.b32.xlu0 %v2243_v26, 256 }
 0x52f   : > { %2260 = vbcast.lane.b32.xlu1 %v2254_v58, 264  ;;  %2256 = vbcast.lane.b32.xlu0 %v2254_v58, 256 }
 0x533   : > { %2271 = vbcast.lane.b32.xlu1 %v2265_v43, 264  ;;  %2267 = vbcast.lane.b32.xlu0 %v2265_v43, 256 }
 0x537   : > { %2282 = vbcast.lane.b32.xlu1 %v2276_v30, 264  ;;  %2278 = vbcast.lane.b32.xlu0 %v2276_v30, 256 }
 0x53b   : > { %2293 = vbcast.lane.b32.xlu1 %v2287_v53, 264  ;;  %2289 = vbcast.lane.b32.xlu0 %v2287_v53, 256 }
 0x53f   : > { %2139 = vbcast.lane.b32.xlu1 %v2133_v39, 264  ;;  %2135 = vbcast.lane.b32.xlu0 %v2133_v39, 256 }
 0x543   : > { %2146 = vbcast.lane.b32.xlu1 %v2144_v61, 256  ;;  %2157 = vbcast.lane.b32.xlu0 %v2155_v41, 256 }
 0x547   : > { %2150 = vbcast.lane.b32.xlu1 %v2144_v61, 264  ;;  %2168 = vbcast.lane.b32.xlu0 %v2166_v21, 256 }
 0x54b   : > { %2161 = vbcast.lane.b32.xlu1 %v2155_v41, 264  ;;  %2179 = vbcast.lane.b32.xlu0 %v2177_v42, 256 }
 0x54f   : > { %2172 = vbcast.lane.b32.xlu1 %v2166_v21, 264  ;;  %2190 = vbcast.lane.b32.xlu0 %v2188_v57, 256 }
 0x553   : > { %2183 = vbcast.lane.b32.xlu1 %v2177_v42, 264  ;;  %2201 = vbcast.lane.b32.xlu0 %v2199_v8, 256 }
 0x557   : > { %2194 = vbcast.lane.b32.xlu1 %v2188_v57, 264  ;;  %2212 = vbcast.lane.b32.xlu0 %v2210_v50, 256 }
 0x55b   : > { %2205 = vbcast.lane.b32.xlu1 %v2199_v8, 264  ;;  %2300 = vbcast.lane.b32.xlu0 %v2298_v0, 256 }
 0x55f   : > { %2216 = vbcast.lane.b32.xlu1 %v2210_v50, 264 }
 0x563   : > { %2304 = vbcast.lane.b32.xlu1 %v2298_v0, 264 }
 0x595   : > { %v2228_v15 = vpop.permute.xlu1 %2227  ;;  %v2224_v11 = vpop.permute.xlu0 %2223 }
 0x596   : > { %v2323_v44 = vmul.f32 %v2228_v15, %v3581_v1  ;;  %v2322_v27 = vmul.f32 %v2224_v11, %v3584_v60 }
 0x598   : > { %v2722_v55 = vpack.c.bf16 %v2323_v44, %v2322_v27 }
 0x599   : > { %v2239_v29 = vpop.permute.xlu1 %2238  ;;  %v2235_v28 = vpop.permute.xlu0 %2234 }
 0x59a   : > { %2766 = vst [vmem:[%s3953_s8 + $0x40] sm:$0xff] %v2722_v55   ;;  %v2325_v34 = vmul.f32 %v2239_v29, %v3597_v3  ;;  %v2324_v45 = vmul.f32 %v2235_v28, %v3600_v59  ;;  %v4028_v29 = vld [vmem:[#allocation5_spill] sm:$0xff] }
 0x59c   : > { %v2727_v1 = vpack.c.bf16 %v2325_v34, %v2324_v45  ;;  %v4029_v45 = vld [vmem:[#allocation7_spill] sm:$0xff] }
 0x59d   : > { %v2250_v60 = vpop.permute.xlu1 %2249  ;;  %v2246_v32 = vpop.permute.xlu0 %2245 }
 0x59e   : > { %2767 = vst [vmem:[%s3953_s8 + $0x48] sm:$0xff] %v2727_v1   ;;  %v2327_v22 = vmul.f32 %v2250_v60, %v3613_v9  ;;  %v2326_v14 = vmul.f32 %v2246_v32, %v3616_v4 }
 0x5a0   : > { %v2732_v54 = vpack.c.bf16 %v2327_v22, %v2326_v14  ;;  %v4031_v22 = vld [vmem:[#allocation4_spill] sm:$0xff] }
 0x5a1   : > { %v2261_v51 = vpop.permute.xlu1 %2260  ;;  %v2257_v19 = vpop.permute.xlu0 %2256 }
 0x5a2   : > { %2768 = vst [vmem:[%s3953_s8 + $0x50] sm:$0xff] %v2732_v54   ;;  %v2329_v35 = vmul.f32 %v2261_v51, %v3629_v24  ;;  %v2328_v3 = vmul.f32 %v2257_v19, %v3632_v18  ;;  %v4032_v54 = vld [vmem:[#allocation3_spill] sm:$0xff] }
 0x5a4   : > { %v2737_v59 = vpack.c.bf16 %v2329_v35, %v2328_v3  ;;  %v4033_v3 = vld [vmem:[#allocation9_spill] sm:$0xff] }
 0x5a5   : > { %v2272_v31 = vpop.permute.xlu1 %2271  ;;  %v2268_v26 = vpop.permute.xlu0 %2267 }
 0x5a6   : > { %2769 = vst [vmem:[%s3953_s8 + $0x58] sm:$0xff] %v2737_v59   ;;  %v2331_v36 = vmul.f32 %v2272_v31, %v3645_v33  ;;  %v2330_v9 = vmul.f32 %v2268_v26, %v3648_v25  ;;  %v4034_v31 = vld [vmem:[#allocation8_spill] sm:$0xff] }
 0x5a8   : > { %v2742_v4 = vpack.c.bf16 %v2331_v36, %v2330_v9 }
 0x5a9   : > { %v2283_v58 = vpop.permute.xlu1 %2282  ;;  %v2279_v38 = vpop.permute.xlu0 %2278 }
 0x5aa   : > { %2770 = vst [vmem:[%s3953_s8 + $0x60] sm:$0xff] %v2742_v4   ;;  %v2333_v43 = vmul.f32 %v2283_v58, %v3661_v63  ;;  %v2332_v24 = vmul.f32 %v2279_v38, %v3664_v48 }
 0x5ac   : > { %v2747_v18 = vpack.c.bf16 %v2333_v43, %v2332_v24 }
 0x5ad   : > { %v2294_v37 = vpop.permute.xlu1 %2293  ;;  %v2290_v16 = vpop.permute.xlu0 %2289 }
 0x5ae   : > { %2771 = vst [vmem:[%s3953_s8 + $0x68] sm:$0xff] %v2747_v18   ;;  %v2335_v56 = vmul.f32 %v2294_v37, %v3669_v46  ;;  %v2334_v33 = vmul.f32 %v2290_v16, %v3672_v40 }
 0x5b0   : > { %v2752_v30 = vpack.c.bf16 %v2335_v56, %v2334_v33 }
 0x5b1   : > { %v2140_v25 = vpop.permute.xlu1 %2139  ;;  %v2136_v49 = vpop.permute.xlu0 %2135 }
 0x5b2   : > { %2772 = vst [vmem:[%s3953_s8 + $0x70] sm:$0xff] %v2752_v30   ;;  %v2307_v20 = vmul.f32 %v2140_v25, %v3568_v10  ;;  %v2306_v63 = vmul.f32 %v2136_v49, %v3560_v5 }
 0x5b4   : > { %v2682_v53 = vpack.c.bf16 %v2307_v20, %v2306_v63 }
 0x5b5   : > { %v2147_v48 = vpop.permute.xlu1 %2146  ;;  %v2158_v39 = vpop.permute.xlu0 %2157 }
 0x5b6   : > { %2683 = vst [vmem:[%s3953_s8] sm:$0xff] %v2682_v53   ;;  %v2308_v46 = vmul.f32 %v2147_v48, %v3557_v2  ;;  %v2310_v8 = vmul.f32 %v2158_v39, %v3592_v47 }
 0x5b9   : > { %v2151_v61 = vpop.permute.xlu1 %2150  ;;  %v2169_v41 = vpop.permute.xlu0 %2168 }
 0x5ba   : > { %v2309_v40 = vmul.f32 %v2151_v61, %v3565_v6  ;;  %v2312_v0 = vmul.f32 %v2169_v41, %v3608_v7 }
 0x5bc   : > { %v2687_v21 = vpack.c.bf16 %v2309_v40, %v2308_v46 }
 0x5bd   : > { %v2162_v42 = vpop.permute.xlu1 %2161  ;;  %v2180_v57 = vpop.permute.xlu0 %2179 }
 0x5be   : > { %2759 = vst [vmem:[%s3953_s8 + $0x8] sm:$0xff] %v2687_v21   ;;  %v2311_v5 = vmul.f32 %v2162_v42, %v3589_v52  ;;  %v2314_v11 = vmul.f32 %v2180_v57, %v3624_v13  ;;  %v4030_v13 = vld [vmem:[#allocation6_spill] sm:$0xff] }
 0x5c0   : > { %v2692_v10 = vpack.c.bf16 %v2311_v5, %v2310_v8 }
 0x5c1   : > { %v2173_v62 = vpop.permute.xlu1 %2172  ;;  %v2191_v50 = vpop.permute.xlu0 %2190 }
 0x5c2   : > { %2760 = vst [vmem:[%s3953_s8 + $0x10] sm:$0xff] %v2692_v10   ;;  %v2313_v2 = vmul.f32 %v2173_v62, %v3605_v12  ;;  %v2316_v55 = vmul.f32 %v2191_v50, %v3640_v23 }
 0x5c4   : > { %v2697_v6 = vpack.c.bf16 %v2313_v2, %v2312_v0 }
 0x5c5   : > { %v2184_v15 = vpop.permute.xlu1 %2183  ;;  %v2202_v44 = vpop.permute.xlu0 %2201 }
 0x5c6   : > { %2761 = vst [vmem:[%s3953_s8 + $0x18] sm:$0xff] %v2697_v6   ;;  %v2315_v47 = vmul.f32 %v2184_v15, %v3621_v17  ;;  %v2318_v1 = vmul.f32 %v2202_v44, %v4029_v45 }
 0x5c8   : > { %v2702_v52 = vpack.c.bf16 %v2315_v47, %v2314_v11 }
 0x5c9   : > { %v2195_v27 = vpop.permute.xlu1 %2194  ;;  %v2213_v12 = vpop.permute.xlu0 %2212 }
 0x5ca   : > { %2762 = vst [vmem:[%s3953_s8 + $0x20] sm:$0xff] %v2702_v52   ;;  %v2317_v7 = vmul.f32 %v2195_v27, %v4028_v29  ;;  %v2320_v14 = vmul.f32 %v2213_v12, %v4031_v22 }
 0x5cc   : > { %v2707_v28 = vpack.c.bf16 %v2317_v7, %v2316_v55 }
 0x5cd   : > { %v2206_v34 = vpop.permute.xlu1 %2205  ;;  %v2301_v51 = vpop.permute.xlu0 %2300 }
 0x5ce   : > { %2763 = vst [vmem:[%s3953_s8 + $0x28] sm:$0xff] %v2707_v28   ;;  %v2319_v60 = vmul.f32 %v2206_v34, %v4030_v13  ;;  %v2336_v59 = vmul.f32 %v2301_v51, %v4033_v3 }
 0x5d0   : > { %v2712_v17 = vpack.c.bf16 %v2319_v60, %v2318_v1 }
 0x5d1   : > { %v2217_v32 = vpop.permute.xlu1 %2216 }
 0x5d2   : > { %2764 = vst [vmem:[%s3953_s8 + $0x30] sm:$0xff] %v2712_v17   ;;  %v2321_v23 = vmul.f32 %v2217_v32, %v4032_v54 }
 0x5d4   : > { %v2717_v19 = vpack.c.bf16 %v2321_v23, %v2320_v14 }
 0x5d5   : > { %v2305_v35 = vpop.permute.xlu1 %2304 }
 0x5d6   : > { %2765 = vst [vmem:[%s3953_s8 + $0x38] sm:$0xff] %v2717_v19   ;;  %v2337_v26 = vmul.f32 %v2305_v35, %v4034_v31 }
 0x5d8   : > { %v2757_v36 = vpack.c.bf16 %v2337_v26, %v2336_v59 }
 0x5da   : > { %2773 = vst [vmem:[%s3953_s8 + $0x78] sm:$0xff] %v2757_v36  }
 0x5db PF: > { %s20_s11 = sadd.s32 1, %s3145_s11  }
 0x5dc   : > { %p17_p4 = scmp.ge.s32.totalorder %s20_s11, 4  }
 0x5de   :  { %19 = sbr.rel (!%p17_p4) target bundleno = 2 (0x2), region = 91 }

// kernel: attentive_cnn_forward.4
= control target key start
LH: loop header
LB: loop body
LE: loop exit
PB: predicated region body
PF: predicated region fallthrough
CT: control target
= control target key end

     0   :  { %s5921_s11 = smov 0   ;;  %s7651_s0 = inlined_call_operand.vmem [shape: bf16[2,16,16,128], index: 0, kind: input, shape index: {}]   ;;  %s7652_s1 = inlined_call_operand.vmem [shape: bf16[3,384,128], index: 1, kind: input, shape index: {}]   ;;  %s7653_s2 = inlined_call_operand.vmem [shape: f32[1,128], index: 2, kind: input, shape index: {}]   ;;  %s7654_s3 = inlined_call_operand.vmem [shape: f32[128,128], index: 3, kind: input, shape index: {}]   ;;  %s7655_s4 = inlined_call_operand.vmem [shape: f32[1,128], index: 4, kind: input, shape index: {}]   ;;  %s7656_s5 = inlined_call_operand.vmem [shape: f32[128,128], index: 5, kind: input, shape index: {}]   ;;  %s7657_s6 = inlined_call_operand.vmem [shape: f32[1,128], index: 6, kind: input, shape index: {}]   ;;  %s7658_s7 = inlined_call_operand.vmem [shape: f32[6,16,16], index: 7, kind: input, shape index: {}]   ;;  %s7659_s8 = inlined_call_operand.<no memory space> [shape: f32[1], index: 8, kind: input, shape index: {}]   ;;  %s7660_s9 = inlined_call_operand.vmem [shape: bf16[2,16,16,128], index: 9, kind: output, shape index: {}]  }
   0x1   :  { %14 = sst [smem:[#allocation2]] %s7659_s8 }
   0x2 LB: > { %s4405_s12 = sadd.s32 4294967295, %s5862_s11   ;;  %p4409_p0 = scmp.ge.s32.totalorder %s5862_s11, 1  ;;  %s5862_s11 = sphi %s5921_s11, %s20_s11  }
   0x3   : > { %p288_p1 = scmp.lt.s32.totalorder %s5862_s11, 3 }
   0x5   : > { %p289_p2 = pnand %p4409_p0, %p288_p1 }
   0x7   : > { %292 = sbr.rel (%p289_p2) target bundleno = 1758 (0x6de), region = 56 }
   0xe   : > { %v5762_v0 = vld [vmem:[%s7652_s1 + $0x100] sm:$0xff]   ;;  %v5765_v3 = vld [vmem:[%s7652_s1 + $0x108] sm:$0xff]   ;;  %v5768_v6 = vld [vmem:[%s7652_s1 + $0x110] sm:$0xff]   ;;  %p324_p3 = scmp.lt.s32.totalorder %s4405_s12, 1  ;;  %vm591_vm0 = vcmask 1040384   ;;  %vm867_vm4 = vcmask 1046528  }
   0xf   : > { %v5763_v1 = vld [vmem:[%s7652_s1 + $0x140] sm:$0xff]   ;;  %4786 = vmatprep.subr.bf16.mxu0 %v5762_v0  ;;  %v5766_v4 = vld [vmem:[%s7652_s1 + $0x148] sm:$0xff]   ;;  %v5769_v7 = vld [vmem:[%s7652_s1 + $0x150] sm:$0xff]   ;;  %vm592_vm1 = vsmask.f32 256  ;;  %vm5866_vm5 = vmmov 0  }
  0x10   : > { %v5764_v2 = vld [vmem:[%s7652_s1 + $0xc0] sm:$0xff]   ;;  %5252 = vmatprep.subr.bf16.mxu1 %v5763_v1  ;;  %v5767_v5 = vld [vmem:[%s7652_s1 + $0xc8] sm:$0xff]   ;;  %v5770_v8 = vld [vmem:[%s7652_s1 + $0xd0] sm:$0xff]   ;;  %s7685_s12 = smov (!%p324_p3, %s4405_s12), 1  ;;  %vm626_vm3 = vsmask.f32 7424 }
  0x11   : > { %4787 = vmatpush3.bf16.msra.mxu0 %v5764_v2  ;;  %5253 = vmatpush3.bf16.msra.mxu1 %v5763_v1  ;;  %v5771_v9 = vld [vmem:[%s7652_s1 + $0x118] sm:$0xff]   ;;  %v5774_v12 = vld [vmem:[%s7652_s1 + $0x120] sm:$0xff]   ;;  %v5777_v15 = vld [vmem:[%s7652_s1 + $0x128] sm:$0xff]   ;;  %s4657_s26 = sshll.u32 %s7685_s12, 7  ;;  %vm3090_vm6 = vcmask 130112   ;;  %vm3227_vm7 = vcmask 1042434  }
  0x12   : > { %4788 = vmatprep.subr.bf16.mxu0 %v5765_v3  ;;  %5254 = vmatprep.subr.bf16.mxu1 %v5766_v4  ;;  %v5772_v10 = vld [vmem:[%s7652_s1 + $0x158] sm:$0xff]   ;;  %v5775_v13 = vld [vmem:[%s7652_s1 + $0x160] sm:$0xff]   ;;  %v5778_v16 = vld [vmem:[%s7652_s1 + $0x168] sm:$0xff]   ;;  %s6001_s15 = scalar_lea.vmem %s7651_s0, %s4657_s26  ;;  %vm3239_vm8 = vcmask 1041409   ;;  %vm3229_vm9 = vcmask 1043459   ;;  %vm3231_vm10 = vcmask 1044484   ;;  %s7600_s29 = scalar_lea.vmem %s7660_s9, %s4657_s26 }
  0x13   : > { %v5773_v11 = vld [vmem:[%s7652_s1 + $0xd8] sm:$0xff]   ;;  %v5776_v14 = vld [vmem:[%s7652_s1 + $0xe0] sm:$0xff]   ;;  %v5779_v17 = vld [vmem:[%s7652_s1 + $0xe8] sm:$0xff]   ;;  %vm3233_vm11 = vcmask 1045509   ;;  %vm3235_vm12 = vcmask 1046534   ;;  %vm3237_vm13 = vcmask 1047559  }
  0x14   : > { %v5780_v18 = vld [vmem:[%s7652_s1 + $0x130] sm:$0xff]   ;;  %v5786_v21 = vld [vmem:[%s6001_s15] sm:$0xff]   ;;  %v5783_v22 = vld [vmem:[%s7652_s1 + $0x138] sm:$0xff]   ;;  %vm3457_vm14 = vcmask 130048   ;;  %vm3619_vm15 = vcmask 1045504   ;;  %s3970_s25 = sld [smem:[#allocation2]] }
  0x15   : > { %4789 = vmatpush3.bf16.msra.mxu0 %v5767_v5  ;;  %5255 = vmatpush3.bf16.msra.mxu1 %v5766_v4  ;;  %v5781_v19 = vld [vmem:[%s7652_s1 + $0x170] sm:$0xff]   ;;  %v5784_v23 = vld [vmem:[%s7652_s1 + $0x178] sm:$0xff]   ;;  %v448_v24 = vshrl.u32 %v5786_v21, 16  ;;  %v451_v25 = vshll.u32 %v5786_v21, 16  ;;  %v5787_v26 = vld [vmem:[%s6001_s15 + $0x8] sm:$0xff]  }
  0x16   : > { %4790 = vmatprep.subr.bf16.mxu0 %v5768_v6  ;;  %5256 = vmatprep.subr.bf16.mxu1 %v5769_v7  ;;  %v5782_v20 = vld [vmem:[%s7652_s1 + $0xf0] sm:$0xff]   ;;  %v5785_v27 = vld [vmem:[%s7652_s1 + $0xf8] sm:$0xff]   ;;  %vm6018_vm2 = vmand %vm591_vm0, %vm592_vm1  ;;  %v455_v30 = vshrl.u32 %v5787_v26, 16  ;;  %v458_v31 = vshll.u32 %v5787_v26, 16 }
  0x17   : > { %v450_v28 = vrot.slane %v448_v24, 7  ;;  %v5788_v32 = vld [vmem:[%s7652_s1 + $0x40] sm:$0xff]   ;;  %v5790_v36 = vld [vmem:[%s6001_s15 + $0x10] sm:$0xff]   ;;  %v5791_v43 = vld [vmem:[%s6001_s15 + $0x18] sm:$0xff]  }
  0x18   : > { %v457_v35 = vrot.slane %v455_v30, 7  ;;  %v462_v42 = vshrl.u32 %v5790_v36, 16  ;;  %v5789_v48 = vld [vmem:[%s7652_s1] sm:$0xff]   ;;  %v5792_v57 = vld [vmem:[%s7652_s1 + $0x48] sm:$0xff]   ;;  %v465_v60 = vshll.u32 %v5790_v36, 16  ;;  %v469_v1 = vshrl.u32 %v5791_v43, 16 }
  0x19   : > { %4791 = vmatpush3.bf16.msra.mxu0 %v5770_v8  ;;  %5257 = vmatpush3.bf16.msra.mxu1 %v5769_v7  ;;  %v453_v33 = vor.u32 %v451_v25, %v450_v28  ;;  %v610_v34 = vsel %vm6018_vm2, %v450_v28, 0  ;;  %v5794_v2 = vld [vmem:[%s6001_s15 + $0x20] sm:$0xff]   ;;  %v5795_v3 = vld [vmem:[%s6001_s15 + $0x28] sm:$0xff]   ;;  %v472_v6 = vshll.u32 %v5791_v43, 16  ;;  %v5797_v26 = vld [vmem:[%s7652_s1 + $0x10] sm:$0xff]  }
  0x1a   : > { %4792 = vmatprep.subr.bf16.mxu0 %v5771_v9  ;;  %5258 = vmatprep.subr.bf16.mxu1 %v5772_v10  ;;  %v635_v37 = vshll.u32 %v610_v34, 16  ;;  %v869_v38 = vrot.slane %v610_v34, 1  ;;  %v460_v40 = vor.u32 %v458_v31, %v457_v35  ;;  %v611_v41 = vsel %vm6018_vm2, %v457_v35, 0  ;;  %v5800_v43 = vld [vmem:[%s7652_s1 + $0x58] sm:$0xff]  }
  0x1b   : > { %v6030_v39 = vsel %vm6018_vm2, 0, %v453_v33  ;;  %v872_v50 = vrot.slane %v611_v41, 1  ;;  %v647_v51 = vshll.u32 %v611_v41, 16  ;;  %v464_v52 = vrot.slane %v462_v42, 7 }
  0x1c   : > { %v628_v44 = vshrl.u32 %v6030_v39, 16  ;;  %v630_v45 = vshll.u32 %v6030_v39, 16  ;;  %v637_v46 = vrot.slane %v635_v37, 1  ;;  %v868_v47 = vrot.slane %v6030_v39, 1  ;;  %v5799_v37 = vld [vmem:[%s6001_s15 + $0x38] sm:$0xff]  }
  0x1d   : > { %4793 = vmatpush3.bf16.msra.mxu0 %v5773_v11  ;;  %5259 = vmatpush3.bf16.msra.mxu1 %v5772_v10  ;;  %v6043_v49 = vsel %vm6018_vm2, 0, %v460_v40  ;;  %v649_v59 = vrot.slane %v647_v51, 1  ;;  %v612_v61 = vsel %vm6018_vm2, %v464_v52, 0  ;;  %v467_v5 = vor.u32 %v465_v60, %v464_v52  ;;  %v5793_v10 = vld [vmem:[%s7652_s1 + $0x8] sm:$0xff]  }
  0x1e   : > { %4794 = vmatprep.subr.bf16.mxu0 %v5774_v12  ;;  %5260 = vmatprep.subr.bf16.mxu1 %v5775_v13  ;;  %v632_v53 = vrot.slane %v630_v45, 1  ;;  %v6046_v54 = vsel %vm867_vm4, %v868_v47, %v869_v38  ;;  %v871_v55 = vrot.slane %v6043_v49, 1  ;;  %v640_v56 = vshrl.u32 %v6043_v49, 16 }
  0x1f   : > { %5268 = vmatprep.mubr.bf16.mxu1 %v6046_v54  ;;  %v642_v58 = vshll.u32 %v6043_v49, 16  ;;  %v875_v0 = vrot.slane %v612_v61, 1  ;;  %v659_v7 = vshll.u32 %v612_v61, 16  ;;  %v471_v9 = vrot.slane %v469_v1, 7  ;;  %v5804_v1 = vld [vmem:[%s7652_s1 + $0x60] sm:$0xff]  }
  0x20   : > { %v633_v62 = vor.u32 %v632_v53, %v628_v44  ;;  %v6058_v63 = vsel %vm867_vm4, %v871_v55, %v872_v50  ;;  %v476_v11 = vshrl.u32 %v5794_v2, 16  ;;  %v479_v12 = vshll.u32 %v5794_v2, 16 }
  0x21   : > { %4795 = vmatpush3.bf16.msra.mxu0 %v5776_v14  ;;  %5261 = vmatpush3.bf16.msra.mxu1 %v5775_v13  ;;  %v644_v4 = vrot.slane %v642_v58, 1  ;;  %v6072_v14 = vsel %vm6018_vm2, 0, %v467_v5  ;;  %v486_v31 = vshll.u32 %v5795_v3, 16 }
  0x22   : > { %4796 = vmatprep.subr.bf16.mxu0 %v5777_v15  ;;  %5262 = vmatprep.subr.bf16.mxu1 %v5778_v16  ;;  %v6064_v8 = vsel %vm626_vm3, %v633_v62, %v637_v46  ;;  %v661_v15 = vrot.slane %v659_v7, 1  ;;  %v652_v21 = vshrl.u32 %v6072_v14, 16  ;;  %v654_v24 = vshll.u32 %v6072_v14, 16 }
  0x23   : > { %1205 = vmatprep.mubr.bf16.mxu0 %v6064_v8  ;;  %v645_v13 = vor.u32 %v644_v4, %v640_v56  ;;  %v478_v25 = vrot.slane %v476_v11, 7  ;;  %v500_v4 = vshll.u32 %v5799_v37, 16 }
  0x24   : > { %v656_v34 = vrot.slane %v654_v24, 1 }
  0x25   : > { %4797 = vmatpush3.bf16.msra.mxu0 %v5779_v17  ;;  %5263 = vmatpush3.bf16.msra.mxu1 %v5778_v16  ;;  %v483_v16 = vshrl.u32 %v5795_v3, 16  ;;  %v5796_v17 = vld [vmem:[%s7652_s1 + $0x50] sm:$0xff]   ;;  %v481_v35 = vor.u32 %v479_v12, %v478_v25  ;;  %v6102_v36 = vsel %vm6018_vm2, %v478_v25, 0  ;;  %v5805_v12 = vld [vmem:[%s7652_s1 + $0x20] sm:$0xff]  }
  0x26   : > { %4798 = vmatprep.subr.bf16.mxu0 %v5780_v18  ;;  %5264 = vmatprep.subr.bf16.mxu1 %v5781_v19  ;;  %v874_v18 = vrot.slane %v6072_v14, 1  ;;  %v881_v38 = vrot.slane %v6102_v36, 1  ;;  %v657_v45 = vor.u32 %v656_v34, %v652_v21  ;;  %v683_v11 = vshll.u32 %v6102_v36, 16 }
  0x27   : > { %v485_v30 = vrot.slane %v483_v16, 7  ;;  %v6119_v46 = vsel %vm6018_vm2, 0, %v481_v35  ;;  %v5807_v35 = vld [vmem:[%s6001_s15 + $0x58] sm:$0xff]  }
  0x28   : > { %v880_v50 = vrot.slane %v6119_v46, 1  ;;  %v6133_v55 = vsel %vm626_vm3, %v657_v45, %v661_v15  ;;  %v676_v5 = vshrl.u32 %v6119_v46, 16 }
  0x29   : > { %4799 = vmatpush3.bf16.msra.mxu0 %v5782_v20  ;;  %5265 = vmatpush3.bf16.msra.mxu1 %v5781_v19  ;;  %v474_v19 = vor.u32 %v472_v6, %v471_v9  ;;  %v613_v20 = vsel %vm6018_vm2, %v471_v9, 0  ;;  %v488_v40 = vor.u32 %v486_v31, %v485_v30  ;;  %v6108_v41 = vsel %vm6018_vm2, %v485_v30, 0  ;;  %v5803_v6 = vld [vmem:[%s6001_s15 + $0x48] sm:$0xff]   ;;  %v5806_v30 = vld [vmem:[%s6001_s15 + $0x50] sm:$0xff]  }
  0x2a   : > { %4800 = vmatprep.subr.bf16.mxu0 %v5783_v22  ;;  %5266 = vmatprep.subr.bf16.mxu1 %v5784_v23  ;;  %v6083_v22 = vsel %vm626_vm3, %v645_v13, %v649_v59  ;;  %v884_v47 = vrot.slane %v6108_v41, 1  ;;  %v671_v53 = vshll.u32 %v613_v20, 16  ;;  %v5802_v59 = vld [vmem:[%s6001_s15 + $0x40] sm:$0xff]   ;;  %v6139_v60 = vsel %vm867_vm4, %v880_v50, %v881_v38 }
  0x2b   : > { %v6095_v28 = vsel %vm6018_vm2, 0, %v474_v19  ;;  %v6129_v51 = vsel %vm6018_vm2, 0, %v488_v40  ;;  %v504_v16 = vshrl.u32 %v5802_v59, 16  ;;  %v511_v34 = vshrl.u32 %v5803_v6, 16  ;;  %v5809_v40 = vld [vmem:[%s7652_s1 + $0x28] sm:$0xff]  }
  0x2c   : > { %v877_v33 = vrot.slane %v6095_v28, 1  ;;  %v664_v42 = vshrl.u32 %v6095_v28, 16  ;;  %v666_v52 = vshll.u32 %v6095_v28, 16  ;;  %v883_v56 = vrot.slane %v6129_v51, 1 }
  0x2d   : > { %4801 = vmatpush3.bf16.msra.mxu0 %v5785_v27  ;;  %5267 = vmatpush3.bf16.msra.mxu1 %v5784_v23  ;;  %v878_v23 = vrot.slane %v613_v20, 1  ;;  %v6091_v27 = vsel %vm867_vm4, %v874_v18, %v875_v0  ;;  %v673_v62 = vrot.slane %v671_v53, 1  ;;  %v497_v0 = vshrl.u32 %v5799_v37, 16  ;;  %v5808_v18 = vld [vmem:[%s7652_s1 + $0x68] sm:$0xff]  }
  0x2e   : > { %4922 = vmatprep.subr.bf16.mxu1 %v5788_v32  ;;  %v5798_v32 = vld [vmem:[%s6001_s15 + $0x30] sm:$0xff]   ;;  %v668_v61 = vrot.slane %v666_v52, 1  ;;  %v6147_v2 = vsel %vm867_vm4, %v883_v56, %v884_v47  ;;  %v685_v37 = vrot.slane %v683_v11, 1  ;;  %v514_v38 = vshll.u32 %v5803_v6, 16 }
  0x2f   : > { %v6115_v44 = vsel %vm867_vm4, %v877_v33, %v878_v23  ;;  %v493_v58 = vshll.u32 %v5798_v32, 16  ;;  %v499_v9 = vrot.slane %v497_v0, 7  ;;  %v506_v33 = vrot.slane %v504_v16, 7 }
  0x30   : > { %5269 = vmatmul.mubr.bf16.vlgmr.msra.gmra.mrb[0].mxu1 %v6058_v63  ;;  %1206 = vmatmul.mubr.bf16.vlgmr.msra.gmra.mrb[0].mxu0 %v6030_v39  ;;  %v669_v7 = vor.u32 %v668_v61, %v664_v42  ;;  %v513_v47 = vrot.slane %v511_v34, 7  ;;  %v690_v52 = vshll.u32 %v6129_v51, 16  ;;  %v518_v0 = vshrl.u32 %v5806_v30, 16 }
  0x31   : > { %4923 = vmatpush3.bf16.msra.mxu1 %v5789_v48  ;;  %1213 = vmatprep.mubr.bf16.mxu0 %v6083_v22  ;;  %v5801_v48 = vld [vmem:[%s7652_s1 + $0x18] sm:$0xff]   ;;  %v502_v20 = vor.u32 %v500_v4, %v499_v9  ;;  %v6166_v21 = vsel %vm6018_vm2, %v499_v9, 0  ;;  %v6194_v45 = vsel %vm6018_vm2, %v506_v33, 0  ;;  %v525_v4 = vshrl.u32 %v5807_v35, 16 }
  0x32   : > { %4924 = vmatprep.subr.bf16.mxu1 %v5792_v57  ;;  %5272 = vmatprep.mubr.bf16.mxu1 %v6091_v27  ;;  %v490_v57 = vshrl.u32 %v5798_v32, 16  ;;  %v6169_v23 = vsel %vm626_vm3, %v669_v7, %v673_v62  ;;  %v890_v25 = vrot.slane %v6166_v21, 1  ;;  %v893_v50 = vrot.slane %v6194_v45, 1 }
  0x33   : > { %v6181_v32 = vsel %vm6018_vm2, 0, %v502_v20  ;;  %v6211_v61 = vsel %vm6018_vm2, %v513_v47, 0  ;;  %v695_v62 = vshll.u32 %v6108_v41, 16  ;;  %v692_v9 = vrot.slane %v690_v52, 1 }
  0x34   : > { %v492_v3 = vrot.slane %v490_v57, 7  ;;  %v889_v36 = vrot.slane %v6181_v32, 1  ;;  %v516_v57 = vor.u32 %v514_v38, %v513_v47  ;;  %v896_v11 = vrot.slane %v6211_v61, 1  ;;  %v5813_v38 = vld [vmem:[%s7652_s1 + $0x30] sm:$0xff]  }
  0x35   : > { %4925 = vmatpush3.bf16.msra.mxu1 %v5793_v10  ;;  %v678_v10 = vshll.u32 %v6119_v46, 16  ;;  %v731_v29 = vshll.u32 %v6194_v45, 16 }
  0x36   : > { %4926 = vmatprep.subr.bf16.mxu1 %v5796_v17  ;;  %v495_v13 = vor.u32 %v493_v58, %v492_v3  ;;  %v6158_v15 = vsel %vm6018_vm2, %v492_v3, 0  ;;  %v507_v17 = vshll.u32 %v5802_v59, 16  ;;  %v6201_v53 = vsel %vm867_vm4, %v889_v36, %v890_v25 }
  0x37   : > { %v887_v19 = vrot.slane %v6158_v15, 1  ;;  %v688_v58 = vshrl.u32 %v6129_v51, 16  ;;  %v521_v3 = vshll.u32 %v5806_v30, 16 }
  0x38   : > { %5273 = vmatmul.mubr.bf16.gmra.mrb[4].mxu1 %v6115_v44  ;;  %1214 = vmatmul.mubr.bf16.gmra.mrb[4].mxu0 %v6043_v49  ;;  %v6173_v24 = vsel %vm6018_vm2, 0, %v495_v13  ;;  %v528_v13 = vshll.u32 %v5807_v35, 16 }
  0x39   : > { %4927 = vmatpush3.bf16.msra.mxu1 %v5797_v26  ;;  %1221 = vmatprep.mubr.bf16.mxu0 %v6133_v55  ;;  %v680_v26 = vrot.slane %v678_v10, 1  ;;  %v886_v31 = vrot.slane %v6173_v24, 1  ;;  %v520_v10 = vrot.slane %v518_v0, 7  ;;  %v702_v25 = vshll.u32 %v6173_v24, 16 }
  0x3a   : > { %4928 = vmatprep.subr.bf16.mxu1 %v5800_v43  ;;  %5276 = vmatprep.mubr.bf16.mxu1 %v6139_v60  ;;  %v509_v43 = vor.u32 %v507_v17, %v506_v33  ;;  %v693_v30 = vor.u32 %v692_v9, %v688_v58  ;;  %v700_v52 = vshrl.u32 %v6173_v24, 16 }
  0x3b   : > { %v6190_v42 = vsel %vm867_vm4, %v886_v31, %v887_v19  ;;  %v523_v16 = vor.u32 %v521_v3, %v520_v10  ;;  %v6231_v17 = vsel %vm6018_vm2, %v520_v10, 0  ;;  %v697_v31 = vrot.slane %v695_v62, 1 }
  0x3c   : > { %v6205_v56 = vsel %vm6018_vm2, 0, %v509_v43  ;;  %v899_v19 = vrot.slane %v6231_v17, 1  ;;  %v707_v10 = vshll.u32 %v6158_v15, 16  ;;  %v5816_v15 = vld [vmem:[%s7652_s1 + $0x78] sm:$0xff]  }
  0x3d   : > { %4929 = vmatpush3.bf16.msra.mxu1 %v5801_v48  ;;  %v681_v48 = vor.u32 %v680_v26, %v676_v5  ;;  %v892_v59 = vrot.slane %v6205_v56, 1  ;;  %v5810_v5 = vld [vmem:[%s6001_s15 + $0x60] sm:$0xff]   ;;  %v5812_v26 = vld [vmem:[%s7652_s1 + $0x70] sm:$0xff]   ;;  %v6243_v33 = vsel %vm6018_vm2, 0, %v523_v16  ;;  %v6266_v62 = vsel %vm626_vm3, %v693_v30, %v697_v31 }
  0x3e   : > { %4930 = vmatprep.subr.bf16.mxu1 %v5804_v1  ;;  %v6216_v1 = vsel %vm6018_vm2, 0, %v516_v57  ;;  %v532_v34 = vshrl.u32 %v5810_v5, 16  ;;  %v898_v36 = vrot.slane %v6243_v33, 1  ;;  %v704_v57 = vrot.slane %v702_v25, 1  ;;  %v5817_v25 = vld [vmem:[%s7652_s1 + $0x38] sm:$0xff]  }
  0x3f   : > { %v6220_v6 = vsel %vm626_vm3, %v681_v48, %v685_v37  ;;  %v6223_v7 = vsel %vm867_vm4, %v892_v59, %v893_v50  ;;  %v895_v41 = vrot.slane %v6216_v1, 1  ;;  %v535_v37 = vshll.u32 %v5810_v5, 16  ;;  %v5814_v59 = vld [vmem:[%s6001_s15 + $0x70] sm:$0xff]  }
  0x40   : > { %5277 = vmatmul.mubr.bf16.gmra.mrb[8].mxu1 %v6147_v2  ;;  %1222 = vmatmul.mubr.bf16.gmra.mrb[8].mxu0 %v6072_v14  ;;  %v534_v47 = vrot.slane %v532_v34, 7  ;;  %v6261_v50 = vsel %vm867_vm4, %v898_v36, %v899_v19  ;;  %v549_v16 = vshll.u32 %v5814_v59, 16  ;;  %v705_v30 = vor.u32 %v704_v57, %v700_v52 }
  0x41   : > { %4931 = vmatpush3.bf16.msra.mxu1 %v5805_v12  ;;  %1229 = vmatprep.mubr.bf16.mxu0 %v6169_v23  ;;  %v527_v12 = vrot.slane %v525_v4, 7  ;;  %v6246_v35 = vsel %vm867_vm4, %v895_v41, %v896_v11  ;;  %v5815_v4 = vld [vmem:[%s6001_s15 + $0x78] sm:$0xff]   ;;  %v709_v31 = vrot.slane %v707_v10, 1  ;;  %v714_v34 = vshll.u32 %v6181_v32, 16  ;;  %v5821_v10 = vld [vmem:[%s7652_s1 + $0x1c8] sm:$0xff]  }
  0x42   : > { %4932 = vmatprep.subr.bf16.mxu1 %v5808_v18  ;;  %5280 = vmatprep.mubr.bf16.mxu1 %v6190_v42  ;;  %v5811_v18 = vld [vmem:[%s6001_s15 + $0x68] sm:$0xff]   ;;  %v537_v0 = vor.u32 %v535_v37, %v534_v47  ;;  %v6270_v3 = vsel %vm6018_vm2, %v534_v47, 0  ;;  %v5818_v47 = vld [vmem:[%s7652_s1 + $0x1c0] sm:$0xff]   ;;  %v738_v45 = vshll.u32 %v6216_v1, 16 }
  0x43   : > { %v530_v20 = vor.u32 %v528_v13, %v527_v12  ;;  %v6258_v43 = vsel %vm6018_vm2, %v527_v12, 0  ;;  %v539_v48 = vshrl.u32 %v5811_v18, 16  ;;  %v542_v58 = vshll.u32 %v5811_v18, 16  ;;  %5058 = vmatprep.subr.bf16.mxu0 %v5818_v47 }
  0x44   : > { %v902_v9 = vrot.slane %v6258_v43, 1  ;;  %v6280_v11 = vsel %vm6018_vm2, 0, %v537_v0  ;;  %v905_v12 = vrot.slane %v6270_v3, 1  ;;  %v546_v13 = vshrl.u32 %v5814_v59, 16  ;;  %v6316_v0 = vld [vmem:[%s7652_s1 + $0x80] sm:$0xff]  }
  0x45   : > { %4933 = vmatpush3.bf16.msra.mxu1 %v5809_v40  ;;  %v6254_v40 = vsel %vm6018_vm2, 0, %v530_v20  ;;  %v541_v41 = vrot.slane %v539_v48, 7  ;;  %v904_v18 = vrot.slane %v6280_v11, 1  ;;  %v553_v20 = vshrl.u32 %v5815_v4, 16  ;;  %v5819_v48 = vld [vmem:[%s7652_s1 + $0x180] sm:$0xff]  }
  0x46   : > { %4934 = vmatprep.subr.bf16.mxu1 %v5812_v26  ;;  %v901_v5 = vrot.slane %v6254_v40, 1  ;;  %v548_v26 = vrot.slane %v546_v13, 7  ;;  %v556_v59 = vshll.u32 %v5815_v4, 16  ;;  %v6331_v4 = vsel %vm626_vm3, %v705_v30, %v709_v31  ;;  %5059 = vmatpush3.bf16.msra.mxu0 %v5819_v48  ;;  %v5822_v30 = vld [vmem:[%s7652_s1 + $0x188] sm:$0xff]   ;;  %v5824_v48 = vld [vmem:[%s7652_s1 + $0x1d0] sm:$0xff]  }
  0x47   : > { %v544_v19 = vor.u32 %v542_v58, %v541_v41  ;;  %v6298_v37 = vsel %vm6018_vm2, %v541_v41, 0  ;;  %v6307_v52 = vsel %vm867_vm4, %v904_v18, %v905_v12  ;;  %v555_v58 = vrot.slane %v553_v20, 7  ;;  %5060 = vmatprep.subr.bf16.mxu0 %v5821_v10  ;;  %v5825_v10 = vld [vmem:[%s7652_s1 + $0x190] sm:$0xff]  }
  0x48   : > { %5281 = vmatmul.mubr.bf16.gmra.mrb[12].mxu1 %v6201_v53  ;;  %1230 = vmatmul.mubr.bf16.gmra.mrb[12].mxu0 %v6095_v28  ;;  %v6294_v36 = vsel %vm867_vm4, %v901_v5, %v902_v9  ;;  %v6324_v9 = vsel %vm6018_vm2, %v548_v26, 0  ;;  %v712_v41 = vshrl.u32 %v6181_v32, 16  ;;  %v716_v12 = vrot.slane %v714_v34, 1 }
  0x49   : > { %5284 = vmatprep.mubr.bf16.mxu1 %v6223_v7  ;;  %1237 = vmatprep.mubr.bf16.mxu0 %v6220_v6  ;;  %v6311_v57 = vsel %vm6018_vm2, 0, %v544_v19  ;;  %v719_v13 = vshll.u32 %v6166_v21, 16  ;;  %v908_v18 = vrot.slane %v6298_v37, 1  ;;  %v911_v20 = vrot.slane %v6324_v9, 1 }
  0x4a   : > { %4935 = vmatpush3.bf16.msra.mxu1 %v5813_v38  ;;  %v551_v38 = vor.u32 %v549_v16, %v548_v26  ;;  %v907_v16 = vrot.slane %v6311_v57, 1  ;;  %v717_v21 = vor.u32 %v716_v12, %v712_v41  ;;  %v726_v26 = vshll.u32 %v6205_v56, 16  ;;  %5061 = vmatpush3.bf16.msra.mxu0 %v5822_v30  ;;  %v5831_v30 = vld [vmem:[%s7652_s1 + $0x1a0] sm:$0xff]  }
  0x4b   : > { %4936 = vmatprep.subr.bf16.mxu1 %v5816_v15  ;;  %v558_v15 = vor.u32 %v556_v59, %v555_v58  ;;  %v6359_v47 = vsel %vm6018_vm2, %v555_v58, 0  ;;  %v724_v59 = vshrl.u32 %v6205_v56, 16  ;;  %5062 = vmatprep.subr.bf16.mxu0 %v5824_v48 }
  0x4c   : > { %v6320_v5 = vsel %vm6018_vm2, 0, %v551_v38  ;;  %v6348_v31 = vsel %vm867_vm4, %v907_v16, %v908_v18  ;;  %v728_v12 = vrot.slane %v726_v26, 1  ;;  %v5827_v16 = vld [vmem:[%s7652_s1 + $0x1d8] sm:$0xff]   ;;  %v5830_v26 = vld [vmem:[%s7652_s1 + $0x1e0] sm:$0xff]  }
  0x4d   : > { %v910_v19 = vrot.slane %v6320_v5, 1  ;;  %v6355_v38 = vsel %vm6018_vm2, 0, %v558_v15 }
  0x4e   : > { %4937 = vmatpush3.bf16.msra.mxu1 %v5817_v25  ;;  %v721_v25 = vrot.slane %v719_v13, 1  ;;  %v913_v58 = vrot.slane %v6355_v38, 1  ;;  %v914_v13 = vrot.slane %v6359_v47, 1  ;;  %5063 = vmatpush3.bf16.msra.mxu0 %v5825_v10  ;;  %v729_v18 = vor.u32 %v728_v12, %v724_v59 }
  0x4f   : > { %5300 = vmatprep.subr.bf16.mxu1 %v6316_v0  ;;  %v6351_v34 = vsel %vm867_vm4, %v910_v19, %v911_v20  ;;  %v733_v19 = vrot.slane %v731_v29, 1  ;;  %v5828_v20 = vld [vmem:[%s7652_s1 + $0x198] sm:$0xff]   ;;  %5064 = vmatprep.subr.bf16.mxu0 %v5827_v16  ;;  %v740_v59 = vrot.slane %v738_v45, 1  ;;  %v5864_v10 = vmov 0  }
  0x50   : > { %5285 = vmatmul.mubr.bf16.gmra.mrb[16].mxu1 %v6246_v35  ;;  %1238 = vmatmul.mubr.bf16.gmra.mrb[16].mxu0 %v6119_v46  ;;  %v6370_v41 = vsel %vm626_vm3, %v717_v21, %v721_v25  ;;  %v6386_v15 = vsel %vm867_vm4, %v913_v58, %v914_v13  ;;  %v736_v21 = vshrl.u32 %v6216_v1, 16  ;;  %v743_v25 = vshll.u32 %v6211_v61, 16  ;;  %v5832_v61 = vld [vmem:[%s7652_s1 + $0x1e8] sm:$0xff]   ;;  %v5834_v13 = vld [vmem:[%s7652_s1 + $0x1f0] sm:$0xff]  }
  0x51   : > { %5288 = vmatprep.mubr.bf16.mxu1 %v6261_v50  ;;  %1245 = vmatprep.mubr.bf16.mxu0 %v6266_v62  ;;  %v6398_v48 = vsel %vm626_vm3, %v729_v18, %v733_v19  ;;  %v750_v29 = vshll.u32 %v6243_v33, 16  ;;  %v5833_v58 = vld [vmem:[%s7652_s1 + $0x1a8] sm:$0xff]   ;;  %v755_v18 = vshll.u32 %v6231_v17, 16  ;;  %v748_v45 = vshrl.u32 %v6243_v33, 16  ;;  %v5836_v17 = vld [vmem:[%s7652_s1 + $0x1f8] sm:$0xff]  }
  0x52   : > { %5065 = vmatpush3.bf16.msra.mxu0 %v5828_v20  ;;  %v745_v12 = vrot.slane %v743_v25, 1  ;;  %v741_v16 = vor.u32 %v740_v59, %v736_v21  ;;  %v5823_v19 = vld [vmem:[%s7652_s1 + $0x88] sm:$0xff]   ;;  %v5835_v20 = vld [vmem:[%s7652_s1 + $0x1b0] sm:$0xff]  }
  0x53   : > { %5066 = vmatprep.subr.bf16.mxu0 %v5830_v26  ;;  %v752_v21 = vrot.slane %v750_v29, 1  ;;  %v762_v26 = vshll.u32 %v6254_v40, 16  ;;  %v757_v59 = vrot.slane %v755_v18, 1  ;;  %v760_v29 = vshrl.u32 %v6254_v40, 16 }
  0x54   : > { %v6423_v25 = vsel %vm626_vm3, %v741_v16, %v745_v12  ;;  %v5838_v16 = vld [vmem:[%s7652_s1 + $0xa0] sm:$0xff]  }
  0x56   : > { %5067 = vmatpush3.bf16.msra.mxu0 %v5831_v30  ;;  %v5826_v30 = vld [vmem:[%s7652_s1 + $0x90] sm:$0xff]  }
  0x57   : > { %5068 = vmatprep.subr.bf16.mxu0 %v5832_v61  ;;  %v5837_v61 = vld [vmem:[%s7652_s1 + $0x1b8] sm:$0xff]  }
  0x58   : > { %5289 = vmatmul.mubr.bf16.gmra.mrb[20].mxu1 %v6294_v36  ;;  %1246 = vmatmul.mubr.bf16.gmra.mrb[20].mxu0 %v6129_v51 }
  0x59   : > { %5292 = vmatprep.mubr.bf16.mxu1 %v6307_v52  ;;  %1253 = vmatprep.mubr.bf16.mxu0 %v6331_v4 }
  0x5a   : > { %5069 = vmatpush3.bf16.msra.mxu0 %v5833_v58  ;;  %v764_v58 = vrot.slane %v762_v26, 1  ;;  %v5840_v26 = vld [vmem:[%s7652_s1 + $0xb0] sm:$0xff]  }
  0x5b   : > { %5070 = vmatprep.subr.bf16.mxu0 %v5834_v13  ;;  %v767_v13 = vshll.u32 %v6258_v43, 16  ;;  %v5839_v43 = vld [vmem:[%s7652_s1 + $0xa8] sm:$0xff]  }
  0x5d   : > { %v769_v18 = vrot.slane %v767_v13, 1  ;;  %v6485_v13 = vld [vmem:[%s7652_s1 + $0x200] sm:$0xff]  }
  0x5e   : > { %5071 = vmatpush3.bf16.msra.mxu0 %v5835_v20  ;;  %v772_v20 = vshrl.u32 %v6280_v11, 16 }
  0x5f   : > { %5072 = vmatprep.subr.bf16.mxu0 %v5836_v17  ;;  %v779_v17 = vshll.u32 %v6270_v3, 16  ;;  %v5841_v3 = vld [vmem:[%s7652_s1 + $0xb8] sm:$0xff]  }
  0x60   : > { %5293 = vmatmul.mubr.bf16.gmra.mrb[24].mxu1 %v6348_v31  ;;  %1254 = vmatmul.mubr.bf16.gmra.mrb[24].mxu0 %v6173_v24 }
  0x61   : > { %5296 = vmatprep.mubr.bf16.mxu1 %v6351_v34  ;;  %1261 = vmatprep.mubr.bf16.mxu0 %v6370_v41 }
  0x62   : > { %5073 = vmatpush3.bf16.msra.mxu0 %v5837_v61  ;;  %v786_v61 = vshll.u32 %v6311_v57, 16 }
  0x68   : > { %5297 = vmatmul.mubr.bf16.gmra.mrb[28].mxu1 %v6386_v15  ;;  %1262 = vmatmul.mubr.bf16.gmra.mrb[28].mxu0 %v6181_v32 }
  0x69   : > { %1671 = vmatprep.mubr.bf16.mxu1 %v5864_v10  ;;  %1269 = vmatprep.mubr.bf16.mxu0 %v6398_v48 }
  0x70   : > { %1672 = vmatmul.mubr.bf16.vlgmr.msra.gmra.mrb[32].mxu1 %v5864_v10  ;;  %1270 = vmatmul.mubr.bf16.gmra.mrb[32].mxu0 %v6205_v56 }
  0x71   : > { %5301 = vmatpush3.bf16.msra.mxu1 %v6316_v0  ;;  %1679 = vmatprep.mubr.bf16.mxu1 %v6064_v8  ;;  %v753_v0 = vor.u32 %v752_v21, %v748_v45  ;;  %v5829_v8 = vld [vmem:[%s7652_s1 + $0x98] sm:$0xff]  }
  0x72   : > { %5302 = vmatprep.subr.bf16.mxu1 %v5823_v19  ;;  %1277 = vmatprep.mubr.bf16.mxu0 %v6423_v25 }
  0x73   : > { %v6444_v12 = vsel %vm626_vm3, %v753_v0, %v757_v59  ;;  %v781_v59 = vrot.slane %v779_v17, 1 }
  0x75   : > { %5303 = vmatpush3.bf16.msra.mxu1 %v5823_v19  ;;  %v774_v19 = vshll.u32 %v6280_v11, 16 }
  0x76   : > { %5304 = vmatprep.subr.bf16.mxu1 %v5826_v30 }
  0x77   : > { %v776_v21 = vrot.slane %v774_v19, 1  ;;  %v796_v19 = vshrl.u32 %v6320_v5, 16 }
  0x78   : > { %1680 = vmatmul.mubr.bf16.gmra.mrb[36].mxu1 %v6030_v39  ;;  %1278 = vmatmul.mubr.bf16.gmra.mrb[36].mxu0 %v6216_v1  ;;  %v765_v39 = vor.u32 %v764_v58, %v760_v29  ;;  %v788_v29 = vrot.slane %v786_v61, 1  ;;  %v791_v58 = vshll.u32 %v6298_v37, 16 }
  0x79   : > { %1687 = vmatprep.mubr.bf16.mxu1 %v6083_v22  ;;  %5305 = vmatpush3.bf16.msra.mxu1 %v5826_v30  ;;  %v777_v30 = vor.u32 %v776_v21, %v772_v20  ;;  %v803_v20 = vshll.u32 %v6324_v9, 16  ;;  %v815_v9 = vshll.u32 %v6359_v47, 16 }
  0x7a   : > { %5306 = vmatprep.subr.bf16.mxu1 %v5829_v8  ;;  %1285 = vmatprep.mubr.bf16.mxu0 %v6444_v12  ;;  %v6460_v45 = vsel %vm626_vm3, %v765_v39, %v769_v18  ;;  %v793_v39 = vrot.slane %v791_v58, 1  ;;  %v798_v18 = vshll.u32 %v6320_v5, 16 }
  0x7b   : > { %v6476_v0 = vsel %vm626_vm3, %v777_v30, %v781_v59  ;;  %v805_v17 = vrot.slane %v803_v20, 1  ;;  %v808_v59 = vshrl.u32 %v6355_v38, 16 }
  0x7d   : > { %5307 = vmatpush3.bf16.msra.mxu1 %v5829_v8  ;;  %v784_v8 = vshrl.u32 %v6311_v57, 16 }
  0x7e   : > { %5308 = vmatprep.subr.bf16.mxu1 %v5838_v16 }
  0x80   : > { %1688 = vmatmul.mubr.bf16.gmra.mrb[40].mxu1 %v6043_v49  ;;  %1286 = vmatmul.mubr.bf16.gmra.mrb[40].mxu0 %v6243_v33 }
  0x81   : > { %1695 = vmatprep.mubr.bf16.mxu1 %v6133_v55  ;;  %5309 = vmatpush3.bf16.msra.mxu1 %v5838_v16  ;;  %v789_v16 = vor.u32 %v788_v29, %v784_v8  ;;  %v817_v8 = vrot.slane %v815_v9, 1 }
  0x82   : > { %5310 = vmatprep.subr.bf16.mxu1 %v5839_v43  ;;  %1293 = vmatprep.mubr.bf16.mxu0 %v6460_v45 }
  0x83   : > { %v6492_v37 = vsel %vm626_vm3, %v789_v16, %v793_v39 }
  0x85   : > { %5311 = vmatpush3.bf16.msra.mxu1 %v5839_v43  ;;  %v800_v43 = vrot.slane %v798_v18, 1 }
  0x86   : > { %5312 = vmatprep.subr.bf16.mxu1 %v5840_v26 }
  0x87   : > { %v801_v21 = vor.u32 %v800_v43, %v796_v19 }
  0x88   : > { %1696 = vmatmul.mubr.bf16.gmra.mrb[44].mxu1 %v6072_v14  ;;  %1294 = vmatmul.mubr.bf16.gmra.mrb[44].mxu0 %v6254_v40 }
  0x89   : > { %1703 = vmatprep.mubr.bf16.mxu1 %v6169_v23  ;;  %5313 = vmatpush3.bf16.msra.mxu1 %v5840_v26  ;;  %v810_v26 = vshll.u32 %v6355_v38, 16  ;;  %v6502_v30 = vsel %vm626_vm3, %v801_v21, %v805_v17 }
  0x8a   : > { %5314 = vmatprep.subr.bf16.mxu1 %v5841_v3  ;;  %1301 = vmatprep.mubr.bf16.mxu0 %v6476_v0 }
  0x8b   : > { %v812_v61 = vrot.slane %v810_v26, 1 }
  0x8d   : > { %5315 = vmatpush3.bf16.msra.mxu1 %v5841_v3  ;;  %v813_v3 = vor.u32 %v812_v61, %v808_v59 }
  0x8e   : > { %5348 = vmatprep.subr.bf16.mxu1 %v6485_v13 }
  0x8f   : > { %v6511_v29 = vsel %vm626_vm3, %v813_v3, %v817_v8 }
  0x90   : > { %1704 = vmatmul.mubr.bf16.gmra.mrb[48].mxu1 %v6095_v28  ;;  %1302 = vmatmul.mubr.bf16.gmra.mrb[48].mxu0 %v6280_v11 }
  0x91   : > { %1711 = vmatprep.mubr.bf16.mxu1 %v6220_v6  ;;  %1309 = vmatprep.mubr.bf16.mxu0 %v6492_v37 }
  0x98   : > { %1712 = vmatmul.mubr.bf16.gmra.mrb[52].mxu1 %v6119_v46  ;;  %1310 = vmatmul.mubr.bf16.gmra.mrb[52].mxu0 %v6311_v57 }
  0x99   : > { %1719 = vmatprep.mubr.bf16.mxu1 %v6266_v62  ;;  %1317 = vmatprep.mubr.bf16.mxu0 %v6502_v30 }
  0xa0   : > { %1720 = vmatmul.mubr.bf16.gmra.mrb[56].mxu1 %v6129_v51  ;;  %1318 = vmatmul.mubr.bf16.gmra.mrb[56].mxu0 %v6320_v5 }
  0xa1   : > { %1727 = vmatprep.mubr.bf16.mxu1 %v6331_v4  ;;  %1325 = vmatprep.mubr.bf16.mxu0 %v6511_v29 }
  0xa8   : > { %1728 = vmatmul.mubr.bf16.gmra.mrb[60].mxu1 %v6173_v24  ;;  %1326 = vmatmul.mubr.bf16.gmra.mrb[60].mxu0 %v6355_v38 }
  0xa9   : > { %1735 = vmatprep.mubr.bf16.mxu1 %v6370_v41  ;;  %2186 = vmatprep.mubr.bf16.mxu0 %v6083_v22  ;;  %v5845_v22 = vld [vmem:[%s7652_s1 + $0x218] sm:$0xff]  }
  0xb0   : > { %1736 = vmatmul.mubr.bf16.gmra.mrb[64].mxu1 %v6181_v32  ;;  %2187 = vmatmul.mubr.bf16.vlgmr.msra.gmra.mrb[64].mxu0 %v6043_v49  ;;  %v5843_v49 = vld [vmem:[%s7652_s1 + $0x208] sm:$0xff]  }
  0xb1   : > { %1743 = vmatprep.mubr.bf16.mxu1 %v6398_v48  ;;  %2194 = vmatprep.mubr.bf16.mxu0 %v6133_v55  ;;  %v5849_v55 = vld [vmem:[%s7652_s1 + $0x238] sm:$0xff]  }
  0xb8   : > { %1744 = vmatmul.mubr.bf16.gmra.mrb[68].mxu1 %v6205_v56  ;;  %2195 = vmatmul.mubr.bf16.gmra.mrb[68].mxu0 %v6072_v14  ;;  %v5844_v14 = vld [vmem:[%s7652_s1 + $0x210] sm:$0xff]  }
  0xb9   : > { %1751 = vmatprep.mubr.bf16.mxu1 %v6423_v25  ;;  %2202 = vmatprep.mubr.bf16.mxu0 %v6169_v23 }
  0xc0   : > { %1752 = vmatmul.mubr.bf16.gmra.mrb[72].mxu1 %v6216_v1  ;;  %2203 = vmatmul.mubr.bf16.gmra.mrb[72].mxu0 %v6095_v28  ;;  %v5847_v28 = vld [vmem:[%s7652_s1 + $0x228] sm:$0xff]  }
  0xc1   : > { %1759 = vmatprep.mubr.bf16.mxu1 %v6444_v12  ;;  %2210 = vmatprep.mubr.bf16.mxu0 %v6220_v6 }
  0xc8   : > { %1760 = vmatmul.mubr.bf16.gmra.mrb[76].mxu1 %v6243_v33  ;;  %2211 = vmatmul.mubr.bf16.gmra.mrb[76].mxu0 %v6119_v46  ;;  %v5848_v46 = vld [vmem:[%s7652_s1 + $0x230] sm:$0xff]  }
  0xc9   : > { %1767 = vmatprep.mubr.bf16.mxu1 %v6460_v45  ;;  %2218 = vmatprep.mubr.bf16.mxu0 %v6266_v62 }
  0xd0   : > { %1768 = vmatmul.mubr.bf16.gmra.mrb[80].mxu1 %v6254_v40  ;;  %2219 = vmatmul.mubr.bf16.gmra.mrb[80].mxu0 %v6129_v51 }
  0xd1   : > { %1775 = vmatprep.mubr.bf16.mxu1 %v6476_v0  ;;  %2226 = vmatprep.mubr.bf16.mxu0 %v6331_v4 }
  0xd8   : > { %1776 = vmatmul.mubr.bf16.gmra.mrb[84].mxu1 %v6280_v11  ;;  %2227 = vmatmul.mubr.bf16.gmra.mrb[84].mxu0 %v6173_v24 }
  0xd9   : > { %1783 = vmatprep.mubr.bf16.mxu1 %v6492_v37  ;;  %2234 = vmatprep.mubr.bf16.mxu0 %v6370_v41 }
  0xe0   : > { %1784 = vmatmul.mubr.bf16.gmra.mrb[88].mxu1 %v6311_v57  ;;  %2235 = vmatmul.mubr.bf16.gmra.mrb[88].mxu0 %v6181_v32 }
  0xe1   : > { %1791 = vmatprep.mubr.bf16.mxu1 %v6502_v30  ;;  %2242 = vmatprep.mubr.bf16.mxu0 %v6398_v48 }
  0xe8   : > { %1792 = vmatmul.mubr.bf16.gmra.mrb[92].mxu1 %v6320_v5  ;;  %2243 = vmatmul.mubr.bf16.gmra.mrb[92].mxu0 %v6205_v56 }
  0xe9   : > { %5316 = vmatprep.mubr.bf16.mxu1 %v5864_v10  ;;  %2250 = vmatprep.mubr.bf16.mxu0 %v6423_v25 }
  0xf0   : > { %5317 = vmatmul.mubr.bf16.vlgmr.msra.gmra.mrb[0].mxu1 %v6046_v54  ;;  %2251 = vmatmul.mubr.bf16.gmra.mrb[96].mxu0 %v6216_v1  ;;  %v5846_v54 = vld [vmem:[%s7652_s1 + $0x220] sm:$0xff]  }
  0xf1   : > { %5349 = vmatpush3.bf16.msra.mxu1 %v6485_v13  ;;  %5320 = vmatprep.mubr.bf16.mxu1 %v6058_v63 }
  0xf2   : > { %5350 = vmatprep.subr.bf16.mxu1 %v5843_v49  ;;  %2258 = vmatprep.mubr.bf16.mxu0 %v6444_v12 }
  0xf5   : > { %5351 = vmatpush3.bf16.msra.mxu1 %v5843_v49 }
  0xf6   : > { %5352 = vmatprep.subr.bf16.mxu1 %v5844_v14 }
  0xf8   : > { %5321 = vmatmul.mubr.bf16.gmra.mrb[4].mxu1 %v6091_v27  ;;  %2259 = vmatmul.mubr.bf16.gmra.mrb[100].mxu0 %v6243_v33 }
  0xf9   : > { %5324 = vmatprep.mubr.bf16.mxu1 %v6115_v44  ;;  %5353 = vmatpush3.bf16.msra.mxu1 %v5844_v14 }
  0xfa   : > { %5354 = vmatprep.subr.bf16.mxu1 %v5845_v22  ;;  %2266 = vmatprep.mubr.bf16.mxu0 %v6460_v45 }
  0xfd   : > { %5355 = vmatpush3.bf16.msra.mxu1 %v5845_v22 }
  0xfe   : > { %5356 = vmatprep.subr.bf16.mxu1 %v5846_v54 }
 0x100   : > { %5325 = vmatmul.mubr.bf16.gmra.mrb[8].mxu1 %v6139_v60  ;;  %2267 = vmatmul.mubr.bf16.gmra.mrb[104].mxu0 %v6254_v40 }
 0x101   : > { %5328 = vmatprep.mubr.bf16.mxu1 %v6147_v2  ;;  %5357 = vmatpush3.bf16.msra.mxu1 %v5846_v54 }
 0x102   : > { %5358 = vmatprep.subr.bf16.mxu1 %v5847_v28  ;;  %2274 = vmatprep.mubr.bf16.mxu0 %v6476_v0 }
 0x103   : > { %v4802_v51 = vpop.f32.mrb[0].mxu0 }
 0x104   : > { %v4803_v23 = vpop.f32.mrb[1].mxu0 }
 0x105   : > { %5359 = vmatpush3.bf16.msra.mxu1 %v5847_v28  ;;  %v6586_v24 = vadd.f32 %v4803_v23, %v4802_v51  ;;  %v4805_v32 = vpop.f32.mrb[2].mxu0 }
 0x106   : > { %5360 = vmatprep.subr.bf16.mxu1 %v5848_v46  ;;  %v4806_v56 = vpop.f32.mrb[3].mxu0 }
 0x107   : > { %v6590_v1 = vadd.f32 %v4806_v56, %v4805_v32 }
 0x108   : > { %5329 = vmatmul.mubr.bf16.gmra.mrb[12].mxu1 %v6190_v42  ;;  %2275 = vmatmul.mubr.bf16.gmra.mrb[108].mxu0 %v6280_v11 }
 0x109   : > { %5332 = vmatprep.mubr.bf16.mxu1 %v6201_v53  ;;  %5361 = vmatpush3.bf16.msra.mxu1 %v5848_v46 }
 0x10a   : > { %5362 = vmatprep.subr.bf16.mxu1 %v5849_v55  ;;  %2282 = vmatprep.mubr.bf16.mxu0 %v6492_v37 }
 0x10b   : > { %v4808_v6 = vpop.f32.mrb[4].mxu0 }
 0x10c   : > { %v4809_v33 = vpop.f32.mrb[5].mxu0 }
 0x10d   : > { %5363 = vmatpush3.bf16.msra.mxu1 %v5849_v55  ;;  %v6594_v40 = vadd.f32 %v4809_v33, %v4808_v6  ;;  %v4811_v62 = vpop.f32.mrb[6].mxu0 }
 0x10e   : > { %v4812_v4 = vpop.f32.mrb[7].mxu0 }
 0x10f   : > { %v6598_v47 = vadd.f32 %v4812_v4, %v4811_v62 }
 0x110   : > { %5333 = vmatmul.mubr.bf16.gmra.mrb[16].mxu1 %v6223_v7  ;;  %2283 = vmatmul.mubr.bf16.gmra.mrb[112].mxu0 %v6311_v57 }
 0x111   : > { %5336 = vmatprep.mubr.bf16.mxu1 %v6246_v35  ;;  %2290 = vmatprep.mubr.bf16.mxu0 %v6502_v30 }
 0x113   : > { %v4814_v11 = vpop.f32.mrb[8].mxu0 }
 0x114   : > { %v4815_v41 = vpop.f32.mrb[9].mxu0 }
 0x115   : > { %v6602_v48 = vadd.f32 %v4815_v41, %v4814_v11  ;;  %v4817_v25 = vpop.f32.mrb[10].mxu0 }
 0x116   : > { %v4818_v12 = vpop.f32.mrb[11].mxu0 }
 0x117   : > { %v6606_v45 = vadd.f32 %v4818_v12, %v4817_v25 }
 0x118   : > { %5337 = vmatmul.mubr.bf16.gmra.mrb[20].mxu1 %v6261_v50  ;;  %2291 = vmatmul.mubr.bf16.gmra.mrb[116].mxu0 %v6320_v5 }
 0x119   : > { %5340 = vmatprep.mubr.bf16.mxu1 %v6294_v36  ;;  %2298 = vmatprep.mubr.bf16.mxu0 %v6511_v29 }
 0x11b   : > { %v4820_v0 = vpop.f32.mrb[12].mxu0 }
 0x11c   : > { %v4821_v57 = vpop.f32.mrb[13].mxu0 }
 0x11d   : > { %v6610_v58 = vadd.f32 %v4821_v57, %v4820_v0  ;;  %v4823_v13 = vpop.f32.mrb[14].mxu0 }
 0x11e   : > { %v4824_v16 = vpop.f32.mrb[15].mxu0 }
 0x11f   : > { %v6614_v39 = vadd.f32 %v4824_v16, %v4823_v13 }
 0x120   : > { %5341 = vmatmul.mubr.bf16.gmra.mrb[24].mxu1 %v6307_v52  ;;  %2299 = vmatmul.mubr.bf16.gmra.mrb[120].mxu0 %v6355_v38 }
 0x121   : > { %5344 = vmatprep.mubr.bf16.mxu1 %v6348_v31  ;;  %2306 = vmatprep.mubr.bf16.mxu0 %v5864_v10 }
 0x123   : > { %v4826_v18 = vpop.f32.mrb[16].mxu0 }
 0x124   : > { %v4827_v5 = vpop.f32.mrb[17].mxu0 }
 0x125   : > { %v6618_v37 = vadd.f32 %v4827_v5, %v4826_v18  ;;  %v4829_v19 = vpop.f32.mrb[18].mxu0 }
 0x126   : > { %v4830_v43 = vpop.f32.mrb[19].mxu0 }
 0x127   : > { %v6622_v20 = vadd.f32 %v4830_v43, %v4829_v19 }
 0x128   : > { %5345 = vmatmul.mubr.bf16.gmra.mrb[28].mxu1 %v6351_v34  ;;  %2307 = vmatmul.mubr.bf16.gmra.mrb[124].mxu0 %v5864_v10 }
 0x129   : > { %5364 = vmatprep.mubr.bf16.mxu1 %v6058_v63 }
 0x12b   : > { %v4832_v21 = vpop.f32.mrb[20].mxu0 }
 0x12c   : > { %v4833_v17 = vpop.f32.mrb[21].mxu0 }
 0x12d   : > { %v6625_v26 = vadd.f32 %v4833_v17, %v4832_v21  ;;  %v4835_v38 = vpop.f32.mrb[22].mxu0 }
 0x12e   : > { %v4836_v30 = vpop.f32.mrb[23].mxu0 }
 0x12f   : > { %v6629_v59 = vadd.f32 %v4836_v30, %v4835_v38 }
 0x130   : > { %5365 = vmatmul.mubr.bf16.vlgmr.msra.gmra.mrb[0].mxu1 %v6091_v27 }
 0x131   : > { %5368 = vmatprep.mubr.bf16.mxu1 %v6115_v44 }
 0x133   : > { %v4838_v61 = vpop.f32.mrb[24].mxu0 }
 0x134   : > { %v4839_v9 = vpop.f32.mrb[25].mxu0 }
 0x135   : > { %v6631_v3 = vadd.f32 %v4839_v9, %v4838_v61  ;;  %v4841_v63 = vpop.f32.mrb[26].mxu0 }
 0x136   : > { %v4842_v8 = vpop.f32.mrb[27].mxu0 }
 0x137   : > { %v6635_v29 = vadd.f32 %v4842_v8, %v4841_v63  ;;  %v5865_v8 = vmov 0.0|0.0  }
 0x138   : > { %5369 = vmatmul.mubr.bf16.gmra.mrb[4].mxu1 %v6139_v60  ;;  %5508 = vmatprep.subr.bf16.mxu0 %v5865_v8 }
 0x139   : > { %5372 = vmatprep.mubr.bf16.mxu1 %v6147_v2 }
 0x13b   : > { %v4844_v49 = vpop.f32.mrb[28].mxu0 }
 0x13c   : > { %v4845_v14 = vpop.f32.mrb[29].mxu0 }
 0x13d   : > { %v6637_v27 = vadd.f32 %v4845_v14, %v4844_v49  ;;  %v4847_v22 = vpop.f32.mrb[30].mxu0 }
 0x13e   : > { %v4848_v44 = vpop.f32.mrb[31].mxu0 }
 0x13f   : > { %v6641_v54 = vadd.f32 %v4848_v44, %v4847_v22 }
 0x140   : > { %5373 = vmatmul.mubr.bf16.gmra.mrb[8].mxu1 %v6190_v42 }
 0x141   : > { %5376 = vmatprep.mubr.bf16.mxu1 %v6201_v53 }
 0x143   : > { %v4938_v28 = vpop.f32.mrb[32].mxu1  ;;  %v4850_v55 = vpop.f32.mrb[32].mxu0 }
 0x144   : > { %v4939_v46 = vpop.f32.mrb[33].mxu1  ;;  %v4851_v23 = vpop.f32.mrb[33].mxu0 }
 0x145   : > { %v4940_v60 = vadd.f32 %v4939_v46, %v4938_v28  ;;  %v4941_v51 = vpop.f32.mrb[34].mxu1  ;;  %v6646_v6 = vadd.f32 %v4851_v23, %v4850_v55  ;;  %v4853_v33 = vpop.f32.mrb[34].mxu0 }
 0x146   : > { %v4942_v2 = vpop.f32.mrb[35].mxu1  ;;  %v4854_v42 = vpop.f32.mrb[35].mxu0 }
 0x147   : > { %v6644_v32 = vadd.f32 %v4940_v60, %v6586_v24  ;;  %v4943_v56 = vadd.f32 %v4942_v2, %v4941_v51  ;;  %v6653_v62 = vadd.f32 %v4854_v42, %v4853_v33 }
 0x148   : > { %5377 = vmatmul.mubr.bf16.gmra.mrb[12].mxu1 %v6223_v7 }
 0x149   : > { %v6650_v53 = vadd.f32 %v4943_v56, %v6590_v1  ;;  %5380 = vmatprep.mubr.bf16.mxu1 %v6246_v35 }
 0x14b   : > { %v4944_v4 = vpop.f32.mrb[36].mxu1  ;;  %v4856_v24 = vpop.f32.mrb[36].mxu0 }
 0x14c   : > { %v4945_v11 = vpop.f32.mrb[37].mxu1  ;;  %v4857_v0 = vpop.f32.mrb[37].mxu0 }
 0x14d   : > { %v4946_v41 = vadd.f32 %v4945_v11, %v4944_v4  ;;  %v4947_v25 = vpop.f32.mrb[38].mxu1  ;;  %v6658_v7 = vadd.f32 %v4857_v0, %v4856_v24  ;;  %v4859_v16 = vpop.f32.mrb[38].mxu0 }
 0x14e   : > { %v4948_v12 = vpop.f32.mrb[39].mxu1  ;;  %v4860_v1 = vpop.f32.mrb[39].mxu0 }
 0x14f   : > { %v6656_v57 = vadd.f32 %v4946_v41, %v6594_v40  ;;  %v4949_v13 = vadd.f32 %v4948_v12, %v4947_v25  ;;  %v6665_v18 = vadd.f32 %v4860_v1, %v4859_v16 }
 0x150   : > { %5381 = vmatmul.mubr.bf16.gmra.mrb[16].mxu1 %v6261_v50 }
 0x151   : > { %v6662_v35 = vadd.f32 %v4949_v13, %v6598_v47  ;;  %5384 = vmatprep.mubr.bf16.mxu1 %v6294_v36 }
 0x153   : > { %v4950_v5 = vpop.f32.mrb[40].mxu1  ;;  %v4862_v40 = vpop.f32.mrb[40].mxu0 }
 0x154   : > { %v4951_v19 = vpop.f32.mrb[41].mxu1  ;;  %v4863_v38 = vpop.f32.mrb[41].mxu0 }
 0x155   : > { %v4952_v43 = vadd.f32 %v4951_v19, %v4950_v5  ;;  %v4953_v21 = vpop.f32.mrb[42].mxu1  ;;  %v6670_v50 = vadd.f32 %v4863_v38, %v4862_v40  ;;  %v4865_v9 = vpop.f32.mrb[42].mxu0  ;;  %v2659_v40 = vld [vmem:[%s7654_s3 + $0x18] sm:$0xff] }
 0x156   : > { %v4954_v17 = vpop.f32.mrb[43].mxu1  ;;  %v4866_v47 = vpop.f32.mrb[43].mxu0 }
 0x157   : > { %v6668_v30 = vadd.f32 %v4952_v43, %v6602_v48  ;;  %v4955_v61 = vadd.f32 %v4954_v17, %v4953_v21  ;;  %v6677_v63 = vadd.f32 %v4866_v47, %v4865_v9 }
 0x158   : > { %5385 = vmatmul.mubr.bf16.gmra.mrb[20].mxu1 %v6307_v52  ;;  %v2656_v52 = vld [vmem:[%s7654_s3] sm:$0xff] }
 0x159   : > { %v6674_v36 = vadd.f32 %v4955_v61, %v6606_v45  ;;  %5388 = vmatprep.mubr.bf16.mxu1 %v6348_v31  ;;  %v2657_v45 = vld [vmem:[%s7654_s3 + $0x8] sm:$0xff] }
 0x15a   : > { %v5509_v46 = vpack.c.bf16 %v2657_v45, %v2656_v52 }
 0x15b   : > { %v4956_v49 = vpop.f32.mrb[44].mxu1  ;;  %v4868_v44 = vpop.f32.mrb[44].mxu0 }
 0x15c   : > { %v4957_v48 = vpop.f32.mrb[45].mxu1  ;;  %v4869_v31 = vpop.f32.mrb[45].mxu0  ;;  %5510 = vmatpush3.bf16.msra.mxu0 %v5509_v46 }
 0x15d   : > { %v4958_v14 = vadd.f32 %v4957_v48, %v4956_v49  ;;  %v4959_v22 = vpop.f32.mrb[46].mxu1  ;;  %v6689_v55 = vadd.f32 %v4869_v31, %v4868_v44  ;;  %v4871_v2 = vpop.f32.mrb[46].mxu0  ;;  %5511 = vmatprep.subr.bf16.mxu0 %v5865_v8 }
 0x15e   : > { %v4960_v28 = vpop.f32.mrb[47].mxu1  ;;  %v4872_v23 = vpop.f32.mrb[47].mxu0 }
 0x15f   : > { %v6687_v60 = vadd.f32 %v4958_v14, %v6610_v58  ;;  %v4961_v51 = vadd.f32 %v4960_v28, %v4959_v22  ;;  %v6696_v33 = vadd.f32 %v4872_v23, %v4871_v2 }
 0x160   : > { %5389 = vmatmul.mubr.bf16.gmra.mrb[24].mxu1 %v6351_v34 }
 0x161   : > { %v6693_v56 = vadd.f32 %v4961_v51, %v6614_v39  ;;  %5392 = vmatprep.mubr.bf16.mxu1 %v6386_v15 }
 0x163   : > { %v4962_v42 = vpop.f32.mrb[48].mxu1  ;;  %v4874_v41 = vpop.f32.mrb[48].mxu0 }
 0x164   : > { %v4963_v58 = vpop.f32.mrb[49].mxu1  ;;  %v4875_v24 = vpop.f32.mrb[49].mxu0 }
 0x165   : > { %v4964_v4 = vadd.f32 %v4963_v58, %v4962_v42  ;;  %v4965_v11 = vpop.f32.mrb[50].mxu1  ;;  %v6702_v0 = vadd.f32 %v4875_v24, %v4874_v41  ;;  %v4877_v39 = vpop.f32.mrb[50].mxu0 }
 0x166   : > { %v4966_v25 = vpop.f32.mrb[51].mxu1  ;;  %v4878_v15 = vpop.f32.mrb[51].mxu0 }
 0x167   : > { %v6700_v34 = vadd.f32 %v4964_v4, %v6618_v37  ;;  %v4967_v12 = vadd.f32 %v4966_v25, %v4965_v11  ;;  %v6708_v16 = vadd.f32 %v4878_v15, %v4877_v39  ;;  %v2658_v37 = vld [vmem:[%s7654_s3 + $0x10] sm:$0xff] }
 0x168   : > { %5393 = vmatmul.mubr.bf16.gmra.mrb[28].mxu1 %v5864_v10  ;;  %v5512_v38 = vpack.c.bf16 %v2659_v40, %v2658_v37 }
 0x169   : > { %v6706_v13 = vadd.f32 %v4967_v12, %v6622_v20  ;;  %v2661_v12 = vld [vmem:[%s7654_s3 + $0x28] sm:$0xff] }
 0x16a   : > { %5513 = vmatpush3.bf16.msra.mxu0 %v5512_v38 }
 0x16b   : > { %v4968_v1 = vpop.f32.mrb[52].mxu1  ;;  %v4880_v21 = vpop.f32.mrb[52].mxu0  ;;  %5514 = vmatprep.subr.bf16.mxu0 %v5865_v8 }
 0x16c   : > { %v4969_v5 = vpop.f32.mrb[53].mxu1  ;;  %v4881_v17 = vpop.f32.mrb[53].mxu0 }
 0x16d   : > { %v4970_v19 = vadd.f32 %v4969_v5, %v4968_v1  ;;  %v4971_v43 = vpop.f32.mrb[54].mxu1  ;;  %v6719_v9 = vadd.f32 %v4881_v17, %v4880_v21  ;;  %v4883_v47 = vpop.f32.mrb[54].mxu0 }
 0x16e   : > { %v4972_v10 = vpop.f32.mrb[55].mxu1  ;;  %v4884_v49 = vpop.f32.mrb[55].mxu0 }
 0x16f   : > { %v6717_v20 = vadd.f32 %v4970_v19, %v6625_v26  ;;  %v4973_v61 = vadd.f32 %v4972_v10, %v4971_v43  ;;  %v6724_v14 = vadd.f32 %v4884_v49, %v4883_v47 }
 0x171   : > { %v6722_v48 = vadd.f32 %v4973_v61, %v6629_v59 }
 0x173   : > { %v4974_v22 = vpop.f32.mrb[56].mxu1  ;;  %v4886_v28 = vpop.f32.mrb[56].mxu0 }
 0x174   : > { %v4975_v44 = vpop.f32.mrb[57].mxu1  ;;  %v4887_v31 = vpop.f32.mrb[57].mxu0 }
 0x175   : > { %v4976_v52 = vadd.f32 %v4975_v44, %v4974_v22  ;;  %v4977_v45 = vpop.f32.mrb[58].mxu1  ;;  %v6730_v2 = vadd.f32 %v4887_v31, %v4886_v28  ;;  %v4889_v23 = vpop.f32.mrb[58].mxu0 }
 0x176   : > { %v4978_v26 = vpop.f32.mrb[59].mxu1  ;;  %v4890_v59 = vpop.f32.mrb[59].mxu0 }
 0x177   : > { %v6728_v46 = vadd.f32 %v4976_v52, %v6631_v3  ;;  %v4979_v51 = vadd.f32 %v4978_v26, %v4977_v45  ;;  %v6735_v58 = vadd.f32 %v4890_v59, %v4889_v23  ;;  %v2660_v3 = vld [vmem:[%s7654_s3 + $0x20] sm:$0xff] }
 0x178   : > { %v5515_v1 = vpack.c.bf16 %v2661_v12, %v2660_v3 }
 0x179   : > { %v6733_v42 = vadd.f32 %v4979_v51, %v6635_v29 }
 0x17a   : > { %5516 = vmatpush3.bf16.msra.mxu0 %v5515_v1  ;;  %v2662_v1 = vld [vmem:[%s7654_s3 + $0x30] sm:$0xff] }
 0x17b   : > { %v4980_v4 = vpop.f32.mrb[60].mxu1  ;;  %v4892_v24 = vpop.f32.mrb[60].mxu0  ;;  %5517 = vmatprep.subr.bf16.mxu0 %v5865_v8 }
 0x17c   : > { %v4981_v11 = vpop.f32.mrb[61].mxu1  ;;  %v4893_v15 = vpop.f32.mrb[61].mxu0 }
 0x17d   : > { %v4982_v41 = vadd.f32 %v4981_v11, %v4980_v4  ;;  %v4983_v25 = vpop.f32.mrb[62].mxu1  ;;  %v6746_v19 = vadd.f32 %v4893_v15, %v4892_v24  ;;  %v4895_v43 = vpop.f32.mrb[62].mxu0 }
 0x17e   : > { %v4984_v39 = vpop.f32.mrb[63].mxu1  ;;  %v4896_v21 = vpop.f32.mrb[63].mxu0 }
 0x17f   : > { %v6744_v29 = vadd.f32 %v4982_v41, %v6637_v27  ;;  %v4985_v5 = vadd.f32 %v4984_v39, %v4983_v25  ;;  %v6751_v40 = vadd.f32 %v4896_v21, %v4895_v43 }
 0x181   : > { %v6749_v37 = vadd.f32 %v4985_v5, %v6641_v54 }
 0x183   : > { %v4986_v10 = vpop.f32.mrb[64].mxu1  ;;  %v5074_v38 = vpop.f32.mrb[64].mxu0 }
 0x184   : > { %v4987_v17 = vpop.f32.mrb[65].mxu1  ;;  %v5075_v27 = vpop.f32.mrb[65].mxu0 }
 0x185   : > { %v4988_v61 = vadd.f32 %v4987_v17, %v4986_v10  ;;  %v4989_v47 = vpop.f32.mrb[66].mxu1  ;;  %v5076_v44 = vadd.f32 %v5075_v27, %v5074_v38  ;;  %v5077_v52 = vpop.f32.mrb[66].mxu0 }
 0x186   : > { %v4990_v49 = vpop.f32.mrb[67].mxu1  ;;  %v5078_v28 = vpop.f32.mrb[67].mxu0 }
 0x187   : > { %v6755_v22 = vadd.f32 %v4988_v61, %v6646_v6  ;;  %v4991_v45 = vadd.f32 %v4990_v49, %v4989_v47  ;;  %v5079_v26 = vadd.f32 %v5078_v28, %v5077_v52  ;;  %v6761_v31 = vadd.f32 %v6644_v32, %v5076_v44 }
 0x189   : > { %v6758_v54 = vadd.f32 %v4991_v45, %v6653_v62  ;;  %v6764_v23 = vadd.f32 %v6650_v53, %v5079_v26 }
 0x18b   : > { %v4992_v51 = vpop.f32.mrb[68].mxu1  ;;  %v5080_v4 = vpop.f32.mrb[68].mxu0 }
 0x18c   : > { %v4993_v59 = vpop.f32.mrb[69].mxu1  ;;  %v5081_v41 = vpop.f32.mrb[69].mxu0 }
 0x18d   : > { %v4994_v11 = vadd.f32 %v4993_v59, %v4992_v51  ;;  %v4995_v6 = vpop.f32.mrb[70].mxu1  ;;  %v5082_v3 = vadd.f32 %v5081_v41, %v5080_v4  ;;  %v5083_v62 = vpop.f32.mrb[70].mxu0 }
 0x18e   : > { %v4996_v25 = vpop.f32.mrb[71].mxu1  ;;  %v5084_v39 = vpop.f32.mrb[71].mxu0 }
 0x18f   : > { %v6767_v24 = vadd.f32 %v4994_v11, %v6658_v7  ;;  %v4997_v12 = vadd.f32 %v4996_v25, %v4995_v6  ;;  %v5085_v15 = vadd.f32 %v5084_v39, %v5083_v62  ;;  %v6773_v53 = vadd.f32 %v6656_v57, %v5082_v3  ;;  %v2663_v7 = vld [vmem:[%s7654_s3 + $0x38] sm:$0xff] }
 0x190   : > { %v5518_v21 = vpack.c.bf16 %v2663_v7, %v2662_v1 }
 0x191   : > { %v6770_v32 = vadd.f32 %v4997_v12, %v6665_v18  ;;  %v6782_v43 = vadd.f32 %v6662_v35, %v5085_v15  ;;  %v2664_v15 = vld [vmem:[%s7654_s3 + $0x40] sm:$0xff] }
 0x192   : > { %5519 = vmatpush3.bf16.msra.mxu0 %v5518_v21 }
 0x193   : > { %v4998_v5 = vpop.f32.mrb[72].mxu1  ;;  %v5086_v18 = vpop.f32.mrb[72].mxu0  ;;  %5520 = vmatprep.subr.bf16.mxu0 %v5865_v8 }
 0x194   : > { %v4999_v10 = vpop.f32.mrb[73].mxu1  ;;  %v5087_v57 = vpop.f32.mrb[73].mxu0 }
 0x195   : > { %v5000_v17 = vadd.f32 %v4999_v10, %v4998_v5  ;;  %v5001_v38 = vpop.f32.mrb[74].mxu1  ;;  %v5088_v27 = vadd.f32 %v5087_v57, %v5086_v18  ;;  %v5089_v49 = vpop.f32.mrb[74].mxu0 }
 0x196   : > { %v5002_v61 = vpop.f32.mrb[75].mxu1  ;;  %v5090_v52 = vpop.f32.mrb[75].mxu0 }
 0x197   : > { %v6786_v47 = vadd.f32 %v5000_v17, %v6670_v50  ;;  %v5003_v44 = vadd.f32 %v5002_v61, %v5001_v38  ;;  %v5091_v45 = vadd.f32 %v5090_v52, %v5089_v49  ;;  %v6792_v28 = vadd.f32 %v6668_v30, %v5088_v27 }
 0x199   : > { %v6789_v35 = vadd.f32 %v5003_v44, %v6677_v63  ;;  %v6795_v51 = vadd.f32 %v6674_v36, %v5091_v45 }
 0x19b   : > { %v5004_v26 = vpop.f32.mrb[76].mxu1  ;;  %v5092_v4 = vpop.f32.mrb[76].mxu0 }
 0x19c   : > { %v5005_v59 = vpop.f32.mrb[77].mxu1  ;;  %v5093_v6 = vpop.f32.mrb[77].mxu0 }
 0x19d   : > { %v5006_v11 = vadd.f32 %v5005_v59, %v5004_v26  ;;  %v5007_v50 = vpop.f32.mrb[78].mxu1  ;;  %v5094_v3 = vadd.f32 %v5093_v6, %v5092_v4  ;;  %v5095_v63 = vpop.f32.mrb[78].mxu0 }
 0x19e   : > { %v5008_v41 = vpop.f32.mrb[79].mxu1  ;;  %v5096_v12 = vpop.f32.mrb[79].mxu0 }
 0x19f   : > { %v6798_v25 = vadd.f32 %v5006_v11, %v6689_v55  ;;  %v5009_v62 = vadd.f32 %v5008_v41, %v5007_v50  ;;  %v5097_v39 = vadd.f32 %v5096_v12, %v5095_v63  ;;  %v6804_v36 = vadd.f32 %v6687_v60, %v5094_v3  ;;  %v2665_v55 = vld [vmem:[%s7654_s3 + $0x48] sm:$0xff] }
 0x1a0   : > { %v5521_v5 = vpack.c.bf16 %v2665_v55, %v2664_v15 }
 0x1a1   : > { %v6801_v30 = vadd.f32 %v5009_v62, %v6696_v33  ;;  %v6813_v7 = vadd.f32 %v6693_v56, %v5097_v39  ;;  %v2666_v39 = vld [vmem:[%s7654_s3 + $0x50] sm:$0xff] }
 0x1a2   : > { %5522 = vmatpush3.bf16.msra.mxu0 %v5521_v5 }
 0x1a3   : > { %v5010_v1 = vpop.f32.mrb[80].mxu1  ;;  %v5098_v33 = vpop.f32.mrb[80].mxu0  ;;  %5523 = vmatprep.subr.bf16.mxu0 %v5865_v8 }
 0x1a4   : > { %v5011_v21 = vpop.f32.mrb[81].mxu1  ;;  %v5099_v60 = vpop.f32.mrb[81].mxu0 }
 0x1a5   : > { %v5012_v10 = vadd.f32 %v5011_v21, %v5010_v1  ;;  %v5013_v18 = vpop.f32.mrb[82].mxu1  ;;  %v5100_v57 = vadd.f32 %v5099_v60, %v5098_v33  ;;  %v5101_v61 = vpop.f32.mrb[82].mxu0 }
 0x1a6   : > { %v5014_v17 = vpop.f32.mrb[83].mxu1  ;;  %v5102_v49 = vpop.f32.mrb[83].mxu0 }
 0x1a7   : > { %v6817_v38 = vadd.f32 %v5012_v10, %v6702_v0  ;;  %v5015_v27 = vadd.f32 %v5014_v17, %v5013_v18  ;;  %v5103_v44 = vadd.f32 %v5102_v49, %v5101_v61  ;;  %v6823_v52 = vadd.f32 %v6700_v34, %v5100_v57 }
 0x1a9   : > { %v6820_v56 = vadd.f32 %v5015_v27, %v6708_v16  ;;  %v6826_v26 = vadd.f32 %v6706_v13, %v5103_v44 }
 0x1ab   : > { %v5016_v45 = vpop.f32.mrb[84].mxu1  ;;  %v5104_v4 = vpop.f32.mrb[84].mxu0 }
 0x1ac   : > { %v5017_v59 = vpop.f32.mrb[85].mxu1  ;;  %v5105_v50 = vpop.f32.mrb[85].mxu0 }
 0x1ad   : > { %v5018_v11 = vadd.f32 %v5017_v59, %v5016_v45  ;;  %v5019_v0 = vpop.f32.mrb[86].mxu1  ;;  %v5106_v3 = vadd.f32 %v5105_v50, %v5104_v4  ;;  %v5107_v16 = vpop.f32.mrb[86].mxu0 }
 0x1ae   : > { %v5020_v6 = vpop.f32.mrb[87].mxu1  ;;  %v5108_v62 = vpop.f32.mrb[87].mxu0 }
 0x1af   : > { %v6829_v41 = vadd.f32 %v5018_v11, %v6719_v9  ;;  %v5021_v63 = vadd.f32 %v5020_v6, %v5019_v0  ;;  %v5109_v12 = vadd.f32 %v5108_v62, %v5107_v16  ;;  %v6835_v13 = vadd.f32 %v6717_v20, %v5106_v3  ;;  %v2667_v9 = vld [vmem:[%s7654_s3 + $0x58] sm:$0xff] }
 0x1b0   : > { %v5524_v1 = vpack.c.bf16 %v2667_v9, %v2666_v39 }
 0x1b1   : > { %v6832_v34 = vadd.f32 %v5021_v63, %v6724_v14  ;;  %v6844_v55 = vadd.f32 %v6722_v48, %v5109_v12  ;;  %v2668_v12 = vld [vmem:[%s7654_s3 + $0x60] sm:$0xff] }
 0x1b2   : > { %5525 = vmatpush3.bf16.msra.mxu0 %v5524_v1 }
 0x1b3   : > { %v5022_v15 = vpop.f32.mrb[88].mxu1  ;;  %v5110_v14 = vpop.f32.mrb[88].mxu0  ;;  %5526 = vmatprep.subr.bf16.mxu0 %v5865_v8 }
 0x1b4   : > { %v5023_v5 = vpop.f32.mrb[89].mxu1  ;;  %v5111_v20 = vpop.f32.mrb[89].mxu0 }
 0x1b5   : > { %v5024_v21 = vadd.f32 %v5023_v5, %v5022_v15  ;;  %v5025_v33 = vpop.f32.mrb[90].mxu1  ;;  %v5112_v60 = vadd.f32 %v5111_v20, %v5110_v14  ;;  %v5113_v17 = vpop.f32.mrb[90].mxu0 }
 0x1b6   : > { %v5026_v10 = vpop.f32.mrb[91].mxu1  ;;  %v5114_v61 = vpop.f32.mrb[91].mxu0 }
 0x1b7   : > { %v6848_v18 = vadd.f32 %v5024_v21, %v6730_v2  ;;  %v5027_v57 = vadd.f32 %v5026_v10, %v5025_v33  ;;  %v5115_v27 = vadd.f32 %v5114_v61, %v5113_v17  ;;  %v6854_v49 = vadd.f32 %v6728_v46, %v5112_v60  ;;  %v2671_v10 = vld [vmem:[%s7654_s3 + $0x78] sm:$0xff] }
 0x1b9   : > { %v6851_v48 = vadd.f32 %v5027_v57, %v6735_v58  ;;  %v6857_v45 = vadd.f32 %v6733_v42, %v5115_v27  ;;  %v5867_v57 = vmov 0.0  }
 0x1ba   : > { %5428 = vmatprep.mubr.msk.f32.mxu0 %vm5866_vm5, %v5867_v57 }
 0x1bb   : > { %v5028_v44 = vpop.f32.mrb[92].mxu1  ;;  %v5116_v4 = vpop.f32.mrb[92].mxu0 }
 0x1bc   : > { %v5029_v59 = vpop.f32.mrb[93].mxu1  ;;  %v5117_v0 = vpop.f32.mrb[93].mxu0 }
 0x1bd   : > { %v5030_v11 = vadd.f32 %v5029_v59, %v5028_v44  ;;  %v5031_v2 = vpop.f32.mrb[94].mxu1  ;;  %v5118_v3 = vadd.f32 %v5117_v0, %v5116_v4  ;;  %v5119_v58 = vpop.f32.mrb[94].mxu0 }
 0x1be   : > { %v5032_v50 = vpop.f32.mrb[95].mxu1  ;;  %v5120_v63 = vpop.f32.mrb[95].mxu0 }
 0x1bf   : > { %v6860_v6 = vadd.f32 %v5030_v11, %v6746_v19  ;;  %v5033_v16 = vadd.f32 %v5032_v50, %v5031_v2  ;;  %v5121_v62 = vadd.f32 %v5120_v63, %v5119_v58  ;;  %v6866_v42 = vadd.f32 %v6744_v29, %v5118_v3  ;;  %v2669_v19 = vld [vmem:[%s7654_s3 + $0x68] sm:$0xff] }
 0x1c0   : > { %v5527_v9 = vpack.c.bf16 %v2669_v19, %v2668_v12 }
 0x1c1   : > { %v6863_v46 = vadd.f32 %v5033_v16, %v6751_v40  ;;  %v6875_v39 = vadd.f32 %v6749_v37, %v5121_v62  ;;  %v2670_v37 = vld [vmem:[%s7654_s3 + $0x70] sm:$0xff] }
 0x1c2   : > { %5528 = vmatpush3.bf16.msra.mxu0 %v5527_v9  ;;  %v5530_v17 = vpack.c.bf16 %v2671_v10, %v2670_v37 }
 0x1c3   : > { %v5122_v15 = vpop.f32.mrb[96].mxu0  ;;  %5529 = vmatprep.subr.bf16.mxu0 %v5865_v8 }
 0x1c4   : > { %v5123_v40 = vpop.f32.mrb[97].mxu0 }
 0x1c5   : > { %v5124_v1 = vadd.f32 %v5123_v40, %v5122_v15  ;;  %v5125_v29 = vpop.f32.mrb[98].mxu0 }
 0x1c6   : > { %v5126_v5 = vpop.f32.mrb[99].mxu0  ;;  %5531 = vmatpush3.bf16.msra.mxu0 %v5530_v17 }
 0x1c7   : > { %v5127_v14 = vadd.f32 %v5126_v5, %v5125_v29  ;;  %v6879_v21 = vadd.f32 %v6755_v22, %v5124_v1  ;;  %5532 = vmatprep.subr.bf16.mxu0 %v5865_v8 }
 0x1c9   : > { %v6882_v33 = vadd.f32 %v6758_v54, %v5127_v14 }
 0x1cb   : > { %v5128_v20 = vpop.f32.mrb[100].mxu0 }
 0x1cc   : > { %v5129_v60 = vpop.f32.mrb[101].mxu0 }
 0x1cd   : > { %v5130_v22 = vadd.f32 %v5129_v60, %v5128_v20  ;;  %v5131_v61 = vpop.f32.mrb[102].mxu0 }
 0x1ce   : > { %v5132_v54 = vpop.f32.mrb[103].mxu0 }
 0x1cf   : > { %v5133_v27 = vadd.f32 %v5132_v54, %v5131_v61  ;;  %v6893_v44 = vadd.f32 %v6767_v24, %v5130_v22 }
 0x1d1   : > { %v6897_v59 = vadd.f32 %v6770_v32, %v5133_v27 }
 0x1d3   : > { %v5134_v4 = vpop.f32.mrb[104].mxu0 }
 0x1d4   : > { %v5135_v11 = vpop.f32.mrb[105].mxu0 }
 0x1d5   : > { %v5136_v2 = vadd.f32 %v5135_v11, %v5134_v4  ;;  %v5137_v0 = vpop.f32.mrb[106].mxu0 }
 0x1d6   : > { %v5138_v50 = vpop.f32.mrb[107].mxu0 }
 0x1d7   : > { %v5139_v3 = vadd.f32 %v5138_v50, %v5137_v0  ;;  %v6900_v58 = vadd.f32 %v6786_v47, %v5136_v2 }
 0x1d9   : > { %v6903_v16 = vadd.f32 %v6789_v35, %v5139_v3 }
 0x1db   : > { %v5140_v63 = vpop.f32.mrb[108].mxu0 }
 0x1dc   : > { %v5141_v24 = vpop.f32.mrb[109].mxu0 }
 0x1dd   : > { %v5142_v62 = vadd.f32 %v5141_v24, %v5140_v63  ;;  %v5143_v12 = vpop.f32.mrb[110].mxu0 }
 0x1de   : > { %v5144_v19 = vpop.f32.mrb[111].mxu0 }
 0x1df   : > { %v5145_v9 = vadd.f32 %v5144_v19, %v5143_v12  ;;  %v6906_v32 = vadd.f32 %v6798_v25, %v5142_v62 }
 0x1e1   : > { %v6909_v15 = vadd.f32 %v6801_v30, %v5145_v9 }
 0x1e3   : > { %v5146_v40 = vpop.f32.mrb[112].mxu0 }
 0x1e4   : > { %v5147_v1 = vpop.f32.mrb[113].mxu0 }
 0x1e5   : > { %v5148_v29 = vadd.f32 %v5147_v1, %v5146_v40  ;;  %v5149_v47 = vpop.f32.mrb[114].mxu0 }
 0x1e6   : > { %v5150_v5 = vpop.f32.mrb[115].mxu0 }
 0x1e7   : > { %v5151_v14 = vadd.f32 %v5150_v5, %v5149_v47  ;;  %v6912_v35 = vadd.f32 %v6817_v38, %v5148_v29 }
 0x1e9   : > { %v6915_v20 = vadd.f32 %v6820_v56, %v5151_v14 }
 0x1eb   : > { %v5152_v37 = vpop.f32.mrb[116].mxu0 }
 0x1ec   : > { %v5153_v10 = vpop.f32.mrb[117].mxu0 }
 0x1ed   : > { %v5154_v60 = vadd.f32 %v5153_v10, %v5152_v37  ;;  %v5155_v25 = vpop.f32.mrb[118].mxu0 }
 0x1ee   : > { %v5156_v17 = vpop.f32.mrb[119].mxu0 }
 0x1ef   : > { %v5157_v22 = vadd.f32 %v5156_v17, %v5155_v25  ;;  %v6918_v30 = vadd.f32 %v6829_v41, %v5154_v60 }
 0x1f1   : > { %v6921_v61 = vadd.f32 %v6832_v34, %v5157_v22 }
 0x1f3   : > { %v5158_v54 = vpop.f32.mrb[120].mxu0 }
 0x1f4   : > { %v5159_v27 = vpop.f32.mrb[121].mxu0 }
 0x1f5   : > { %v5160_v4 = vadd.f32 %v5159_v27, %v5158_v54  ;;  %v5161_v38 = vpop.f32.mrb[122].mxu0 }
 0x1f6   : > { %v5162_v11 = vpop.f32.mrb[123].mxu0 }
 0x1f7   : > { %v5163_v2 = vadd.f32 %v5162_v11, %v5161_v38  ;;  %v6924_v56 = vadd.f32 %v6848_v18, %v5160_v4  ;;  %v6939_v18 = vld [vmem:[%s7653_s2] ss:$0 sm:$0xff] }
 0x1f9   : > { %v6927_v0 = vadd.f32 %v6851_v48, %v5163_v2 }
 0x1fb   : > { %v5164_v50 = vpop.f32.mrb[124].mxu0 }
 0x1fc   : > { %v5165_v3 = vpop.f32.mrb[125].mxu0 }
 0x1fd   : > { %v5166_v63 = vadd.f32 %v5165_v3, %v5164_v50  ;;  %v5167_v41 = vpop.f32.mrb[126].mxu0 }
 0x1fe   : > { %v5168_v24 = vpop.f32.mrb[127].mxu0 }
 0x1ff   : > { %v5169_v62 = vadd.f32 %v5168_v24, %v5167_v41  ;;  %v6930_v34 = vadd.f32 %v6860_v6, %v5166_v63 }
 0x201   : > { %v6933_v19 = vadd.f32 %v6863_v46, %v5169_v62 }
 0x203   : > { %v5366_v12 = vpop.f32.mrb[0].mxu1 }
 0x204   : > { %v5582_v9 = vadd.f32 %v6773_v53, %v5366_v12  ;;  %v2349_v48 = vpop.f32.mrb[1].mxu1 }
 0x205   : > { %v5585_v40 = vadd.f32 %v6761_v31, %v2349_v48  ;;  %v5367_v1 = vpop.f32.mrb[2].mxu1 }
 0x206   : > { %v5588_v29 = vadd.f32 %v6782_v43, %v5367_v1  ;;  %v2352_v47 = vpop.f32.mrb[3].mxu1  ;;  %v2517_v46 = vadd.f32 %v5582_v9, %v6939_v18 }
 0x207   : > { %v2515_v6 = vadd.f32 %v5585_v40, %v6939_v18  ;;  %v5591_v5 = vadd.f32 %v6764_v23, %v2352_v47 }
 0x208   : > { %v2518_v37 = vadd.f32 %v5588_v29, %v6939_v18  ;;  %v6953_v43 = vmax.f32 %v2517_v46, 0.0 }
 0x209   : > { %v2516_v53 = vadd.f32 %v5591_v5, %v6939_v18  ;;  %v6947_v14 = vmax.f32 %v2515_v6, 0.0 }
 0x20a   : > { %v6959_v4 = vmax.f32 %v2518_v37, 0.0 }
 0x20b   : > { %v6950_v10 = vmax.f32 %v2516_v53, 0.0  ;;  %v5370_v60 = vpop.f32.mrb[4].mxu1 }
 0x20c   : > { %v5594_v31 = vadd.f32 %v6804_v36, %v5370_v60  ;;  %v2365_v25 = vpop.f32.mrb[5].mxu1 }
 0x20d   : > { %v2579_v17 = vadd.f32 %v6950_v10, %v6947_v14  ;;  %v5597_v23 = vadd.f32 %v6792_v28, %v2365_v25  ;;  %v5371_v22 = vpop.f32.mrb[6].mxu1 }
 0x20e   : > { %v5600_v54 = vadd.f32 %v6813_v7, %v5371_v22  ;;  %v2368_v27 = vpop.f32.mrb[7].mxu1  ;;  %v2521_v2 = vadd.f32 %v5594_v31, %v6939_v18 }
 0x20f   : > { %v2580_v38 = vadd.f32 %v2579_v17, %v6953_v43  ;;  %v2519_v11 = vadd.f32 %v5597_v23, %v6939_v18  ;;  %v5603_v36 = vadd.f32 %v6795_v51, %v2368_v27 }
 0x210   : > { %v2522_v7 = vadd.f32 %v5600_v54, %v6939_v18  ;;  %v6974_v9 = vmax.f32 %v2521_v2, 0.0 }
 0x211   : > { %v6965_v50 = vmax.f32 %v2519_v11, 0.0  ;;  %v2581_v3 = vadd.f32 %v2580_v38, %v6959_v4  ;;  %v2520_v28 = vadd.f32 %v5603_v36, %v6939_v18 }
 0x212   : > { %v6979_v47 = vmax.f32 %v2522_v7, 0.0 }
 0x213   : > { %v2582_v63 = vadd.f32 %v2581_v3, %v6965_v50  ;;  %v6971_v41 = vmax.f32 %v2520_v28, 0.0  ;;  %v5374_v24 = vpop.f32.mrb[8].mxu1 }
 0x214   : > { %v5606_v62 = vadd.f32 %v6835_v13, %v5374_v24  ;;  %v2381_v12 = vpop.f32.mrb[9].mxu1 }
 0x215   : > { %v2583_v51 = vadd.f32 %v2582_v63, %v6971_v41  ;;  %v5609_v48 = vadd.f32 %v6823_v52, %v2381_v12  ;;  %v5375_v40 = vpop.f32.mrb[10].mxu1 }
 0x216   : > { %v5612_v1 = vadd.f32 %v6844_v55, %v5375_v40  ;;  %v2384_v29 = vpop.f32.mrb[11].mxu1  ;;  %v2525_v13 = vadd.f32 %v5606_v62, %v6939_v18 }
 0x217   : > { %v2584_v6 = vadd.f32 %v2583_v51, %v6974_v9  ;;  %v2523_v5 = vadd.f32 %v5609_v48, %v6939_v18  ;;  %v5615_v46 = vadd.f32 %v6826_v26, %v2384_v29 }
 0x218   : > { %v2526_v55 = vadd.f32 %v5612_v1, %v6939_v18  ;;  %v6994_v22 = vmax.f32 %v2525_v13, 0.0 }
 0x219   : > { %v6985_v53 = vmax.f32 %v2523_v5, 0.0  ;;  %v2585_v37 = vadd.f32 %v2584_v6, %v6979_v47  ;;  %v2524_v52 = vadd.f32 %v5615_v46, %v6939_v18 }
 0x21a   : > { %v6999_v36 = vmax.f32 %v2526_v55, 0.0 }
 0x21b   : > { %v2586_v60 = vadd.f32 %v2585_v37, %v6985_v53  ;;  %v6991_v31 = vmax.f32 %v2524_v52, 0.0  ;;  %v5378_v25 = vpop.f32.mrb[12].mxu1 }
 0x21c   : > { %v5618_v17 = vadd.f32 %v6866_v42, %v5378_v25  ;;  %v2397_v23 = vpop.f32.mrb[13].mxu1 }
 0x21d   : > { %v2587_v26 = vadd.f32 %v2586_v60, %v6991_v31  ;;  %v5621_v54 = vadd.f32 %v6854_v49, %v2397_v23  ;;  %v5379_v27 = vpop.f32.mrb[14].mxu1 }
 0x21e   : > { %v5624_v38 = vadd.f32 %v6875_v39, %v5379_v27  ;;  %v2400_v11 = vpop.f32.mrb[15].mxu1  ;;  %v2529_v42 = vadd.f32 %v5618_v17, %v6939_v18 }
 0x21f   : > { %v2588_v2 = vadd.f32 %v2587_v26, %v6994_v22  ;;  %v2527_v3 = vadd.f32 %v5621_v54, %v6939_v18  ;;  %v5627_v28 = vadd.f32 %v6857_v45, %v2400_v11 }
 0x220   : > { %v2530_v39 = vadd.f32 %v5624_v38, %v6939_v18  ;;  %v7014_v40 = vmax.f32 %v2529_v42, 0.0 }
 0x221   : > { %v7005_v63 = vmax.f32 %v2527_v3, 0.0  ;;  %v2589_v7 = vadd.f32 %v2588_v2, %v6999_v36  ;;  %v2528_v49 = vadd.f32 %v5627_v28, %v6939_v18 }
 0x222   : > { %v7019_v46 = vmax.f32 %v2530_v39, 0.0 }
 0x223   : > { %v2590_v24 = vadd.f32 %v2589_v7, %v7005_v63  ;;  %v7011_v62 = vmax.f32 %v2528_v49, 0.0  ;;  %v5382_v12 = vpop.f32.mrb[16].mxu1 }
 0x224   : > { %v5630_v51 = vadd.f32 %v6893_v44, %v5382_v12  ;;  %v2413_v48 = vpop.f32.mrb[17].mxu1 }
 0x225   : > { %v2591_v45 = vadd.f32 %v2590_v24, %v7011_v62  ;;  %v5633_v1 = vadd.f32 %v6879_v21, %v2413_v48  ;;  %v5383_v29 = vpop.f32.mrb[18].mxu1 }
 0x226   : > { %v5636_v6 = vadd.f32 %v6897_v59, %v5383_v29  ;;  %v2416_v5 = vpop.f32.mrb[19].mxu1  ;;  %v2533_v44 = vadd.f32 %v5630_v51, %v6939_v18 }
 0x227   : > { %v2592_v13 = vadd.f32 %v2591_v45, %v7014_v40  ;;  %v2531_v37 = vadd.f32 %v5633_v1, %v6939_v18  ;;  %v5639_v52 = vadd.f32 %v6882_v33, %v2416_v5 }
 0x228   : > { %v2534_v59 = vadd.f32 %v5636_v6, %v6939_v18  ;;  %v7034_v27 = vmax.f32 %v2533_v44, 0.0 }
 0x229   : > { %v7025_v60 = vmax.f32 %v2531_v37, 0.0  ;;  %v2593_v55 = vadd.f32 %v2592_v13, %v7019_v46  ;;  %v2532_v21 = vadd.f32 %v5639_v52, %v6939_v18  ;;  %v2619_v13 = vmax.f32 %v6953_v43, %v6974_v9 }
 0x22a   : > { %v7039_v28 = vmax.f32 %v2534_v59, 0.0  ;;  %v2617_v37 = vmax.f32 %v6947_v14, %v6965_v50  ;;  %v2620_v52 = vmax.f32 %v6959_v4, %v6979_v47  ;;  %v2618_v59 = vmax.f32 %v6950_v10, %v6971_v41 }
 0x22b   : > { %v2594_v25 = vadd.f32 %v2593_v55, %v7025_v60  ;;  %v7031_v17 = vmax.f32 %v2532_v21, 0.0  ;;  %v5386_v23 = vpop.f32.mrb[20].mxu1 }
 0x22c   : > { %v5642_v26 = vadd.f32 %v6906_v32, %v5386_v23  ;;  %v2429_v54 = vpop.f32.mrb[21].mxu1  ;;  %v2623_v23 = vmax.f32 %v2619_v13, %v6994_v22 }
 0x22d   : > { %v2595_v33 = vadd.f32 %v2594_v25, %v7031_v17  ;;  %v5645_v38 = vadd.f32 %v6900_v58, %v2429_v54  ;;  %v5387_v11 = vpop.f32.mrb[22].mxu1  ;;  %v2624_v54 = vmax.f32 %v2620_v52, %v6999_v36 }
 0x22e   : > { %v5648_v2 = vadd.f32 %v6909_v15, %v5387_v11  ;;  %v2432_v3 = vpop.f32.mrb[23].mxu1  ;;  %v2537_v32 = vadd.f32 %v5642_v26, %v6939_v18  ;;  %v2621_v26 = vmax.f32 %v2617_v37, %v6985_v53 }
 0x22f   : > { %v2596_v42 = vadd.f32 %v2595_v33, %v7034_v27  ;;  %v2535_v7 = vadd.f32 %v5645_v38, %v6939_v18  ;;  %v5651_v49 = vadd.f32 %v6903_v16, %v2432_v3 }
 0x230   : > { %v2538_v15 = vadd.f32 %v5648_v2, %v6939_v18  ;;  %v7054_v29 = vmax.f32 %v2537_v32, 0.0  ;;  %v2622_v2 = vmax.f32 %v2618_v59, %v6991_v31  ;;  %v2625_v3 = vmax.f32 %v2621_v26, %v7005_v63 }
 0x231   : > { %v7045_v24 = vmax.f32 %v2535_v7, 0.0  ;;  %v2597_v39 = vadd.f32 %v2596_v42, %v7039_v28  ;;  %v2536_v58 = vadd.f32 %v5651_v49, %v6939_v18  ;;  %v2628_v7 = vmax.f32 %v2624_v54, %v7019_v46 }
 0x232   : > { %v7065_v55 = vmax.f32 %v2538_v15, 0.0  ;;  %v2629_v15 = vmax.f32 %v2625_v3, %v7025_v60 }
 0x233   : > { %v2598_v12 = vadd.f32 %v2597_v39, %v7045_v24  ;;  %v7051_v51 = vmax.f32 %v2536_v58, 0.0  ;;  %v5390_v48 = vpop.f32.mrb[24].mxu1  ;;  %v2626_v58 = vmax.f32 %v2622_v2, %v7011_v62 }
 0x234   : > { %v5654_v45 = vadd.f32 %v6918_v30, %v5390_v48  ;;  %v2445_v1 = vpop.f32.mrb[25].mxu1 }
 0x235   : > { %v2599_v16 = vadd.f32 %v2598_v12, %v7051_v51  ;;  %v5657_v6 = vadd.f32 %v6912_v35, %v2445_v1  ;;  %v5391_v5 = vpop.f32.mrb[26].mxu1  ;;  %v2632_v1 = vmax.f32 %v2628_v7, %v7039_v28  ;;  %v2630_v37 = vmax.f32 %v2626_v58, %v7031_v17 }
 0x236   : > { %v5660_v44 = vadd.f32 %v6921_v61, %v5391_v5  ;;  %v2448_v30 = vpop.f32.mrb[27].mxu1  ;;  %v2541_v61 = vadd.f32 %v5654_v45, %v6939_v18 }
 0x237   : > { %v2600_v21 = vadd.f32 %v2599_v16, %v7054_v29  ;;  %v2539_v25 = vadd.f32 %v5657_v6, %v6939_v18  ;;  %v5663_v35 = vadd.f32 %v6915_v20, %v2448_v30  ;;  %v2627_v20 = vmax.f32 %v2623_v23, %v7014_v40 }
 0x238   : > { %v2542_v42 = vadd.f32 %v5660_v44, %v6939_v18  ;;  %v7093_v16 = vmax.f32 %v2541_v61, 0.0  ;;  %v2636_v23 = vmax.f32 %v2632_v1, %v7065_v55  ;;  %v2634_v61 = vmax.f32 %v2630_v37, %v7051_v51 }
 0x239   : > { %v7076_v33 = vmax.f32 %v2539_v25, 0.0  ;;  %v2601_v38 = vadd.f32 %v2600_v21, %v7065_v55  ;;  %v2540_v11 = vadd.f32 %v5663_v35, %v6939_v18  ;;  %v2631_v12 = vmax.f32 %v2627_v20, %v7034_v27 }
 0x23a   : > { %v7098_v52 = vmax.f32 %v2542_v42, 0.0 }
 0x23b   : > { %v2602_v49 = vadd.f32 %v2601_v38, %v7076_v33  ;;  %v7086_v32 = vmax.f32 %v2540_v11, 0.0  ;;  %v5394_v39 = vpop.f32.mrb[28].mxu1 }
 0x23c   : > { %v5666_v48 = vadd.f32 %v6930_v34, %v5394_v39  ;;  %v2461_v45 = vpop.f32.mrb[29].mxu1  ;;  %v2635_v34 = vmax.f32 %v2631_v12, %v7054_v29 }
 0x23d   : > { %v2603_v6 = vadd.f32 %v2602_v49, %v7086_v32  ;;  %v5669_v5 = vadd.f32 %v6924_v56, %v2461_v45  ;;  %v5395_v13 = vpop.f32.mrb[30].mxu1  ;;  %v2633_v56 = vmax.f32 %v2629_v15, %v7045_v24  ;;  %v2638_v42 = vmax.f32 %v2634_v61, %v7086_v32 }
 0x23e   : > { %v2545_v44 = vadd.f32 %v5666_v48, %v6939_v18  ;;  %v5672_v30 = vadd.f32 %v6933_v19, %v5395_v13  ;;  %v2464_v21 = vpop.f32.mrb[31].mxu1  ;;  %v2639_v2 = vmax.f32 %v2635_v34, %v7093_v16 }
 0x23f   : > { %v2604_v25 = vadd.f32 %v2603_v6, %v7093_v16  ;;  %v2543_v35 = vadd.f32 %v5669_v5, %v6939_v18  ;;  %v5675_v59 = vadd.f32 %v6927_v0, %v2464_v21  ;;  %v2640_v0 = vmax.f32 %v2636_v23, %v7098_v52  ;;  %v2750_v23 = vld [vmem:[%s7656_s5] sm:$0xff] }
 0x240   : > { %v7108_v26 = vmax.f32 %v2545_v44, 0.0  ;;  %v2546_v54 = vadd.f32 %v5672_v30, %v6939_v18  ;;  %v2637_v3 = vmax.f32 %v2633_v56, %v7076_v33 }
 0x241   : > { %v7112_v19 = vmax.f32 %v2543_v35, 0.0  ;;  %v2605_v38 = vadd.f32 %v2604_v25, %v7098_v52  ;;  %v2544_v11 = vadd.f32 %v5675_v59, %v6939_v18 }
 0x242   : > { %v7118_v20 = vmax.f32 %v2546_v54, 0.0  ;;  %v2643_v39 = vmax.f32 %v2639_v2, %v7108_v26  ;;  %v2751_v54 = vld [vmem:[%s7656_s5 + $0x8] sm:$0xff] }
 0x243   : > { %v2606_v7 = vadd.f32 %v2605_v38, %v7112_v19  ;;  %v7123_v49 = vmax.f32 %v2544_v11, 0.0  ;;  %v2641_v18 = vmax.f32 %v2637_v3, %v7112_v19  ;;  %v5533_v2 = vpack.c.bf16 %v2751_v54, %v2750_v23  ;;  %v2753_v3 = vld [vmem:[%s7656_s5 + $0x18] sm:$0xff] }
 0x244   : > { %v2644_v58 = vmax.f32 %v2640_v0, %v7118_v20  ;;  %v2752_v0 = vld [vmem:[%s7656_s5 + $0x10] sm:$0xff] }
 0x245   : > { %v2607_v12 = vadd.f32 %v2606_v7, %v7123_v49  ;;  %v2642_v15 = vmax.f32 %v2638_v42, %v7123_v49  ;;  %v5536_v7 = vpack.c.bf16 %v2753_v3, %v2752_v0 }
 0x246   : > { %v2646_v48 = vmax.f32 %v2643_v39, %v2644_v58  ;;  %v2754_v39 = vld [vmem:[%s7656_s5 + $0x20] sm:$0xff]  ;;  %v2755_v58 = vld [vmem:[%s7656_s5 + $0x28] sm:$0xff] }
 0x247   : > { %v2608_v45 = vadd.f32 %v2607_v12, %v7108_v26  ;;  %v2645_v1 = vmax.f32 %v2641_v18, %v2642_v15  ;;  %v5539_v18 = vpack.c.bf16 %v2755_v58, %v2754_v39  ;;  %v2756_v12 = vld [vmem:[%s7656_s5 + $0x30] sm:$0xff] }
 0x249   : > { %v2609_v6 = vadd.f32 %v2608_v45, %v7118_v20  ;;  %v2647_v5 = vmax.f32 %v2645_v1, %v2646_v48  ;;  %v2758_v48 = vld [vmem:[%s7656_s5 + $0x40] sm:$0xff]  ;;  %v2759_v45 = vld [vmem:[%s7656_s5 + $0x48] sm:$0xff] }
 0x24a   : > { %v5545_v1 = vpack.c.bf16 %v2759_v45, %v2758_v48 }
 0x24b   : > { %v2610_v13 = vrot.slane %v2609_v6, 4  ;;  %v2648_v37 = vrot.slane %v2647_v5, 4 }
 0x24d   : > { %v2611_v44 = vadd.f32 %v2610_v13, %v2609_v6  ;;  %v2649_v30 = vmax.f32 %v2647_v5, %v2648_v37  ;;  %v2760_v6 = vld [vmem:[%s7656_s5 + $0x50] sm:$0xff]  ;;  %v2761_v5 = vld [vmem:[%s7656_s5 + $0x58] sm:$0xff]  ;;  %v2762_v37 = vld [vmem:[%s7656_s5 + $0x60] sm:$0xff] }
 0x24e   : > { %v5548_v13 = vpack.c.bf16 %v2761_v5, %v2760_v6  ;;  %v3445_v6 = vld [vmem:[%s7658_s7 + $0x8] sm:$0xff] }
 0x24f   : > { %v2612_v21 = vrot.slane %v2611_v44, 2  ;;  %v2650_v34 = vrot.slane %v2649_v30, 2 }
 0x251   : > { %v2613_v25 = vadd.f32 %v2612_v21, %v2611_v44  ;;  %v2651_v35 = vmax.f32 %v2649_v30, %v2650_v34  ;;  %v2763_v44 = vld [vmem:[%s7656_s5 + $0x68] sm:$0xff]  ;;  %v2764_v21 = vld [vmem:[%s7656_s5 + $0x70] sm:$0xff]  ;;  %v2765_v34 = vld [vmem:[%s7656_s5 + $0x78] sm:$0xff] }
 0x252   : > { %v5551_v30 = vpack.c.bf16 %v2763_v44, %v2762_v37 }
 0x253   : > { %v2614_v59 = vrot.slane %v2613_v25, 1  ;;  %v2652_v56 = vrot.slane %v2651_v35, 1 }
 0x255   : > { %v2615_v61 = vadd.f32 %v2614_v59, %v2613_v25  ;;  %v2653_v11 = vmax.f32 %v2651_v35, %v2652_v56  ;;  %v5554_v25 = vpack.c.bf16 %v2765_v34, %v2764_v21  ;;  %v4599_v35 = vld [vmem:[%s7655_s4] ss:$0 sm:$0xff] }
 0x257   : > { %v2616_v38 = vmul.f32 0.00390625, %v2615_v61 }
 0x259   : > { %v2655_v42 = vsel %vm591_vm0, %v2616_v38, %v2653_v11 }
 0x25a   : > { %5429 = vmatmul.mubr.f32.vlgmr.msra.gmra.mrb[128].mxu0 %v2655_v42  ;;  %v2851_v42 = vlaneseq }
 0x25b   : > { %5534 = vmatpush3.bf16.msra.mxu0 %v5533_v2  ;;  %5463 = vmatprep.mubr.msk.f32.mxu0 %vm5866_vm5, %v5867_v57  ;;  %v2757_v57 = vld [vmem:[%s7656_s5 + $0x38] sm:$0xff] }
 0x25c   : > { %5535 = vmatprep.subr.bf16.mxu0 %v5865_v8  ;;  %v5542_v15 = vpack.c.bf16 %v2757_v57, %v2756_v12 }
 0x25f   : > { %5537 = vmatpush3.bf16.msra.mxu0 %v5536_v7  ;;  %v7197_v7 = vshrl.u32 %v2851_v42, 7 }
 0x260   : > { %5538 = vmatprep.subr.bf16.mxu0 %v5865_v8 }
 0x263   : > { %5540 = vmatpush3.bf16.msra.mxu0 %v5539_v18  ;;  %v7200_v18 = vsub.s32 0, %v7197_v7 }
 0x264   : > { %5541 = vmatprep.subr.bf16.mxu0 %v5865_v8 }
 0x267   : > { %5543 = vmatpush3.bf16.msra.mxu0 %v5542_v15 }
 0x268   : > { %5544 = vmatprep.subr.bf16.mxu0 %v5865_v8 }
 0x26b   : > { %5546 = vmatpush3.bf16.msra.mxu0 %v5545_v1 }
 0x26c   : > { %5547 = vmatprep.subr.bf16.mxu0 %v5865_v8 }
 0x26f   : > { %5549 = vmatpush3.bf16.msra.mxu0 %v5548_v13 }
 0x270   : > { %5550 = vmatprep.subr.bf16.mxu0 %v5865_v8 }
 0x273   : > { %5552 = vmatpush3.bf16.msra.mxu0 %v5551_v30 }
 0x274   : > { %5553 = vmatprep.subr.bf16.mxu0 %v5865_v8  ;;  %v4600_v8 = vld [vmem:[%s7657_s6] ss:$0 sm:$0xff] }
 0x277   : > { %5555 = vmatpush3.bf16.msra.mxu0 %v5554_v25 }
 0x32d   : > { %v2745_v59 = vpop.f32.mrb[128].mxu0 }
 0x32e   : > { %v2746_v56 = vadd.f32 %v4599_v35, %v2745_v59  ;;  %v5430_v23 = vpop.f32.mrb[129].mxu0 }
 0x330   : > { %v2749_v54 = vmax.f32 %v2746_v56, 0.0 }
 0x332   : > { %5464 = vmatmul.mubr.f32.vlgmr.msra.gmra.mrb[130].mxu0 %v2749_v54 }
 0x405   : > { %v2839_v61 = vpop.f32.mrb[130].mxu0 }
 0x406   : > { %v2840_v38 = vadd.f32 %v4600_v8, %v2839_v61  ;;  %v5465_v11 = vpop.f32.mrb[131].mxu0 }
 0x408   : > { %v2844_v2 = vrot.slane %v2840_v38, 1 }
 0x40a   : > { %v2846_v0 = vadd.f32 %v2844_v2, %v2840_v38  ;;  %v3080_v38 = vand.u32 127, %v2851_v42 }
 0x40c   : > { %v2847_v3 = vmul.f32 0.5, %v2846_v0  ;;  %v3085_v0 = vadd.s32 4294967288, %v3080_v38 }
 0x40e   : > { %5850 = vtanh.f32 %v2847_v3 }
 0x418   : > { %v5851_v39 = vpop.eup %5850 }
 0x419   : > { %v2849_v58 = vadd.f32 1.0, %v5851_v39 }
 0x41b   : > { %v2850_v12 = vmul.f32 0.5, %v2849_v58  ;;  %v7392_v58 = vsub.s32 %v3085_v0, %v7197_v7 }
 0x41d   : > { %v2854_v57 = vrot.slane %v2850_v12, %v7200_v18  ;;  %v7395_v12 = vsub.s32 %v3080_v38, %v7197_v7 }
 0x41f   : > { %v7204_v15 = vmul.f32 %v2854_v57, %v6953_v43  ;;  %v7207_v48 = vmul.f32 %v2854_v57, %v6947_v14  ;;  %v7212_v45 = vmul.f32 %v2854_v57, %v6959_v4  ;;  %v7215_v1 = vmul.f32 %v2854_v57, %v6950_v10 }
 0x420   : > { %v7220_v43 = vmul.f32 %v2854_v57, %v7019_v46  ;;  %v7223_v14 = vmul.f32 %v2854_v57, %v7014_v40  ;;  %v7228_v4 = vmul.f32 %v2854_v57, %v7031_v17  ;;  %v7231_v10 = vmul.f32 %v2854_v57, %v7025_v60 }
 0x421   : > { %2891 = vmax.xlane.f32.xlu1 %v7204_v15  ;;  %2887 = vmax.xlane.f32.xlu0 %v7207_v48  ;;  %v7236_v46 = vmul.f32 %v2854_v57, %v6971_v41  ;;  %v7239_v40 = vmul.f32 %v2854_v57, %v6965_v50  ;;  %v7244_v17 = vmul.f32 %v2854_v57, %v7039_v28 }
 0x422   : > { %7670 = vst [vmem:[#allocation3_spill] sm:$0xff] %v7220_v43  ;;  %7671 = vst [vmem:[#allocation4_spill] sm:$0xff] %v7223_v14  ;;  %v7247_v60 = vmul.f32 %v2854_v57, %v7034_v27  ;;  %v7252_v41 = vmul.f32 %v2854_v57, %v6979_v47  ;;  %v7255_v50 = vmul.f32 %v2854_v57, %v6974_v9 }
 0x423   : > { %v7260_v28 = vmul.f32 %v2854_v57, %v7051_v51  ;;  %v7263_v27 = vmul.f32 %v2854_v57, %v7045_v24  ;;  %v7268_v47 = vmul.f32 %v2854_v57, %v6991_v31  ;;  %v7271_v9 = vmul.f32 %v2854_v57, %v6985_v53 }
 0x424   : > { %v7276_v51 = vmul.f32 %v2854_v57, %v7065_v55  ;;  %v7279_v24 = vmul.f32 %v2854_v57, %v7054_v29  ;;  %v7284_v31 = vmul.f32 %v2854_v57, %v6999_v36  ;;  %v7287_v53 = vmul.f32 %v2854_v57, %v6994_v22 }
 0x425   : > { %2893 = vmax.xlane.f32.xlu1 %v7212_v45  ;;  %2889 = vmax.xlane.f32.xlu0 %v7215_v1  ;;  %v7292_v55 = vmul.f32 %v2854_v57, %v7086_v32  ;;  %v7295_v29 = vmul.f32 %v2854_v57, %v7076_v33  ;;  %v7300_v36 = vmul.f32 %v2854_v57, %v7011_v62 }
 0x426   : > { %7672 = vst [vmem:[#allocation5_spill] sm:$0xff] %v7284_v31  ;;  %v7303_v22 = vmul.f32 %v2854_v57, %v7005_v63  ;;  %v7308_v32 = vmul.f32 %v2854_v57, %v7098_v52  ;;  %v7311_v33 = vmul.f32 %v2854_v57, %v7093_v16  ;;  %v7316_v62 = vmul.f32 %v2854_v57, %v7123_v49  ;;  %v3444_v49 = vld [vmem:[%s7658_s7] sm:$0xff] }
 0x427   : > { %7673 = vst [vmem:[#allocation6_spill] sm:$0xff] %v7300_v36  ;;  %v7319_v63 = vmul.f32 %v2854_v57, %v7112_v19  ;;  %v7324_v52 = vmul.f32 %v2854_v57, %v7118_v20  ;;  %v7327_v16 = vmul.f32 %v2854_v57, %v7108_v26  ;;  %v4601_v26 = vld [vmem:[%s7658_s7 + $0x10] sm:$0xff]  ;;  %v4602_v19 = vld [vmem:[%s7658_s7 + $0x18] sm:$0xff]  ;;  %v7357_v5 = vpack.c.bf16 %v3445_v6, %v3444_v49 }
 0x428   : > { %7674 = vst [vmem:[#allocation7_spill] sm:$0xff] %v7303_v22  ;;  %v5556_v20 = vpack.c.bf16 %v4602_v19, %v4601_v26 }
 0x429   : > { %2917 = vmax.xlane.f32.xlu1 %v7220_v43  ;;  %2915 = vmax.xlane.f32.xlu0 %v7223_v14  ;;  %7675 = vst [vmem:[#allocation8_spill] sm:$0xff] %v7324_v52  ;;  %7676 = vst [vmem:[#allocation9_spill] sm:$0xff] %v7327_v16 }
 0x42a   : > { %5557 = vmatprep.subr.bf16.mxu0 %v5556_v20 }
 0x42b   : > { %5559 = vmatpush3.bf16.msra.mxu0 %v5556_v20 }
 0x42c   : > { %5561 = vmatprep.subr.bf16.mxu0 %v7357_v5 }
 0x42d   : > { %2921 = vmax.xlane.f32.xlu1 %v7228_v4  ;;  %2919 = vmax.xlane.f32.xlu0 %v7231_v10 }
 0x431   : > { %2897 = vmax.xlane.f32.xlu1 %v7236_v46  ;;  %2895 = vmax.xlane.f32.xlu0 %v7239_v40 }
 0x435   : > { %2925 = vmax.xlane.f32.xlu1 %v7244_v17  ;;  %2923 = vmax.xlane.f32.xlu0 %v7247_v60 }
 0x439   : > { %2901 = vmax.xlane.f32.xlu1 %v7252_v41  ;;  %2899 = vmax.xlane.f32.xlu0 %v7255_v50 }
 0x43d   : > { %2929 = vmax.xlane.f32.xlu1 %v7260_v28  ;;  %2927 = vmax.xlane.f32.xlu0 %v7263_v27 }
 0x441   : > { %2905 = vmax.xlane.f32.xlu1 %v7268_v47  ;;  %2903 = vmax.xlane.f32.xlu0 %v7271_v9 }
 0x445   : > { %2933 = vmax.xlane.f32.xlu1 %v7276_v51  ;;  %2931 = vmax.xlane.f32.xlu0 %v7279_v24 }
 0x449   : > { %2909 = vmax.xlane.f32.xlu1 %v7284_v31  ;;  %2907 = vmax.xlane.f32.xlu0 %v7287_v53 }
 0x44d   : > { %2937 = vmax.xlane.f32.xlu1 %v7292_v55  ;;  %2935 = vmax.xlane.f32.xlu0 %v7295_v29 }
 0x451   : > { %2913 = vmax.xlane.f32.xlu1 %v7300_v36  ;;  %2911 = vmax.xlane.f32.xlu0 %v7303_v22 }
 0x455   : > { %2941 = vmax.xlane.f32.xlu1 %v7308_v32  ;;  %2939 = vmax.xlane.f32.xlu0 %v7311_v33 }
 0x459   : > { %2945 = vmax.xlane.f32.xlu1 %v7316_v62  ;;  %2943 = vmax.xlane.f32.xlu0 %v7319_v63 }
 0x45d   : > { %2949 = vmax.xlane.f32.xlu1 %v7324_v52  ;;  %2947 = vmax.xlane.f32.xlu0 %v7327_v16 }
 0x461   : > { %2953 = vadd.xlane.f32.xlu1 %v7215_v1  ;;  %2951 = vadd.xlane.f32.xlu0 %v7207_v48 }
 0x465   : > { %2957 = vadd.xlane.f32.xlu1 %v7212_v45  ;;  %2955 = vadd.xlane.f32.xlu0 %v7204_v15 }
 0x469   : > { %2961 = vadd.xlane.f32.xlu1 %v7236_v46  ;;  %2959 = vadd.xlane.f32.xlu0 %v7239_v40 }
 0x46d   : > { %2981 = vadd.xlane.f32.xlu1 %v7220_v43  ;;  %2979 = vadd.xlane.f32.xlu0 %v7223_v14 }
 0x471   : > { %2985 = vadd.xlane.f32.xlu1 %v7228_v4  ;;  %2983 = vadd.xlane.f32.xlu0 %v7231_v10 }
 0x475   : > { %2965 = vadd.xlane.f32.xlu1 %v7252_v41  ;;  %2963 = vadd.xlane.f32.xlu0 %v7255_v50 }
 0x479   : > { %2989 = vadd.xlane.f32.xlu1 %v7244_v17  ;;  %2987 = vadd.xlane.f32.xlu0 %v7247_v60 }
 0x47d   : > { %2969 = vadd.xlane.f32.xlu1 %v7268_v47  ;;  %2967 = vadd.xlane.f32.xlu0 %v7271_v9 }
 0x481   : > { %2993 = vadd.xlane.f32.xlu1 %v7260_v28  ;;  %2991 = vadd.xlane.f32.xlu0 %v7263_v27 }
 0x485   : > { %2973 = vadd.xlane.f32.xlu1 %v7284_v31  ;;  %2971 = vadd.xlane.f32.xlu0 %v7287_v53 }
 0x489   : > { %2997 = vadd.xlane.f32.xlu1 %v7276_v51  ;;  %2995 = vadd.xlane.f32.xlu0 %v7279_v24 }
 0x48d   : > { %2977 = vadd.xlane.f32.xlu1 %v7300_v36  ;;  %2975 = vadd.xlane.f32.xlu0 %v7303_v22 }
 0x491   : > { %3001 = vadd.xlane.f32.xlu1 %v7292_v55  ;;  %2999 = vadd.xlane.f32.xlu0 %v7295_v29 }
 0x495   : > { %3005 = vadd.xlane.f32.xlu1 %v7308_v32  ;;  %3003 = vadd.xlane.f32.xlu0 %v7311_v33 }
 0x499   : > { %3009 = vadd.xlane.f32.xlu1 %v7316_v62  ;;  %3007 = vadd.xlane.f32.xlu0 %v7319_v63 }
 0x49d   : > { %3013 = vadd.xlane.f32.xlu1 %v7324_v52  ;;  %3011 = vadd.xlane.f32.xlu0 %v7327_v16 }
 0x4ae   : > { %v2892_v13 = vpop.xlane.xlu1 %2891  ;;  %v2888_v37 = vpop.xlane.xlu0 %2887 }
 0x4af   : > { %v3095_v20 = vrot.slane %v2892_v13, %v7395_v12  ;;  %v3084_v49 = vrot.slane %v2888_v37, %v7395_v12 }
 0x4b2   : > { %v2894_v44 = vpop.xlane.xlu1 %2893  ;;  %v2890_v30 = vpop.xlane.xlu0 %2889 }
 0x4b3   : > { %v3099_v19 = vrot.slane %v2894_v44, %v7392_v58  ;;  %v3089_v42 = vrot.slane %v2890_v30, %v7392_v58 }
 0x4b5   : > { %v3100_v0 = vsel %vm3090_vm6, %v3099_v19, %v3095_v20  ;;  %v3091_v38 = vsel %vm3090_vm6, %v3089_v42, %v3084_v49 }
 0x4b6   : > { %v7378_v21 = vpop.xlane.xlu1 %2917  ;;  %v7380_v34 = vpop.xlane.xlu0 %2915  ;;  %v3228_v14 = vsel %vm3227_vm7, %v3100_v0, %v3091_v38 }
 0x4ba   : > { %v2922_v25 = vpop.xlane.xlu1 %2921  ;;  %v2920_v35 = vpop.xlane.xlu0 %2919 }
 0x4bb   : > { %v3162_v19 = vrot.slane %v2922_v25, %v7392_v58  ;;  %v3158_v42 = vrot.slane %v2920_v35, %v7395_v12 }
 0x4be   : > { %v2898_v59 = vpop.xlane.xlu1 %2897  ;;  %v2896_v56 = vpop.xlane.xlu0 %2895 }
 0x4bf   : > { %v3108_v16 = vrot.slane %v2898_v59, %v7392_v58  ;;  %v3104_v44 = vrot.slane %v2896_v56, %v7395_v12  ;;  %v3153_v56 = vrot.slane %v7378_v21, %v7392_v58 }
 0x4c1   : > { %v3109_v0 = vsel %vm3090_vm6, %v3108_v16, %v3104_v44 }
 0x4c2   : > { %v7382_v23 = vpop.xlane.xlu1 %2925  ;;  %v7384_v54 = vpop.xlane.xlu0 %2923 }
 0x4c3   : > { %v3171_v25 = vrot.slane %v7382_v23, %v7392_v58  ;;  %v3167_v35 = vrot.slane %v7384_v54, %v7395_v12 }
 0x4c6   : > { %v2902_v8 = vpop.xlane.xlu1 %2901  ;;  %v2900_v61 = vpop.xlane.xlu0 %2899 }
 0x4c7   : > { %v3117_v30 = vrot.slane %v2902_v8, %v7392_v58  ;;  %v3113_v13 = vrot.slane %v2900_v61, %v7395_v12  ;;  %v3149_v8 = vrot.slane %v7380_v34, %v7395_v12 }
 0x4ca   : > { %v7387_v11 = vpop.xlane.xlu1 %2929  ;;  %v7389_v2 = vpop.xlane.xlu0 %2927 }
 0x4cb   : > { %v3180_v21 = vrot.slane %v7387_v11, %v7392_v58  ;;  %v3176_v34 = vrot.slane %v7389_v2, %v7395_v12 }
 0x4ce   : > { %v2906_v3 = vpop.xlane.xlu1 %2905  ;;  %v2904_v39 = vpop.xlane.xlu0 %2903 }
 0x4cf   : > { %v3126_v20 = vrot.slane %v2906_v3, %v7392_v58  ;;  %v3122_v59 = vrot.slane %v2904_v39, %v7395_v12  ;;  %v3118_v3 = vsel %vm3090_vm6, %v3117_v30, %v3113_v13  ;;  %v3230_v30 = vsel %vm3229_vm9, %v3109_v0, %v3228_v14 }
 0x4d1   : > { %v3127_v23 = vsel %vm3090_vm6, %v3126_v20, %v3122_v59 }
 0x4d2   : > { %v7397_v57 = vpop.xlane.xlu1 %2933  ;;  %v7399_v26 = vpop.xlane.xlu0 %2931 }
 0x4d3   : > { %v3189_v54 = vrot.slane %v7397_v57, %v7392_v58  ;;  %v3185_v44 = vrot.slane %v7399_v26, %v7395_v12  ;;  %v3181_v26 = vsel %vm3090_vm6, %v3180_v21, %v3176_v34 }
 0x4d6   : > { %v2910_v6 = vpop.xlane.xlu1 %2909  ;;  %v2908_v52 = vpop.xlane.xlu0 %2907 }
 0x4d7   : > { %v3135_v61 = vrot.slane %v2910_v6, %v7392_v58  ;;  %v3131_v49 = vrot.slane %v2908_v52, %v7395_v12  ;;  %v3163_v6 = vsel %vm3090_vm6, %v3162_v19, %v3158_v42  ;;  %v3172_v19 = vsel %vm3090_vm6, %v3171_v25, %v3167_v35 }
 0x4d8   : > { %v3232_v42 = vsel %vm3231_vm10, %v3118_v3, %v3230_v30 }
 0x4d9   : > { %v3136_v11 = vsel %vm3090_vm6, %v3135_v61, %v3131_v49  ;;  %v3234_v14 = vsel %vm3233_vm11, %v3127_v23, %v3232_v42 }
 0x4da   : > { %v2938_v43 = vpop.xlane.xlu1 %2937  ;;  %v2936_v37 = vpop.xlane.xlu0 %2935 }
 0x4db   : > { %v3198_v2 = vrot.slane %v2938_v43, %v7392_v58  ;;  %v3194_v13 = vrot.slane %v2936_v37, %v7395_v12 }
 0x4dd   : > { %v3199_v0 = vsel %vm3090_vm6, %v3198_v2, %v3194_v13 }
 0x4de   : > { %v2914_v39 = vpop.xlane.xlu1 %2913  ;;  %v2912_v38 = vpop.xlane.xlu0 %2911 }
 0x4df   : > { %v3144_v52 = vrot.slane %v2914_v39, %v7392_v58  ;;  %v3140_v16 = vrot.slane %v2912_v38, %v7395_v12  ;;  %v3154_v39 = vsel %vm3090_vm6, %v3153_v56, %v3149_v8  ;;  %v3190_v56 = vsel %vm3090_vm6, %v3189_v54, %v3185_v44 }
 0x4e0   : > { %v3240_v37 = vsel %vm3239_vm8, %v3163_v6, %v3154_v39  ;;  %v3236_v8 = vsel %vm3235_vm12, %v3136_v11, %v3234_v14 }
 0x4e1   : > { %v3145_v20 = vsel %vm3090_vm6, %v3144_v52, %v3140_v16  ;;  %v3241_v49 = vsel %vm3227_vm7, %v3172_v19, %v3240_v37 }
 0x4e2   : > { %v2942_v57 = vpop.xlane.xlu1 %2941  ;;  %v2940_v59 = vpop.xlane.xlu0 %2939  ;;  %v3238_v25 = vsel %vm3237_vm13, %v3145_v20, %v3236_v8  ;;  %v3242_v35 = vsel %vm3229_vm9, %v3181_v26, %v3241_v49  ;;  %v4608_v26 = vld [vmem:[%s7658_s7 + $0x28] sm:$0xff] }
 0x4e3   : > { %v3207_v61 = vrot.slane %v2942_v57, %v7392_v58  ;;  %v3203_v43 = vrot.slane %v2940_v59, %v7395_v12  ;;  %v3243_v34 = vsel %vm3231_vm10, %v3190_v56, %v3242_v35  ;;  %v3249_v23 = vsel %vm591_vm0, 0.0, %v3238_v25  ;;  %v4607_v59 = vld [vmem:[%s7658_s7 + $0x20] sm:$0xff]  ;;  %v4611_v25 = vld [vmem:[%s7658_s7 + $0x30] sm:$0xff]  ;;  %v4612_v35 = vld [vmem:[%s7658_s7 + $0x38] sm:$0xff] }
 0x4e4   : > { %v3244_v6 = vsel %vm3233_vm11, %v3199_v0, %v3243_v34  ;;  %v3452_v19 = vrot.slane %v3249_v23, 1  ;;  %v5564_v56 = vpack.c.bf16 %v4608_v26, %v4607_v59  ;;  %v3620_v34 = vrot.slane %v3249_v23, 2 }
 0x4e5   : > { %v3208_v3 = vsel %vm3090_vm6, %v3207_v61, %v3203_v43 }
 0x4e6   : > { %v2946_v38 = vpop.xlane.xlu1 %2945  ;;  %v2944_v21 = vpop.xlane.xlu0 %2943  ;;  %v3245_v54 = vsel %vm3235_vm12, %v3208_v3, %v3244_v6 }
 0x4e7   : > { %v3216_v52 = vrot.slane %v2946_v38, %v7392_v58  ;;  %v3212_v16 = vrot.slane %v2944_v21, %v7395_v12 }
 0x4e9   : > { %v3217_v44 = vsel %vm3090_vm6, %v3216_v52, %v3212_v16  ;;  %v5568_v52 = vpack.c.bf16 %v4612_v35, %v4611_v25 }
 0x4ea   : > { %v3246_v30 = vsel %vm3237_vm13, %v3217_v44, %v3245_v54  ;;  %v2950_v11 = vpop.xlane.xlu1 %2949  ;;  %v2948_v2 = vpop.xlane.xlu0 %2947  ;;  %v4615_v44 = vld [vmem:[%s7658_s7 + $0x40] sm:$0xff] }
 0x4eb   : > { %v3225_v13 = vrot.slane %v2950_v11, %v7392_v58  ;;  %v3221_v39 = vrot.slane %v2948_v2, %v7395_v12  ;;  %v3453_v42 = vrot.slane %v3246_v30, 1  ;;  %v3621_v21 = vrot.slane %v3246_v30, 2 }
 0x4ed   : > { %v3226_v20 = vsel %vm3090_vm6, %v3225_v13, %v3221_v39  ;;  %v3454_v57 = vsel %vm867_vm4, %v3452_v19, %v3453_v42 }
 0x4ee   : > { %v3250_v14 = vsel %vm591_vm0, %v3226_v20, 0.0  ;;  %v2954_v61 = vpop.xlane.xlu1 %2953  ;;  %5470 = vmatprep.mubr.msk.f32.mxu0 %vm3457_vm14, %v3454_v57  ;;  %v2952_v43 = vpop.xlane.xlu0 %2951 }
 0x4ef   : > { %v3455_v37 = vrot.slane %v3250_v14, 1  ;;  %v3623_v54 = vrot.slane %v3250_v14, 2  ;;  %v3016_v35 = vmul.f32 0.0078125, %v2954_v61 }
 0x4f1   : > { %v3456_v8 = vsel %vm867_vm4, %v3453_v42, %v3455_v37  ;;  %v3290_v22 = vrot.slane %v3016_v35, %v7392_v58 }
 0x4f2   : > { %v2958_v49 = vpop.xlane.xlu1 %2957  ;;  %5471 = vmatmul.mubr.msk.f32.vlgmr.msra.gmra.mrb[132].mxu0 %vm3457_vm14, %v3456_v8  ;;  %v2956_v0 = vpop.xlane.xlu0 %2955 }
 0x4f3   : > { %5477 = vmatprep.mubr.msk.f32.mxu0 %vm3457_vm14, %v3249_v23  ;;  %5563 = vmatpush3.bf16.msra.mxu0 %v7357_v5  ;;  %v3622_v5 = vsel %vm3619_vm15, %v3620_v34, %v3621_v21  ;;  %v4616_v23 = vld [vmem:[%s7658_s7 + $0x48] sm:$0xff]  ;;  %v3018_v26 = vmul.f32 0.0078125, %v2958_v49  ;;  %v3017_v14 = vmul.f32 0.0078125, %v2956_v0  ;;  %v3015_v34 = vmul.f32 0.0078125, %v2952_v43 }
 0x4f4   : > { %5565 = vmatprep.subr.bf16.mxu0 %v5564_v56  ;;  %v7499_v13 = vpack.c.bf16 %v4616_v23, %v4615_v44 }
 0x4f6   : > { %v2962_v3 = vpop.xlane.xlu1 %2961  ;;  %v2960_v38 = vpop.xlane.xlu0 %2959 }
 0x4f7   : > { %v3020_v8 = vmul.f32 0.0078125, %v2962_v3  ;;  %v3019_v25 = vmul.f32 0.0078125, %v2960_v38  ;;  %v3286_v3 = vrot.slane %v3015_v34, %v7395_v12 }
 0x4f9   : > { %v3304_v36 = vrot.slane %v3019_v25, %v7395_v12  ;;  %v3291_v25 = vsel %vm3090_vm6, %v3290_v22, %v3286_v3 }
 0x4fa   : > { %v2982_v16 = vpop.xlane.xlu1 %2981  ;;  %5478 = vmatmul.mubr.msk.f32.vlgmr.msra.gmra.mrb[132].mxu0 %vm3457_vm14, %v3246_v30  ;;  %v2980_v6 = vpop.xlane.xlu0 %2979  ;;  %v3624_v30 = vsel %vm3619_vm15, %v3621_v21, %v3623_v54  ;;  %v3299_v54 = vrot.slane %v3018_v26, %v7392_v58 }
 0x4fb   : > { %5484 = vmatprep.mubr.msk.f32.mxu0 %vm3457_vm14, %v3622_v5  ;;  %5567 = vmatpush3.bf16.msra.mxu0 %v5564_v56 }
 0x4fc   : > { %5569 = vmatprep.subr.bf16.mxu0 %v5568_v52 }
 0x4fe   : > { %v2986_v11 = vpop.xlane.xlu1 %2985  ;;  %v2984_v2 = vpop.xlane.xlu0 %2983 }
 0x4ff   : > { %v3032_v31 = vmul.f32 0.0078125, %v2986_v11 }
 0x502   : > { %v2966_v39 = vpop.xlane.xlu1 %2965  ;;  %5485 = vmatmul.mubr.msk.f32.vlgmr.msra.gmra.mrb[132].mxu0 %vm3457_vm14, %v3624_v30  ;;  %v2964_v19 = vpop.xlane.xlu0 %2963  ;;  %v3308_v30 = vrot.slane %v3020_v8, %v7392_v58 }
 0x503   : > { %5571 = vmatpush3.bf16.msra.mxu0 %v5568_v52  ;;  %v3022_v21 = vmul.f32 0.0078125, %v2966_v39  ;;  %v3021_v5 = vmul.f32 0.0078125, %v2964_v19  ;;  %v3295_v52 = vrot.slane %v3017_v14, %v7395_v12 }
 0x504   : > { %5573 = vmatprep.subr.bf16.mxu0 %v7499_v13  ;;  %v3309_v8 = vsel %vm3090_vm6, %v3308_v30, %v3304_v36  ;;  %v3031_v36 = vmul.f32 0.0078125, %v2984_v2  ;;  %v3362_v30 = vrot.slane %v3032_v31, %v7392_v58 }
 0x505   : > { %v3317_v38 = vrot.slane %v3022_v21, %v7392_v58  ;;  %v3313_v39 = vrot.slane %v3021_v5, %v7395_v12  ;;  %v3300_v19 = vsel %vm3090_vm6, %v3299_v54, %v3295_v52  ;;  %v3030_v52 = vmul.f32 0.0078125, %v2982_v16 }
 0x506   : > { %v2990_v42 = vpop.xlane.xlu1 %2989  ;;  %v2988_v20 = vpop.xlane.xlu0 %2987  ;;  %v3427_v21 = vsel %vm3227_vm7, %v3300_v19, %v3291_v25  ;;  %v3358_v2 = vrot.slane %v3031_v36, %v7395_v12 }
 0x507   : > { %v3318_v5 = vsel %vm3090_vm6, %v3317_v38, %v3313_v39  ;;  %v3428_v54 = vsel %vm3229_vm9, %v3309_v8, %v3427_v21 }
 0x508   : > { %v3429_v3 = vsel %vm3231_vm10, %v3318_v5, %v3428_v54 }
 0x50a   : > { %v2970_v57 = vpop.xlane.xlu1 %2969  ;;  %v2968_v59 = vpop.xlane.xlu0 %2967 }
 0x50b   : > { %v3024_v49 = vmul.f32 0.0078125, %v2970_v57  ;;  %v3023_v0 = vmul.f32 0.0078125, %v2968_v59 }
 0x50d   : > { %v3326_v57 = vrot.slane %v3024_v49, %v7392_v58  ;;  %v3322_v59 = vrot.slane %v3023_v0, %v7395_v12 }
 0x50e   : > { %v2994_v37 = vpop.xlane.xlu1 %2993  ;;  %v2992_v56 = vpop.xlane.xlu0 %2991 }
 0x50f   : > { %v3327_v49 = vsel %vm3090_vm6, %v3326_v57, %v3322_v59  ;;  %v3036_v38 = vmul.f32 0.0078125, %v2994_v37  ;;  %v3035_v39 = vmul.f32 0.0078125, %v2992_v56  ;;  %v3353_v37 = vrot.slane %v3030_v52, %v7392_v58 }
 0x510   : > { %v3430_v59 = vsel %vm3233_vm11, %v3327_v49, %v3429_v3 }
 0x511   : > { %v3376_v54 = vrot.slane %v3035_v39, %v7395_v12 }
 0x512   : > { %v2974_v44 = vpop.xlane.xlu1 %2973  ;;  %v2972_v23 = vpop.xlane.xlu0 %2971 }
 0x513   : > { %v3026_v61 = vmul.f32 0.0078125, %v2974_v44  ;;  %v3025_v43 = vmul.f32 0.0078125, %v2972_v23  ;;  %v3029_v44 = vmul.f32 0.0078125, %v2980_v6 }
 0x515   : > { %v3335_v35 = vrot.slane %v3026_v61, %v7392_v58  ;;  %v3331_v34 = vrot.slane %v3025_v43, %v7395_v12  ;;  %v3034_v61 = vmul.f32 0.0078125, %v2990_v42  ;;  %v3033_v43 = vmul.f32 0.0078125, %v2988_v20 }
 0x516   : > { %v2998_v26 = vpop.xlane.xlu1 %2997  ;;  %v2996_v14 = vpop.xlane.xlu0 %2995 }
 0x517   : > { %v3336_v19 = vsel %vm3090_vm6, %v3335_v35, %v3331_v34  ;;  %v3038_v8 = vmul.f32 0.0078125, %v2998_v26  ;;  %v3037_v31 = vmul.f32 0.0078125, %v2996_v14  ;;  %v3371_v56 = vrot.slane %v3034_v61, %v7392_v58 }
 0x518   : > { %v3431_v20 = vsel %vm3235_vm12, %v3336_v19, %v3430_v59  ;;  %v3367_v35 = vrot.slane %v3033_v43, %v7395_v12  ;;  %v3349_v26 = vrot.slane %v3029_v44, %v7395_v12  ;;  %v3380_v14 = vrot.slane %v3036_v38, %v7392_v58 }
 0x519   : > { %v3385_v52 = vrot.slane %v3037_v31, %v7395_v12 }
 0x51a   : > { %v2978_v11 = vpop.xlane.xlu1 %2977  ;;  %v2976_v23 = vpop.xlane.xlu0 %2975  ;;  %v3372_v43 = vsel %vm3090_vm6, %v3371_v56, %v3367_v35  ;;  %v3354_v19 = vsel %vm3090_vm6, %v3353_v37, %v3349_v26 }
 0x51b   : > { %v3028_v22 = vmul.f32 0.0078125, %v2978_v11  ;;  %v3027_v0 = vmul.f32 0.0078125, %v2976_v23  ;;  %v3363_v11 = vsel %vm3090_vm6, %v3362_v30, %v3358_v2  ;;  %v3389_v23 = vrot.slane %v3038_v8, %v7392_v58 }
 0x51c   : > { %v3381_v30 = vsel %vm3090_vm6, %v3380_v14, %v3376_v54 }
 0x51d   : > { %v3344_v16 = vrot.slane %v3028_v22, %v7392_v58  ;;  %v3340_v6 = vrot.slane %v3027_v0, %v7395_v12 }
 0x51e   : > { %v3002_v25 = vpop.xlane.xlu1 %3001  ;;  %v3000_v57 = vpop.xlane.xlu0 %2999 }
 0x51f   : > { %v3040_v21 = vmul.f32 0.0078125, %v3002_v25  ;;  %v3039_v5 = vmul.f32 0.0078125, %v3000_v57  ;;  %v3345_v42 = vsel %vm3090_vm6, %v3344_v16, %v3340_v6  ;;  %v3433_v16 = vsel %vm3239_vm8, %v3363_v11, %v3354_v19 }
 0x520   : > { %v3432_v34 = vsel %vm3237_vm13, %v3345_v42, %v3431_v20  ;;  %v3390_v6 = vsel %vm3090_vm6, %v3389_v23, %v3385_v52  ;;  %v3434_v31 = vsel %vm3227_vm7, %v3372_v43, %v3433_v16 }
 0x521   : > { %v3442_v36 = vsel %vm591_vm0, 0.0, %v3432_v34  ;;  %v3398_v0 = vrot.slane %v3040_v21, %v7392_v58  ;;  %v3394_v44 = vrot.slane %v3039_v5, %v7395_v12  ;;  %v4619_v21 = vld [vmem:[%s7658_s7 + $0x50] sm:$0xff]  ;;  %v4620_v5 = vld [vmem:[%s7658_s7 + $0x58] sm:$0xff]  ;;  %v3435_v42 = vsel %vm3229_vm9, %v3381_v30, %v3434_v31 }
 0x522   : > { %v3006_v49 = vpop.xlane.xlu1 %3005  ;;  %5491 = vmatprep.mubr.msk.f32.mxu0 %vm3457_vm14, %v3442_v36  ;;  %v3004_v22 = vpop.xlane.xlu0 %3003  ;;  %v3436_v37 = vsel %vm3231_vm10, %v3390_v6, %v3435_v42  ;;  %v5576_v54 = vpack.c.bf16 %v4620_v5, %v4619_v21  ;;  %v3884_v16 = vrot.slane %v3442_v36, 2 }
 0x523   : > { %v3042_v3 = vmul.f32 0.0078125, %v3006_v49  ;;  %v3041_v61 = vmul.f32 0.0078125, %v3004_v22  ;;  %v3399_v25 = vsel %vm3090_vm6, %v3398_v0, %v3394_v44  ;;  %v3795_v0 = vrot.slane %v3442_v36, 1 }
 0x524   : > { %v3437_v34 = vsel %vm3233_vm11, %v3399_v25, %v3436_v37 }
 0x525   : > { %v3407_v38 = vrot.slane %v3042_v3, %v7392_v58  ;;  %v3403_v39 = vrot.slane %v3041_v61, %v7395_v12 }
 0x526   : > { %v3010_v2 = vpop.xlane.xlu1 %3009  ;;  %v3008_v8 = vpop.xlane.xlu0 %3007 }
 0x527   : > { %v3044_v57 = vmul.f32 0.0078125, %v3010_v2  ;;  %v3043_v59 = vmul.f32 0.0078125, %v3008_v8  ;;  %v3408_v20 = vsel %vm3090_vm6, %v3407_v38, %v3403_v39  ;;  %v3971_v2 = vstv %s3970_s25 }
 0x528   : > { %v3438_v49 = vsel %vm3235_vm12, %v3408_v20, %v3437_v34  ;;  %v3995_v20 = vsub.s32 1, %v7197_v7 }
 0x529   : > { %v3416_v56 = vrot.slane %v3044_v57, %v7392_v58  ;;  %v3412_v35 = vrot.slane %v3043_v59, %v7395_v12 }
 0x52a   : > { %v3014_v26 = vpop.xlane.xlu1 %3013  ;;  %v3012_v14 = vpop.xlane.xlu0 %3011 }
 0x52b   : > { %v3417_v11 = vsel %vm3090_vm6, %v3416_v56, %v3412_v35  ;;  %v3046_v23 = vmul.f32 0.0078125, %v3014_v26  ;;  %v3045_v52 = vmul.f32 0.0078125, %v3012_v14  ;;  %v4006_v35 = vsub.s32 2, %v7197_v7 }
 0x52c   : > { %v3439_v22 = vsel %vm3237_vm13, %v3417_v11, %v3438_v49  ;;  %v4017_v26 = vsub.s32 3, %v7197_v7 }
 0x52d   : > { %v3425_v44 = vrot.slane %v3046_v23, %v7392_v58  ;;  %v3421_v3 = vrot.slane %v3045_v52, %v7395_v12  ;;  %5492 = vmatmul.mubr.msk.f32.vlgmr.msra.gmra.mrb[132].mxu0 %vm3457_vm14, %v3439_v22  ;;  %v3796_v61 = vrot.slane %v3439_v22, 1  ;;  %v3885_v39 = vrot.slane %v3439_v22, 2 }
 0x52e   : > { %5575 = vmatpush3.bf16.msra.mxu0 %v7499_v13  ;;  %v4039_v23 = vsub.s32 5, %v7197_v7 }
 0x52f   : > { %v3426_v43 = vsel %vm3090_vm6, %v3425_v44, %v3421_v3  ;;  %v3797_v19 = vsel %vm867_vm4, %v3795_v0, %v3796_v61  ;;  %5577 = vmatprep.subr.bf16.mxu0 %v5576_v54  ;;  %v3886_v12 = vsel %vm3619_vm15, %v3884_v16, %v3885_v39  ;;  %v4050_v0 = vsub.s32 6, %v7197_v7 }
 0x530   : > { %v3443_v30 = vsel %vm591_vm0, %v3426_v43, 0.0  ;;  %5498 = vmatprep.mubr.msk.f32.mxu0 %vm3457_vm14, %v3797_v19 }
 0x531   : > { %v3798_v38 = vrot.slane %v3443_v30, 1  ;;  %v3887_v13 = vrot.slane %v3443_v30, 2 }
 0x533   : > { %v3799_v58 = vsel %vm867_vm4, %v3796_v61, %v3798_v38  ;;  %v3888_v6 = vsel %vm3619_vm15, %v3885_v39, %v3887_v13 }
 0x535   : > { %5499 = vmatmul.mubr.msk.f32.vlgmr.msra.gmra.mrb[132].mxu0 %vm3457_vm14, %v3799_v58  ;;  %v4061_v58 = vsub.s32 7, %v7197_v7 }
 0x536   : > { %5579 = vmatpush3.bf16.msra.mxu0 %v5576_v54  ;;  %5505 = vmatprep.mubr.msk.f32.mxu0 %vm3457_vm14, %v3886_v12  ;;  %v4028_v54 = vsub.s32 4, %v7197_v7 }
 0x53d   : > { %5506 = vmatmul.mubr.msk.f32.vlgmr.msra.gmra.mrb[132].mxu0 %vm3457_vm14, %v3888_v6 }
 0x610   : > { %v5507_v8 = vpop.f32.mrb[132].mxu0 }
 0x611   : > { %v3973_v31 = vadd.f32 %v5507_v8, %v3971_v2  ;;  %v3959_v25 = vpop.f32.mrb[133].mxu0 }
 0x612   : > { %v3972_v5 = vadd.f32 %v3971_v2, %v3959_v25 }
 0x613   : > { %v3975_v36 = vmul.f32 0.5, %v3973_v31 }
 0x614   : > { %v3974_v37 = vmul.f32 0.5, %v3972_v5 }
 0x615   : > { %5852 = vtanh.f32 %v3975_v36 }
 0x616   : > { %5854 = vtanh.f32 %v3974_v37 }
 0x61f   : > { %v5853_v57 = vpop.eup %5852 }
 0x620   : > { %v3979_v59 = vadd.f32 1.0, %v5853_v57  ;;  %v5855_v52 = vpop.eup %5854 }
 0x621   : > { %v3978_v49 = vadd.f32 1.0, %v5855_v52 }
 0x622   : > { %v3981_v21 = vmul.f32 0.5, %v3979_v59 }
 0x623   : > { %v3980_v44 = vmul.f32 0.5, %v3978_v49 }
 0x624   : > { %v4073_v42 = vrot.slane %v3981_v21, %v7200_v18  ;;  %v4084_v56 = vrot.slane %v3981_v21, %v3995_v20  ;;  %v4095_v34 = vrot.slane %v3981_v21, %v4006_v35  ;;  %v4106_v14 = vrot.slane %v3981_v21, %v4017_v26 }
 0x625   : > { %v4117_v11 = vrot.slane %v3981_v21, %v4028_v54  ;;  %v4128_v22 = vrot.slane %v3981_v21, %v4039_v23  ;;  %v4139_v3 = vrot.slane %v3981_v21, %v4050_v0  ;;  %v3985_v61 = vrot.slane %v3980_v44, %v7200_v18 }
 0x626   : > { %4079 = vbcast.lane.b32.xlu1 %v4073_v42, 264  ;;  %4075 = vbcast.lane.b32.xlu0 %v4073_v42, 256  ;;  %v3996_v43 = vrot.slane %v3980_v44, %v3995_v20  ;;  %v4007_v19 = vrot.slane %v3980_v44, %v4006_v35  ;;  %v4018_v30 = vrot.slane %v3980_v44, %v4017_v26 }
 0x627   : > { %v4029_v38 = vrot.slane %v3980_v44, %v4028_v54  ;;  %v4040_v39 = vrot.slane %v3980_v44, %v4039_v23  ;;  %v4051_v16 = vrot.slane %v3980_v44, %v4050_v0  ;;  %v4062_v18 = vrot.slane %v3980_v44, %v4061_v58 }
 0x628   : > { %v4150_v12 = vrot.slane %v3981_v21, %v4061_v58 }
 0x62a   : > { %4090 = vbcast.lane.b32.xlu1 %v4084_v56, 264  ;;  %4086 = vbcast.lane.b32.xlu0 %v4084_v56, 256 }
 0x62e   : > { %4101 = vbcast.lane.b32.xlu1 %v4095_v34, 264  ;;  %4097 = vbcast.lane.b32.xlu0 %v4095_v34, 256 }
 0x632   : > { %4112 = vbcast.lane.b32.xlu1 %v4106_v14, 264  ;;  %4108 = vbcast.lane.b32.xlu0 %v4106_v14, 256 }
 0x636   : > { %4123 = vbcast.lane.b32.xlu1 %v4117_v11, 264  ;;  %4119 = vbcast.lane.b32.xlu0 %v4117_v11, 256 }
 0x63a   : > { %4134 = vbcast.lane.b32.xlu1 %v4128_v22, 264  ;;  %4130 = vbcast.lane.b32.xlu0 %v4128_v22, 256 }
 0x63e   : > { %4145 = vbcast.lane.b32.xlu1 %v4139_v3, 264  ;;  %4141 = vbcast.lane.b32.xlu0 %v4139_v3, 256 }
 0x642   : > { %3991 = vbcast.lane.b32.xlu1 %v3985_v61, 264  ;;  %3987 = vbcast.lane.b32.xlu0 %v3985_v61, 256 }
 0x646   : > { %3998 = vbcast.lane.b32.xlu1 %v3996_v43, 256  ;;  %4009 = vbcast.lane.b32.xlu0 %v4007_v19, 256 }
 0x64a   : > { %4002 = vbcast.lane.b32.xlu1 %v3996_v43, 264  ;;  %4020 = vbcast.lane.b32.xlu0 %v4018_v30, 256 }
 0x64e   : > { %4013 = vbcast.lane.b32.xlu1 %v4007_v19, 264  ;;  %4031 = vbcast.lane.b32.xlu0 %v4029_v38, 256 }
 0x652   : > { %4024 = vbcast.lane.b32.xlu1 %v4018_v30, 264  ;;  %4042 = vbcast.lane.b32.xlu0 %v4040_v39, 256 }
 0x656   : > { %4035 = vbcast.lane.b32.xlu1 %v4029_v38, 264  ;;  %4053 = vbcast.lane.b32.xlu0 %v4051_v16, 256 }
 0x65a   : > { %4046 = vbcast.lane.b32.xlu1 %v4040_v39, 264  ;;  %4064 = vbcast.lane.b32.xlu0 %v4062_v18, 256 }
 0x65e   : > { %4057 = vbcast.lane.b32.xlu1 %v4051_v16, 264  ;;  %4152 = vbcast.lane.b32.xlu0 %v4150_v12, 256 }
 0x662   : > { %4068 = vbcast.lane.b32.xlu1 %v4062_v18, 264 }
 0x666   : > { %4156 = vbcast.lane.b32.xlu1 %v4150_v12, 264 }
 0x698   : > { %v4080_v13 = vpop.permute.xlu1 %4079  ;;  %v4076_v6 = vpop.permute.xlu0 %4075 }
 0x699   : > { %v4175_v2 = vmul.f32 %v4080_v13, %v7228_v4  ;;  %v4174_v8 = vmul.f32 %v4076_v6, %v7231_v10 }
 0x69b   : > { %v4734_v7 = vpack.c.bf16 %v4175_v2, %v4174_v8 }
 0x69c   : > { %v4091_v31 = vpop.permute.xlu1 %4090  ;;  %v4087_v25 = vpop.permute.xlu0 %4086 }
 0x69d   : > { %4778 = vst [vmem:[%s7600_s29 + $0x40] sm:$0xff] %v4734_v7   ;;  %v4177_v36 = vmul.f32 %v4091_v31, %v7244_v17  ;;  %v4176_v57 = vmul.f32 %v4087_v25, %v7247_v60  ;;  %v7677_v31 = vld [vmem:[#allocation5_spill] sm:$0xff] }
 0x69f   : > { %v4739_v4 = vpack.c.bf16 %v4177_v36, %v4176_v57  ;;  %v7678_v57 = vld [vmem:[#allocation7_spill] sm:$0xff] }
 0x6a0   : > { %v4102_v10 = vpop.permute.xlu1 %4101  ;;  %v4098_v59 = vpop.permute.xlu0 %4097 }
 0x6a1   : > { %4779 = vst [vmem:[%s7600_s29 + $0x48] sm:$0xff] %v4739_v4   ;;  %v4179_v21 = vmul.f32 %v4102_v10, %v7260_v28  ;;  %v4178_v5 = vmul.f32 %v4098_v59, %v7263_v27 }
 0x6a3   : > { %v4744_v42 = vpack.c.bf16 %v4179_v21, %v4178_v5  ;;  %v7680_v21 = vld [vmem:[#allocation4_spill] sm:$0xff] }
 0x6a4   : > { %v4113_v20 = vpop.permute.xlu1 %4112  ;;  %v4109_v37 = vpop.permute.xlu0 %4108 }
 0x6a5   : > { %4780 = vst [vmem:[%s7600_s29 + $0x50] sm:$0xff] %v4744_v42   ;;  %v4181_v56 = vmul.f32 %v4113_v20, %v7276_v51  ;;  %v4180_v17 = vmul.f32 %v4109_v37, %v7279_v24  ;;  %v7681_v42 = vld [vmem:[#allocation3_spill] sm:$0xff] }
 0x6a7   : > { %v4749_v60 = vpack.c.bf16 %v4181_v56, %v4180_v17  ;;  %v7682_v17 = vld [vmem:[#allocation9_spill] sm:$0xff] }
 0x6a8   : > { %v4124_v35 = vpop.permute.xlu1 %4123  ;;  %v4120_v34 = vpop.permute.xlu0 %4119 }
 0x6a9   : > { %4781 = vst [vmem:[%s7600_s29 + $0x58] sm:$0xff] %v4749_v60   ;;  %v4183_v26 = vmul.f32 %v4124_v35, %v7292_v55  ;;  %v4182_v28 = vmul.f32 %v4120_v34, %v7295_v29  ;;  %v7683_v35 = vld [vmem:[#allocation8_spill] sm:$0xff] }
 0x6ab   : > { %v4754_v27 = vpack.c.bf16 %v4183_v26, %v4182_v28 }
 0x6ac   : > { %v4135_v14 = vpop.permute.xlu1 %4134  ;;  %v4131_v54 = vpop.permute.xlu0 %4130 }
 0x6ad   : > { %4782 = vst [vmem:[%s7600_s29 + $0x60] sm:$0xff] %v4754_v27   ;;  %v4185_v11 = vmul.f32 %v4135_v14, %v7308_v32  ;;  %v4184_v51 = vmul.f32 %v4131_v54, %v7311_v33 }
 0x6af   : > { %v4759_v24 = vpack.c.bf16 %v4185_v11, %v4184_v51 }
 0x6b0   : > { %v4146_v23 = vpop.permute.xlu1 %4145  ;;  %v4142_v52 = vpop.permute.xlu0 %4141 }
 0x6b1   : > { %4783 = vst [vmem:[%s7600_s29 + $0x68] sm:$0xff] %v4759_v24   ;;  %v4187_v49 = vmul.f32 %v4146_v23, %v7316_v62  ;;  %v4186_v55 = vmul.f32 %v4142_v52, %v7319_v63 }
 0x6b3   : > { %v4764_v22 = vpack.c.bf16 %v4187_v49, %v4186_v55 }
 0x6b4   : > { %v3992_v29 = vpop.permute.xlu1 %3991  ;;  %v3988_v0 = vpop.permute.xlu0 %3987 }
 0x6b5   : > { %4784 = vst [vmem:[%s7600_s29 + $0x70] sm:$0xff] %v4764_v22   ;;  %v4159_v44 = vmul.f32 %v3992_v29, %v7215_v1  ;;  %v4158_v32 = vmul.f32 %v3988_v0, %v7207_v48 }
 0x6b7   : > { %v4694_v3 = vpack.c.bf16 %v4159_v44, %v4158_v32 }
 0x6b8   : > { %v3999_v33 = vpop.permute.xlu1 %3998  ;;  %v4010_v61 = vpop.permute.xlu0 %4009 }
 0x6b9   : > { %4695 = vst [vmem:[%s7600_s29] sm:$0xff] %v4694_v3   ;;  %v4160_v62 = vmul.f32 %v3999_v33, %v7204_v15  ;;  %v4162_v16 = vmul.f32 %v4010_v61, %v7239_v40 }
 0x6bc   : > { %v4003_v43 = vpop.permute.xlu1 %4002  ;;  %v4021_v19 = vpop.permute.xlu0 %4020 }
 0x6bd   : > { %v4161_v63 = vmul.f32 %v4003_v43, %v7212_v45  ;;  %v4164_v12 = vmul.f32 %v4021_v19, %v7255_v50 }
 0x6bf   : > { %v4699_v30 = vpack.c.bf16 %v4161_v63, %v4160_v62 }
 0x6c0   : > { %v4014_v38 = vpop.permute.xlu1 %4013  ;;  %v4032_v39 = vpop.permute.xlu0 %4031 }
 0x6c1   : > { %4771 = vst [vmem:[%s7600_s29 + $0x8] sm:$0xff] %v4699_v30   ;;  %v4163_v48 = vmul.f32 %v4014_v38, %v7236_v46  ;;  %v4166_v6 = vmul.f32 %v4032_v39, %v7271_v9  ;;  %v7679_v9 = vld [vmem:[#allocation6_spill] sm:$0xff] }
 0x6c3   : > { %v4704_v1 = vpack.c.bf16 %v4163_v48, %v4162_v16 }
 0x6c4   : > { %v4025_v58 = vpop.permute.xlu1 %4024  ;;  %v4043_v18 = vpop.permute.xlu0 %4042 }
 0x6c5   : > { %4772 = vst [vmem:[%s7600_s29 + $0x10] sm:$0xff] %v4704_v1   ;;  %v4165_v15 = vmul.f32 %v4025_v58, %v7252_v41  ;;  %v4168_v7 = vmul.f32 %v4043_v18, %v7287_v53 }
 0x6c7   : > { %v4709_v45 = vpack.c.bf16 %v4165_v15, %v4164_v12 }
 0x6c8   : > { %v4036_v13 = vpop.permute.xlu1 %4035  ;;  %v4054_v2 = vpop.permute.xlu0 %4053 }
 0x6c9   : > { %4773 = vst [vmem:[%s7600_s29 + $0x18] sm:$0xff] %v4709_v45   ;;  %v4167_v40 = vmul.f32 %v4036_v13, %v7268_v47  ;;  %v4170_v4 = vmul.f32 %v4054_v2, %v7678_v57 }
 0x6cb   : > { %v4714_v46 = vpack.c.bf16 %v4167_v40, %v4166_v6 }
 0x6cc   : > { %v4047_v8 = vpop.permute.xlu1 %4046  ;;  %v4065_v41 = vpop.permute.xlu0 %4064 }
 0x6cd   : > { %4774 = vst [vmem:[%s7600_s29 + $0x20] sm:$0xff] %v4714_v46   ;;  %v4169_v50 = vmul.f32 %v4047_v8, %v7677_v31  ;;  %v4172_v5 = vmul.f32 %v4065_v41, %v7680_v21 }
 0x6cf   : > { %v4719_v25 = vpack.c.bf16 %v4169_v50, %v4168_v7 }
 0x6d0   : > { %v4058_v36 = vpop.permute.xlu1 %4057  ;;  %v4153_v20 = vpop.permute.xlu0 %4152 }
 0x6d1   : > { %4775 = vst [vmem:[%s7600_s29 + $0x28] sm:$0xff] %v4719_v25   ;;  %v4171_v10 = vmul.f32 %v4058_v36, %v7679_v9  ;;  %v4188_v60 = vmul.f32 %v4153_v20, %v7682_v17 }
 0x6d3   : > { %v4724_v47 = vpack.c.bf16 %v4171_v10, %v4170_v4 }
 0x6d4   : > { %v4069_v59 = vpop.permute.xlu1 %4068 }
 0x6d5   : > { %4776 = vst [vmem:[%s7600_s29 + $0x30] sm:$0xff] %v4724_v47   ;;  %v4173_v53 = vmul.f32 %v4069_v59, %v7681_v42 }
 0x6d7   : > { %v4729_v37 = vpack.c.bf16 %v4173_v53, %v4172_v5 }
 0x6d8   : > { %v4157_v56 = vpop.permute.xlu1 %4156 }
 0x6d9   : > { %4777 = vst [vmem:[%s7600_s29 + $0x38] sm:$0xff] %v4729_v37   ;;  %v4189_v34 = vmul.f32 %v4157_v56, %v7683_v35 }
 0x6db   : > { %v4769_v26 = vpack.c.bf16 %v4189_v34, %v4188_v60 }
 0x6dd   : > { %4785 = vst [vmem:[%s7600_s29 + $0x78] sm:$0xff] %v4769_v26  }
 0x6de PF: > { %s20_s11 = sadd.s32 1, %s5862_s11  }
 0x6df   : > { %p17_p4 = scmp.ge.s32.totalorder %s20_s11, 4  }
 0x6e1   :  { %19 = sbr.rel (!%p17_p4) target bundleno = 2 (0x2), region = 93 }

// kernel: attentive_cnn_forward.5
= control target key start
LH: loop header
LB: loop body
LE: loop exit
PB: predicated region body
PF: predicated region fallthrough
CT: control target
= control target key end

     0   :  { %s3555_s12 = smov 0   ;;  %s4646_s0 = inlined_call_operand.vmem [shape: bf16[2,16,16,128], index: 0, kind: input, shape index: {}]   ;;  %s4647_s1 = inlined_call_operand.vmem [shape: bf16[3,384,128], index: 1, kind: input, shape index: {}]   ;;  %s4648_s2 = inlined_call_operand.vmem [shape: f32[1,128], index: 2, kind: input, shape index: {}]   ;;  %s4649_s3 = inlined_call_operand.vmem [shape: f32[2,16,16,128], index: 3, kind: output, shape index: {}]  }
   0x1 LB: > { %s2503_s13 = sadd.s32 4294967295, %s3532_s12   ;;  %p2507_p0 = scmp.ge.s32.totalorder %s3532_s12, 1  ;;  %s3532_s12 = sphi %s3555_s12, %s13_s12  }
   0x2   : > { %p137_p1 = scmp.lt.s32.totalorder %s3532_s12, 3 }
   0x4   : > { %p138_p2 = pnand %p2507_p0, %p137_p1 }
   0x6   : > { %141 = sbr.rel (%p138_p2) target bundleno = 557 (0x22d), region = 32 }
   0xd   : > { %v3438_v0 = vld [vmem:[%s4647_s1 + $0x100] sm:$0xff]   ;;  %v3441_v3 = vld [vmem:[%s4647_s1 + $0x108] sm:$0xff]   ;;  %v3444_v6 = vld [vmem:[%s4647_s1 + $0x110] sm:$0xff]   ;;  %p161_p3 = scmp.lt.s32.totalorder %s2503_s13, 1  ;;  %vm428_vm0 = vcmask 1040384   ;;  %vm704_vm2 = vcmask 1046528  }
   0xe   : > { %v3569_v1 = vld [vmem:[%s4647_s1 + $0x140] sm:$0xff]   ;;  %2701 = vmatprep.subr.bf16.mxu0 %v3438_v0  ;;  %v3582_v4 = vld [vmem:[%s4647_s1 + $0x148] sm:$0xff]   ;;  %v3594_v7 = vld [vmem:[%s4647_s1 + $0x150] sm:$0xff]   ;;  %vm429_vm1 = vsmask.f32 256 }
   0xf   : > { %v3440_v2 = vld [vmem:[%s4647_s1 + $0xc0] sm:$0xff]   ;;  %3253 = vmatprep.subr.bf16.mxu1 %v3569_v1  ;;  %v3443_v5 = vld [vmem:[%s4647_s1 + $0xc8] sm:$0xff]   ;;  %v3446_v8 = vld [vmem:[%s4647_s1 + $0xd0] sm:$0xff]   ;;  %s4675_s13 = smov (!%p161_p3, %s2503_s13), 1  ;;  %vm463_vm4 = vsmask.f32 7424 }
  0x10   : > { %2702 = vmatpush3.bf16.msra.mxu0 %v3440_v2  ;;  %3261 = vmatpush3.bf16.msra.mxu1 %v3569_v1  ;;  %v3447_v9 = vld [vmem:[%s4647_s1 + $0x118] sm:$0xff]   ;;  %v3450_v12 = vld [vmem:[%s4647_s1 + $0x120] sm:$0xff]   ;;  %v3453_v15 = vld [vmem:[%s4647_s1 + $0x128] sm:$0xff]   ;;  %s2699_s23 = sshll.u32 %s4675_s13, 7  ;;  %s2700_s15 = sshll.u32 %s4675_s13, 8 }
  0x11   : > { %2703 = vmatprep.subr.bf16.mxu0 %v3441_v3  ;;  %3254 = vmatprep.subr.bf16.mxu1 %v3582_v4  ;;  %v3607_v10 = vld [vmem:[%s4647_s1 + $0x158] sm:$0xff]   ;;  %v3622_v13 = vld [vmem:[%s4647_s1 + $0x160] sm:$0xff]   ;;  %v3639_v16 = vld [vmem:[%s4647_s1 + $0x168] sm:$0xff]   ;;  %s3658_s5 = scalar_lea.vmem %s4646_s0, %s2699_s23  ;;  %s4537_s18 = scalar_lea.vmem %s4649_s3, %s2700_s15 }
  0x12   : > { %v3449_v11 = vld [vmem:[%s4647_s1 + $0xd8] sm:$0xff]   ;;  %v3452_v14 = vld [vmem:[%s4647_s1 + $0xe0] sm:$0xff]   ;;  %v3455_v17 = vld [vmem:[%s4647_s1 + $0xe8] sm:$0xff]  }
  0x13   : > { %v3456_v18 = vld [vmem:[%s4647_s1 + $0x130] sm:$0xff]   ;;  %v3462_v21 = vld [vmem:[%s3658_s5] sm:$0xff]   ;;  %v3459_v22 = vld [vmem:[%s4647_s1 + $0x138] sm:$0xff]  }
  0x14   : > { %2704 = vmatpush3.bf16.msra.mxu0 %v3443_v5  ;;  %3262 = vmatpush3.bf16.msra.mxu1 %v3582_v4  ;;  %v3653_v19 = vld [vmem:[%s4647_s1 + $0x170] sm:$0xff]   ;;  %v3672_v23 = vld [vmem:[%s4647_s1 + $0x178] sm:$0xff]   ;;  %v285_v24 = vshrl.u32 %v3462_v21, 16  ;;  %v288_v25 = vshll.u32 %v3462_v21, 16  ;;  %v3463_v26 = vld [vmem:[%s3658_s5 + $0x40] sm:$0xff]  }
  0x15   : > { %2705 = vmatprep.subr.bf16.mxu0 %v3444_v6  ;;  %3255 = vmatprep.subr.bf16.mxu1 %v3594_v7  ;;  %v3458_v20 = vld [vmem:[%s4647_s1 + $0xf0] sm:$0xff]   ;;  %v3464_v27 = vld [vmem:[%s3658_s5 + $0x48] sm:$0xff]   ;;  %v3461_v28 = vld [vmem:[%s4647_s1 + $0xf8] sm:$0xff]   ;;  %v341_v31 = vshrl.u32 %v3463_v26, 16  ;;  %v344_v32 = vshll.u32 %v3463_v26, 16 }
  0x16   : > { %v287_v29 = vrot.slane %v285_v24, 7  ;;  %vm3681_vm3 = vmand %vm428_vm0, %vm429_vm1  ;;  %v348_v33 = vshrl.u32 %v3464_v27, 16  ;;  %v3465_v34 = vld [vmem:[%s4647_s1 + $0x40] sm:$0xff]   ;;  %v351_v38 = vshll.u32 %v3464_v27, 16  ;;  %v3469_v48 = vld [vmem:[%s3658_s5 + $0x8] sm:$0xff]  }
  0x17   : > { %v343_v37 = vrot.slane %v341_v31, 7  ;;  %v3466_v55 = vld [vmem:[%s4647_s1] sm:$0xff]   ;;  %v292_v56 = vshrl.u32 %v3469_v48, 16  ;;  %v3467_v58 = vld [vmem:[%s4647_s1 + $0x48] sm:$0xff]   ;;  %v295_v59 = vshll.u32 %v3469_v48, 16  ;;  %v3470_v60 = vld [vmem:[%s3658_s5 + $0x50] sm:$0xff]  }
  0x18   : > { %2706 = vmatpush3.bf16.msra.mxu0 %v3446_v8  ;;  %3263 = vmatpush3.bf16.msra.mxu1 %v3594_v7  ;;  %v290_v35 = vor.u32 %v288_v25, %v287_v29  ;;  %v3691_v36 = vsel %vm3681_vm3, %v287_v29, 0  ;;  %v350_v40 = vrot.slane %v348_v33, 7  ;;  %v3471_v61 = vld [vmem:[%s3658_s5 + $0x58] sm:$0xff]   ;;  %v355_v3 = vshrl.u32 %v3470_v60, 16  ;;  %v3472_v26 = vld [vmem:[%s4647_s1 + $0x50] sm:$0xff]  }
  0x19   : > { %2707 = vmatprep.subr.bf16.mxu0 %v3447_v9  ;;  %3256 = vmatprep.subr.bf16.mxu1 %v3607_v10  ;;  %v472_v39 = vshll.u32 %v3691_v36, 16  ;;  %v346_v42 = vor.u32 %v344_v32, %v343_v37  ;;  %v3701_v43 = vsel %vm3681_vm3, %v343_v37, 0  ;;  %v294_v2 = vrot.slane %v292_v56, 7  ;;  %v3473_v37 = vld [vmem:[%s4647_s1 + $0x10] sm:$0xff]  }
  0x1a   : > { %v3697_v41 = vsel %vm3681_vm3, 0, %v290_v35  ;;  %v730_v47 = vrot.slane %v3701_v43, 1  ;;  %v353_v50 = vor.u32 %v351_v38, %v350_v40  ;;  %v3714_v51 = vsel %vm3681_vm3, %v350_v40, 0  ;;  %v3474_v40 = vld [vmem:[%s4647_s1 + $0x58] sm:$0xff]  }
  0x1b   : > { %v465_v44 = vshrl.u32 %v3697_v41, 16  ;;  %v467_v45 = vshll.u32 %v3697_v41, 16  ;;  %v474_v46 = vrot.slane %v472_v39, 1  ;;  %v3710_v49 = vsel %vm3681_vm3, 0, %v346_v42 }
  0x1c   : > { %2708 = vmatpush3.bf16.msra.mxu0 %v3449_v11  ;;  %3264 = vmatpush3.bf16.msra.mxu1 %v3607_v10  ;;  %v729_v53 = vrot.slane %v3710_v49, 1  ;;  %v733_v54 = vrot.slane %v3714_v51, 1  ;;  %v3723_v57 = vsel %vm3681_vm3, 0, %v353_v50  ;;  %v358_v5 = vshll.u32 %v3470_v60, 16 }
  0x1d   : > { %2709 = vmatprep.subr.bf16.mxu0 %v3450_v12  ;;  %3257 = vmatprep.subr.bf16.mxu1 %v3622_v13  ;;  %v469_v52 = vrot.slane %v467_v45, 1  ;;  %v732_v0 = vrot.slane %v3723_v57, 1  ;;  %v362_v6 = vshrl.u32 %v3471_v61, 16  ;;  %v365_v8 = vshll.u32 %v3471_v61, 16  ;;  %v3475_v61 = vld [vmem:[%s4647_s1 + $0x18] sm:$0xff]  }
  0x1e   : > { %v3731_v63 = vsel %vm704_vm2, %v729_v53, %v730_v47  ;;  %v297_v12 = vor.u32 %v295_v59, %v294_v2  ;;  %v3477_v47 = vld [vmem:[%s3658_s5 + $0x60] sm:$0xff]  }
  0x1f   : > { %v470_v62 = vor.u32 %v469_v52, %v465_v44  ;;  %3141 = vmatprep.mubr.bf16.mxu1 %v3731_v63  ;;  %v3739_v11 = vsel %vm704_vm2, %v732_v0, %v733_v54  ;;  %v3478_v52 = vld [vmem:[%s3658_s5 + $0x68] sm:$0xff]   ;;  %v372_v56 = vshll.u32 %v3477_v47, 16 }
  0x20   : > { %2710 = vmatpush3.bf16.msra.mxu0 %v3452_v14  ;;  %3265 = vmatpush3.bf16.msra.mxu1 %v3622_v13  ;;  %v3743_v14 = vsel %vm3681_vm3, %v294_v2, 0  ;;  %v3754_v21 = vsel %vm3681_vm3, 0, %v297_v12  ;;  %v376_v59 = vshrl.u32 %v3478_v52, 16  ;;  %v379_v60 = vshll.u32 %v3478_v52, 16  ;;  %v3479_v2 = vld [vmem:[%s4647_s1 + $0x60] sm:$0xff]  }
  0x21   : > { %2711 = vmatprep.subr.bf16.mxu0 %v3453_v15  ;;  %3258 = vmatprep.subr.bf16.mxu1 %v3639_v16  ;;  %v3736_v9 = vsel %vm463_vm4, %v470_v62, %v474_v46  ;;  %v484_v15 = vshll.u32 %v3743_v14, 16  ;;  %v479_v24 = vshll.u32 %v3754_v21, 16 }
  0x22   : > { %1042 = vmatprep.mubr.bf16.mxu0 %v3736_v9 }
  0x23   : > { %v486_v27 = vrot.slane %v484_v15, 1  ;;  %v481_v32 = vrot.slane %v479_v24, 1 }
  0x24   : > { %2712 = vmatpush3.bf16.msra.mxu0 %v3455_v17  ;;  %3266 = vmatpush3.bf16.msra.mxu1 %v3639_v16  ;;  %v357_v17 = vrot.slane %v355_v3, 7 }
  0x25   : > { %2713 = vmatprep.subr.bf16.mxu0 %v3456_v18  ;;  %3259 = vmatprep.subr.bf16.mxu1 %v3653_v19  ;;  %v364_v18 = vrot.slane %v362_v6, 7 }
  0x26   : > { %v360_v25 = vor.u32 %v358_v5, %v357_v17  ;;  %v378_v5 = vrot.slane %v376_v59, 7  ;;  %v3486_v59 = vld [vmem:[%s4647_s1 + $0x70] sm:$0xff]  }
  0x27   : > { %v367_v29 = vor.u32 %v365_v8, %v364_v18  ;;  %v3768_v31 = vsel %vm3681_vm3, %v364_v18, 0 }
  0x28   : > { %2714 = vmatpush3.bf16.msra.mxu0 %v3458_v20  ;;  %3267 = vmatpush3.bf16.msra.mxu1 %v3653_v19  ;;  %v3468_v20 = vld [vmem:[%s4647_s1 + $0x8] sm:$0xff]   ;;  %v3774_v33 = vsel %vm3681_vm3, 0, %v360_v25  ;;  %v739_v35 = vrot.slane %v3768_v31, 1 }
  0x29   : > { %2715 = vmatprep.subr.bf16.mxu0 %v3459_v22  ;;  %3260 = vmatprep.subr.bf16.mxu1 %v3672_v23  ;;  %v477_v22 = vshrl.u32 %v3754_v21, 16  ;;  %v735_v38 = vrot.slane %v3774_v33, 1  ;;  %v3784_v39 = vsel %vm3681_vm3, 0, %v367_v29 }
  0x2a   : > { %v738_v46 = vrot.slane %v3784_v39, 1 }
  0x2b   : > { %v482_v45 = vor.u32 %v481_v32, %v477_v22  ;;  %v3483_v32 = vld [vmem:[%s3658_s5 + $0x18] sm:$0xff]  }
  0x2c   : > { %2716 = vmatpush3.bf16.msra.mxu0 %v3461_v28  ;;  %3268 = vmatpush3.bf16.msra.mxu1 %v3672_v23  ;;  %v3764_v28 = vsel %vm3681_vm3, %v357_v17, 0  ;;  %v3802_v54 = vsel %vm704_vm2, %v738_v46, %v739_v35  ;;  %v3480_v17 = vld [vmem:[%s4647_s1 + $0x20] sm:$0xff]  }
  0x2d   : > { %3109 = vmatprep.subr.bf16.mxu0 %v3569_v1  ;;  %2837 = vmatprep.subr.bf16.mxu1 %v3465_v34  ;;  %v736_v34 = vrot.slane %v3764_v28, 1  ;;  %v3798_v53 = vsel %vm463_vm4, %v482_v45, %v486_v27  ;;  %v3481_v27 = vld [vmem:[%s4647_s1 + $0x68] sm:$0xff]   ;;  %v309_v45 = vshll.u32 %v3483_v32, 16 }
  0x2f   : > { %3142 = vmatmul.mubr.bf16.vlgmr.msra.gmra.mrb[0].mxu1 %v3739_v11  ;;  %1043 = vmatmul.mubr.bf16.vlgmr.msra.gmra.mrb[0].mxu0 %v3697_v41  ;;  %v3793_v48 = vsel %vm704_vm2, %v735_v38, %v736_v34  ;;  %v3484_v34 = vld [vmem:[%s3658_s5 + $0x70] sm:$0xff]   ;;  %v3485_v38 = vld [vmem:[%s3658_s5 + $0x78] sm:$0xff]  }
  0x30   : > { %2838 = vmatpush3.bf16.msra.mxu1 %v3466_v55  ;;  %3110 = vmatpush3.bf16.msra.mxu0 %v3569_v1  ;;  %v3476_v1 = vld [vmem:[%s3658_s5 + $0x10] sm:$0xff]   ;;  %v369_v55 = vshrl.u32 %v3477_v47, 16  ;;  %v383_v46 = vshrl.u32 %v3484_v34, 16  ;;  %v390_v52 = vshrl.u32 %v3485_v38, 16 }
  0x31   : > { %2839 = vmatprep.subr.bf16.mxu1 %v3467_v58  ;;  %3111 = vmatprep.subr.bf16.mxu0 %v3582_v4  ;;  %v299_v42 = vshrl.u32 %v3476_v1, 16  ;;  %v302_v44 = vshll.u32 %v3476_v1, 16 }
  0x32   : > { %3145 = vmatprep.mubr.bf16.mxu1 %v3793_v48  ;;  %1050 = vmatprep.mubr.bf16.mxu0 %v3798_v53  ;;  %v371_v0 = vrot.slane %v369_v55, 7 }
  0x33   : > { %v301_v50 = vrot.slane %v299_v42, 7  ;;  %v3482_v42 = vld [vmem:[%s4647_s1 + $0x28] sm:$0xff]  }
  0x34   : > { %2840 = vmatpush3.bf16.msra.mxu1 %v3468_v20  ;;  %3112 = vmatpush3.bf16.msra.mxu0 %v3582_v4  ;;  %v374_v15 = vor.u32 %v372_v56, %v371_v0  ;;  %v3831_v18 = vsel %vm3681_vm3, %v371_v0, 0  ;;  %v381_v20 = vor.u32 %v379_v60, %v378_v5  ;;  %v385_v56 = vrot.slane %v383_v46, 7 }
  0x35   : > { %2841 = vmatprep.subr.bf16.mxu1 %v3472_v26  ;;  %3113 = vmatprep.subr.bf16.mxu0 %v3594_v7  ;;  %v304_v4 = vor.u32 %v302_v44, %v301_v50  ;;  %v3808_v58 = vsel %vm3681_vm3, %v301_v50, 0  ;;  %v742_v25 = vrot.slane %v3831_v18, 1  ;;  %v306_v44 = vshrl.u32 %v3483_v32, 16 }
  0x36   : > { %v496_v62 = vshll.u32 %v3808_v58, 16  ;;  %v3839_v24 = vsel %vm3681_vm3, 0, %v374_v15  ;;  %v3849_v1 = vsel %vm3681_vm3, 0, %v381_v20  ;;  %v386_v50 = vshll.u32 %v3484_v34, 16  ;;  %v3489_v34 = vld [vmem:[%s4647_s1 + $0x38] sm:$0xff]  }
  0x37   : > { %3146 = vmatmul.mubr.bf16.gmra.mrb[4].mxu1 %v3802_v54  ;;  %1051 = vmatmul.mubr.bf16.gmra.mrb[4].mxu0 %v3754_v21  ;;  %v3820_v3 = vsel %vm3681_vm3, 0, %v304_v4  ;;  %v741_v29 = vrot.slane %v3839_v24, 1  ;;  %v308_v55 = vrot.slane %v306_v44, 7  ;;  %v393_v4 = vshll.u32 %v3485_v38, 16 }
  0x38   : > { %2842 = vmatpush3.bf16.msra.mxu1 %v3473_v37  ;;  %3114 = vmatpush3.bf16.msra.mxu0 %v3594_v7  ;;  %v489_v6 = vshrl.u32 %v3820_v3, 16  ;;  %v491_v8 = vshll.u32 %v3820_v3, 16  ;;  %v498_v12 = vrot.slane %v496_v62, 1  ;;  %v3835_v7 = vsel %vm3681_vm3, %v378_v5, 0 }
  0x39   : > { %2843 = vmatprep.subr.bf16.mxu1 %v3474_v40  ;;  %3115 = vmatprep.subr.bf16.mxu0 %v3607_v10  ;;  %v745_v26 = vrot.slane %v3835_v7, 1  ;;  %v744_v37 = vrot.slane %v3849_v1, 1  ;;  %v3858_v40 = vsel %vm704_vm2, %v741_v29, %v742_v25  ;;  %v392_v60 = vrot.slane %v390_v52, 7  ;;  %v3490_v25 = vld [vmem:[%s3658_s5 + $0x20] sm:$0xff]   ;;  %v3492_v52 = vld [vmem:[%s3658_s5 + $0x28] sm:$0xff]  }
  0x3a   : > { %v493_v22 = vrot.slane %v491_v8, 1  ;;  %4661 = vst [vmem:[#allocation2_spill] sm:$0xff] %v3858_v40  ;;  %3149 = vmatprep.mubr.bf16.mxu1 %v3858_v40  ;;  %v311_v62 = vor.u32 %v309_v45, %v308_v55  ;;  %v3881_v0 = vsel %vm3681_vm3, %v308_v55, 0  ;;  %v3885_v5 = vsel %vm3681_vm3, %v385_v56, 0 }
  0x3b   : > { %v748_v8 = vrot.slane %v3885_v5, 1  ;;  %v3892_v15 = vsel %vm3681_vm3, %v392_v60, 0  ;;  %v316_v38 = vshll.u32 %v3490_v25, 16  ;;  %v640_v40 = vshll.u32 %v3885_v5, 16 }
  0x3c   : > { %2844 = vmatpush3.bf16.msra.mxu1 %v3475_v61  ;;  %3116 = vmatpush3.bf16.msra.mxu0 %v3607_v10  ;;  %v494_v35 = vor.u32 %v493_v22, %v489_v6  ;;  %v3868_v10 = vsel %vm704_vm2, %v744_v37, %v745_v26  ;;  %v3487_v61 = vld [vmem:[%s4647_s1 + $0x30] sm:$0xff]   ;;  %v508_v6 = vshll.u32 %v3881_v0, 16  ;;  %v3900_v20 = vsel %vm3681_vm3, 0, %v311_v62 }
  0x3d   : > { %2845 = vmatprep.subr.bf16.mxu1 %v3479_v2  ;;  %3117 = vmatprep.subr.bf16.mxu0 %v3622_v13  ;;  %4662 = vst [vmem:[#allocation3_spill] sm:$0xff] %v3868_v10  ;;  %v388_v2 = vor.u32 %v386_v50, %v385_v56  ;;  %v751_v22 = vrot.slane %v3892_v15, 1  ;;  %v501_v26 = vshrl.u32 %v3900_v20, 16  ;;  %v313_v37 = vshrl.u32 %v3490_v25, 16 }
  0x3e   : > { %v3864_v47 = vsel %vm463_vm4, %v494_v35, %v498_v12  ;;  %v395_v12 = vor.u32 %v393_v4, %v392_v60  ;;  %v510_v29 = vrot.slane %v508_v6, 1  ;;  %v561_v4 = vshrl.u32 %v3710_v49, 16 }
  0x3f   : > { %1058 = vmatprep.mubr.bf16.mxu0 %v3864_v47  ;;  %3150 = vmatmul.mubr.bf16.gmra.mrb[8].mxu1 %v3868_v10  ;;  %v315_v50 = vrot.slane %v313_v37, 7  ;;  %v323_v62 = vshll.u32 %v3492_v52, 16  ;;  %v705_v5 = vrot.slane %v3697_v41, 1 }
  0x40   : > { %2846 = vmatpush3.bf16.msra.mxu1 %v3480_v17  ;;  %1059 = vmatmul.mubr.bf16.gmra.mrb[8].mxu0 %v3820_v3  ;;  %v3488_v17 = vld [vmem:[%s4647_s1 + $0x78] sm:$0xff]   ;;  %v3916_v35 = vsel %vm3681_vm3, 0, %v395_v12 }
  0x41   : > { %2847 = vmatprep.subr.bf16.mxu1 %v3481_v27  ;;  %3118 = vmatpush3.bf16.msra.mxu0 %v3622_v13  ;;  %v3904_v13 = vsel %vm3681_vm3, 0, %v388_v2  ;;  %v503_v27 = vshll.u32 %v3900_v20, 16  ;;  %v750_v46 = vrot.slane %v3916_v35, 1  ;;  %v3939_v60 = vsel %vm3681_vm3, %v315_v50, 0 }
  0x42   : > { %3119 = vmatprep.subr.bf16.mxu0 %v3639_v16  ;;  %v747_v32 = vrot.slane %v3904_v13, 1  ;;  %v520_v6 = vshll.u32 %v3939_v60, 16 }
  0x43   : > { %v505_v44 = vrot.slane %v503_v27, 1  ;;  %v3932_v56 = vsel %vm704_vm2, %v750_v46, %v751_v22  ;;  %v3495_v22 = vld [vmem:[%s3658_s5 + $0x38] sm:$0xff]   ;;  %v568_v27 = vshll.u32 %v3701_v43, 16 }
  0x44   : > { %2848 = vmatpush3.bf16.msra.mxu1 %v3482_v42  ;;  %v3921_v42 = vld [vmem:[%s4647_s1 + $0x80] sm:$0xff]   ;;  %v3925_v45 = vsel %vm704_vm2, %v747_v32, %v748_v8  ;;  %4664 = vst [vmem:[#allocation5_spill] sm:$0xff] %v3932_v56  ;;  %v4651_v8 = vmov 0   ;;  %v334_v46 = vshrl.u32 %v3495_v22, 16 }
  0x45   : > { %2849 = vmatprep.subr.bf16.mxu1 %v3486_v59  ;;  %3120 = vmatpush3.bf16.msra.mxu0 %v3639_v16  ;;  %4663 = vst [vmem:[#allocation4_spill] sm:$0xff] %v3925_v45  ;;  %v506_v55 = vor.u32 %v505_v44, %v501_v26  ;;  %v3493_v16 = vld [vmem:[%s3658_s5 + $0x30] sm:$0xff]   ;;  %v318_v59 = vor.u32 %v316_v38, %v315_v50  ;;  %v563_v26 = vshll.u32 %v3710_v49, 16  ;;  %v337_v50 = vshll.u32 %v3495_v22, 16 }
  0x46   : > { %3121 = vmatprep.subr.bf16.mxu0 %v3653_v19  ;;  %3153 = vmatprep.mubr.bf16.mxu1 %v3925_v45  ;;  %v327_v12 = vshrl.u32 %v3493_v16, 16 }
  0x47   : > { %3154 = vmatmul.mubr.bf16.gmra.mrb[12].mxu1 %v3932_v56  ;;  %v3943_v2 = vsel %vm463_vm4, %v506_v55, %v510_v29  ;;  %v3951_v25 = vsel %vm3681_vm3, 0, %v318_v59  ;;  %v3494_v59 = vld [vmem:[%s4647_s1 + $0x88] sm:$0xff]  }
  0x48   : > { %2850 = vmatpush3.bf16.msra.mxu1 %v3487_v61  ;;  %v320_v61 = vshrl.u32 %v3492_v52, 16  ;;  %1508 = vmatprep.mubr.bf16.mxu1 %v4651_v8  ;;  %v513_v29 = vshrl.u32 %v3951_v25, 16  ;;  %v515_v32 = vshll.u32 %v3951_v25, 16  ;;  %v329_v37 = vrot.slane %v327_v12, 7 }
  0x49   : > { %2851 = vmatprep.subr.bf16.mxu1 %v3488_v17  ;;  %3122 = vmatpush3.bf16.msra.mxu0 %v3653_v19  ;;  %v330_v17 = vshll.u32 %v3493_v16, 16 }
  0x4a   : > { %1066 = vmatprep.mubr.bf16.mxu0 %v3943_v2  ;;  %v322_v19 = vrot.slane %v320_v61, 7  ;;  %3123 = vmatprep.subr.bf16.mxu0 %v3672_v23  ;;  %v517_v43 = vrot.slane %v515_v32, 1  ;;  %v3968_v16 = vsel %vm3681_vm3, %v329_v37, 0 }
  0x4b   : > { %1067 = vmatmul.mubr.bf16.gmra.mrb[12].mxu0 %v3900_v20  ;;  %v332_v55 = vor.u32 %v330_v17, %v329_v37 }
  0x4c   : > { %2852 = vmatpush3.bf16.msra.mxu1 %v3489_v34  ;;  %v522_v34 = vrot.slane %v520_v6, 1  ;;  %v325_v38 = vor.u32 %v323_v62, %v322_v19  ;;  %v3962_v44 = vsel %vm3681_vm3, %v322_v19, 0  ;;  %v544_v62 = vshll.u32 %v3968_v16, 16 }
  0x4d   : > { %3157 = vmatprep.subr.bf16.mxu1 %v3921_v42  ;;  %3124 = vmatpush3.bf16.msra.mxu0 %v3672_v23  ;;  %v532_v52 = vshll.u32 %v3962_v44, 16  ;;  %v336_v6 = vrot.slane %v334_v46, 7  ;;  %v565_v23 = vrot.slane %v563_v26, 1  ;;  %v518_v12 = vor.u32 %v517_v43, %v513_v29 }
  0x4e   : > { %v3975_v61 = vsel %vm3681_vm3, 0, %v325_v38  ;;  %v3983_v32 = vsel %vm3681_vm3, 0, %v332_v55  ;;  %v546_v37 = vrot.slane %v544_v62, 1  ;;  %v570_v55 = vrot.slane %v568_v27, 1 }
  0x4f   : > { %v525_v22 = vshrl.u32 %v3975_v61, 16  ;;  %v527_v17 = vshll.u32 %v3975_v61, 16  ;;  %v534_v19 = vrot.slane %v532_v52, 1  ;;  %1509 = vmatmul.mubr.bf16.vlgmr.msra.gmra.mrb[16].mxu1 %v4651_v8  ;;  %v339_v56 = vor.u32 %v337_v50, %v336_v6  ;;  %v3500_v50 = vld [vmem:[%s4647_s1 + $0x1c0] sm:$0xff]  }
  0x50   : > { %v3987_v38 = vsel %vm3681_vm3, %v336_v6, 0  ;;  %v3990_v26 = vsel %vm463_vm4, %v518_v12, %v522_v34  ;;  %3158 = vmatpush3.bf16.msra.mxu1 %v3921_v42  ;;  %1516 = vmatprep.mubr.bf16.mxu1 %v3736_v9  ;;  %v537_v46 = vshrl.u32 %v3983_v32, 16  ;;  %v539_v43 = vshll.u32 %v3983_v32, 16  ;;  %v3496_v9 = vld [vmem:[%s4647_s1 + $0x90] sm:$0xff]  }
  0x51   : > { %v529_v29 = vrot.slane %v527_v17, 1  ;;  %1074 = vmatprep.mubr.bf16.mxu0 %v3990_v26  ;;  %3159 = vmatprep.subr.bf16.mxu1 %v3494_v59  ;;  %v4002_v34 = vsel %vm3681_vm3, 0, %v339_v56  ;;  %v556_v42 = vshll.u32 %v3987_v38, 16  ;;  %v566_v52 = vor.u32 %v565_v23, %v561_v4  ;;  %v3497_v23 = vld [vmem:[%s4647_s1 + $0x98] sm:$0xff]  }
  0x52   : > { %v541_v6 = vrot.slane %v539_v43, 1  ;;  %v549_v12 = vshrl.u32 %v4002_v34, 16  ;;  %v551_v17 = vshll.u32 %v4002_v34, 16  ;;  %2973 = vmatprep.subr.bf16.mxu0 %v3500_v50  ;;  %v573_v4 = vshrl.u32 %v3723_v57, 16 }
  0x53   : > { %1075 = vmatmul.mubr.bf16.gmra.mrb[16].mxu0 %v3951_v25  ;;  %v530_v62 = vor.u32 %v529_v29, %v525_v22  ;;  %v4011_v30 = vrot.slane %v556_v42, 1  ;;  %v4014_v56 = vsel %vm463_vm4, %v566_v52, %v570_v55  ;;  %v575_v27 = vshll.u32 %v3723_v57, 16 }
  0x54   : > { %v542_v29 = vor.u32 %v541_v6, %v537_v46  ;;  %3160 = vmatpush3.bf16.msra.mxu1 %v3494_v59  ;;  %v553_v43 = vrot.slane %v551_v17, 1  ;;  %v580_v50 = vshll.u32 %v3714_v51, 16  ;;  %v585_v52 = vshrl.u32 %v3774_v33, 16 }
  0x55   : > { %v4022_v22 = vsel %vm463_vm4, %v530_v62, %v534_v19  ;;  %3161 = vmatprep.subr.bf16.mxu1 %v3496_v9  ;;  %v577_v42 = vrot.slane %v575_v27, 1  ;;  %v587_v55 = vshll.u32 %v3774_v33, 16  ;;  %v592_v8 = vshll.u32 %v3764_v28, 16 }
  0x56   : > { %1082 = vmatprep.mubr.bf16.mxu0 %v4022_v22  ;;  %v4030_v45 = vsel %vm463_vm4, %v542_v29, %v546_v37  ;;  %v582_v19 = vrot.slane %v580_v50, 1  ;;  %v597_v46 = vshrl.u32 %v3784_v39, 16  ;;  %v599_v6 = vshll.u32 %v3784_v39, 16  ;;  %v3498_v29 = vld [vmem:[%s4647_s1 + $0xa0] sm:$0xff]  }
  0x57   : > { %1517 = vmatmul.mubr.bf16.gmra.mrb[20].mxu1 %v3697_v41  ;;  %v578_v59 = vor.u32 %v577_v42, %v573_v4  ;;  %v589_v51 = vrot.slane %v587_v55, 1  ;;  %v594_v62 = vrot.slane %v592_v8, 1  ;;  %v554_v17 = vor.u32 %v553_v43, %v549_v12 }
  0x58   : > { %1524 = vmatprep.mubr.bf16.mxu1 %v3798_v53  ;;  %3162 = vmatpush3.bf16.msra.mxu1 %v3496_v9  ;;  %v604_v27 = vshll.u32 %v3768_v31, 16  ;;  %v609_v28 = vshrl.u32 %v3839_v24, 16  ;;  %v611_v37 = vshll.u32 %v3839_v24, 16  ;;  %v601_v50 = vrot.slane %v599_v6, 1 }
  0x59   : > { %v4043_v4 = vsel %vm463_vm4, %v578_v59, %v582_v19  ;;  %v590_v8 = vor.u32 %v589_v51, %v585_v52  ;;  %3163 = vmatprep.subr.bf16.mxu1 %v3497_v23  ;;  %v616_v42 = vshll.u32 %v3831_v18, 16  ;;  %v621_v12 = vshrl.u32 %v3849_v1, 16 }
  0x5a   : > { %v606_v9 = vrot.slane %v604_v27, 1  ;;  %v613_v31 = vrot.slane %v611_v37, 1  ;;  %v623_v43 = vshll.u32 %v3849_v1, 16  ;;  %v602_v19 = vor.u32 %v601_v50, %v597_v46  ;;  %v3499_v46 = vld [vmem:[%s4647_s1 + $0xa8] sm:$0xff]  }
  0x5b   : > { %1083 = vmatmul.mubr.bf16.gmra.mrb[20].mxu0 %v3975_v61  ;;  %v4051_v55 = vsel %vm463_vm4, %v590_v8, %v594_v62  ;;  %v618_v59 = vrot.slane %v616_v42, 1  ;;  %v628_v52 = vshll.u32 %v3835_v7, 16  ;;  %v633_v6 = vshrl.u32 %v3904_v13, 16 }
  0x5c   : > { %1090 = vmatprep.mubr.bf16.mxu0 %v4030_v45  ;;  %3164 = vmatpush3.bf16.msra.mxu1 %v3497_v23  ;;  %v614_v51 = vor.u32 %v613_v31, %v609_v28  ;;  %v625_v18 = vrot.slane %v623_v43, 1  ;;  %v635_v27 = vshll.u32 %v3904_v13, 16  ;;  %v4057_v37 = vsel %vm463_vm4, %v602_v19, %v606_v9 }
  0x5d   : > { %3165 = vmatprep.subr.bf16.mxu1 %v3498_v29  ;;  %v630_v10 = vrot.slane %v628_v52, 1  ;;  %v645_v7 = vshrl.u32 %v3916_v35, 16  ;;  %v647_v8 = vshll.u32 %v3916_v35, 16  ;;  %v642_v50 = vrot.slane %v640_v40, 1 }
  0x5e   : > { %v4065_v23 = vsel %vm463_vm4, %v614_v51, %v618_v59  ;;  %v626_v62 = vor.u32 %v625_v18, %v621_v12  ;;  %v637_v28 = vrot.slane %v635_v27, 1  ;;  %v652_v42 = vshll.u32 %v3892_v15, 16  ;;  %v3501_v27 = vld [vmem:[%s4647_s1 + $0x180] sm:$0xff]  }
  0x5f   : > { %1525 = vmatmul.mubr.bf16.gmra.mrb[24].mxu1 %v3754_v21  ;;  %v706_v9 = vrot.slane %v3691_v36, 1  ;;  %v4074_v31 = vsel %vm463_vm4, %v554_v17, %v4011_v30  ;;  %v649_v19 = vrot.slane %v647_v8, 1  ;;  %v3502_v36 = vld [vmem:[%s4647_s1 + $0xb0] sm:$0xff]   ;;  %v3511_v17 = vld [vmem:[%s4647_s1 + $0xb8] sm:$0xff]   ;;  %v709_v59 = vrot.slane %v3743_v14, 1  ;;  %v3503_v14 = vld [vmem:[%s4647_s1 + $0x1c8] sm:$0xff]  }
  0x60   : > { %1532 = vmatprep.mubr.bf16.mxu1 %v3864_v47  ;;  %3166 = vmatpush3.bf16.msra.mxu1 %v3498_v29  ;;  %v4078_v12 = vsel %vm463_vm4, %v626_v62, %v630_v10  ;;  %v638_v43 = vor.u32 %v637_v28, %v633_v6  ;;  %v654_v40 = vrot.slane %v652_v42, 1  ;;  %v4104_v29 = vld [vmem:[%s4647_s1 + $0x200] sm:$0xff]   ;;  %v708_v52 = vrot.slane %v3754_v21, 1  ;;  %v3505_v28 = vld [vmem:[%s4647_s1 + $0x1d0] sm:$0xff]  }
  0x61   : > { %3167 = vmatprep.subr.bf16.mxu1 %v3499_v46  ;;  %v4081_v15 = vsel %vm704_vm2, %v705_v5, %v706_v9  ;;  %v650_v30 = vor.u32 %v649_v19, %v645_v7  ;;  %v711_v51 = vrot.slane %v3820_v3, 1  ;;  %v712_v18 = vrot.slane %v3808_v58, 1  ;;  %v3504_v58 = vld [vmem:[%s4647_s1 + $0x188] sm:$0xff]   ;;  %v3506_v5 = vld [vmem:[%s4647_s1 + $0x190] sm:$0xff]  }
  0x62   : > { %v4088_v41 = vsel %vm463_vm4, %v638_v43, %v642_v50  ;;  %v4144_v6 = vsel %vm704_vm2, %v708_v52, %v709_v59  ;;  %v714_v7 = vrot.slane %v3900_v20, 1  ;;  %v715_v62 = vrot.slane %v3881_v0, 1  ;;  %v3507_v0 = vld [vmem:[%s4647_s1 + $0x1d8] sm:$0xff]   ;;  %v3510_v59 = vld [vmem:[%s4647_s1 + $0x1a0] sm:$0xff]  }
  0x63   : > { %1091 = vmatmul.mubr.bf16.gmra.mrb[24].mxu0 %v3983_v32  ;;  %v4092_v10 = vsel %vm463_vm4, %v650_v30, %v654_v40  ;;  %v717_v8 = vrot.slane %v3951_v25, 1  ;;  %v718_v50 = vrot.slane %v3939_v60, 1  ;;  %v3508_v60 = vld [vmem:[%s4647_s1 + $0x198] sm:$0xff]   ;;  %v720_v43 = vrot.slane %v3975_v61, 1  ;;  %v3509_v40 = vld [vmem:[%s4647_s1 + $0x1e0] sm:$0xff]  }
  0x64   : > { %1098 = vmatprep.mubr.bf16.mxu0 %v4074_v31  ;;  %3168 = vmatpush3.bf16.msra.mxu1 %v3499_v46  ;;  %v4154_v46 = vsel %vm704_vm2, %v711_v51, %v712_v18  ;;  %v4170_v42 = vsel %vm704_vm2, %v714_v7, %v715_v62  ;;  %v721_v19 = vrot.slane %v3962_v44, 1  ;;  %v724_v30 = vrot.slane %v3968_v16, 1  ;;  %v3512_v44 = vld [vmem:[%s4647_s1 + $0x1e8] sm:$0xff]   ;;  %v3517_v62 = vld [vmem:[%s4647_s1 + $0x1b8] sm:$0xff]  }
  0x65   : > { %3169 = vmatprep.subr.bf16.mxu1 %v3502_v36  ;;  %v4180_v9 = vsel %vm704_vm2, %v717_v8, %v718_v50  ;;  %v3513_v16 = vld [vmem:[%s4647_s1 + $0x1a8] sm:$0xff]   ;;  %v726_v51 = vrot.slane %v4002_v34, 1  ;;  %v727_v18 = vrot.slane %v3987_v38, 1  ;;  %v3516_v38 = vld [vmem:[%s4647_s1 + $0x1f8] sm:$0xff]   ;;  %v4665_v7 = vmov 0   ;;  %v3520_v8 = vld [vmem:[%s4647_s1 + $0x210] sm:$0xff]  }
  0x66   : > { %v4668_v50 = vld [vmem:[#allocation4_spill] sm:$0xff] }
  0x67   : > { %1533 = vmatmul.mubr.bf16.gmra.mrb[28].mxu1 %v3820_v3 }
  0x68   : > { %1540 = vmatprep.mubr.bf16.mxu1 %v3943_v2  ;;  %3170 = vmatpush3.bf16.msra.mxu1 %v3502_v36  ;;  %v723_v36 = vrot.slane %v3983_v32, 1 }
  0x69   : > { %3171 = vmatprep.subr.bf16.mxu1 %v3511_v17 }
  0x6a   : > { %v4206_v52 = vsel %vm704_vm2, %v723_v36, %v724_v30 }
  0x6b   : > { %1099 = vmatmul.mubr.bf16.gmra.mrb[28].mxu0 %v4002_v34 }
  0x6c   : > { %1106 = vmatprep.mubr.bf16.mxu0 %v4014_v56  ;;  %3172 = vmatpush3.bf16.msra.mxu1 %v3511_v17  ;;  %v4196_v17 = vsel %vm704_vm2, %v720_v43, %v721_v19 }
  0x6d   : > { %3205 = vmatprep.subr.bf16.mxu1 %v4104_v29 }
  0x6f   : > { %1541 = vmatmul.mubr.bf16.gmra.mrb[32].mxu1 %v3900_v20 }
  0x70   : > { %1548 = vmatprep.mubr.bf16.mxu1 %v3990_v26 }
  0x73   : > { %1107 = vmatmul.mubr.bf16.gmra.mrb[32].mxu0 %v3710_v49 }
  0x74   : > { %1114 = vmatprep.mubr.bf16.mxu0 %v4043_v4 }
  0x77   : > { %1549 = vmatmul.mubr.bf16.gmra.mrb[36].mxu1 %v3951_v25 }
  0x78   : > { %1556 = vmatprep.mubr.bf16.mxu1 %v4022_v22 }
  0x7b   : > { %1115 = vmatmul.mubr.bf16.gmra.mrb[36].mxu0 %v3723_v57 }
  0x7c   : > { %1122 = vmatprep.mubr.bf16.mxu0 %v4051_v55 }
  0x7f   : > { %1557 = vmatmul.mubr.bf16.gmra.mrb[40].mxu1 %v3975_v61 }
  0x80   : > { %1564 = vmatprep.mubr.bf16.mxu1 %v4030_v45 }
  0x83   : > { %1123 = vmatmul.mubr.bf16.gmra.mrb[40].mxu0 %v3774_v33 }
  0x84   : > { %1130 = vmatprep.mubr.bf16.mxu0 %v4057_v37 }
  0x87   : > { %1565 = vmatmul.mubr.bf16.gmra.mrb[44].mxu1 %v3983_v32 }
  0x88   : > { %1572 = vmatprep.mubr.bf16.mxu1 %v4074_v31 }
  0x8b   : > { %1131 = vmatmul.mubr.bf16.gmra.mrb[44].mxu0 %v3784_v39 }
  0x8c   : > { %1138 = vmatprep.mubr.bf16.mxu0 %v4065_v23 }
  0x8f   : > { %1573 = vmatmul.mubr.bf16.gmra.mrb[48].mxu1 %v4002_v34 }
  0x90   : > { %1580 = vmatprep.mubr.bf16.mxu1 %v4014_v56 }
  0x93   : > { %1139 = vmatmul.mubr.bf16.gmra.mrb[48].mxu0 %v3839_v24 }
  0x94   : > { %1146 = vmatprep.mubr.bf16.mxu0 %v4078_v12 }
  0x97   : > { %1581 = vmatmul.mubr.bf16.gmra.mrb[52].mxu1 %v3710_v49 }
  0x98   : > { %1588 = vmatprep.mubr.bf16.mxu1 %v4043_v4 }
  0x9b   : > { %1147 = vmatmul.mubr.bf16.gmra.mrb[52].mxu0 %v3849_v1 }
  0x9c   : > { %1154 = vmatprep.mubr.bf16.mxu0 %v4088_v41 }
  0x9f   : > { %1589 = vmatmul.mubr.bf16.gmra.mrb[56].mxu1 %v3723_v57 }
  0xa0   : > { %1596 = vmatprep.mubr.bf16.mxu1 %v4051_v55 }
  0xa3   : > { %1155 = vmatmul.mubr.bf16.gmra.mrb[56].mxu0 %v3904_v13 }
  0xa4   : > { %1162 = vmatprep.mubr.bf16.mxu0 %v4092_v10 }
  0xa7   : > { %1597 = vmatmul.mubr.bf16.gmra.mrb[60].mxu1 %v3774_v33 }
  0xa8   : > { %1604 = vmatprep.mubr.bf16.mxu1 %v4057_v37 }
  0xab   : > { %1163 = vmatmul.mubr.bf16.gmra.mrb[60].mxu0 %v3916_v35 }
  0xac   : > { %3125 = vmatprep.mubr.bf16.mxu0 %v4081_v15 }
  0xaf   : > { %1605 = vmatmul.mubr.bf16.gmra.mrb[64].mxu1 %v3784_v39 }
  0xb0   : > { %1612 = vmatprep.mubr.bf16.mxu1 %v4065_v23 }
  0xb3   : > { %3126 = vmatmul.mubr.bf16.vlgmr.msra.gmra.mrb[64].mxu0 %v4144_v6 }
  0xb4   : > { %2974 = vmatpush3.bf16.msra.mxu0 %v3501_v27  ;;  %3129 = vmatprep.mubr.bf16.mxu0 %v4154_v46  ;;  %v3514_v27 = vld [vmem:[%s4647_s1 + $0x1f0] sm:$0xff]  }
  0xb5   : > { %2975 = vmatprep.subr.bf16.mxu0 %v3503_v14  ;;  %v4220_v14 = vsel %vm704_vm2, %v726_v51, %v727_v18 }
  0xb7   : > { %1613 = vmatmul.mubr.bf16.gmra.mrb[68].mxu1 %v3839_v24 }
  0xb8   : > { %2976 = vmatpush3.bf16.msra.mxu0 %v3504_v58  ;;  %1620 = vmatprep.mubr.bf16.mxu1 %v4078_v12  ;;  %v3515_v58 = vld [vmem:[%s4647_s1 + $0x1b0] sm:$0xff]  }
  0xb9   : > { %2977 = vmatprep.subr.bf16.mxu0 %v3505_v28  ;;  %v3519_v28 = vld [vmem:[%s4647_s1 + $0x208] sm:$0xff]  }
  0xbb   : > { %3130 = vmatmul.mubr.bf16.gmra.mrb[68].mxu0 %v4170_v42 }
  0xbc   : > { %2978 = vmatpush3.bf16.msra.mxu0 %v3506_v5  ;;  %3133 = vmatprep.mubr.bf16.mxu0 %v4180_v9 }
  0xbd   : > { %2979 = vmatprep.subr.bf16.mxu0 %v3507_v0 }
  0xbf   : > { %1621 = vmatmul.mubr.bf16.gmra.mrb[72].mxu1 %v3849_v1 }
  0xc0   : > { %2980 = vmatpush3.bf16.msra.mxu0 %v3508_v60  ;;  %1628 = vmatprep.mubr.bf16.mxu1 %v4088_v41 }
  0xc1   : > { %2981 = vmatprep.subr.bf16.mxu0 %v3509_v40 }
  0xc3   : > { %3134 = vmatmul.mubr.bf16.gmra.mrb[72].mxu0 %v4196_v17 }
  0xc4   : > { %2982 = vmatpush3.bf16.msra.mxu0 %v3510_v59  ;;  %3137 = vmatprep.mubr.bf16.mxu0 %v4206_v52 }
  0xc5   : > { %2983 = vmatprep.subr.bf16.mxu0 %v3512_v44 }
  0xc7   : > { %1629 = vmatmul.mubr.bf16.gmra.mrb[76].mxu1 %v3904_v13 }
  0xc8   : > { %2984 = vmatpush3.bf16.msra.mxu0 %v3513_v16  ;;  %3173 = vmatprep.mubr.bf16.mxu1 %v4665_v7 }
  0xc9   : > { %2985 = vmatprep.subr.bf16.mxu0 %v3514_v27 }
  0xcb   : > { %3138 = vmatmul.mubr.bf16.gmra.mrb[76].mxu0 %v4220_v14 }
  0xcc   : > { %2986 = vmatpush3.bf16.msra.mxu0 %v3515_v58  ;;  %2023 = vmatprep.mubr.bf16.mxu0 %v3798_v53  ;;  %v3521_v53 = vld [vmem:[%s4647_s1 + $0x218] sm:$0xff]  }
  0xcd   : > { %2987 = vmatprep.subr.bf16.mxu0 %v3516_v38 }
  0xcf   : > { %3174 = vmatmul.mubr.bf16.vlgmr.msra.gmra.mrb[80].mxu1 %v4081_v15  ;;  %v3522_v15 = vld [vmem:[%s4647_s1 + $0x220] sm:$0xff]  }
  0xd0   : > { %2988 = vmatpush3.bf16.msra.mxu0 %v3517_v62  ;;  %3206 = vmatpush3.bf16.msra.mxu1 %v4104_v29  ;;  %v4667_v29 = vld [vmem:[#allocation3_spill] sm:$0xff] }
  0xd1   : > { %3177 = vmatprep.mubr.bf16.mxu1 %v4144_v6  ;;  %3207 = vmatprep.subr.bf16.mxu1 %v3519_v28 }
  0xd3   : > { %2024 = vmatmul.mubr.bf16.vlgmr.msra.gmra.mrb[80].mxu0 %v3754_v21  ;;  %v3523_v21 = vld [vmem:[%s4647_s1 + $0x228] sm:$0xff]  }
  0xd4   : > { %2031 = vmatprep.mubr.bf16.mxu0 %v3864_v47  ;;  %3208 = vmatpush3.bf16.msra.mxu1 %v3519_v28  ;;  %v3524_v47 = vld [vmem:[%s4647_s1 + $0x230] sm:$0xff]  }
  0xd5   : > { %3209 = vmatprep.subr.bf16.mxu1 %v3520_v8 }
  0xd7   : > { %3178 = vmatmul.mubr.bf16.gmra.mrb[84].mxu1 %v4154_v46 }
  0xd8   : > { %3181 = vmatprep.mubr.bf16.mxu1 %v4170_v42  ;;  %3210 = vmatpush3.bf16.msra.mxu1 %v3520_v8 }
  0xd9   : > { %3211 = vmatprep.subr.bf16.mxu1 %v3521_v53 }
  0xdb   : > { %2032 = vmatmul.mubr.bf16.gmra.mrb[84].mxu0 %v3820_v3  ;;  %v3525_v3 = vld [vmem:[%s4647_s1 + $0x238] sm:$0xff]  }
  0xdc   : > { %2039 = vmatprep.mubr.bf16.mxu0 %v3943_v2  ;;  %3212 = vmatpush3.bf16.msra.mxu1 %v3521_v53  ;;  %v4666_v2 = vld [vmem:[#allocation2_spill] sm:$0xff] }
  0xdd   : > { %3213 = vmatprep.subr.bf16.mxu1 %v3522_v15 }
  0xdf   : > { %3182 = vmatmul.mubr.bf16.gmra.mrb[88].mxu1 %v4180_v9 }
  0xe0   : > { %3185 = vmatprep.mubr.bf16.mxu1 %v4196_v17  ;;  %3214 = vmatpush3.bf16.msra.mxu1 %v3522_v15 }
  0xe1   : > { %3215 = vmatprep.subr.bf16.mxu1 %v3523_v21 }
  0xe3   : > { %2040 = vmatmul.mubr.bf16.gmra.mrb[88].mxu0 %v3900_v20 }
  0xe4   : > { %2047 = vmatprep.mubr.bf16.mxu0 %v3990_v26  ;;  %3216 = vmatpush3.bf16.msra.mxu1 %v3523_v21 }
  0xe5   : > { %3217 = vmatprep.subr.bf16.mxu1 %v3524_v47 }
  0xe7   : > { %3186 = vmatmul.mubr.bf16.gmra.mrb[92].mxu1 %v4206_v52 }
  0xe8   : > { %3189 = vmatprep.mubr.bf16.mxu1 %v4220_v14  ;;  %3218 = vmatpush3.bf16.msra.mxu1 %v3524_v47 }
  0xe9   : > { %3219 = vmatprep.subr.bf16.mxu1 %v3525_v3 }
  0xeb   : > { %2048 = vmatmul.mubr.bf16.gmra.mrb[92].mxu0 %v3951_v25 }
  0xec   : > { %2055 = vmatprep.mubr.bf16.mxu0 %v4022_v22  ;;  %3220 = vmatpush3.bf16.msra.mxu1 %v3525_v3 }
  0xef   : > { %3190 = vmatmul.mubr.bf16.gmra.mrb[0].mxu1 %v3731_v63 }
  0xf0   : > { %3193 = vmatprep.mubr.bf16.mxu1 %v3739_v11 }
  0xf3   : > { %2056 = vmatmul.mubr.bf16.gmra.mrb[96].mxu0 %v3975_v61 }
  0xf4   : > { %2063 = vmatprep.mubr.bf16.mxu0 %v4030_v45 }
  0xf7   : > { %3194 = vmatmul.mubr.bf16.gmra.mrb[4].mxu1 %v3793_v48 }
  0xf8   : > { %3197 = vmatprep.mubr.bf16.mxu1 %v3802_v54 }
  0xfb   : > { %2064 = vmatmul.mubr.bf16.gmra.mrb[100].mxu0 %v3983_v32 }
  0xfc   : > { %2071 = vmatprep.mubr.bf16.mxu0 %v4074_v31 }
  0xff   : > { %3198 = vmatmul.mubr.bf16.gmra.mrb[8].mxu1 %v4666_v2 }
 0x100   : > { %3201 = vmatprep.mubr.bf16.mxu1 %v4667_v29 }
 0x102   : > { %v2717_v20 = vpop.f32.mrb[0].mxu0 }
 0x103   : > { %v2718_v25 = vpop.f32.mrb[1].mxu0  ;;  %2072 = vmatmul.mubr.bf16.gmra.mrb[104].mxu0 %v4002_v34 }
 0x104   : > { %v4282_v26 = vadd.f32 %v2718_v25, %v2717_v20  ;;  %v2720_v22 = vpop.f32.mrb[2].mxu0  ;;  %2079 = vmatprep.mubr.bf16.mxu0 %v4014_v56 }
 0x105   : > { %v2721_v61 = vpop.f32.mrb[3].mxu0 }
 0x106   : > { %v4286_v45 = vadd.f32 %v2721_v61, %v2720_v22 }
 0x107   : > { %3202 = vmatmul.mubr.bf16.gmra.mrb[12].mxu1 %v4668_v50 }
 0x108   : > { %3221 = vmatprep.mubr.bf16.mxu1 %v4144_v6 }
 0x10a   : > { %v2723_v32 = vpop.f32.mrb[4].mxu0 }
 0x10b   : > { %v2724_v31 = vpop.f32.mrb[5].mxu0  ;;  %2080 = vmatmul.mubr.bf16.gmra.mrb[108].mxu0 %v3710_v49 }
 0x10c   : > { %v4291_v5 = vadd.f32 %v2724_v31, %v2723_v32  ;;  %v2726_v0 = vpop.f32.mrb[6].mxu0  ;;  %2087 = vmatprep.mubr.bf16.mxu0 %v4043_v4 }
 0x10d   : > { %v2727_v60 = vpop.f32.mrb[7].mxu0 }
 0x10e   : > { %v4294_v43 = vadd.f32 %v2727_v60, %v2726_v0 }
 0x10f   : > { %3222 = vmatmul.mubr.bf16.vlgmr.msra.gmra.mrb[80].mxu1 %v4154_v46 }
 0x110   : > { %3225 = vmatprep.mubr.bf16.mxu1 %v4170_v42 }
 0x113   : > { %v2729_v34 = vpop.f32.mrb[8].mxu0  ;;  %2088 = vmatmul.mubr.bf16.gmra.mrb[112].mxu0 %v3723_v57 }
 0x114   : > { %v2730_v56 = vpop.f32.mrb[9].mxu0  ;;  %2095 = vmatprep.mubr.bf16.mxu0 %v4051_v55 }
 0x115   : > { %v4300_v19 = vadd.f32 %v2730_v56, %v2729_v34  ;;  %v2732_v6 = vpop.f32.mrb[10].mxu0 }
 0x116   : > { %v2733_v40 = vpop.f32.mrb[11].mxu0 }
 0x117   : > { %v4303_v49 = vadd.f32 %v2733_v40, %v2732_v6  ;;  %3226 = vmatmul.mubr.bf16.gmra.mrb[84].mxu1 %v4180_v9 }
 0x118   : > { %3229 = vmatprep.mubr.bf16.mxu1 %v4196_v17 }
 0x11b   : > { %2096 = vmatmul.mubr.bf16.gmra.mrb[116].mxu0 %v3774_v33 }
 0x11c   : > { %2103 = vmatprep.mubr.bf16.mxu0 %v4057_v37 }
 0x11e   : > { %v2735_v4 = vpop.f32.mrb[12].mxu0 }
 0x11f   : > { %v2736_v46 = vpop.f32.mrb[13].mxu0  ;;  %3230 = vmatmul.mubr.bf16.gmra.mrb[88].mxu1 %v4206_v52 }
 0x120   : > { %v4309_v57 = vadd.f32 %v2736_v46, %v2735_v4  ;;  %v2738_v42 = vpop.f32.mrb[14].mxu0  ;;  %3233 = vmatprep.mubr.bf16.mxu1 %v4220_v14  ;;  %v4669_v4 = vld [vmem:[#allocation5_spill] sm:$0xff] }
 0x121   : > { %v2739_v36 = vpop.f32.mrb[15].mxu0 }
 0x122   : > { %v4313_v55 = vadd.f32 %v2739_v36, %v2738_v42  ;;  %v2853_v9 = vpop.f32.mrb[16].mxu1 }
 0x123   : > { %2104 = vmatmul.mubr.bf16.gmra.mrb[120].mxu0 %v3784_v39  ;;  %v2854_v30 = vpop.f32.mrb[17].mxu1 }
 0x124   : > { %2111 = vmatprep.mubr.bf16.mxu0 %v4065_v23  ;;  %v4317_v33 = vadd.f32 %v2854_v30, %v2853_v9  ;;  %v2856_v37 = vpop.f32.mrb[18].mxu1 }
 0x125   : > { %v2857_v59 = vpop.f32.mrb[19].mxu1 }
 0x126   : > { %v2741_v17 = vpop.f32.mrb[16].mxu0  ;;  %v4319_v16 = vadd.f32 %v2857_v59, %v2856_v37 }
 0x127   : > { %v2742_v44 = vpop.f32.mrb[17].mxu0  ;;  %3234 = vmatmul.mubr.bf16.gmra.mrb[92].mxu1 %v3731_v63 }
 0x128   : > { %v4321_v52 = vadd.f32 %v2742_v44, %v2741_v17  ;;  %v2744_v51 = vpop.f32.mrb[18].mxu0  ;;  %3237 = vmatprep.mubr.bf16.mxu1 %v3739_v11 }
 0x129   : > { %v2745_v18 = vpop.f32.mrb[19].mxu0 }
 0x12a   : > { %v4325_v39 = vadd.f32 %v2745_v18, %v2744_v51  ;;  %v2859_v23 = vpop.f32.mrb[20].mxu1 }
 0x12b   : > { %2112 = vmatmul.mubr.bf16.gmra.mrb[124].mxu0 %v3839_v24  ;;  %v2860_v27 = vpop.f32.mrb[21].mxu1 }
 0x12c   : > { %2119 = vmatprep.mubr.bf16.mxu0 %v4078_v12  ;;  %v4329_v14 = vadd.f32 %v2860_v27, %v2859_v23  ;;  %v2862_v58 = vpop.f32.mrb[22].mxu1 }
 0x12d   : > { %v2863_v62 = vpop.f32.mrb[23].mxu1 }
 0x12e   : > { %v2747_v38 = vpop.f32.mrb[20].mxu0  ;;  %v4331_v8 = vadd.f32 %v2863_v62, %v2862_v58 }
 0x12f   : > { %v2748_v28 = vpop.f32.mrb[21].mxu0  ;;  %3238 = vmatmul.mubr.bf16.gmra.mrb[0].mxu1 %v3793_v48 }
 0x130   : > { %v4333_v63 = vadd.f32 %v2748_v28, %v2747_v38  ;;  %v2750_v53 = vpop.f32.mrb[22].mxu0  ;;  %3241 = vmatprep.mubr.bf16.mxu1 %v3802_v54 }
 0x131   : > { %v2751_v11 = vpop.f32.mrb[23].mxu0 }
 0x132   : > { %v4337_v24 = vadd.f32 %v2751_v11, %v2750_v53  ;;  %v2865_v12 = vpop.f32.mrb[24].mxu1 }
 0x133   : > { %2120 = vmatmul.mubr.bf16.gmra.mrb[128].mxu0 %v3849_v1  ;;  %v2866_v15 = vpop.f32.mrb[25].mxu1 }
 0x134   : > { %2127 = vmatprep.mubr.bf16.mxu0 %v4088_v41  ;;  %v4341_v21 = vadd.f32 %v2866_v15, %v2865_v12  ;;  %v2868_v47 = vpop.f32.mrb[26].mxu1 }
 0x135   : > { %v2869_v20 = vpop.f32.mrb[27].mxu1 }
 0x136   : > { %v2753_v3 = vpop.f32.mrb[24].mxu0  ;;  %v4343_v22 = vadd.f32 %v2869_v20, %v2868_v47 }
 0x137   : > { %v2754_v25 = vpop.f32.mrb[25].mxu0  ;;  %3242 = vmatmul.mubr.bf16.gmra.mrb[4].mxu1 %v4666_v2 }
 0x138   : > { %v4345_v48 = vadd.f32 %v2754_v25, %v2753_v3  ;;  %v2756_v61 = vpop.f32.mrb[26].mxu0  ;;  %3245 = vmatprep.mubr.bf16.mxu1 %v4667_v29 }
 0x139   : > { %v2757_v54 = vpop.f32.mrb[27].mxu0 }
 0x13a   : > { %v4349_v1 = vadd.f32 %v2757_v54, %v2756_v61  ;;  %v2871_v41 = vpop.f32.mrb[28].mxu1 }
 0x13b   : > { %2128 = vmatmul.mubr.bf16.gmra.mrb[132].mxu0 %v3904_v13  ;;  %v2872_v32 = vpop.f32.mrb[29].mxu1 }
 0x13c   : > { %2135 = vmatprep.mubr.bf16.mxu0 %v4092_v10  ;;  %v4353_v31 = vadd.f32 %v2872_v32, %v2871_v41  ;;  %v2874_v0 = vpop.f32.mrb[30].mxu1 }
 0x13d   : > { %v2875_v34 = vpop.f32.mrb[31].mxu1 }
 0x13e   : > { %v2759_v60 = vpop.f32.mrb[28].mxu0  ;;  %v4355_v6 = vadd.f32 %v2875_v34, %v2874_v0 }
 0x13f   : > { %v2760_v56 = vpop.f32.mrb[29].mxu0  ;;  %3246 = vmatmul.mubr.bf16.gmra.mrb[8].mxu1 %v4668_v50 }
 0x140   : > { %v4357_v2 = vadd.f32 %v2760_v56, %v2759_v60  ;;  %v2762_v40 = vpop.f32.mrb[30].mxu0  ;;  %3249 = vmatprep.mubr.bf16.mxu1 %v4669_v4 }
 0x141   : > { %v2763_v29 = vpop.f32.mrb[31].mxu0 }
 0x142   : > { %v4361_v13 = vadd.f32 %v2763_v29, %v2762_v40  ;;  %v2877_v10 = vpop.f32.mrb[32].mxu1 }
 0x143   : > { %2136 = vmatmul.mubr.bf16.gmra.mrb[136].mxu0 %v3916_v35  ;;  %v2878_v46 = vpop.f32.mrb[33].mxu1 }
 0x144   : > { %2143 = vmatprep.mubr.bf16.mxu0 %v4665_v7  ;;  %v4365_v42 = vadd.f32 %v2878_v46, %v2877_v10  ;;  %v2880_v36 = vpop.f32.mrb[34].mxu1 }
 0x145   : > { %v2881_v30 = vpop.f32.mrb[35].mxu1 }
 0x146   : > { %v2765_v9 = vpop.f32.mrb[32].mxu0  ;;  %v4367_v17 = vadd.f32 %v2881_v30, %v2880_v36 }
 0x147   : > { %v2766_v37 = vpop.f32.mrb[33].mxu0  ;;  %3250 = vmatmul.mubr.bf16.gmra.mrb[12].mxu1 %v4665_v7 }
 0x148   : > { %v2767_v50 = vadd.f32 %v2766_v37, %v2765_v9  ;;  %v2768_v59 = vpop.f32.mrb[34].mxu0 }
 0x149   : > { %v2769_v44 = vpop.f32.mrb[35].mxu0 }
 0x14a   : > { %v2770_v51 = vadd.f32 %v2769_v44, %v2768_v59  ;;  %v2883_v35 = vpop.f32.mrb[36].mxu1 }
 0x14b   : > { %2144 = vmatmul.mubr.bf16.gmra.mrb[140].mxu0 %v4665_v7  ;;  %v2884_v18 = vpop.f32.mrb[37].mxu1 }
 0x14c   : > { %v4371_v23 = vadd.f32 %v2884_v18, %v2883_v35  ;;  %v2886_v27 = vpop.f32.mrb[38].mxu1 }
 0x14d   : > { %v2887_v38 = vpop.f32.mrb[39].mxu1 }
 0x14e   : > { %v2771_v58 = vpop.f32.mrb[36].mxu0  ;;  %v4373_v28 = vadd.f32 %v2887_v38, %v2886_v27 }
 0x14f   : > { %v2772_v62 = vpop.f32.mrb[37].mxu0 }
 0x150   : > { %v2773_v53 = vadd.f32 %v2772_v62, %v2771_v58  ;;  %v2774_v11 = vpop.f32.mrb[38].mxu0 }
 0x151   : > { %v2775_v12 = vpop.f32.mrb[39].mxu0 }
 0x152   : > { %v2776_v15 = vadd.f32 %v2775_v12, %v2774_v11  ;;  %v2889_v47 = vpop.f32.mrb[40].mxu1 }
 0x153   : > { %v2890_v3 = vpop.f32.mrb[41].mxu1 }
 0x154   : > { %v4375_v20 = vadd.f32 %v2890_v3, %v2889_v47  ;;  %v2892_v25 = vpop.f32.mrb[42].mxu1 }
 0x155   : > { %v2893_v61 = vpop.f32.mrb[43].mxu1 }
 0x156   : > { %v2777_v7 = vpop.f32.mrb[40].mxu0  ;;  %v4377_v41 = vadd.f32 %v2893_v61, %v2892_v25 }
 0x157   : > { %v2778_v54 = vpop.f32.mrb[41].mxu0 }
 0x158   : > { %v2779_v32 = vadd.f32 %v2778_v54, %v2777_v7  ;;  %v2780_v0 = vpop.f32.mrb[42].mxu0 }
 0x159   : > { %v2781_v60 = vpop.f32.mrb[43].mxu0 }
 0x15a   : > { %v2782_v34 = vadd.f32 %v2781_v60, %v2780_v0  ;;  %v2895_v56 = vpop.f32.mrb[44].mxu1 }
 0x15b   : > { %v2896_v40 = vpop.f32.mrb[45].mxu1 }
 0x15c   : > { %v4379_v29 = vadd.f32 %v2896_v40, %v2895_v56  ;;  %v2898_v4 = vpop.f32.mrb[46].mxu1 }
 0x15d   : > { %v2899_v46 = vpop.f32.mrb[47].mxu1 }
 0x15e   : > { %v2783_v10 = vpop.f32.mrb[44].mxu0  ;;  %v4381_v9 = vadd.f32 %v2899_v46, %v2898_v4 }
 0x15f   : > { %v2784_v36 = vpop.f32.mrb[45].mxu0 }
 0x160   : > { %v2785_v30 = vadd.f32 %v2784_v36, %v2783_v10  ;;  %v2786_v37 = vpop.f32.mrb[46].mxu0 }
 0x161   : > { %v2787_v59 = vpop.f32.mrb[47].mxu0 }
 0x162   : > { %v2788_v44 = vadd.f32 %v2787_v59, %v2786_v37  ;;  %v2901_v35 = vpop.f32.mrb[48].mxu1 }
 0x163   : > { %v2902_v18 = vpop.f32.mrb[49].mxu1 }
 0x164   : > { %v2903_v27 = vadd.f32 %v2902_v18, %v2901_v35  ;;  %v2904_v58 = vpop.f32.mrb[50].mxu1 }
 0x165   : > { %v2905_v62 = vpop.f32.mrb[51].mxu1 }
 0x166   : > { %v2789_v38 = vpop.f32.mrb[48].mxu0  ;;  %v4383_v12 = vadd.f32 %v2903_v27, %v2767_v50  ;;  %v2906_v47 = vadd.f32 %v2905_v62, %v2904_v58 }
 0x167   : > { %v2790_v11 = vpop.f32.mrb[49].mxu0 }
 0x168   : > { %v2791_v3 = vadd.f32 %v2790_v11, %v2789_v38  ;;  %v2792_v25 = vpop.f32.mrb[50].mxu0  ;;  %v4385_v61 = vadd.f32 %v2906_v47, %v2770_v51 }
 0x169   : > { %v2793_v7 = vpop.f32.mrb[51].mxu0 }
 0x16a   : > { %v2794_v54 = vadd.f32 %v2793_v7, %v2792_v25  ;;  %v2907_v0 = vpop.f32.mrb[52].mxu1 }
 0x16b   : > { %v2908_v60 = vpop.f32.mrb[53].mxu1 }
 0x16c   : > { %v2909_v56 = vadd.f32 %v2908_v60, %v2907_v0  ;;  %v2910_v40 = vpop.f32.mrb[54].mxu1 }
 0x16d   : > { %v2911_v10 = vpop.f32.mrb[55].mxu1 }
 0x16e   : > { %v2795_v4 = vpop.f32.mrb[52].mxu0  ;;  %v4387_v36 = vadd.f32 %v2909_v56, %v2773_v53  ;;  %v2912_v37 = vadd.f32 %v2911_v10, %v2910_v40 }
 0x16f   : > { %v2796_v46 = vpop.f32.mrb[53].mxu0 }
 0x170   : > { %v2797_v59 = vadd.f32 %v2796_v46, %v2795_v4  ;;  %v2798_v50 = vpop.f32.mrb[54].mxu0  ;;  %v4389_v18 = vadd.f32 %v2912_v37, %v2776_v15 }
 0x171   : > { %v2799_v35 = vpop.f32.mrb[55].mxu0 }
 0x172   : > { %v4391_v27 = vadd.f32 %v2799_v35, %v2798_v50  ;;  %v2913_v51 = vpop.f32.mrb[56].mxu1 }
 0x173   : > { %v2914_v58 = vpop.f32.mrb[57].mxu1 }
 0x174   : > { %v2915_v38 = vadd.f32 %v2914_v58, %v2913_v51  ;;  %v2916_v62 = vpop.f32.mrb[58].mxu1 }
 0x175   : > { %v2917_v47 = vpop.f32.mrb[59].mxu1 }
 0x176   : > { %v2801_v11 = vpop.f32.mrb[56].mxu0  ;;  %v4393_v7 = vadd.f32 %v2915_v38, %v2779_v32  ;;  %v2918_v0 = vadd.f32 %v2917_v47, %v2916_v62 }
 0x177   : > { %v2802_v25 = vpop.f32.mrb[57].mxu0 }
 0x178   : > { %4670 = vst [vmem:[#allocation2_spill] sm:$0xff] %v4393_v7  ;;  %v4395_v53 = vadd.f32 %v2802_v25, %v2801_v11  ;;  %v2804_v60 = vpop.f32.mrb[58].mxu0  ;;  %v4397_v40 = vadd.f32 %v2918_v0, %v2782_v34 }
 0x179   : > { %v2805_v56 = vpop.f32.mrb[59].mxu0 }
 0x17a   : > { %4671 = vst [vmem:[#allocation3_spill] sm:$0xff] %v4397_v40  ;;  %v4399_v15 = vadd.f32 %v2805_v56, %v2804_v60  ;;  %v2919_v4 = vpop.f32.mrb[60].mxu1 }
 0x17b   : > { %v2920_v10 = vpop.f32.mrb[61].mxu1 }
 0x17c   : > { %v2921_v46 = vadd.f32 %v2920_v10, %v2919_v4  ;;  %v2922_v37 = vpop.f32.mrb[62].mxu1 }
 0x17d   : > { %v2923_v35 = vpop.f32.mrb[63].mxu1 }
 0x17e   : > { %v2807_v50 = vpop.f32.mrb[60].mxu0  ;;  %v4401_v58 = vadd.f32 %v2921_v46, %v2785_v30  ;;  %v2924_v32 = vadd.f32 %v2923_v35, %v2922_v37 }
 0x17f   : > { %v2808_v51 = vpop.f32.mrb[61].mxu0 }
 0x180   : > { %v4403_v38 = vadd.f32 %v2808_v51, %v2807_v50  ;;  %v2810_v62 = vpop.f32.mrb[62].mxu0  ;;  %v4405_v47 = vadd.f32 %v2924_v32, %v2788_v44 }
 0x181   : > { %v2811_v11 = vpop.f32.mrb[63].mxu0 }
 0x182   : > { %v4407_v34 = vadd.f32 %v2811_v11, %v2810_v62  ;;  %v2925_v25 = vpop.f32.mrb[64].mxu1 }
 0x183   : > { %v2926_v0 = vpop.f32.mrb[65].mxu1 }
 0x184   : > { %v2927_v60 = vadd.f32 %v2926_v0, %v2925_v25  ;;  %v2928_v56 = vpop.f32.mrb[66].mxu1 }
 0x185   : > { %v2929_v10 = vpop.f32.mrb[67].mxu1 }
 0x186   : > { %v3127_v4 = vpop.f32.mrb[64].mxu0  ;;  %v4410_v30 = vadd.f32 %v2927_v60, %v2791_v3  ;;  %v2930_v46 = vadd.f32 %v2929_v10, %v2928_v56 }
 0x187   : > { %v1214_v40 = vadd.f32 %v3127_v4, %v4291_v5  ;;  %v1205_v7 = vpop.f32.mrb[65].mxu0 }
 0x188   : > { %v1206_v37 = vadd.f32 %v4282_v26, %v1205_v7  ;;  %v3128_v50 = vpop.f32.mrb[66].mxu0  ;;  %v4417_v32 = vadd.f32 %v2930_v46, %v2794_v54 }
 0x189   : > { %v4414_v44 = vadd.f32 %v4329_v14, %v1214_v40  ;;  %v1217_v35 = vadd.f32 %v3128_v50, %v4294_v43  ;;  %v1208_v51 = vpop.f32.mrb[67].mxu0 }
 0x18a   : > { %v4420_v62 = vadd.f32 %v4317_v33, %v1206_v37  ;;  %v1209_v5 = vadd.f32 %v4286_v45, %v1208_v51  ;;  %v2931_v11 = vpop.f32.mrb[68].mxu1 }
 0x18b   : > { %v4424_v3 = vadd.f32 %v4331_v8, %v1217_v35  ;;  %v2932_v7 = vpop.f32.mrb[69].mxu1 }
 0x18c   : > { %v4427_v26 = vadd.f32 %v4319_v16, %v1209_v5  ;;  %v2933_v14 = vadd.f32 %v2932_v7, %v2931_v11  ;;  %v2934_v40 = vpop.f32.mrb[70].mxu1 }
 0x18d   : > { %v2935_v43 = vpop.f32.mrb[71].mxu1 }
 0x18e   : > { %v3131_v25 = vpop.f32.mrb[68].mxu0  ;;  %v4430_v60 = vadd.f32 %v2933_v14, %v2797_v59  ;;  %v2936_v33 = vadd.f32 %v2935_v43, %v2934_v40 }
 0x18f   : > { %v1230_v54 = vadd.f32 %v3131_v25, %v4309_v57  ;;  %v1221_v0 = vpop.f32.mrb[69].mxu0 }
 0x190   : > { %v1222_v45 = vadd.f32 %v4300_v19, %v1221_v0  ;;  %v3132_v56 = vpop.f32.mrb[70].mxu0  ;;  %v4438_v10 = vadd.f32 %v2936_v33, %v4391_v27 }
 0x191   : > { %v4434_v8 = vadd.f32 %v4353_v31, %v1230_v54  ;;  %v1233_v16 = vadd.f32 %v3132_v56, %v4313_v55  ;;  %v1224_v4 = vpop.f32.mrb[71].mxu0 }
 0x192   : > { %v4441_v46 = vadd.f32 %v4341_v21, %v1222_v45  ;;  %v1225_v57 = vadd.f32 %v4303_v49, %v1224_v4  ;;  %v2937_v37 = vpop.f32.mrb[72].mxu1 }
 0x193   : > { %v4445_v59 = vadd.f32 %v4355_v6, %v1233_v16  ;;  %v2938_v31 = vpop.f32.mrb[73].mxu1 }
 0x194   : > { %v4448_v19 = vadd.f32 %v4343_v22, %v1225_v57  ;;  %v2939_v50 = vadd.f32 %v2938_v31, %v2937_v37  ;;  %v2940_v35 = vpop.f32.mrb[74].mxu1 }
 0x195   : > { %v2941_v51 = vpop.f32.mrb[75].mxu1 }
 0x196   : > { %v3135_v55 = vpop.f32.mrb[72].mxu0  ;;  %v4452_v21 = vadd.f32 %v2939_v50, %v4395_v53  ;;  %v2942_v11 = vadd.f32 %v2941_v51, %v2940_v35 }
 0x197   : > { %v1246_v27 = vadd.f32 %v3135_v55, %v4333_v63  ;;  %v1237_v5 = vpop.f32.mrb[73].mxu0 }
 0x198   : > { %v1238_v49 = vadd.f32 %v4321_v52, %v1237_v5  ;;  %v3136_v6 = vpop.f32.mrb[74].mxu0  ;;  %v4460_v40 = vadd.f32 %v2942_v11, %v4399_v15 }
 0x199   : > { %v4456_v7 = vadd.f32 %v4371_v23, %v1246_v27  ;;  %v1249_v22 = vadd.f32 %v3136_v6, %v4337_v24  ;;  %v1240_v14 = vpop.f32.mrb[75].mxu0 }
 0x19a   : > { %v1543_v25 = vadd.f32 %v4365_v42, %v1238_v49  ;;  %v1241_v63 = vadd.f32 %v4325_v39, %v1240_v14  ;;  %v2943_v43 = vpop.f32.mrb[76].mxu1 }
 0x19b   : > { %v4465_v53 = vadd.f32 %v4373_v28, %v1249_v22  ;;  %v2944_v54 = vpop.f32.mrb[77].mxu1 }
 0x19c   : > { %v1546_v52 = vadd.f32 %v4367_v17, %v1241_v63  ;;  %v2945_v0 = vadd.f32 %v2944_v54, %v2943_v43  ;;  %v2946_v23 = vpop.f32.mrb[78].mxu1 }
 0x19d   : > { %v2947_v45 = vpop.f32.mrb[79].mxu1 }
 0x19e   : > { %v3139_v33 = vpop.f32.mrb[76].mxu0  ;;  %v4470_v15 = vadd.f32 %v2945_v0, %v4403_v38  ;;  %v2948_v42 = vadd.f32 %v2947_v45, %v2946_v23 }
 0x19f   : > { %v1262_v24 = vadd.f32 %v3139_v33, %v4357_v2  ;;  %v1253_v56 = vpop.f32.mrb[77].mxu0 }
 0x1a0   : > { %v1254_v39 = vadd.f32 %v4345_v48, %v1253_v56  ;;  %v3140_v16 = vpop.f32.mrb[78].mxu0  ;;  %v4478_v57 = vadd.f32 %v2948_v42, %v4407_v34 }
 0x1a1   : > { %v4474_v28 = vadd.f32 %v4379_v29, %v1262_v24  ;;  %v1265_v17 = vadd.f32 %v3140_v16, %v4361_v13  ;;  %v1256_v4 = vpop.f32.mrb[79].mxu0 }
 0x1a2   : > { %v1559_v37 = vadd.f32 %v4375_v20, %v1254_v39  ;;  %v1257_v2 = vadd.f32 %v4349_v1, %v1256_v4 }
 0x1a3   : > { %v4483_v38 = vadd.f32 %v4381_v9, %v1265_v17 }
 0x1a4   : > { %v1562_v31 = vadd.f32 %v4377_v41, %v1257_v2 }
 0x1a6   : > { %v2989_v48 = vpop.f32.mrb[80].mxu0 }
 0x1a7   : > { %v2990_v50 = vpop.f32.mrb[81].mxu0 }
 0x1a8   : > { %v2991_v35 = vadd.f32 %v2990_v50, %v2989_v48  ;;  %v2992_v29 = vpop.f32.mrb[82].mxu0 }
 0x1a9   : > { %v2993_v55 = vpop.f32.mrb[83].mxu0 }
 0x1aa   : > { %v2994_v51 = vadd.f32 %v2993_v55, %v2992_v29  ;;  %v4487_v13 = vadd.f32 %v2991_v35, %v4420_v62 }
 0x1ac   : > { %v4490_v34 = vadd.f32 %v2994_v51, %v4427_v26 }
 0x1ae   : > { %v2995_v20 = vpop.f32.mrb[84].mxu0 }
 0x1af   : > { %v2996_v27 = vpop.f32.mrb[85].mxu0 }
 0x1b0   : > { %v2997_v1 = vadd.f32 %v2996_v27, %v2995_v20  ;;  %v2998_v5 = vpop.f32.mrb[86].mxu0 }
 0x1b1   : > { %v2999_v9 = vpop.f32.mrb[87].mxu0 }
 0x1b2   : > { %v3000_v11 = vadd.f32 %v2999_v9, %v2998_v5  ;;  %v3271_v41 = vadd.f32 %v2997_v1, %v4414_v44 }
 0x1b4   : > { %v3279_v49 = vadd.f32 %v3000_v11, %v4424_v3 }
 0x1b6   : > { %v3001_v6 = vpop.f32.mrb[88].mxu0 }
 0x1b7   : > { %v3002_v22 = vpop.f32.mrb[89].mxu0 }
 0x1b8   : > { %v3003_v14 = vadd.f32 %v3002_v22, %v3001_v6  ;;  %v3004_v63 = vpop.f32.mrb[90].mxu0 }
 0x1b9   : > { %v3005_v43 = vpop.f32.mrb[91].mxu0 }
 0x1ba   : > { %v3006_v62 = vadd.f32 %v3005_v43, %v3004_v63  ;;  %v4495_v54 = vadd.f32 %v3003_v14, %v4441_v46 }
 0x1bc   : > { %v4498_v26 = vadd.f32 %v3006_v62, %v4448_v19 }
 0x1be   : > { %v3007_v0 = vpop.f32.mrb[92].mxu0 }
 0x1bf   : > { %v3008_v23 = vpop.f32.mrb[93].mxu0 }
 0x1c0   : > { %v3009_v33 = vadd.f32 %v3008_v23, %v3007_v0  ;;  %v3010_v45 = vpop.f32.mrb[94].mxu0  ;;  %v4526_v0 = vld [vmem:[%s4648_s2] ss:$0 sm:$0xff] }
 0x1c1   : > { %v3011_v24 = vpop.f32.mrb[95].mxu0 }
 0x1c2   : > { %v3012_v44 = vadd.f32 %v3011_v24, %v3010_v45  ;;  %v4501_v3 = vadd.f32 %v3009_v33, %v4434_v8 }
 0x1c4   : > { %v4504_v56 = vadd.f32 %v3012_v44, %v4445_v59 }
 0x1c6   : > { %v3013_v42 = vpop.f32.mrb[96].mxu0 }
 0x1c7   : > { %v3014_v39 = vpop.f32.mrb[97].mxu0 }
 0x1c8   : > { %v3015_v16 = vadd.f32 %v3014_v39, %v3013_v42  ;;  %v3016_v46 = vpop.f32.mrb[98].mxu0 }
 0x1c9   : > { %v3017_v17 = vpop.f32.mrb[99].mxu0 }
 0x1ca   : > { %v3018_v4 = vadd.f32 %v3017_v17, %v3016_v46  ;;  %v4506_v19 = vadd.f32 %v3015_v16, %v1543_v25 }
 0x1cc   : > { %v4508_v2 = vadd.f32 %v3018_v4, %v1546_v52 }
 0x1ce   : > { %v3019_v48 = vpop.f32.mrb[100].mxu0 }
 0x1cf   : > { %v3020_v50 = vpop.f32.mrb[101].mxu0 }
 0x1d0   : > { %v3021_v35 = vadd.f32 %v3020_v50, %v3019_v48  ;;  %v3022_v29 = vpop.f32.mrb[102].mxu0 }
 0x1d1   : > { %v3023_v55 = vpop.f32.mrb[103].mxu0 }
 0x1d2   : > { %v3024_v8 = vadd.f32 %v3023_v55, %v3022_v29  ;;  %v4511_v51 = vadd.f32 %v3021_v35, %v4456_v7 }
 0x1d4   : > { %v4514_v59 = vadd.f32 %v3024_v8, %v4465_v53 }
 0x1d6   : > { %v3025_v20 = vpop.f32.mrb[104].mxu0 }
 0x1d7   : > { %v3026_v27 = vpop.f32.mrb[105].mxu0 }
 0x1d8   : > { %v3027_v1 = vadd.f32 %v3026_v27, %v3025_v20  ;;  %v3028_v25 = vpop.f32.mrb[106].mxu0 }
 0x1d9   : > { %v3029_v5 = vpop.f32.mrb[107].mxu0 }
 0x1da   : > { %v3030_v52 = vadd.f32 %v3029_v5, %v3028_v25  ;;  %v4516_v9 = vadd.f32 %v3027_v1, %v1559_v37 }
 0x1dc   : > { %v4518_v11 = vadd.f32 %v3030_v52, %v1562_v31 }
 0x1de   : > { %v3031_v6 = vpop.f32.mrb[108].mxu0 }
 0x1df   : > { %v3032_v22 = vpop.f32.mrb[109].mxu0 }
 0x1e0   : > { %v3033_v14 = vadd.f32 %v3032_v22, %v3031_v6  ;;  %v3034_v63 = vpop.f32.mrb[110].mxu0 }
 0x1e1   : > { %v3035_v7 = vpop.f32.mrb[111].mxu0 }
 0x1e2   : > { %v3036_v43 = vadd.f32 %v3035_v7, %v3034_v63  ;;  %v4521_v53 = vadd.f32 %v3033_v14, %v4474_v28  ;;  %v3223_v62 = vpop.f32.mrb[80].mxu1 }
 0x1e3   : > { %v3272_v37 = vadd.f32 %v3271_v41, %v3223_v62  ;;  %v2186_v23 = vpop.f32.mrb[81].mxu1 }
 0x1e4   : > { %v4530_v31 = vadd.f32 %v3036_v43, %v4483_v38  ;;  %v3276_v33 = vadd.f32 %v4487_v13, %v2186_v23  ;;  %v3224_v45 = vpop.f32.mrb[82].mxu1 }
 0x1e5   : > { %v2354_v44 = vadd.f32 %v3272_v37, %v4526_v0  ;;  %v3280_v28 = vadd.f32 %v3279_v49, %v3224_v45  ;;  %v2189_v42 = vpop.f32.mrb[83].mxu1 }
 0x1e6   : > { %v3037_v24 = vpop.f32.mrb[112].mxu0  ;;  %v2352_v39 = vadd.f32 %v3276_v33, %v4526_v0  ;;  %v3284_v38 = vadd.f32 %v4490_v34, %v2189_v42 }
 0x1e7   : > { %v3038_v41 = vpop.f32.mrb[113].mxu0  ;;  %v2386_v13 = vmax.f32 %v2354_v44, 0.0  ;;  %v2355_v49 = vadd.f32 %v3280_v28, %v4526_v0 }
 0x1e8   : > { %v3039_v16 = vadd.f32 %v3038_v41, %v3037_v24  ;;  %v3040_v46 = vpop.f32.mrb[114].mxu0  ;;  %v2384_v17 = vmax.f32 %v2352_v39, 0.0  ;;  %v2353_v48 = vadd.f32 %v3284_v38, %v4526_v0 }
 0x1e9   : > { %v3041_v4 = vpop.f32.mrb[115].mxu0  ;;  %2418 = vst [vmem:[%s4537_s18 + $0x10] sm:$0xff] %v2386_v13  ;;  %v2387_v50 = vmax.f32 %v2355_v49, 0.0 }
 0x1ea   : > { %v3042_v35 = vadd.f32 %v3041_v4, %v3040_v46  ;;  %v4545_v29 = vadd.f32 %v4383_v12, %v3039_v16  ;;  %2416 = vst [vmem:[%s4537_s18] sm:$0xff] %v2384_v17  ;;  %v2385_v55 = vmax.f32 %v2353_v48, 0.0  ;;  %v3227_v8 = vpop.f32.mrb[84].mxu1 }
 0x1eb   : > { %2419 = vst [vmem:[%s4537_s18 + $0x18] sm:$0xff] %v2387_v50  ;;  %v3288_v34 = vadd.f32 %v4501_v3, %v3227_v8  ;;  %v2202_v20 = vpop.f32.mrb[85].mxu1 }
 0x1ec   : > { %v4551_v27 = vadd.f32 %v4385_v61, %v3042_v35  ;;  %2417 = vst [vmem:[%s4537_s18 + $0x8] sm:$0xff] %v2385_v55  ;;  %v3292_v1 = vadd.f32 %v4495_v54, %v2202_v20  ;;  %v3228_v25 = vpop.f32.mrb[86].mxu1  ;;  %v4672_v55 = vld [vmem:[#allocation2_spill] sm:$0xff] }
 0x1ed   : > { %v2358_v52 = vadd.f32 %v3288_v34, %v4526_v0  ;;  %v3296_v12 = vadd.f32 %v4504_v56, %v3228_v25  ;;  %v2205_v6 = vpop.f32.mrb[87].mxu1  ;;  %v4673_v25 = vld [vmem:[#allocation3_spill] sm:$0xff] }
 0x1ee   : > { %v3043_v5 = vpop.f32.mrb[116].mxu0  ;;  %v2356_v14 = vadd.f32 %v3292_v1, %v4526_v0  ;;  %v3300_v3 = vadd.f32 %v4498_v26, %v2205_v6 }
 0x1ef   : > { %v3044_v22 = vpop.f32.mrb[117].mxu0  ;;  %v2390_v61 = vmax.f32 %v2358_v52, 0.0  ;;  %v2359_v54 = vadd.f32 %v3296_v12, %v4526_v0 }
 0x1f0   : > { %v3045_v63 = vadd.f32 %v3044_v22, %v3043_v5  ;;  %v3046_v7 = vpop.f32.mrb[118].mxu0  ;;  %v2388_v43 = vmax.f32 %v2356_v14, 0.0  ;;  %v2357_v37 = vadd.f32 %v3300_v3, %v4526_v0 }
 0x1f1   : > { %v3047_v62 = vpop.f32.mrb[119].mxu0  ;;  %2422 = vst [vmem:[%s4537_s18 + $0x30] sm:$0xff] %v2390_v61  ;;  %v2391_v56 = vmax.f32 %v2359_v54, 0.0 }
 0x1f2   : > { %v3048_v23 = vadd.f32 %v3047_v62, %v3046_v7  ;;  %v3334_v33 = vadd.f32 %v4387_v36, %v3045_v63  ;;  %2420 = vst [vmem:[%s4537_s18 + $0x20] sm:$0xff] %v2388_v43  ;;  %v2389_v45 = vmax.f32 %v2357_v37, 0.0  ;;  %v3231_v24 = vpop.f32.mrb[88].mxu1 }
 0x1f3   : > { %2423 = vst [vmem:[%s4537_s18 + $0x38] sm:$0xff] %v2391_v56  ;;  %v3304_v26 = vadd.f32 %v4511_v51, %v3231_v24  ;;  %v2218_v44 = vpop.f32.mrb[89].mxu1 }
 0x1f4   : > { %v3340_v28 = vadd.f32 %v4389_v18, %v3048_v23  ;;  %2421 = vst [vmem:[%s4537_s18 + $0x28] sm:$0xff] %v2389_v45  ;;  %v3308_v42 = vadd.f32 %v4506_v19, %v2218_v44  ;;  %v3232_v41 = vpop.f32.mrb[90].mxu1 }
 0x1f5   : > { %v2362_v38 = vadd.f32 %v3304_v26, %v4526_v0  ;;  %v3312_v13 = vadd.f32 %v4514_v59, %v3232_v41  ;;  %v2221_v36 = vpop.f32.mrb[91].mxu1 }
 0x1f6   : > { %v3049_v39 = vpop.f32.mrb[120].mxu0  ;;  %v2360_v46 = vadd.f32 %v3308_v42, %v4526_v0  ;;  %v3316_v51 = vadd.f32 %v4508_v2, %v2221_v36 }
 0x1f7   : > { %v3050_v16 = vpop.f32.mrb[121].mxu0  ;;  %v2394_v49 = vmax.f32 %v2362_v38, 0.0  ;;  %v2363_v19 = vadd.f32 %v3312_v13, %v4526_v0 }
 0x1f8   : > { %v3051_v18 = vadd.f32 %v3050_v16, %v3049_v39  ;;  %v3052_v17 = vpop.f32.mrb[122].mxu0  ;;  %v2392_v4 = vmax.f32 %v2360_v46, 0.0  ;;  %v2361_v50 = vadd.f32 %v3316_v51, %v4526_v0 }
 0x1f9   : > { %v3053_v48 = vpop.f32.mrb[123].mxu0  ;;  %2426 = vst [vmem:[%s4537_s18 + $0x50] sm:$0xff] %v2394_v49  ;;  %v2395_v59 = vmax.f32 %v2363_v19, 0.0 }
 0x1fa   : > { %v3054_v35 = vadd.f32 %v3053_v48, %v3052_v17  ;;  %v4577_v8 = vadd.f32 %v4672_v55, %v3051_v18  ;;  %2424 = vst [vmem:[%s4537_s18 + $0x40] sm:$0xff] %v2392_v4  ;;  %v2393_v34 = vmax.f32 %v2361_v50, 0.0  ;;  %v3235_v20 = vpop.f32.mrb[92].mxu1 }
 0x1fb   : > { %2427 = vst [vmem:[%s4537_s18 + $0x58] sm:$0xff] %v2395_v59  ;;  %v3320_v2 = vadd.f32 %v4521_v53, %v3235_v20  ;;  %v2234_v1 = vpop.f32.mrb[93].mxu1 }
 0x1fc   : > { %v4583_v5 = vadd.f32 %v4673_v25, %v3054_v35  ;;  %2425 = vst [vmem:[%s4537_s18 + $0x48] sm:$0xff] %v2393_v34  ;;  %v3324_v52 = vadd.f32 %v4516_v9, %v2234_v1  ;;  %v3236_v12 = vpop.f32.mrb[94].mxu1 }
 0x1fd   : > { %v2366_v22 = vadd.f32 %v3320_v2, %v4526_v0  ;;  %v3328_v14 = vadd.f32 %v4530_v31, %v3236_v12  ;;  %v2237_v3 = vpop.f32.mrb[95].mxu1 }
 0x1fe   : > { %v3055_v6 = vpop.f32.mrb[124].mxu0  ;;  %v2364_v63 = vadd.f32 %v3324_v52, %v4526_v0  ;;  %v3332_v53 = vadd.f32 %v4518_v11, %v2237_v3 }
 0x1ff   : > { %v3056_v61 = vpop.f32.mrb[125].mxu0  ;;  %v2398_v7 = vmax.f32 %v2366_v22, 0.0  ;;  %v2367_v9 = vadd.f32 %v3328_v14, %v4526_v0 }
 0x200   : > { %v3057_v54 = vadd.f32 %v3056_v61, %v3055_v6  ;;  %v3058_v43 = vpop.f32.mrb[126].mxu0  ;;  %v2396_v62 = vmax.f32 %v2364_v63, 0.0  ;;  %v2365_v56 = vadd.f32 %v3332_v53, %v4526_v0 }
 0x201   : > { %v3059_v37 = vpop.f32.mrb[127].mxu0  ;;  %2430 = vst [vmem:[%s4537_s18 + $0x70] sm:$0xff] %v2398_v7  ;;  %v2399_v31 = vmax.f32 %v2367_v9, 0.0 }
 0x202   : > { %v3060_v23 = vadd.f32 %v3059_v37, %v3058_v43  ;;  %v3346_v45 = vadd.f32 %v4401_v58, %v3057_v54  ;;  %2428 = vst [vmem:[%s4537_s18 + $0x60] sm:$0xff] %v2396_v62  ;;  %v2397_v24 = vmax.f32 %v2365_v56, 0.0  ;;  %v3239_v26 = vpop.f32.mrb[0].mxu1 }
 0x203   : > { %2431 = vst [vmem:[%s4537_s18 + $0x78] sm:$0xff] %v2399_v31  ;;  %v3335_v11 = vadd.f32 %v3334_v33, %v3239_v26  ;;  %v2250_v44 = vpop.f32.mrb[1].mxu1 }
 0x204   : > { %v3352_v42 = vadd.f32 %v4405_v47, %v3060_v23  ;;  %2429 = vst [vmem:[%s4537_s18 + $0x68] sm:$0xff] %v2397_v24  ;;  %v3338_v41 = vadd.f32 %v4545_v29, %v2250_v44  ;;  %v3240_v39 = vpop.f32.mrb[2].mxu1 }
 0x205   : > { %v2370_v13 = vadd.f32 %v3335_v11, %v4526_v0  ;;  %v3341_v36 = vadd.f32 %v3340_v28, %v3240_v39  ;;  %v2253_v16 = vpop.f32.mrb[3].mxu1 }
 0x206   : > { %v3061_v38 = vpop.f32.mrb[128].mxu0  ;;  %v2368_v46 = vadd.f32 %v3338_v41, %v4526_v0  ;;  %v3344_v33 = vadd.f32 %v4551_v27, %v2253_v16 }
 0x207   : > { %v3062_v58 = vpop.f32.mrb[129].mxu0  ;;  %v2402_v51 = vmax.f32 %v2370_v13, 0.0  ;;  %v2371_v29 = vadd.f32 %v3341_v36, %v4526_v0 }
 0x208   : > { %v3063_v49 = vadd.f32 %v3062_v58, %v3061_v38  ;;  %v3064_v47 = vpop.f32.mrb[130].mxu0  ;;  %v2400_v18 = vmax.f32 %v2368_v46, 0.0  ;;  %v2369_v19 = vadd.f32 %v3344_v33, %v4526_v0 }
 0x209   : > { %v3065_v17 = vpop.f32.mrb[131].mxu0  ;;  %2434 = vst [vmem:[%s4537_s18 + $0x90] sm:$0xff] %v2402_v51  ;;  %v2403_v28 = vmax.f32 %v2371_v29, 0.0 }
 0x20a   : > { %v3066_v4 = vadd.f32 %v3065_v17, %v3064_v47  ;;  %v3361_v48 = vadd.f32 %v4410_v30, %v3063_v49  ;;  %2432 = vst [vmem:[%s4537_s18 + $0x80] sm:$0xff] %v2400_v18  ;;  %v2401_v50 = vmax.f32 %v2369_v19, 0.0  ;;  %v3243_v59 = vpop.f32.mrb[4].mxu1 }
 0x20b   : > { %2435 = vst [vmem:[%s4537_s18 + $0x98] sm:$0xff] %v2403_v28  ;;  %v3347_v27 = vadd.f32 %v3346_v45, %v3243_v59  ;;  %v2266_v35 = vpop.f32.mrb[5].mxu1 }
 0x20c   : > { %v3367_v55 = vadd.f32 %v4417_v32, %v3066_v4  ;;  %2433 = vst [vmem:[%s4537_s18 + $0x88] sm:$0xff] %v2401_v50  ;;  %v3350_v34 = vadd.f32 %v4577_v8, %v2266_v35  ;;  %v3244_v20 = vpop.f32.mrb[6].mxu1 }
 0x20d   : > { %v2374_v1 = vadd.f32 %v3347_v27, %v4526_v0  ;;  %v3353_v25 = vadd.f32 %v3352_v42, %v3244_v20  ;;  %v2269_v52 = vpop.f32.mrb[7].mxu1 }
 0x20e   : > { %v3067_v2 = vpop.f32.mrb[132].mxu0  ;;  %v2372_v12 = vadd.f32 %v3350_v34, %v4526_v0  ;;  %v3356_v6 = vadd.f32 %v4583_v5, %v2269_v52 }
 0x20f   : > { %v3068_v30 = vpop.f32.mrb[133].mxu0  ;;  %v2406_v22 = vmax.f32 %v2374_v1, 0.0  ;;  %v2375_v8 = vadd.f32 %v3353_v25, %v4526_v0 }
 0x210   : > { %v3069_v14 = vadd.f32 %v3068_v30, %v3067_v2  ;;  %v3070_v32 = vpop.f32.mrb[134].mxu0  ;;  %v2404_v3 = vmax.f32 %v2372_v12, 0.0  ;;  %v2373_v63 = vadd.f32 %v3356_v6, %v4526_v0 }
 0x211   : > { %v3071_v61 = vpop.f32.mrb[135].mxu0  ;;  %2438 = vst [vmem:[%s4537_s18 + $0xb0] sm:$0xff] %v2406_v22  ;;  %v2407_v53 = vmax.f32 %v2375_v8, 0.0 }
 0x212   : > { %v3072_v7 = vadd.f32 %v3071_v61, %v3070_v32  ;;  %v3358_v54 = vadd.f32 %v4430_v60, %v3069_v14  ;;  %2436 = vst [vmem:[%s4537_s18 + $0xa0] sm:$0xff] %v2404_v3  ;;  %v2405_v43 = vmax.f32 %v2373_v63, 0.0  ;;  %v3247_v9 = vpop.f32.mrb[8].mxu1 }
 0x213   : > { %2439 = vst [vmem:[%s4537_s18 + $0xb8] sm:$0xff] %v2407_v53  ;;  %v2282_v62 = vpop.f32.mrb[9].mxu1 }
 0x214   : > { %v3359_v5 = vadd.f32 %v3358_v54, %v3247_v9  ;;  %v3364_v37 = vadd.f32 %v4438_v10, %v3072_v7  ;;  %2437 = vst [vmem:[%s4537_s18 + $0xa8] sm:$0xff] %v2405_v43  ;;  %v3362_v56 = vadd.f32 %v3361_v48, %v2282_v62  ;;  %v3248_v31 = vpop.f32.mrb[10].mxu1 }
 0x215   : > { %v2285_v26 = vpop.f32.mrb[11].mxu1 }
 0x216   : > { %v3073_v23 = vpop.f32.mrb[136].mxu0  ;;  %v2378_v45 = vadd.f32 %v3359_v5, %v4526_v0  ;;  %v3365_v24 = vadd.f32 %v3364_v37, %v3248_v31  ;;  %v2376_v60 = vadd.f32 %v3362_v56, %v4526_v0  ;;  %v3368_v44 = vadd.f32 %v3367_v55, %v2285_v26 }
 0x217   : > { %v3074_v11 = vpop.f32.mrb[137].mxu0 }
 0x218   : > { %v2410_v42 = vmax.f32 %v2378_v45, 0.0  ;;  %v3075_v41 = vadd.f32 %v3074_v11, %v3073_v23  ;;  %v3076_v39 = vpop.f32.mrb[138].mxu0  ;;  %v2379_v10 = vadd.f32 %v3365_v24, %v4526_v0  ;;  %v2408_v38 = vmax.f32 %v2376_v60, 0.0 }
 0x219   : > { %v3077_v13 = vpop.f32.mrb[139].mxu0  ;;  %v2377_v36 = vadd.f32 %v3368_v44, %v4526_v0 }
 0x21a   : > { %2442 = vst [vmem:[%s4537_s18 + $0xd0] sm:$0xff] %v2410_v42  ;;  %v2411_v16 = vmax.f32 %v2379_v10, 0.0  ;;  %v3078_v58 = vadd.f32 %v3077_v13, %v3076_v39  ;;  %v3373_v46 = vadd.f32 %v4452_v21, %v3075_v41  ;;  %2440 = vst [vmem:[%s4537_s18 + $0xc0] sm:$0xff] %v2408_v38  ;;  %v3251_v51 = vpop.f32.mrb[12].mxu1 }
 0x21b   : > { %v2409_v33 = vmax.f32 %v2377_v36, 0.0  ;;  %v2298_v49 = vpop.f32.mrb[13].mxu1 }
 0x21c   : > { %2443 = vst [vmem:[%s4537_s18 + $0xd8] sm:$0xff] %v2411_v16  ;;  %v3379_v47 = vadd.f32 %v4460_v40, %v3078_v58  ;;  %v3374_v29 = vadd.f32 %v3373_v46, %v2298_v49  ;;  %v3252_v18 = vpop.f32.mrb[14].mxu1 }
 0x21d   : > { %2441 = vst [vmem:[%s4537_s18 + $0xc8] sm:$0xff] %v2409_v33  ;;  %v2301_v19 = vpop.f32.mrb[15].mxu1 }
 0x21e   : > { %v3079_v17 = vpop.f32.mrb[140].mxu0  ;;  %v2380_v4 = vadd.f32 %v3374_v29, %v4526_v0  ;;  %v3380_v48 = vadd.f32 %v3379_v47, %v2301_v19 }
 0x21f   : > { %v3080_v28 = vpop.f32.mrb[141].mxu0 }
 0x220   : > { %v3081_v50 = vadd.f32 %v3080_v28, %v3079_v17  ;;  %v3082_v21 = vpop.f32.mrb[142].mxu0  ;;  %v2412_v59 = vmax.f32 %v2380_v4, 0.0  ;;  %v2381_v35 = vadd.f32 %v3380_v48, %v4526_v0 }
 0x221   : > { %v3083_v27 = vpop.f32.mrb[143].mxu0 }
 0x222   : > { %v3370_v40 = vadd.f32 %v4470_v15, %v3081_v50  ;;  %v3084_v55 = vadd.f32 %v3083_v27, %v3082_v21  ;;  %2444 = vst [vmem:[%s4537_s18 + $0xe0] sm:$0xff] %v2412_v59  ;;  %v2413_v34 = vmax.f32 %v2381_v35, 0.0 }
 0x224   : > { %v3371_v20 = vadd.f32 %v3370_v40, %v3251_v51  ;;  %v3376_v2 = vadd.f32 %v4478_v57, %v3084_v55  ;;  %2445 = vst [vmem:[%s4537_s18 + $0xe8] sm:$0xff] %v2413_v34 }
 0x226   : > { %v2382_v1 = vadd.f32 %v3371_v20, %v4526_v0  ;;  %v3377_v25 = vadd.f32 %v3376_v2, %v3252_v18 }
 0x228   : > { %v2414_v52 = vmax.f32 %v2382_v1, 0.0  ;;  %v2383_v30 = vadd.f32 %v3377_v25, %v4526_v0 }
 0x22a   : > { %2446 = vst [vmem:[%s4537_s18 + $0xf0] sm:$0xff] %v2414_v52  ;;  %v2415_v12 = vmax.f32 %v2383_v30, 0.0 }
 0x22c   : > { %2447 = vst [vmem:[%s4537_s18 + $0xf8] sm:$0xff] %v2415_v12 }
 0x22d PF: > { %s13_s12 = sadd.s32 1, %s3532_s12  }
 0x22e   : > { %p10_p4 = scmp.ge.s32.totalorder %s13_s12, 4  }
 0x230   :  { %12 = sbr.rel (!%p10_p4) target bundleno = 1 (0x1), region = 64 }

</bundles_post_ra>
